<compile_context>
chip_gen: v5e
topology: v5e:2x2
jax: 0.10.0
libtpu: 0.0.40
codegen_flags: <defaults>
</compile_context>

<pallas_src>
import math

import jax
import jax.numpy as jnp
from jax import lax
from jax.experimental import pallas as pl
from jax.experimental.pallas import tpu as pltpu

INV_SQRT2 = 0.7071067811865476

# Portable scoped-VMEM budget (default on v6e/v7x; raises v5e from 16 MiB).
VMEM_LIMIT = 32 * 1024 * 1024


def _gelu(x):
    # exact (erf-based) GELU, matching torch.nn.GELU() default
    return 0.5 * x * (1.0 + lax.erf(x * INV_SQRT2))


# ---------------------------------------------------------------------------
# Kernel 1: GINConv(eps=0) MLP, tiled over node-row blocks.
#   per block: agg = A_blk @ x + x_blk ; h = Lin2(gelu(Lin1(agg)))
#   also emits per-block masked [sum, sum_sq, count] partials for BatchNorm (one pass).
# A, x and the weights are fed to the MXU in bf16 with f32 accumulation.
# ---------------------------------------------------------------------------
def _gin_mlp_kernel(a_ref, xk_ref, xq_ref, m_ref, w1_ref, b1_ref, w2_ref, b2_ref,
                    h_ref, st_ref):
    # aggregation: sum_j A[i,j] * x_j  +  x_i   (GIN with eps = 0)
    agg = jnp.dot(a_ref[...], xk_ref[...], preferred_element_type=jnp.float32)
    agg = agg + xq_ref[...].astype(jnp.float32)

    h = jnp.dot(agg.astype(jnp.bfloat16), w1_ref[...],
                preferred_element_type=jnp.float32) + b1_ref[...]
    h = _gelu(h)
    h = jnp.dot(h.astype(jnp.bfloat16), w2_ref[...],
                preferred_element_type=jnp.float32) + b2_ref[...]
    h_ref[...] = h

    # single-pass masked moments for BatchNorm (var = E[x^2] - mean^2, finalized in the
    # BN kernel).  Row 2 carries the valid-node count broadcast across all lanes.
    m = m_ref[...]
    hm = h * m
    s1 = jnp.sum(hm, axis=0, keepdims=True)                       # (1, H)  sum(h * mask)
    s2 = jnp.sum(hm * h, axis=0, keepdims=True)                   # (1, H)  sum(h^2 * mask)
    s0 = jnp.sum(m * jnp.ones_like(s1), axis=0, keepdims=True)    # (1, H)  count (all lanes)
    st_ref[...] = jnp.concatenate(
        [s1, s2, s0, jnp.zeros((5, s1.shape[1]), jnp.float32)], axis=0)


def gin_mlp(A_bf, x, mask, w1, b1, w2, b2, tm):
    N, Fin = x.shape
    H = w1.shape[1]
    nrb = N // tm
    x_bf = x.astype(jnp.bfloat16)      # no-op for layers whose input is already bf16
    w1_bf = w1.astype(jnp.bfloat16)
    w2_bf = w2.astype(jnp.bfloat16)

    return pl.pallas_call(
        _gin_mlp_kernel,
        out_shape=(jax.ShapeDtypeStruct((N, H), jnp.float32),
                   jax.ShapeDtypeStruct((nrb, 8, H), jnp.float32)),
        grid=(nrb,),
        in_specs=[
            pl.BlockSpec((tm, N), lambda i: (i, 0)),     # A row block
            pl.BlockSpec((N, Fin), lambda i: (0, 0)),    # full x  (K side of A@x)
            pl.BlockSpec((tm, Fin), lambda i: (i, 0)),   # x row block (self term)
            pl.BlockSpec((tm, 1), lambda i: (i, 0)),     # mask row block
            pl.BlockSpec((Fin, H), lambda i: (0, 0)),
            pl.BlockSpec((1, H), lambda i: (0, 0)),
            pl.BlockSpec((H, H), lambda i: (0, 0)),
            pl.BlockSpec((1, H), lambda i: (0, 0)),
        ],
        out_specs=[
            pl.BlockSpec((tm, H), lambda i: (i, 0)),
            pl.BlockSpec((None, 8, H), lambda i: (i, 0, 0)),   # per-block BN partials
        ],
        compiler_params=pltpu.CompilerParams(
            dimension_semantics=("parallel",),
            vmem_limit_bytes=VMEM_LIMIT),
    )(A_bf, x_bf, x_bf, mask, w1_bf, b1, w2_bf, b2)


# ---------------------------------------------------------------------------
# Kernel 2: finalize BatchNorm statistics + apply affine + GELU + mask, tiled over
# node rows; also computes the TopK attention score tanh(y . w / ||w||).
# The (nrb, 8, H) partial-stat reduction is tiny, so each block redoes it (keeps the
# row axis "parallel" and removes the XLA glue op between kernel 1 and kernel 2).
# ---------------------------------------------------------------------------
def _bn_act_score_kernel(h_ref, st_ref, m_ref, g_ref, b_ref, wn_ref, y_ref, s_ref):
    st = jnp.sum(st_ref[...], axis=0)            # (8, H): [sum, sum_sq, count, 0...]
    tot = st[0:1, :]
    tot2 = st[1:2, :]
    cnt = jnp.maximum(st[2:3, :], 1.0)
    mean = tot / cnt
    var = jnp.maximum(tot2 / cnt - mean * mean, 0.0)   # biased variance (training mode)
    inv = lax.rsqrt(var + 1e-5)
    scale = g_ref[...] * inv
    shift = b_ref[...] - mean * scale

    y = _gelu(h_ref[...] * scale + shift) * m_ref[...]
    y_ref[...] = y
    s_ref[...] = jnp.tanh(jnp.sum(y * wn_ref[...], axis=1, keepdims=True))


def bn_act_score(h, stats, mask, gamma, beta, wn, tm):
    N, H = h.shape
    nrb = N // tm
    return pl.pallas_call(
        _bn_act_score_kernel,
        out_shape=(jax.ShapeDtypeStruct((N, H), jnp.float32),
                   jax.ShapeDtypeStruct((N, 1), jnp.float32)),
        grid=(nrb,),
        in_specs=[pl.BlockSpec((tm, H), lambda i: (i, 0)),
                  pl.BlockSpec((nrb, 8, H), lambda i: (0, 0, 0)),
                  pl.BlockSpec((tm, 1), lambda i: (i, 0)),
                  pl.BlockSpec((1, H), lambda i: (0, 0)),
                  pl.BlockSpec((1, H), lambda i: (0, 0)),
                  pl.BlockSpec((1, H), lambda i: (0, 0))],
        out_specs=[pl.BlockSpec((tm, H), lambda i: (i, 0)),
                   pl.BlockSpec((tm, 1), lambda i: (i, 0))],
        compiler_params=pltpu.CompilerParams(
            dimension_semantics=("parallel",),
            vmem_limit_bytes=VMEM_LIMIT),
    )(h, stats, mask, gamma, beta, wn)


# ---------------------------------------------------------------------------
# Kernel 3: fused TopK gating + global readout per graph.
#   x_new = y * score * keep  (written back in bf16 for the next GIN layer)
#   readout = [gmp(x_new) || gap(x_new)]  accumulated into acc; the last layer's
#   variant fuses the final Linear instead of emitting x_new.
# mem[g, n] = 1 iff node n is kept and belongs to graph g; memT = mem.T.
# TODO(synk): for very large N the node axis should be tiled with running max/sum
#             accumulators; at these sizes a single resident block is fine.
# ---------------------------------------------------------------------------
def _readout(mem, memT, x):
    G = mem.shape[0]
    sums = jnp.dot(mem, x, preferred_element_type=jnp.float32)         # (G, H) on MXU
    cnt = jnp.maximum(jnp.sum(mem, axis=1, keepdims=True), 1.0)        # (G, 1)
    mean = sums / cnt
    mx = jnp.concatenate(
        [jnp.max(jnp.where(memT[:, g:g + 1] > 0, x, -1e30), axis=0, keepdims=True)
         for g in range(G)], axis=0)                                   # (G, H)
    return jnp.concatenate([mx, mean], axis=1)                         # (G, 2H)


def _topk_pool_kernel(y_ref, s_ref, k_ref, mem_ref, memT_ref, acc_ref, xn_ref, r_ref):
    xn = y_ref[...] * s_ref[...] * k_ref[...]
    xn_ref[...] = xn.astype(jnp.bfloat16)
    r_ref[...] = acc_ref[...] + _readout(mem_ref[...], memT_ref[...], xn)


def _topk_pool_linear_kernel(y_ref, s_ref, k_ref, mem_ref, memT_ref, acc_ref,
                             wl_ref, bl_ref, o_ref):
    xn = y_ref[...] * s_ref[...] * k_ref[...]
    r = acc_ref[...] + _readout(mem_ref[...], memT_ref[...], xn)       # x1+x2+x3+x4
    o_ref[...] = jnp.dot(r, wl_ref[...],
                         preferred_element_type=jnp.float32) + bl_ref[...]


def topk_pool(y, score, keep, mem, memT, acc):
    N, H = y.shape
    G = mem.shape[0]
    return pl.pallas_call(
        _topk_pool_kernel,
        out_shape=(jax.ShapeDtypeStruct((N, H), jnp.bfloat16),
                   jax.ShapeDtypeStruct((G, 2 * H), jnp.float32)),
        grid=(1,),
        in_specs=[pl.BlockSpec((N, H), lambda i: (0, 0)),
                  pl.BlockSpec((N, 1), lambda i: (0, 0)),
                  pl.BlockSpec((N, 1), lambda i: (0, 0)),
                  pl.BlockSpec((G, N), lambda i: (0, 0)),
                  pl.BlockSpec((N, G), lambda i: (0, 0)),
                  pl.BlockSpec((G, 2 * H), lambda i: (0, 0))],
        out_specs=[pl.BlockSpec((N, H), lambda i: (0, 0)),
                   pl.BlockSpec((G, 2 * H), lambda i: (0, 0))],
        compiler_params=pltpu.CompilerParams(
            dimension_semantics=("arbitrary",),
            vmem_limit_bytes=VMEM_LIMIT),
    )(y, score, keep, mem, memT, acc)


def topk_pool_linear(y, score, keep, mem, memT, acc, wl, bl):
    N, H = y.shape
    G = mem.shape[0]
    Fout = wl.shape[1]
    return pl.pallas_call(
        _topk_pool_linear_kernel,
        out_shape=jax.ShapeDtypeStruct((G, Fout), jnp.float32),
        grid=(1,),
        in_specs=[pl.BlockSpec((N, H), lambda i: (0, 0)),
                  pl.BlockSpec((N, 1), lambda i: (0, 0)),
                  pl.BlockSpec((N, 1), lambda i: (0, 0)),
                  pl.BlockSpec((G, N), lambda i: (0, 0)),
                  pl.BlockSpec((N, G), lambda i: (0, 0)),
                  pl.BlockSpec((G, 2 * H), lambda i: (0, 0)),
                  pl.BlockSpec((2 * H, Fout), lambda i: (0, 0)),
                  pl.BlockSpec((1, Fout), lambda i: (0, 0))],
        out_specs=pl.BlockSpec((G, Fout), lambda i: (0, 0)),
        compiler_params=pltpu.CompilerParams(
            dimension_semantics=("arbitrary",),
            vmem_limit_bytes=VMEM_LIMIT),
    )(y, score, keep, mem, memT, acc, wl, bl)


# ---------------------------------------------------------------------------
# TopKPooling node selection: per-graph segmented argsort (graphs are fixed-size
# contiguous slot ranges here), keep = rank < ceil(ratio * n_valid).  Dropped nodes
# keep their slots with zeroed features / mask; the adjacency is not rewritten.
# TODO(synk): general ragged per-graph top-k needs a segmented sort; kept in JAX glue.
# ---------------------------------------------------------------------------
def topk_keep_mask(score, mask, ratio, G, npg):
    N = score.shape[0]
    valid = mask[:, 0] > 0.0
    s = jnp.where(valid, score, -2.0).reshape(G, npg)       # tanh scores live in [-1, 1]
    order = jnp.argsort(-s, axis=1)                         # descending
    rank = jnp.argsort(order, axis=1)                       # inverse perm = rank in graph
    n_valid = jnp.sum(valid.reshape(G, npg), axis=1)
    k_per = jnp.ceil(ratio * n_valid.astype(jnp.float32)).astype(jnp.int32)
    keep = valid.reshape(G, npg) & (rank < k_per[:, None])
    return keep.reshape(N).astype(jnp.float32)[:, None]     # (N, 1)


# ---------------------------------------------------------------------------
def make_forward(layer_params, wl, bl, ratio, G, npg, tm):
    n_layers = len(layer_params)
    H = layer_params[0][0].shape[1]

    def forward(x, A, mask, batch):
        A_bf = A.astype(jnp.bfloat16)     # cast once; adjacency is constant across layers
        # pad input features to a lane-dense multiple of 128 (zero columns are a no-op)
        Fin = x.shape[1]
        Fp = ((Fin + 127) // 128) * 128
        h = jnp.pad(x, ((0, 0), (0, Fp - Fin))) if Fp != Fin else x
        m = mask
        graph_ids = jnp.arange(G)
        mem_base = (batch[None, :] == graph_ids[:, None]).astype(jnp.float32)   # (G, N)
        acc = jnp.zeros((G, 2 * H), jnp.float32)
        out = None

        for li, (w1, b1, w2, b2, gamma, beta, pw) in enumerate(layer_params):
            if w1.shape[0] != h.shape[1]:      # pad layer-1 weight rows (constant-folded)
                w1 = jnp.pad(w1, ((0, h.shape[1] - w1.shape[0]), (0, 0)))
            wn = (pw / jnp.sqrt(jnp.sum(pw * pw)))[None, :]                    # (1, H)

            h_pre, stats = gin_mlp(A_bf, h, m, w1, b1, w2, b2, tm)             # Pallas
            y, score = bn_act_score(h_pre, stats, m, gamma, beta, wn, tm)      # Pallas
            keep = topk_keep_mask(score[:, 0], m, ratio, G, npg)               # JAX glue
            mem = mem_base * keep[:, 0][None, :]                               # (G, N)
            memT = mem.T
            if li < n_layers - 1:
                h, acc = topk_pool(y, score, keep, mem, memT, acc)             # Pallas
                m = keep
            else:
                out = topk_pool_linear(y, score, keep, mem, memT, acc, wl, bl) # Pallas
        return out

    return forward


# ---------------------------------------------------------------------------
if __name__ == "__main__":
    N, G = 256, 2                     # 256 nodes, 2 graphs of 128 nodes each
    Fin, H, Fout = 16, 128, 128       # H = 128 -> lane-dense matmuls / stores
    ratio = 0.5
    npg = N // G
    TM = 128                          # node-row tile (grid of N // TM row blocks)
    assert N % TM == 0

    key = jax.random.PRNGKey(0)
    keys = list(jax.random.split(key, 24))
    ki = iter(keys)

    def lin_init(k, fan_in, fan_out):
        k1, k2 = jax.random.split(k)
        bound = 1.0 / math.sqrt(fan_in)
        w = jax.random.uniform(k1, (fan_in, fan_out), jnp.float32, -bound, bound)
        b = jax.random.uniform(k2, (1, fan_out), jnp.float32, -bound, bound)
        return w, b

    layer_params = []
    for fin, h in [(Fin, H), (H, H), (H, H), (H, H)]:
        w1, b1 = lin_init(next(ki), fin, h)
        w2, b2 = lin_init(next(ki), h, h)
        gamma = jnp.ones((1, h), jnp.float32)     # BatchNorm default init
        beta = jnp.zeros((1, h), jnp.float32)
        pw = jax.random.uniform(next(ki), (h,), jnp.float32, -1.0, 1.0)  # TopK attn weight
        layer_params.append((w1, b1, w2, b2, gamma, beta, pw))
    wl, bl = lin_init(next(ki), 2 * H, Fout)

    # deterministic graph data: bidirectional ring inside each graph
    x = jax.random.normal(next(ki), (N, Fin), jnp.float32)
    batch = jnp.repeat(jnp.arange(G), npg)
    src, dst = [], []
    for g in range(G):
        base = g * npg
        for i in range(npg):
            j = (i + 1) % npg
            src += [base + i, base + j]
            dst += [base + j, base + i]
    A0 = jnp.zeros((N, N), jnp.float32).at[jnp.array(dst), jnp.array(src)].add(1.0)
    mask0 = jnp.ones((N, 1), jnp.float32)

    forward = jax.jit(make_forward(layer_params, wl, bl, ratio, G, npg, TM))
    out = forward(x, A0, mask0, batch)
    jax.block_until_ready(out)
    assert out.shape == (G, Fout) and out.dtype == jnp.float32
    assert bool(jnp.all(jnp.isfinite(out)))
    print("KERNEL_OK")
</pallas_src>

<mosaic_0001>
module attributes {stable_mosaic.version = 11 : i64} {
  func.func @_bn_act_score_kernel(%arg0: i32, %arg1: memref<128x128xf32, #tpu.memory_space<vmem>>, %arg2: memref<2x8x128xf32, #tpu.memory_space<vmem>>, %arg3: memref<128x1xf32, #tpu.memory_space<vmem>>, %arg4: memref<1x128xf32, #tpu.memory_space<vmem>>, %arg5: memref<1x128xf32, #tpu.memory_space<vmem>>, %arg6: memref<1x128xf32, #tpu.memory_space<vmem>>, %arg7: memref<128x128xf32, #tpu.memory_space<vmem>>, %arg8: memref<128x1xf32, #tpu.memory_space<vmem>>) attributes {dimension_semantics = [#tpu.dimension_semantics<parallel>], iteration_bounds = array<i64: 2>, scalar_prefetch = 0 : i64, scratch_operands = 0 : i64, tpu.core_type = #tpu.core_type<tc>, window_params = [{transform_indices = @transform_0, window_bounds = array<i64: 128, 128>}, {pipeline_mode = #tpu.pipeline_mode<synchronous>, transform_indices = @transform_1, window_bounds = array<i64: 2, 8, 128>}, {transform_indices = @transform_2, window_bounds = array<i64: 128, 1>}, {pipeline_mode = #tpu.pipeline_mode<synchronous>, transform_indices = @transform_3, window_bounds = array<i64: 1, 128>}, {pipeline_mode = #tpu.pipeline_mode<synchronous>, transform_indices = @transform_4, window_bounds = array<i64: 1, 128>}, {pipeline_mode = #tpu.pipeline_mode<synchronous>, transform_indices = @transform_5, window_bounds = array<i64: 1, 128>}, {transform_indices = @transform_6, window_bounds = array<i64: 128, 128>}, {transform_indices = @transform_7, window_bounds = array<i64: 128, 1>}]} {
    %c0 = arith.constant 0 : index
    %c0_0 = arith.constant 0 : index
    %c0_1 = arith.constant 0 : index
    %0 = vector.load %arg2[%c0, %c0_0, %c0_1] : memref<2x8x128xf32, #tpu.memory_space<vmem>>, vector<2x8x128xf32>
    %cst = arith.constant dense<0.000000e+00> : vector<8x128xf32>
    %1 = vector.multi_reduction <add>, %0, %cst [0] : vector<2x8x128xf32> to vector<8x128xf32>
    %2 = vector.extract_strided_slice %1 {offsets = [0, 0], sizes = [1, 128], strides = [1, 1]} : vector<8x128xf32> to vector<1x128xf32>
    %3 = vector.extract_strided_slice %1 {offsets = [1, 0], sizes = [1, 128], strides = [1, 1]} : vector<8x128xf32> to vector<1x128xf32>
    %4 = vector.extract_strided_slice %1 {offsets = [2, 0], sizes = [1, 128], strides = [1, 1]} : vector<8x128xf32> to vector<1x128xf32>
    %cst_2 = arith.constant 1.000000e+00 : f32
    %5 = vector.broadcast %cst_2 : f32 to vector<1x128xf32>
    %6 = arith.maximumf %4, %5 : vector<1x128xf32>
    %7 = arith.divf %2, %6 : vector<1x128xf32>
    %8 = arith.divf %3, %6 : vector<1x128xf32>
    %9 = arith.mulf %7, %7 : vector<1x128xf32>
    %10 = arith.subf %8, %9 : vector<1x128xf32>
    %cst_3 = arith.constant 0.000000e+00 : f32
    %11 = vector.broadcast %cst_3 : f32 to vector<1x128xf32>
    %12 = arith.maximumf %10, %11 : vector<1x128xf32>
    %cst_4 = arith.constant 9.99999974E-6 : f32
    %13 = vector.broadcast %cst_4 : f32 to vector<1x128xf32>
    %14 = arith.addf %12, %13 : vector<1x128xf32>
    %15 = math.rsqrt %14 : vector<1x128xf32>
    %c0_5 = arith.constant 0 : index
    %c0_6 = arith.constant 0 : index
    %16 = vector.load %arg4[%c0_5, %c0_6] : memref<1x128xf32, #tpu.memory_space<vmem>>, vector<1x128xf32>
    %17 = arith.mulf %16, %15 : vector<1x128xf32>
    %c0_7 = arith.constant 0 : index
    %c0_8 = arith.constant 0 : index
    %18 = vector.load %arg5[%c0_7, %c0_8] : memref<1x128xf32, #tpu.memory_space<vmem>>, vector<1x128xf32>
    %19 = arith.mulf %7, %17 : vector<1x128xf32>
    %20 = arith.subf %18, %19 : vector<1x128xf32>
    %c0_9 = arith.constant 0 : index
    %c0_10 = arith.constant 0 : index
    %21 = vector.load %arg1[%c0_9, %c0_10] : memref<128x128xf32, #tpu.memory_space<vmem>>, vector<128x128xf32>
    %22 = vector.broadcast %17 : vector<1x128xf32> to vector<128x128xf32>
    %23 = arith.mulf %21, %22 : vector<128x128xf32>
    %24 = vector.broadcast %20 : vector<1x128xf32> to vector<128x128xf32>
    %25 = arith.addf %23, %24 : vector<128x128xf32>
    %cst_11 = arith.constant 5.000000e-01 : f32
    %26 = vector.broadcast %cst_11 : f32 to vector<128x128xf32>
    %27 = arith.mulf %26, %25 : vector<128x128xf32>
    %cst_12 = arith.constant 0.707106769 : f32
    %28 = vector.broadcast %cst_12 : f32 to vector<128x128xf32>
    %29 = arith.mulf %25, %28 : vector<128x128xf32>
    %30 = math.erf %29 : vector<128x128xf32>
    %cst_13 = arith.constant 1.000000e+00 : f32
    %31 = vector.broadcast %cst_13 : f32 to vector<128x128xf32>
    %32 = arith.addf %31, %30 : vector<128x128xf32>
    %33 = arith.mulf %27, %32 : vector<128x128xf32>
    %c0_14 = arith.constant 0 : index
    %c0_15 = arith.constant 0 : index
    %34 = vector.load %arg3[%c0_14, %c0_15] : memref<128x1xf32, #tpu.memory_space<vmem>>, vector<128x1xf32>
    %35 = vector.broadcast %34 : vector<128x1xf32> to vector<128x128xf32>
    %36 = arith.mulf %33, %35 : vector<128x128xf32>
    %c0_16 = arith.constant 0 : index
    %c0_17 = arith.constant 0 : index
    %37 = vector.load %arg7[%c0_16, %c0_17] : memref<128x128xf32, #tpu.memory_space<vmem>>, vector<128x128xf32>
    tpu.vector_store %arg7[%c0_16, %c0_17], %36 {strides = array<i32>} : memref<128x128xf32, #tpu.memory_space<vmem>>, vector<128x128xf32>,
    %c0_18 = arith.constant 0 : index
    %c0_19 = arith.constant 0 : index
    %38 = vector.load %arg6[%c0_18, %c0_19] : memref<1x128xf32, #tpu.memory_space<vmem>>, vector<1x128xf32>
    %39 = vector.broadcast %38 : vector<1x128xf32> to vector<128x128xf32>
    %40 = arith.mulf %36, %39 : vector<128x128xf32>
    %cst_20 = arith.constant dense<0.000000e+00> : vector<128xf32>
    %41 = vector.multi_reduction <add>, %40, %cst_20 [1] : vector<128x128xf32> to vector<128xf32>
    %42 = vector.shape_cast %41 : vector<128xf32> to vector<128x1xf32>
    %43 = math.tanh %42 : vector<128x1xf32>
    %c0_21 = arith.constant 0 : index
    %c0_22 = arith.constant 0 : index
    %44 = vector.load %arg8[%c0_21, %c0_22] : memref<128x1xf32, #tpu.memory_space<vmem>>, vector<128x1xf32>
    tpu.vector_store %arg8[%c0_21, %c0_22], %43 {strides = array<i32>} : memref<128x1xf32, #tpu.memory_space<vmem>>, vector<128x1xf32>,
    return
  }
  func.func @transform_0(%arg0: i32) -> (i32, i32) {
    %c0_i32 = arith.constant 0 : i32
    %c0_i32_0 = arith.constant 0 : i32
    return %arg0, %c0_i32 : i32, i32
  }
  func.func @transform_1(%arg0: i32) -> (i32, i32, i32) {
    %c0_i32 = arith.constant 0 : i32
    %c0_i32_0 = arith.constant 0 : i32
    %c0_i32_1 = arith.constant 0 : i32
    %c0_i32_2 = arith.constant 0 : i32
    return %c0_i32, %c0_i32_0, %c0_i32_1 : i32, i32, i32
  }
  func.func @transform_2(%arg0: i32) -> (i32, i32) {
    %c0_i32 = arith.constant 0 : i32
    %c0_i32_0 = arith.constant 0 : i32
    return %arg0, %c0_i32 : i32, i32
  }
  func.func @transform_3(%arg0: i32) -> (i32, i32) {
    %c0_i32 = arith.constant 0 : i32
    %c0_i32_0 = arith.constant 0 : i32
    %c0_i32_1 = arith.constant 0 : i32
    return %c0_i32, %c0_i32_0 : i32, i32
  }
  func.func @transform_4(%arg0: i32) -> (i32, i32) {
    %c0_i32 = arith.constant 0 : i32
    %c0_i32_0 = arith.constant 0 : i32
    %c0_i32_1 = arith.constant 0 : i32
    return %c0_i32, %c0_i32_0 : i32, i32
  }
  func.func @transform_5(%arg0: i32) -> (i32, i32) {
    %c0_i32 = arith.constant 0 : i32
    %c0_i32_0 = arith.constant 0 : i32
    %c0_i32_1 = arith.constant 0 : i32
    return %c0_i32, %c0_i32_0 : i32, i32
  }
  func.func @transform_6(%arg0: i32) -> (i32, i32) {
    %c0_i32 = arith.constant 0 : i32
    %c0_i32_0 = arith.constant 0 : i32
    return %arg0, %c0_i32 : i32, i32
  }
  func.func @transform_7(%arg0: i32) -> (i32, i32) {
    %c0_i32 = arith.constant 0 : i32
    %c0_i32_0 = arith.constant 0 : i32
    return %arg0, %c0_i32 : i32, i32
  }
}

module attributes {stable_mosaic.version = 11 : i64} {
  func.func @_gin_mlp_kernel(%arg0: i32, %arg1: memref<128x256xbf16, #tpu.memory_space<vmem>>, %arg2: memref<256x128xbf16, #tpu.memory_space<vmem>>, %arg3: memref<128x128xbf16, #tpu.memory_space<vmem>>, %arg4: memref<128x1xf32, #tpu.memory_space<vmem>>, %arg5: memref<128x128xbf16, #tpu.memory_space<vmem>>, %arg6: memref<1x128xf32, #tpu.memory_space<vmem>>, %arg7: memref<128x128xbf16, #tpu.memory_space<vmem>>, %arg8: memref<1x128xf32, #tpu.memory_space<vmem>>, %arg9: memref<128x128xf32, #tpu.memory_space<vmem>>, %arg10: memref<1x8x128xf32, #tpu.memory_space<vmem>>) attributes {dimension_semantics = [#tpu.dimension_semantics<parallel>], iteration_bounds = array<i64: 2>, scalar_prefetch = 0 : i64, scratch_operands = 0 : i64, tpu.core_type = #tpu.core_type<tc>, window_params = [{transform_indices = @transform_0, window_bounds = array<i64: 128, 256>}, {pipeline_mode = #tpu.pipeline_mode<synchronous>, transform_indices = @transform_1, window_bounds = array<i64: 256, 128>}, {transform_indices = @transform_2, window_bounds = array<i64: 128, 128>}, {transform_indices = @transform_3, window_bounds = array<i64: 128, 1>}, {pipeline_mode = #tpu.pipeline_mode<synchronous>, transform_indices = @transform_4, window_bounds = array<i64: 128, 128>}, {pipeline_mode = #tpu.pipeline_mode<synchronous>, transform_indices = @transform_5, window_bounds = array<i64: 1, 128>}, {pipeline_mode = #tpu.pipeline_mode<synchronous>, transform_indices = @transform_6, window_bounds = array<i64: 128, 128>}, {pipeline_mode = #tpu.pipeline_mode<synchronous>, transform_indices = @transform_7, window_bounds = array<i64: 1, 128>}, {transform_indices = @transform_8, window_bounds = array<i64: 128, 128>}, {transform_indices = @transform_9, window_bounds = array<i64: 1, 8, 128>}]} {
    %c0 = arith.constant 0 : index
    %c0_0 = arith.constant 0 : index
    %0 = vector.load %arg1[%c0, %c0_0] : memref<128x256xbf16, #tpu.memory_space<vmem>>, vector<128x256xbf16>
    %c0_1 = arith.constant 0 : index
    %c0_2 = arith.constant 0 : index
    %1 = vector.load %arg2[%c0_1, %c0_2] : memref<256x128xbf16, #tpu.memory_space<vmem>>, vector<256x128xbf16>
    %cst = arith.constant dense<0.000000e+00> : vector<128x128xf32>
    %2 = tpu.matmul %0, %1, %cst {dimension_numbers = #tpu.dot_dimension_numbers<[1], [0], [0], [1], [0, 0, 1, 1], [], []>} : vector<128x256xbf16>, vector<256x128xbf16>, vector<128x128xf32> -> vector<128x128xf32>
    %c0_3 = arith.constant 0 : index
    %c0_4 = arith.constant 0 : index
    %3 = vector.load %arg3[%c0_3, %c0_4] : memref<128x128xbf16, #tpu.memory_space<vmem>>, vector<128x128xbf16>
    %4 = arith.extf %3 : vector<128x128xbf16> to vector<128x128xf32>
    %5 = arith.addf %2, %4 : vector<128x128xf32>
    %6 = arith.truncf %5 : vector<128x128xf32> to vector<128x128xbf16>
    %c0_5 = arith.constant 0 : index
    %c0_6 = arith.constant 0 : index
    %7 = vector.load %arg5[%c0_5, %c0_6] : memref<128x128xbf16, #tpu.memory_space<vmem>>, vector<128x128xbf16>
    %cst_7 = arith.constant dense<0.000000e+00> : vector<128x128xf32>
    %8 = tpu.matmul %6, %7, %cst_7 {dimension_numbers = #tpu.dot_dimension_numbers<[1], [0], [0], [1], [0, 0, 1, 1], [], []>} : vector<128x128xbf16>, vector<128x128xbf16>, vector<128x128xf32> -> vector<128x128xf32>
    %c0_8 = arith.constant 0 : index
    %c0_9 = arith.constant 0 : index
    %9 = vector.load %arg6[%c0_8, %c0_9] : memref<1x128xf32, #tpu.memory_space<vmem>>, vector<1x128xf32>
    %10 = vector.broadcast %9 : vector<1x128xf32> to vector<128x128xf32>
    %11 = arith.addf %8, %10 : vector<128x128xf32>
    %cst_10 = arith.constant 5.000000e-01 : f32
    %12 = vector.broadcast %cst_10 : f32 to vector<128x128xf32>
    %13 = arith.mulf %12, %11 : vector<128x128xf32>
    %cst_11 = arith.constant 0.707106769 : f32
    %14 = vector.broadcast %cst_11 : f32 to vector<128x128xf32>
    %15 = arith.mulf %11, %14 : vector<128x128xf32>
    %16 = math.erf %15 : vector<128x128xf32>
    %cst_12 = arith.constant 1.000000e+00 : f32
    %17 = vector.broadcast %cst_12 : f32 to vector<128x128xf32>
    %18 = arith.addf %17, %16 : vector<128x128xf32>
    %19 = arith.mulf %13, %18 : vector<128x128xf32>
    %20 = arith.truncf %19 : vector<128x128xf32> to vector<128x128xbf16>
    %c0_13 = arith.constant 0 : index
    %c0_14 = arith.constant 0 : index
    %21 = vector.load %arg7[%c0_13, %c0_14] : memref<128x128xbf16, #tpu.memory_space<vmem>>, vector<128x128xbf16>
    %cst_15 = arith.constant dense<0.000000e+00> : vector<128x128xf32>
    %22 = tpu.matmul %20, %21, %cst_15 {dimension_numbers = #tpu.dot_dimension_numbers<[1], [0], [0], [1], [0, 0, 1, 1], [], []>} : vector<128x128xbf16>, vector<128x128xbf16>, vector<128x128xf32> -> vector<128x128xf32>
    %c0_16 = arith.constant 0 : index
    %c0_17 = arith.constant 0 : index
    %23 = vector.load %arg8[%c0_16, %c0_17] : memref<1x128xf32, #tpu.memory_space<vmem>>, vector<1x128xf32>
    %24 = vector.broadcast %23 : vector<1x128xf32> to vector<128x128xf32>
    %25 = arith.addf %22, %24 : vector<128x128xf32>
    %c0_18 = arith.constant 0 : index
    %c0_19 = arith.constant 0 : index
    %26 = vector.load %arg9[%c0_18, %c0_19] : memref<128x128xf32, #tpu.memory_space<vmem>>, vector<128x128xf32>
    tpu.vector_store %arg9[%c0_18, %c0_19], %25 {strides = array<i32>} : memref<128x128xf32, #tpu.memory_space<vmem>>, vector<128x128xf32>,
    %c0_20 = arith.constant 0 : index
    %c0_21 = arith.constant 0 : index
    %27 = vector.load %arg4[%c0_20, %c0_21] : memref<128x1xf32, #tpu.memory_space<vmem>>, vector<128x1xf32>
    %28 = vector.broadcast %27 : vector<128x1xf32> to vector<128x128xf32>
    %29 = arith.mulf %25, %28 : vector<128x128xf32>
    %cst_22 = arith.constant dense<0.000000e+00> : vector<128xf32>
    %30 = vector.multi_reduction <add>, %29, %cst_22 [0] : vector<128x128xf32> to vector<128xf32>
    %31 = vector.shape_cast %30 : vector<128xf32> to vector<1x128xf32>
    %32 = arith.mulf %29, %25 : vector<128x128xf32>
    %cst_23 = arith.constant dense<0.000000e+00> : vector<128xf32>
    %33 = vector.multi_reduction <add>, %32, %cst_23 [0] : vector<128x128xf32> to vector<128xf32>
    %34 = vector.shape_cast %33 : vector<128xf32> to vector<1x128xf32>
    %cst_24 = arith.constant 1.000000e+00 : f32
    %35 = vector.broadcast %cst_24 : f32 to vector<1x128xf32>
    %36 = vector.broadcast %27 : vector<128x1xf32> to vector<128x128xf32>
    %37 = vector.broadcast %35 : vector<1x128xf32> to vector<128x128xf32>
    %38 = arith.mulf %36, %37 : vector<128x128xf32>
    %cst_25 = arith.constant dense<0.000000e+00> : vector<128xf32>
    %39 = vector.multi_reduction <add>, %38, %cst_25 [0] : vector<128x128xf32> to vector<128xf32>
    %40 = vector.shape_cast %39 : vector<128xf32> to vector<1x128xf32>
    %cst_26 = arith.constant 0.000000e+00 : f32
    %41 = vector.broadcast %cst_26 : f32 to vector<5x128xf32>
    %42 = tpu.concatenate %31, %34, %40, %41 in 0 : vector<1x128xf32>, vector<1x128xf32>, vector<1x128xf32>, vector<5x128xf32> -> vector<8x128xf32>
    %c0_27 = arith.constant 0 : index
    %c0_28 = arith.constant 0 : index
    %c0_29 = arith.constant 0 : index
    %43 = vector.load %arg10[%c0_27, %c0_28, %c0_29] : memref<1x8x128xf32, #tpu.memory_space<vmem>>, vector<1x8x128xf32>
    %44 = vector.shape_cast %43 : vector<1x8x128xf32> to vector<8x128xf32>
    %45 = vector.shape_cast %42 : vector<8x128xf32> to vector<1x8x128xf32>
    tpu.vector_store %arg10[%c0_27, %c0_28, %c0_29], %45 {strides = array<i32>} : memref<1x8x128xf32, #tpu.memory_space<vmem>>, vector<1x8x128xf32>,
    return
  }
  func.func @transform_0(%arg0: i32) -> (i32, i32) {
    %c0_i32 = arith.constant 0 : i32
    %c0_i32_0 = arith.constant 0 : i32
    return %arg0, %c0_i32 : i32, i32
  }
  func.func @transform_1(%arg0: i32) -> (i32, i32) {
    %c0_i32 = arith.constant 0 : i32
    %c0_i32_0 = arith.constant 0 : i32
    %c0_i32_1 = arith.constant 0 : i32
    return %c0_i32, %c0_i32_0 : i32, i32
  }
  func.func @transform_2(%arg0: i32) -> (i32, i32) {
    %c0_i32 = arith.constant 0 : i32
    %c0_i32_0 = arith.constant 0 : i32
    return %arg0, %c0_i32 : i32, i32
  }
  func.func @transform_3(%arg0: i32) -> (i32, i32) {
    %c0_i32 = arith.constant 0 : i32
    %c0_i32_0 = arith.constant 0 : i32
    return %arg0, %c0_i32 : i32, i32
  }
  func.func @transform_4(%arg0: i32) -> (i32, i32) {
    %c0_i32 = arith.constant 0 : i32
    %c0_i32_0 = arith.constant 0 : i32
    %c0_i32_1 = arith.constant 0 : i32
    return %c0_i32, %c0_i32_0 : i32, i32
  }
  func.func @transform_5(%arg0: i32) -> (i32, i32) {
    %c0_i32 = arith.constant 0 : i32
    %c0_i32_0 = arith.constant 0 : i32
    %c0_i32_1 = arith.constant 0 : i32
    return %c0_i32, %c0_i32_0 : i32, i32
  }
  func.func @transform_6(%arg0: i32) -> (i32, i32) {
    %c0_i32 = arith.constant 0 : i32
    %c0_i32_0 = arith.constant 0 : i32
    %c0_i32_1 = arith.constant 0 : i32
    return %c0_i32, %c0_i32_0 : i32, i32
  }
  func.func @transform_7(%arg0: i32) -> (i32, i32) {
    %c0_i32 = arith.constant 0 : i32
    %c0_i32_0 = arith.constant 0 : i32
    %c0_i32_1 = arith.constant 0 : i32
    return %c0_i32, %c0_i32_0 : i32, i32
  }
  func.func @transform_8(%arg0: i32) -> (i32, i32) {
    %c0_i32 = arith.constant 0 : i32
    %c0_i32_0 = arith.constant 0 : i32
    return %arg0, %c0_i32 : i32, i32
  }
  func.func @transform_9(%arg0: i32) -> (i32, i32, i32) {
    %c0_i32 = arith.constant 0 : i32
    %c0_i32_0 = arith.constant 0 : i32
    %c0_i32_1 = arith.constant 0 : i32
    return %arg0, %c0_i32, %c0_i32_0 : i32, i32, i32
  }
}

module attributes {stable_mosaic.version = 11 : i64} {
  func.func @_topk_pool_kernel(%arg0: i32, %arg1: memref<256x128xf32, #tpu.memory_space<vmem>>, %arg2: memref<256x1xf32, #tpu.memory_space<vmem>>, %arg3: memref<256x1xf32, #tpu.memory_space<vmem>>, %arg4: memref<2x256xf32, #tpu.memory_space<vmem>>, %arg5: memref<256x2xf32, #tpu.memory_space<vmem>>, %arg6: memref<2x256xf32, #tpu.memory_space<vmem>>, %arg7: memref<256x128xbf16, #tpu.memory_space<vmem>>, %arg8: memref<2x256xf32, #tpu.memory_space<vmem>>) attributes {dimension_semantics = [#tpu.dimension_semantics<arbitrary>], iteration_bounds = array<i64: 1>, scalar_prefetch = 0 : i64, scratch_operands = 0 : i64, tpu.core_type = #tpu.core_type<tc>, window_params = [{pipeline_mode = #tpu.pipeline_mode<synchronous>, transform_indices = @transform_0, window_bounds = array<i64: 256, 128>}, {pipeline_mode = #tpu.pipeline_mode<synchronous>, transform_indices = @transform_1, window_bounds = array<i64: 256, 1>}, {pipeline_mode = #tpu.pipeline_mode<synchronous>, transform_indices = @transform_2, window_bounds = array<i64: 256, 1>}, {pipeline_mode = #tpu.pipeline_mode<synchronous>, transform_indices = @transform_3, window_bounds = array<i64: 2, 256>}, {pipeline_mode = #tpu.pipeline_mode<synchronous>, transform_indices = @transform_4, window_bounds = array<i64: 256, 2>}, {pipeline_mode = #tpu.pipeline_mode<synchronous>, transform_indices = @transform_5, window_bounds = array<i64: 2, 256>}, {pipeline_mode = #tpu.pipeline_mode<synchronous>, transform_indices = @transform_6, window_bounds = array<i64: 256, 128>}, {pipeline_mode = #tpu.pipeline_mode<synchronous>, transform_indices = @transform_7, window_bounds = array<i64: 2, 256>}]} {
    %c0 = arith.constant 0 : index
    %c0_0 = arith.constant 0 : index
    %0 = vector.load %arg1[%c0, %c0_0] : memref<256x128xf32, #tpu.memory_space<vmem>>, vector<256x128xf32>
    %c0_1 = arith.constant 0 : index
    %c0_2 = arith.constant 0 : index
    %1 = vector.load %arg2[%c0_1, %c0_2] : memref<256x1xf32, #tpu.memory_space<vmem>>, vector<256x1xf32>
    %2 = vector.broadcast %1 : vector<256x1xf32> to vector<256x128xf32>
    %3 = arith.mulf %0, %2 : vector<256x128xf32>
    %c0_3 = arith.constant 0 : index
    %c0_4 = arith.constant 0 : index
    %4 = vector.load %arg3[%c0_3, %c0_4] : memref<256x1xf32, #tpu.memory_space<vmem>>, vector<256x1xf32>
    %5 = vector.broadcast %4 : vector<256x1xf32> to vector<256x128xf32>
    %6 = arith.mulf %3, %5 : vector<256x128xf32>
    %7 = arith.truncf %6 : vector<256x128xf32> to vector<256x128xbf16>
    %c0_5 = arith.constant 0 : index
    %c0_6 = arith.constant 0 : index
    %8 = vector.load %arg7[%c0_5, %c0_6] : memref<256x128xbf16, #tpu.memory_space<vmem>>, vector<256x128xbf16>
    tpu.vector_store %arg7[%c0_5, %c0_6], %7 {strides = array<i32>} : memref<256x128xbf16, #tpu.memory_space<vmem>>, vector<256x128xbf16>,
    %c0_7 = arith.constant 0 : index
    %c0_8 = arith.constant 0 : index
    %9 = vector.load %arg6[%c0_7, %c0_8] : memref<2x256xf32, #tpu.memory_space<vmem>>, vector<2x256xf32>
    %c0_9 = arith.constant 0 : index
    %c0_10 = arith.constant 0 : index
    %10 = vector.load %arg4[%c0_9, %c0_10] : memref<2x256xf32, #tpu.memory_space<vmem>>, vector<2x256xf32>
    %c0_11 = arith.constant 0 : index
    %c0_12 = arith.constant 0 : index
    %11 = vector.load %arg5[%c0_11, %c0_12] : memref<256x2xf32, #tpu.memory_space<vmem>>, vector<256x2xf32>
    %cst = arith.constant dense<0.000000e+00> : vector<2x128xf32>
    %12 = tpu.matmul %10, %6, %cst {dimension_numbers = #tpu.dot_dimension_numbers<[1], [0], [0], [1], [0, 0, 1, 1], [], []>} : vector<2x256xf32>, vector<256x128xf32>, vector<2x128xf32> -> vector<2x128xf32>
    %cst_13 = arith.constant dense<0.000000e+00> : vector<2xf32>
    %13 = vector.multi_reduction <add>, %10, %cst_13 [1] : vector<2x256xf32> to vector<2xf32>
    %14 = vector.shape_cast %13 : vector<2xf32> to vector<2x1xf32>
    %cst_14 = arith.constant 1.000000e+00 : f32
    %15 = vector.broadcast %cst_14 : f32 to vector<2x1xf32>
    %16 = arith.maximumf %14, %15 : vector<2x1xf32>
    %17 = vector.broadcast %16 : vector<2x1xf32> to vector<2x128xf32>
    %18 = arith.divf %12, %17 : vector<2x128xf32>
    %19 = vector.extract_strided_slice %11 {offsets = [0, 0], sizes = [256, 1], strides = [1, 1]} : vector<256x2xf32> to vector<256x1xf32>
    %cst_15 = arith.constant 0.000000e+00 : f32
    %20 = vector.broadcast %cst_15 : f32 to vector<256x1xf32>
    %21 = arith.cmpf ogt, %19, %20 : vector<256x1xf32>
    %cst_16 = arith.constant -1.000000e+30 : f32
    %22 = vector.shape_cast %21 : vector<256x1xi1> to vector<256x1xi1>
    %23 = vector.broadcast %22 : vector<256x1xi1> to vector<256x128xi1>
    %24 = vector.broadcast %cst_16 : f32 to vector<256x128xf32>
    %25 = arith.select %23, %6, %24 : vector<256x128xi1>, vector<256x128xf32>
    %cst_17 = arith.constant dense<0xFF800000> : vector<128xf32>
    %26 = vector.multi_reduction <maximumf>, %25, %cst_17 [0] : vector<256x128xf32> to vector<128xf32>
    %27 = vector.shape_cast %26 : vector<128xf32> to vector<1x128xf32>
    %28 = vector.extract_strided_slice %11 {offsets = [0, 1], sizes = [256, 1], strides = [1, 1]} : vector<256x2xf32> to vector<256x1xf32>
    %cst_18 = arith.constant 0.000000e+00 : f32
    %29 = vector.broadcast %cst_18 : f32 to vector<256x1xf32>
    %30 = arith.cmpf ogt, %28, %29 : vector<256x1xf32>
    %cst_19 = arith.constant -1.000000e+30 : f32
    %31 = vector.shape_cast %30 : vector<256x1xi1> to vector<256x1xi1>
    %32 = vector.broadcast %31 : vector<256x1xi1> to vector<256x128xi1>
    %33 = vector.broadcast %cst_19 : f32 to vector<256x128xf32>
    %34 = arith.select %32, %6, %33 : vector<256x128xi1>, vector<256x128xf32>
    %cst_20 = arith.constant dense<0xFF800000> : vector<128xf32>
    %35 = vector.multi_reduction <maximumf>, %34, %cst_20 [0] : vector<256x128xf32> to vector<128xf32>
    %36 = vector.shape_cast %35 : vector<128xf32> to vector<1x128xf32>
    %37 = tpu.concatenate %27, %36 in 0 : vector<1x128xf32>, vector<1x128xf32> -> vector<2x128xf32>
    %38 = tpu.concatenate %37, %18 in 1 : vector<2x128xf32>, vector<2x128xf32> -> vector<2x256xf32>
    %39 = arith.addf %9, %38 : vector<2x256xf32>
    %c0_21 = arith.constant 0 : index
    %c0_22 = arith.constant 0 : index
    %40 = vector.load %arg8[%c0_21, %c0_22] : memref<2x256xf32, #tpu.memory_space<vmem>>, vector<2x256xf32>
    tpu.vector_store %arg8[%c0_21, %c0_22], %39 {strides = array<i32>} : memref<2x256xf32, #tpu.memory_space<vmem>>, vector<2x256xf32>,
    return
  }
  func.func @transform_0(%arg0: i32) -> (i32, i32) {
    %c0_i32 = arith.constant 0 : i32
    %c0_i32_0 = arith.constant 0 : i32
    %c0_i32_1 = arith.constant 0 : i32
    return %c0_i32, %c0_i32_0 : i32, i32
  }
  func.func @transform_1(%arg0: i32) -> (i32, i32) {
    %c0_i32 = arith.constant 0 : i32
    %c0_i32_0 = arith.constant 0 : i32
    %c0_i32_1 = arith.constant 0 : i32
    return %c0_i32, %c0_i32_0 : i32, i32
  }
  func.func @transform_2(%arg0: i32) -> (i32, i32) {
    %c0_i32 = arith.constant 0 : i32
    %c0_i32_0 = arith.constant 0 : i32
    %c0_i32_1 = arith.constant 0 : i32
    return %c0_i32, %c0_i32_0 : i32, i32
  }
  func.func @transform_3(%arg0: i32) -> (i32, i32) {
    %c0_i32 = arith.constant 0 : i32
    %c0_i32_0 = arith.constant 0 : i32
    %c0_i32_1 = arith.constant 0 : i32
    return %c0_i32, %c0_i32_0 : i32, i32
  }
  func.func @transform_4(%arg0: i32) -> (i32, i32) {
    %c0_i32 = arith.constant 0 : i32
    %c0_i32_0 = arith.constant 0 : i32
    %c0_i32_1 = arith.constant 0 : i32
    return %c0_i32, %c0_i32_0 : i32, i32
  }
  func.func @transform_5(%arg0: i32) -> (i32, i32) {
    %c0_i32 = arith.constant 0 : i32
    %c0_i32_0 = arith.constant 0 : i32
    %c0_i32_1 = arith.constant 0 : i32
    return %c0_i32, %c0_i32_0 : i32, i32
  }
  func.func @transform_6(%arg0: i32) -> (i32, i32) {
    %c0_i32 = arith.constant 0 : i32
    %c0_i32_0 = arith.constant 0 : i32
    %c0_i32_1 = arith.constant 0 : i32
    return %c0_i32, %c0_i32_0 : i32, i32
  }
  func.func @transform_7(%arg0: i32) -> (i32, i32) {
    %c0_i32 = arith.constant 0 : i32
    %c0_i32_0 = arith.constant 0 : i32
    %c0_i32_1 = arith.constant 0 : i32
    return %c0_i32, %c0_i32_0 : i32, i32
  }
}

module attributes {stable_mosaic.version = 11 : i64} {
  func.func @_topk_pool_linear_kernel(%arg0: i32, %arg1: memref<256x128xf32, #tpu.memory_space<vmem>>, %arg2: memref<256x1xf32, #tpu.memory_space<vmem>>, %arg3: memref<256x1xf32, #tpu.memory_space<vmem>>, %arg4: memref<2x256xf32, #tpu.memory_space<vmem>>, %arg5: memref<256x2xf32, #tpu.memory_space<vmem>>, %arg6: memref<2x256xf32, #tpu.memory_space<vmem>>, %arg7: memref<256x128xf32, #tpu.memory_space<vmem>>, %arg8: memref<1x128xf32, #tpu.memory_space<vmem>>, %arg9: memref<2x128xf32, #tpu.memory_space<vmem>>) attributes {dimension_semantics = [#tpu.dimension_semantics<arbitrary>], iteration_bounds = array<i64: 1>, scalar_prefetch = 0 : i64, scratch_operands = 0 : i64, tpu.core_type = #tpu.core_type<tc>, window_params = [{pipeline_mode = #tpu.pipeline_mode<synchronous>, transform_indices = @transform_0, window_bounds = array<i64: 256, 128>}, {pipeline_mode = #tpu.pipeline_mode<synchronous>, transform_indices = @transform_1, window_bounds = array<i64: 256, 1>}, {pipeline_mode = #tpu.pipeline_mode<synchronous>, transform_indices = @transform_2, window_bounds = array<i64: 256, 1>}, {pipeline_mode = #tpu.pipeline_mode<synchronous>, transform_indices = @transform_3, window_bounds = array<i64: 2, 256>}, {pipeline_mode = #tpu.pipeline_mode<synchronous>, transform_indices = @transform_4, window_bounds = array<i64: 256, 2>}, {pipeline_mode = #tpu.pipeline_mode<synchronous>, transform_indices = @transform_5, window_bounds = array<i64: 2, 256>}, {pipeline_mode = #tpu.pipeline_mode<synchronous>, transform_indices = @transform_6, window_bounds = array<i64: 256, 128>}, {pipeline_mode = #tpu.pipeline_mode<synchronous>, transform_indices = @transform_7, window_bounds = array<i64: 1, 128>}, {pipeline_mode = #tpu.pipeline_mode<synchronous>, transform_indices = @transform_8, window_bounds = array<i64: 2, 128>}]} {
    %c0 = arith.constant 0 : index
    %c0_0 = arith.constant 0 : index
    %0 = vector.load %arg1[%c0, %c0_0] : memref<256x128xf32, #tpu.memory_space<vmem>>, vector<256x128xf32>
    %c0_1 = arith.constant 0 : index
    %c0_2 = arith.constant 0 : index
    %1 = vector.load %arg2[%c0_1, %c0_2] : memref<256x1xf32, #tpu.memory_space<vmem>>, vector<256x1xf32>
    %2 = vector.broadcast %1 : vector<256x1xf32> to vector<256x128xf32>
    %3 = arith.mulf %0, %2 : vector<256x128xf32>
    %c0_3 = arith.constant 0 : index
    %c0_4 = arith.constant 0 : index
    %4 = vector.load %arg3[%c0_3, %c0_4] : memref<256x1xf32, #tpu.memory_space<vmem>>, vector<256x1xf32>
    %5 = vector.broadcast %4 : vector<256x1xf32> to vector<256x128xf32>
    %6 = arith.mulf %3, %5 : vector<256x128xf32>
    %c0_5 = arith.constant 0 : index
    %c0_6 = arith.constant 0 : index
    %7 = vector.load %arg6[%c0_5, %c0_6] : memref<2x256xf32, #tpu.memory_space<vmem>>, vector<2x256xf32>
    %c0_7 = arith.constant 0 : index
    %c0_8 = arith.constant 0 : index
    %8 = vector.load %arg4[%c0_7, %c0_8] : memref<2x256xf32, #tpu.memory_space<vmem>>, vector<2x256xf32>
    %c0_9 = arith.constant 0 : index
    %c0_10 = arith.constant 0 : index
    %9 = vector.load %arg5[%c0_9, %c0_10] : memref<256x2xf32, #tpu.memory_space<vmem>>, vector<256x2xf32>
    %cst = arith.constant dense<0.000000e+00> : vector<2x128xf32>
    %10 = tpu.matmul %8, %6, %cst {dimension_numbers = #tpu.dot_dimension_numbers<[1], [0], [0], [1], [0, 0, 1, 1], [], []>} : vector<2x256xf32>, vector<256x128xf32>, vector<2x128xf32> -> vector<2x128xf32>
    %cst_11 = arith.constant dense<0.000000e+00> : vector<2xf32>
    %11 = vector.multi_reduction <add>, %8, %cst_11 [1] : vector<2x256xf32> to vector<2xf32>
    %12 = vector.shape_cast %11 : vector<2xf32> to vector<2x1xf32>
    %cst_12 = arith.constant 1.000000e+00 : f32
    %13 = vector.broadcast %cst_12 : f32 to vector<2x1xf32>
    %14 = arith.maximumf %12, %13 : vector<2x1xf32>
    %15 = vector.broadcast %14 : vector<2x1xf32> to vector<2x128xf32>
    %16 = arith.divf %10, %15 : vector<2x128xf32>
    %17 = vector.extract_strided_slice %9 {offsets = [0, 0], sizes = [256, 1], strides = [1, 1]} : vector<256x2xf32> to vector<256x1xf32>
    %cst_13 = arith.constant 0.000000e+00 : f32
    %18 = vector.broadcast %cst_13 : f32 to vector<256x1xf32>
    %19 = arith.cmpf ogt, %17, %18 : vector<256x1xf32>
    %cst_14 = arith.constant -1.000000e+30 : f32
    %20 = vector.shape_cast %19 : vector<256x1xi1> to vector<256x1xi1>
    %21 = vector.broadcast %20 : vector<256x1xi1> to vector<256x128xi1>
    %22 = vector.broadcast %cst_14 : f32 to vector<256x128xf32>
    %23 = arith.select %21, %6, %22 : vector<256x128xi1>, vector<256x128xf32>
    %cst_15 = arith.constant dense<0xFF800000> : vector<128xf32>
    %24 = vector.multi_reduction <maximumf>, %23, %cst_15 [0] : vector<256x128xf32> to vector<128xf32>
    %25 = vector.shape_cast %24 : vector<128xf32> to vector<1x128xf32>
    %26 = vector.extract_strided_slice %9 {offsets = [0, 1], sizes = [256, 1], strides = [1, 1]} : vector<256x2xf32> to vector<256x1xf32>
    %cst_16 = arith.constant 0.000000e+00 : f32
    %27 = vector.broadcast %cst_16 : f32 to vector<256x1xf32>
    %28 = arith.cmpf ogt, %26, %27 : vector<256x1xf32>
    %cst_17 = arith.constant -1.000000e+30 : f32
    %29 = vector.shape_cast %28 : vector<256x1xi1> to vector<256x1xi1>
    %30 = vector.broadcast %29 : vector<256x1xi1> to vector<256x128xi1>
    %31 = vector.broadcast %cst_17 : f32 to vector<256x128xf32>
    %32 = arith.select %30, %6, %31 : vector<256x128xi1>, vector<256x128xf32>
    %cst_18 = arith.constant dense<0xFF800000> : vector<128xf32>
    %33 = vector.multi_reduction <maximumf>, %32, %cst_18 [0] : vector<256x128xf32> to vector<128xf32>
    %34 = vector.shape_cast %33 : vector<128xf32> to vector<1x128xf32>
    %35 = tpu.concatenate %25, %34 in 0 : vector<1x128xf32>, vector<1x128xf32> -> vector<2x128xf32>
    %36 = tpu.concatenate %35, %16 in 1 : vector<2x128xf32>, vector<2x128xf32> -> vector<2x256xf32>
    %37 = arith.addf %7, %36 : vector<2x256xf32>
    %c0_19 = arith.constant 0 : index
    %c0_20 = arith.constant 0 : index
    %38 = vector.load %arg7[%c0_19, %c0_20] : memref<256x128xf32, #tpu.memory_space<vmem>>, vector<256x128xf32>
    %cst_21 = arith.constant dense<0.000000e+00> : vector<2x128xf32>
    %39 = tpu.matmul %37, %38, %cst_21 {dimension_numbers = #tpu.dot_dimension_numbers<[1], [0], [0], [1], [0, 0, 1, 1], [], []>} : vector<2x256xf32>, vector<256x128xf32>, vector<2x128xf32> -> vector<2x128xf32>
    %c0_22 = arith.constant 0 : index
    %c0_23 = arith.constant 0 : index
    %40 = vector.load %arg8[%c0_22, %c0_23] : memref<1x128xf32, #tpu.memory_space<vmem>>, vector<1x128xf32>
    %41 = vector.broadcast %40 : vector<1x128xf32> to vector<2x128xf32>
    %42 = arith.addf %39, %41 : vector<2x128xf32>
    %c0_24 = arith.constant 0 : index
    %c0_25 = arith.constant 0 : index
    %43 = vector.load %arg9[%c0_24, %c0_25] : memref<2x128xf32, #tpu.memory_space<vmem>>, vector<2x128xf32>
    tpu.vector_store %arg9[%c0_24, %c0_25], %42 {strides = array<i32>} : memref<2x128xf32, #tpu.memory_space<vmem>>, vector<2x128xf32>,
    return
  }
  func.func @transform_0(%arg0: i32) -> (i32, i32) {
    %c0_i32 = arith.constant 0 : i32
    %c0_i32_0 = arith.constant 0 : i32
    %c0_i32_1 = arith.constant 0 : i32
    return %c0_i32, %c0_i32_0 : i32, i32
  }
  func.func @transform_1(%arg0: i32) -> (i32, i32) {
    %c0_i32 = arith.constant 0 : i32
    %c0_i32_0 = arith.constant 0 : i32
    %c0_i32_1 = arith.constant 0 : i32
    return %c0_i32, %c0_i32_0 : i32, i32
  }
  func.func @transform_2(%arg0: i32) -> (i32, i32) {
    %c0_i32 = arith.constant 0 : i32
    %c0_i32_0 = arith.constant 0 : i32
    %c0_i32_1 = arith.constant 0 : i32
    return %c0_i32, %c0_i32_0 : i32, i32
  }
  func.func @transform_3(%arg0: i32) -> (i32, i32) {
    %c0_i32 = arith.constant 0 : i32
    %c0_i32_0 = arith.constant 0 : i32
    %c0_i32_1 = arith.constant 0 : i32
    return %c0_i32, %c0_i32_0 : i32, i32
  }
  func.func @transform_4(%arg0: i32) -> (i32, i32) {
    %c0_i32 = arith.constant 0 : i32
    %c0_i32_0 = arith.constant 0 : i32
    %c0_i32_1 = arith.constant 0 : i32
    return %c0_i32, %c0_i32_0 : i32, i32
  }
  func.func @transform_5(%arg0: i32) -> (i32, i32) {
    %c0_i32 = arith.constant 0 : i32
    %c0_i32_0 = arith.constant 0 : i32
    %c0_i32_1 = arith.constant 0 : i32
    return %c0_i32, %c0_i32_0 : i32, i32
  }
  func.func @transform_6(%arg0: i32) -> (i32, i32) {
    %c0_i32 = arith.constant 0 : i32
    %c0_i32_0 = arith.constant 0 : i32
    %c0_i32_1 = arith.constant 0 : i32
    return %c0_i32, %c0_i32_0 : i32, i32
  }
  func.func @transform_7(%arg0: i32) -> (i32, i32) {
    %c0_i32 = arith.constant 0 : i32
    %c0_i32_0 = arith.constant 0 : i32
    %c0_i32_1 = arith.constant 0 : i32
    return %c0_i32, %c0_i32_0 : i32, i32
  }
  func.func @transform_8(%arg0: i32) -> (i32, i32) {
    %c0_i32 = arith.constant 0 : i32
    %c0_i32_0 = arith.constant 0 : i32
    %c0_i32_1 = arith.constant 0 : i32
    return %c0_i32, %c0_i32_0 : i32, i32
  }
}

</mosaic_0001>

<bundles_post_ra>
// kernel: forward.13
= control target key start
LH: loop header
LB: loop body
LE: loop exit
PB: predicated region body
PF: predicated region fallthrough
CT: control target
= control target key end

     0   :  { %s1620_s24 = smov 0   ;;  %s2431_s0 = inlined_call_operand.vmem [shape: f32[256,128], index: 0, kind: input, shape index: {}]   ;;  %s2432_s1 = inlined_call_operand.vmem [shape: f32[2,8,128], index: 1, kind: input, shape index: {}]   ;;  %s2433_s2 = inlined_call_operand.vmem [shape: f32[256,1], index: 2, kind: input, shape index: {}]   ;;  %s2434_s3 = inlined_call_operand.vmem [shape: f32[1,128], index: 3, kind: input, shape index: {}]   ;;  %s2435_s4 = inlined_call_operand.vmem [shape: f32[1,128], index: 4, kind: input, shape index: {}]   ;;  %s2436_s5 = inlined_call_operand.vmem [shape: f32[1,128], index: 5, kind: input, shape index: {}]   ;;  %s2437_s6 = inlined_call_operand.vmem [shape: f32[256,128], index: 6, kind: output, shape index: {0}]   ;;  %s2438_s7 = inlined_call_operand.vmem [shape: f32[256,1], index: 7, kind: output, shape index: {1}]  }
   0x1 LB: > { %s1457_s25 = sadd.s32 4294967295, %s1577_s24   ;;  %p1461_p0 = scmp.ge.s32.totalorder %s1577_s24, 1  ;;  %s1577_s24 = sphi %s1620_s24, %s18_s24  }
   0x2   : > { %p252_p1 = scmp.lt.s32.totalorder %s1577_s24, 3 }
   0x4   : > { %p253_p2 = pnand %p1461_p0, %p252_p1 }
   0x5   : > { %s1462_s26 = sshll.u32 (!%p253_p2), %s1457_s25, 4 }
   0x6   : > { %256 = sbr.rel (%p253_p2) target bundleno = 414 (0x19e), region = 44  ;;  %p295_p3 = scmp.lt.s32.totalorder (!%p253_p2), %s1462_s26, 31 }
   0xb   : > { %v318_v0 = vld [vmem:[%s2432_s1] sm:$0xff]  ;;  %v319_v1 = vld [vmem:[%s2432_s1 + $0x8] sm:$0xff]  ;;  %v1579_v2 = vmov 0   ;;  %s2486_s26 = smov (!%p295_p3, %s1462_s26), 31 }
   0xc   : > { %1498 = vset.pattern.permute.xlu1 %v1579_v2  ;;  %1497 = vset.pattern.permute.xlu0 %v1579_v2  ;;  %v320_v3 = vadd.f32 %v319_v1, %v318_v0  ;;  %s1634_s8 = sshll.u32 %s2486_s26, 3  ;;  %v374_v57 = vld [vmem:[%s2434_s3] sm:$0x1] }
   0xd   : > { %1499 = vset.pattern.permute.xlu2 %v1579_v2  ;;  %s1640_s11 = scalar_lea.vmem %s2433_s2, %s1634_s8  ;;  %s1666_s16 = scalar_lea.vmem %s2431_s0, %s1634_s8  ;;  %v381_v60 = vld [vmem:[%s2435_s4] sm:$0x1] }
   0xe   : > { %v321_v4 = vmax.f32 %v320_v3, 1.0  ;;  %v1144_v7 = vld [vmem:[%s1640_s11 + $0x10] sm:$0xff]  ;;  %v1142_v8 = vld [vmem:[%s1640_s11] sm:$0xff]  ;;  %v1145_v11 = vld [vmem:[%s1640_s11 + $0x18] sm:$0xff]  ;;  %s1904_s21 = scalar_lea.vmem %s2437_s6, %s1634_s8  ;;  %s2392_s27 = scalar_lea.vmem %s2438_s7, %s1634_s8 }
   0xf   : > { %v1146_v9 = vld [vmem:[%s1640_s11 + $0x20] sm:$0xff]  ;;  %1170 = vperm.xlu1 %1498, %v1144_v7   ;;  %1160 = vperm.xlu0 %1497, %v1142_v8   ;;  %v1143_v12 = vld [vmem:[%s1640_s11 + $0x8] sm:$0xff]  ;;  %v1149_v28 = vld [vmem:[%s1640_s11 + $0x38] sm:$0xff] }
  0x10   : > { %v323_v5 = vrot.slane %v321_v4, 2  ;;  %v340_v6 = vrot.slane %v321_v4, 1  ;;  %1180 = vperm.xlu2 %1499, %v1146_v9   ;;  %v1147_v14 = vld [vmem:[%s1640_s11 + $0x28] sm:$0xff]  ;;  %v1148_v29 = vld [vmem:[%s1640_s11 + $0x30] sm:$0xff]  ;;  %v1150_v31 = vld [vmem:[%s1640_s11 + $0x40] sm:$0xff] }
  0x11   : > { %v1152_v40 = vld [vmem:[%s1640_s11 + $0x50] sm:$0xff]  ;;  %v1151_v41 = vld [vmem:[%s1640_s11 + $0x48] sm:$0xff]  ;;  %v1153_v42 = vld [vmem:[%s1640_s11 + $0x58] sm:$0xff] }
  0x12   : > { %1501 = vrcp.f32 %v323_v5  ;;  %vm330_vm0 = vweird.f32 %v323_v5  ;;  %v336_v16 = vand.u32 2147483648, %v323_v5  ;;  %v334_v19 = vand.u32 2147483647, %v323_v5  ;;  %v1155_v46 = vld [vmem:[%s1640_s11 + $0x68] sm:$0xff]  ;;  %v1154_v47 = vld [vmem:[%s1640_s11 + $0x60] sm:$0xff]  ;;  %v1156_v48 = vld [vmem:[%s1640_s11 + $0x70] sm:$0xff] }
  0x13   : > { %1503 = vrcp.f32 %v340_v6  ;;  %v353_v20 = vand.u32 2147483648, %v340_v6  ;;  %vm347_vm2 = vweird.f32 %v340_v6  ;;  %v351_v22 = vand.u32 2147483647, %v340_v6  ;;  %v1157_v51 = vld [vmem:[%s1640_s11 + $0x78] sm:$0xff]  ;;  %v388_v61 = vld [vmem:[%s1666_s16 + $0x20] sm:$0xff]  ;;  %v389_v62 = vld [vmem:[%s1666_s16 + $0x28] sm:$0xff] }
  0x14   : > { %v337_v24 = vor.u32 1.1754944e-38, %v336_v16  ;;  %vm335_vm5 = vcmp.eq.f32.partialorder %v334_v19, 8.507059e+37  ;;  %v392_v63 = vld [vmem:[%s1666_s16 + $0x40] sm:$0xff]  ;;  %v386_v2 = vld [vmem:[%s1666_s16 + $0x10] sm:$0xff] }
  0x15   : > { %v354_v27 = vor.u32 1.1754944e-38, %v353_v20  ;;  %vm352_vm7 = vcmp.eq.f32.partialorder %v351_v22, 8.507059e+37  ;;  %v384_v7 = vld [vmem:[%s1666_s16] sm:$0xff] }
  0x17   : > { %1175 = vperm.xlu1 %1498, %v1145_v11   ;;  %1165 = vperm.xlu0 %1497, %v1143_v12  }
  0x18   : > { %v1502_v10 = vpop.eup %1501  ;;  %1185 = vperm.xlu2 %1499, %v1147_v14  }
  0x19   : > { %v1504_v13 = vpop.eup %1503  ;;  %v326_v15 = vmul.f32 %v1502_v10, %v323_v5  ;;  %vm331_vm1 = vweird.f32 %v1502_v10 }
  0x1a   : > { %v343_v17 = vmul.f32 %v1504_v13, %v340_v6  ;;  %vm348_vm3 = vweird.f32 %v1504_v13  ;;  %vm332_vm4 = vmor %vm330_vm0, %vm331_vm1 }
  0x1b   : > { %v327_v18 = vsub.f32 1.0, %v326_v15  ;;  %vm349_vm6 = vmor %vm347_vm2, %vm348_vm3 }
  0x1c   : > { %v344_v21 = vsub.f32 1.0, %v343_v17 }
  0x1d   : > { %v328_v23 = vmul.f32 %v1502_v10, %v327_v18 }
  0x1e   : > { %v345_v25 = vmul.f32 %v1504_v13, %v344_v21 }
  0x1f   : > { %v329_v26 = vadd.f32 %v1502_v10, %v328_v23  ;;  %1195 = vperm.xlu1 %1498, %v1149_v28   ;;  %1190 = vperm.xlu0 %1497, %v1148_v29  }
  0x20   : > { %v346_v30 = vadd.f32 %v1504_v13, %v345_v25  ;;  %1200 = vperm.xlu2 %1499, %v1150_v31  }
  0x21   : > { %v333_v32 = vsel %vm332_vm4, %v1502_v10, %v329_v26 }
  0x22   : > { %v338_v33 = vsel %vm335_vm5, %v337_v24, %v333_v32  ;;  %v350_v34 = vsel %vm349_vm6, %v1504_v13, %v346_v30 }
  0x23   : > { %v339_v35 = vmul.f32 %v338_v33, %v320_v3  ;;  %v355_v36 = vsel %vm352_vm7, %v354_v27, %v350_v34 }
  0x24   : > { %v356_v37 = vmul.f32 %v355_v36, %v320_v3 }
  0x25   : > { %v357_v38 = vmul.f32 %v339_v35, %v339_v35 }
  0x27   : > { %v359_v39 = vrot.slane %v357_v38, 7  ;;  %1210 = vperm.xlu1 %1498, %v1152_v40   ;;  %1205 = vperm.xlu0 %1497, %v1151_v41  }
  0x28   : > { %1215 = vperm.xlu2 %1499, %v1153_v42  }
  0x29   : > { %v361_v43 = vsub.f32 %v356_v37, %v359_v39 }
  0x2b   : > { %v362_v44 = vmax.f32 %v361_v43, 0.0 }
  0x2d   : > { %v363_v45 = vadd.f32 1e-05, %v362_v44 }
  0x2f   : > { %1505 = vrsqrt.f32 %v363_v45  ;;  %1225 = vperm.xlu1 %1498, %v1155_v46   ;;  %1220 = vperm.xlu0 %1497, %v1154_v47   ;;  %vm370_vm8 = vweird.f32 %v363_v45 }
  0x30   : > { %1230 = vperm.xlu2 %1499, %v1156_v48  }
  0x35   : > { %v1506_v49 = vpop.eup %1505 }
  0x36   : > { %v365_v50 = vmul.f32 %v1506_v49, %v363_v45  ;;  %vm371_vm9 = vweird.f32 %v1506_v49 }
  0x37   : > { %1235 = vperm.xlu0 %1497, %v1157_v51   ;;  %vm372_vm10 = vmor %vm370_vm8, %vm371_vm9 }
  0x38   : > { %v366_v52 = vmul.f32 %v1506_v49, %v365_v50 }
  0x3a   : > { %v367_v53 = vmul.f32 0.5, %v366_v52 }
  0x3c   : > { %v368_v54 = vsub.f32 1.5, %v367_v53 }
  0x3e   : > { %v369_v55 = vmul.f32 %v1506_v49, %v368_v54 }
  0x40   : > { %v373_v56 = vsel %vm372_vm10, %v1506_v49, %v369_v55 }
  0x41   : > { %376 = vst [vmem:[#allocation1] sm:$0xff] %v373_v56 }
  0x48   : > { %v378_v58 = vld [vmem:[#allocation1 + $0x1] ss:$9 sm:$0xff] }
  0x49   : > { %v380_v59 = vmul.f32 %v378_v58, %v374_v57 }
  0x4b   : > { %v382_v0 = vmul.f32 %v380_v59, %v339_v35  ;;  %v1674_v1 = vperm.slane %v380_v59, 0 }
  0x4d   : > { %v383_v3 = vsub.f32 %v381_v60, %v382_v0  ;;  %v407_v4 = vmul.f32 %v1674_v1, %v388_v61  ;;  %v408_v5 = vmul.f32 %v1674_v1, %v389_v62  ;;  %v411_v6 = vmul.f32 %v1674_v1, %v392_v63  ;;  %v387_v63 = vld [vmem:[%s1666_s16 + $0x18] sm:$0xff] }
  0x4e   : > { %v405_v8 = vmul.f32 %v1674_v1, %v386_v2  ;;  %v403_v10 = vmul.f32 %v1674_v1, %v384_v7 }
  0x4f   : > { %v1682_v9 = vperm.slane %v383_v3, 0 }
  0x51   : > { %v1686_v11 = vadd.f32 %v1682_v9, %v407_v4  ;;  %v1689_v12 = vadd.f32 %v1682_v9, %v408_v5  ;;  %v1692_v13 = vadd.f32 %v1682_v9, %v411_v6  ;;  %v1695_v14 = vadd.f32 %v1682_v9, %v405_v8 }
  0x52   : > { %v1710_v19 = vadd.f32 %v1682_v9, %v403_v10 }
  0x53   : > { %v1698_v15 = vmul.f32 0.70710677, %v1686_v11  ;;  %v1701_v16 = vmul.f32 0.70710677, %v1689_v12  ;;  %v1704_v17 = vmul.f32 0.70710677, %v1692_v13 }
  0x54   : > { %v1707_v18 = vmul.f32 0.70710677, %v1695_v14  ;;  %v1729_v28 = vmul.f32 0.70710677, %v1710_v19 }
  0x55   : > { %v630_v20 = vmul.f32 %v1698_v15, %v1698_v15  ;;  %v670_v21 = vmul.f32 %v1701_v16, %v1701_v16  ;;  %v790_v22 = vmul.f32 %v1704_v17, %v1704_v17 }
  0x56   : > { %v550_v23 = vmul.f32 %v1707_v18, %v1707_v18 }
  0x57   : > { %v1720_v24 = vmin.f32 %v630_v20, 16.0  ;;  %v1722_v25 = vmin.f32 %v670_v21, 16.0  ;;  %v1724_v26 = vmin.f32 %v790_v22, 16.0 }
  0x58   : > { %v1726_v27 = vmin.f32 %v550_v23, 16.0 }
  0x59   : > { %v632_v29 = vmul.f32 2.1237322e-06, %v1720_v24  ;;  %v643_v30 = vmul.f32 3.8918573e-05, %v1720_v24  ;;  %v672_v31 = vmul.f32 2.1237322e-06, %v1722_v25 }
  0x5a   : > { %v683_v32 = vmul.f32 3.8918573e-05, %v1722_v25  ;;  %v792_v33 = vmul.f32 2.1237322e-06, %v1724_v26  ;;  %v803_v34 = vmul.f32 3.8918573e-05, %v1724_v26 }
  0x5b   : > { %v633_v35 = vadd.f32 0.00028619796, %v632_v29  ;;  %v644_v36 = vadd.f32 0.001143296, %v643_v30  ;;  %v673_v37 = vadd.f32 0.00028619796, %v672_v31  ;;  %v470_v31 = vmul.f32 %v1729_v28, %v1729_v28 }
  0x5c   : > { %v684_v38 = vadd.f32 0.001143296, %v683_v32  ;;  %v793_v39 = vadd.f32 0.00028619796, %v792_v33  ;;  %v804_v40 = vadd.f32 0.001143296, %v803_v34 }
  0x5d   : > { %v634_v41 = vmul.f32 %v633_v35, %v1720_v24  ;;  %v645_v42 = vmul.f32 %v644_v36, %v1720_v24  ;;  %v674_v43 = vmul.f32 %v673_v37, %v1722_v25  ;;  %v552_v44 = vmul.f32 2.1237322e-06, %v1726_v27 }
  0x5e   : > { %v685_v45 = vmul.f32 %v684_v38, %v1722_v25  ;;  %v794_v46 = vmul.f32 %v793_v39, %v1724_v26  ;;  %v805_v47 = vmul.f32 %v804_v40, %v1724_v26  ;;  %v563_v48 = vmul.f32 3.8918573e-05, %v1726_v27 }
  0x5f   : > { %v635_v49 = vadd.f32 0.0036580483, %v634_v41  ;;  %v646_v50 = vadd.f32 0.014752088, %v645_v42  ;;  %v675_v51 = vadd.f32 0.0036580483, %v674_v43  ;;  %v406_v35 = vmul.f32 %v1674_v1, %v387_v63 }
  0x60   : > { %v686_v52 = vadd.f32 0.014752088, %v685_v45  ;;  %v795_v53 = vadd.f32 0.0036580483, %v794_v46  ;;  %v806_v54 = vadd.f32 0.014752088, %v805_v47 }
  0x61   : > { %v636_v55 = vmul.f32 %v635_v49, %v1720_v24  ;;  %v647_v56 = vmul.f32 %v646_v50, %v1720_v24  ;;  %v676_v57 = vmul.f32 %v675_v51, %v1722_v25  ;;  %v553_v58 = vadd.f32 0.00028619796, %v552_v44  ;;  %v395_v47 = vld [vmem:[%s1666_s16 + $0x58] sm:$0xff] }
  0x62   : > { %v687_v59 = vmul.f32 %v686_v52, %v1722_v25  ;;  %v796_v60 = vmul.f32 %v795_v53, %v1724_v26  ;;  %v807_v61 = vmul.f32 %v806_v54, %v1724_v26  ;;  %v564_v62 = vadd.f32 0.001143296, %v563_v48 }
  0x63   : > { %v637_v0 = vadd.f32 0.05243302, %v636_v55  ;;  %v648_v2 = vadd.f32 0.112945676, %v647_v56  ;;  %v677_v3 = vadd.f32 0.05243302, %v676_v57  ;;  %v554_v4 = vmul.f32 %v553_v58, %v1726_v27 }
  0x64   : > { %v688_v5 = vadd.f32 0.112945676, %v687_v59  ;;  %v797_v6 = vadd.f32 0.05243302, %v796_v60  ;;  %v808_v7 = vadd.f32 0.112945676, %v807_v61  ;;  %v565_v8 = vmul.f32 %v564_v62, %v1726_v27 }
  0x65   : > { %v638_v10 = vmul.f32 %v637_v0, %v1720_v24  ;;  %v649_v20 = vmul.f32 %v648_v2, %v1720_v24  ;;  %v678_v21 = vmul.f32 %v677_v3, %v1722_v25  ;;  %v555_v22 = vadd.f32 0.0036580483, %v554_v4 }
  0x66   : > { %v689_v23 = vmul.f32 %v688_v5, %v1722_v25  ;;  %v798_v29 = vmul.f32 %v797_v6, %v1724_v26  ;;  %v809_v30 = vmul.f32 %v808_v7, %v1724_v26  ;;  %v566_v38 = vadd.f32 0.014752088, %v565_v8 }
  0x67   : > { %v639_v32 = vadd.f32 0.18741608, %v638_v10  ;;  %v650_v33 = vadd.f32 0.4994258, %v649_v20  ;;  %v679_v34 = vadd.f32 0.18741608, %v678_v21  ;;  %v556_v42 = vmul.f32 %v555_v22, %v1726_v27 }
  0x68   : > { %v690_v36 = vadd.f32 0.4994258, %v689_v23  ;;  %v799_v37 = vadd.f32 0.18741608, %v798_v29  ;;  %v1768_v43 = vmul.f32 0.5, %v1686_v11  ;;  %v1773_v50 = vmin.f32 %v470_v31, 16.0 }
  0x69   : > { %v640_v39 = vmul.f32 %v639_v32, %v1720_v24  ;;  %v651_v40 = vmul.f32 %v650_v33, %v1720_v24  ;;  %v680_v41 = vmul.f32 %v679_v34, %v1722_v25  ;;  %v810_v46 = vadd.f32 0.4994258, %v809_v30 }
  0x6a   : > { %v691_v44 = vmul.f32 %v690_v36, %v1722_v25  ;;  %v800_v45 = vmul.f32 %v799_v37, %v1724_v26  ;;  %v1776_v51 = vadd.f32 %v1682_v9, %v406_v35  ;;  %v567_v11 = vmul.f32 %v566_v38, %v1726_v27  ;;  %v1814_v31 = vpop.permute.xlu2 %1180 }
  0x6b   : > { %v641_v48 = vadd.f32 1.1283791, %v640_v39  ;;  %v652_v49 = vadd.f32 1.0, %v651_v40  ;;  %v681_v24 = vadd.f32 1.1283791, %v680_v41  ;;  %v811_v53 = vmul.f32 %v810_v46, %v1724_v26 }
  0x6c   : > { %v692_v52 = vadd.f32 1.0, %v691_v44  ;;  %v1781_v25 = vmul.f32 0.5, %v1689_v12  ;;  %v557_v54 = vadd.f32 0.05243302, %v556_v42  ;;  %v414_v55 = vmul.f32 %v1674_v1, %v395_v47 }
  0x6d   : > { %1507 = vrcp.f32 %v652_v49  ;;  %v662_v56 = vand.u32 2147483647, %v652_v49  ;;  %v664_v57 = vand.u32 2147483648, %v652_v49  ;;  %v801_v58 = vadd.f32 1.1283791, %v800_v45 }
  0x6e   : > { %1509 = vrcp.f32 %v692_v52  ;;  %v1785_v59 = vmul.f32 %v641_v48, %v1698_v15  ;;  %vm658_vm11 = vweird.f32 %v652_v49  ;;  %v702_v60 = vand.u32 2147483647, %v692_v52 }
  0x6f   : > { %v1788_v26 = vmul.f32 0.5, %v1692_v13  ;;  %v1791_v61 = vmul.f32 %v681_v24, %v1701_v16  ;;  %v704_v12 = vand.u32 2147483648, %v692_v52  ;;  %v1793_v62 = vadd.f32 1.0, %v811_v53 }
  0x70   : > { %v568_v63 = vadd.f32 0.112945676, %v567_v11  ;;  %vm698_vm12 = vweird.f32 %v692_v52  ;;  %v558_v0 = vmul.f32 %v557_v54, %v1726_v27  ;;  %v472_v2 = vmul.f32 2.1237322e-06, %v1773_v50 }
  0x71   : > { %v483_v15 = vmul.f32 3.8918573e-05, %v1773_v50  ;;  %vm1798_vm13 = vcmp.eq.f32.partialorder %v662_v56, 8.507059e+37  ;;  %v665_v13 = vor.u32 1.1754944e-38, %v664_v57  ;;  %v1803_v4 = vmul.f32 %v801_v58, %v1704_v17 }
  0x72   : > { %1511 = vrcp.f32 %v1793_v62  ;;  %vm1806_vm14 = vcmp.eq.f32.partialorder %v702_v60, 8.507059e+37  ;;  %v822_v6 = vand.u32 2147483647, %v1793_v62  ;;  %v569_v7 = vmul.f32 %v568_v63, %v1726_v27 }
  0x73   : > { %v1508_v16 = vpop.eup %1507  ;;  %v473_v8 = vadd.f32 0.00028619796, %v472_v2  ;;  %v484_v10 = vadd.f32 0.001143296, %v483_v15  ;;  %v705_v22 = vor.u32 1.1754944e-38, %v704_v12  ;;  %vm818_vm15 = vweird.f32 %v1793_v62 }
  0x74   : > { %v1510_v20 = vpop.eup %1509  ;;  %v654_v21 = vmul.f32 %v1508_v16, %v652_v49  ;;  %v824_v17 = vand.u32 2147483648, %v1793_v62  ;;  %vm659_vm0 = vweird.f32 %v1508_v16  ;;  %v559_v29 = vadd.f32 0.18741608, %v558_v0 }
  0x75   : > { %v694_v23 = vmul.f32 %v1510_v20, %v692_v52  ;;  %v570_v30 = vadd.f32 0.4994258, %v569_v7  ;;  %v474_v33 = vmul.f32 %v473_v8, %v1773_v50  ;;  %v485_v34 = vmul.f32 %v484_v10, %v1773_v50  ;;  %vm1831_vm3 = vmor %vm658_vm11, %vm659_vm0 }
  0x76   : > { %v655_v32 = vsub.f32 1.0, %v654_v21  ;;  %v1819_v35 = vadd.f32 %v1682_v9, %v414_v55  ;;  %vm699_vm1 = vweird.f32 %v1510_v20  ;;  %vm1821_vm2 = vcmp.eq.f32.partialorder %v822_v6, 8.507059e+37 }
  0x77   : > { %v695_v36 = vsub.f32 1.0, %v694_v23  ;;  %v571_v38 = vmul.f32 %v570_v30, %v1726_v27  ;;  %v475_v41 = vadd.f32 0.0036580483, %v474_v33  ;;  %v486_v42 = vadd.f32 0.014752088, %v485_v34  ;;  %vm1838_vm4 = vmor %vm698_vm12, %vm699_vm1 }
  0x78   : > { %v1512_v39 = vpop.eup %1511  ;;  %v656_v40 = vmul.f32 %v1508_v16, %v655_v32  ;;  %v1827_v44 = vmul.f32 0.70710677, %v1819_v35  ;;  %v825_v48 = vor.u32 1.1754944e-38, %v824_v17  ;;  %v560_v24 = vmul.f32 %v559_v29, %v1726_v27 }
  0x79   : > { %v696_v46 = vmul.f32 %v1510_v20, %v695_v36  ;;  %v814_v47 = vmul.f32 %v1512_v39, %v1793_v62  ;;  %v1842_v54 = vadd.f32 1.0, %v571_v38  ;;  %v476_v49 = vmul.f32 %v475_v41, %v1773_v50 }
  0x7a   : > { %v657_v53 = vadd.f32 %v1508_v16, %v656_v40  ;;  %v1846_v55 = vmul.f32 0.70710677, %v1776_v51  ;;  %vm819_vm5 = vweird.f32 %v1512_v39  ;;  %v487_v58 = vmul.f32 %v486_v42, %v1773_v50 }
  0x7b   : > { %v697_v56 = vadd.f32 %v1510_v20, %v696_v46  ;;  %v815_v57 = vsub.f32 1.0, %v814_v47  ;;  %1513 = vrcp.f32 %v1842_v54  ;;  %v582_v52 = vand.u32 2147483647, %v1842_v54  ;;  %vm1865_vm6 = vmor %vm818_vm15, %vm819_vm5 }
  0x7c   : > { %v661_v27 = vsel %vm1831_vm3, %v1508_v16, %v657_v53  ;;  %v910_v60 = vmul.f32 %v1827_v44, %v1827_v44  ;;  %v584_v2 = vand.u32 2147483648, %v1842_v54  ;;  %v561_v7 = vadd.f32 1.1283791, %v560_v24 }
  0x7d   : > { %v666_v12 = vsel %vm1798_vm13, %v665_v13, %v661_v27  ;;  %v701_v63 = vsel %vm1838_vm4, %v1510_v20, %v697_v56  ;;  %v816_v0 = vmul.f32 %v1512_v39, %v815_v57  ;;  %v477_v3 = vadd.f32 0.05243302, %v476_v49 }
  0x7e   : > { %v667_v15 = vmul.f32 %v666_v12, %v1785_v59  ;;  %v706_v16 = vsel %vm1806_vm14, %v705_v22, %v701_v63  ;;  %v488_v10 = vadd.f32 0.112945676, %v487_v58  ;;  %v590_v20 = vmul.f32 %v1846_v55, %v1846_v55  ;;  %v1186_v59 = vpop.permute.xlu2 %1185 }
  0x7f   : > { %v707_v13 = vmul.f32 %v706_v16, %v1791_v61  ;;  %v817_v8 = vadd.f32 %v1512_v39, %v816_v0  ;;  %vm578_vm7 = vweird.f32 %v1842_v54  ;;  %v478_v5 = vmul.f32 %v477_v3, %v1773_v50 }
  0x80   : > { %v1474_v21 = vclamps-f32 %v667_v15, 1.0  ;;  %v1874_v62 = vmin.f32 %v910_v60, 16.0  ;;  %vm1878_vm8 = vcmp.eq.f32.partialorder %v582_v52, 8.507059e+37  ;;  %v585_v61 = vor.u32 1.1754944e-38, %v584_v2 }
  0x81   : > { %v1475_v22 = vclamps-f32 %v707_v13, 1.0  ;;  %v821_v17 = vsel %vm1865_vm6, %v1512_v39, %v817_v8  ;;  %v489_v29 = vmul.f32 %v488_v10, %v1773_v50  ;;  %v1514_v30 = vpop.eup %1513  ;;  %v479_v34 = vadd.f32 0.18741608, %v478_v5 }
  0x82   : > { %v1114_v32 = vadd.f32 1.0, %v1474_v21  ;;  %v826_v33 = vsel %vm1821_vm2, %v825_v48, %v821_v17  ;;  %v912_v36 = vmul.f32 2.1237322e-06, %v1874_v62  ;;  %v574_v39 = vmul.f32 %v1514_v30, %v1842_v54 }
  0x83   : > { %v1115_v38 = vadd.f32 1.0, %v1475_v22  ;;  %v827_v40 = vmul.f32 %v826_v33, %v1803_v4  ;;  %vm579_vm9 = vweird.f32 %v1514_v30  ;;  %v480_v42 = vmul.f32 %v479_v34, %v1773_v50 }
  0x84   : > { %v1130_v41 = vmul.f32 %v1114_v32, %v1768_v43  ;;  %v490_v45 = vadd.f32 0.4994258, %v489_v29  ;;  %v913_v46 = vadd.f32 0.00028619796, %v912_v36  ;;  %v575_v48 = vsub.f32 1.0, %v574_v39  ;;  %v385_v43 = vld [vmem:[%s1666_s16 + $0x8] sm:$0xff]  ;;  %vm1914_vm10 = vmor %vm578_vm7, %vm579_vm9 }
  0x85   : > { %v1131_v37 = vmul.f32 %v1115_v38, %v1781_v25  ;;  %v1478_v47 = vclamps-f32 %v827_v40, 1.0  ;;  %v923_v24 = vmul.f32 3.8918573e-05, %v1874_v62  ;;  %v1897_v49 = vmin.f32 %v590_v20, 16.0 }
  0x86   : > { %v1893_v53 = vmul.f32 %v1814_v31, %v1130_v41  ;;  %v491_v4 = vmul.f32 %v490_v45, %v1773_v50  ;;  %v914_v11 = vmul.f32 %v913_v46, %v1874_v62  ;;  %v576_v57 = vmul.f32 %v1514_v30, %v575_v48  ;;  %v1201_v54 = vpop.permute.xlu2 %1200 }
  0x87   : > { %v1906_v25 = vmul.f32 %v1186_v59, %v1131_v37  ;;  %v1118_v56 = vadd.f32 1.0, %v1478_v47  ;;  %v481_v31 = vadd.f32 1.1283791, %v480_v42  ;;  %v562_v50 = vmul.f32 %v561_v7, %v1707_v18  ;;  %v398_v7 = vld [vmem:[%s1666_s16 + $0x70] sm:$0xff] }
  0x88   : > { %1258 = vst [vmem:[%s1904_s21 + $0x20] sm:$0xff] %v1893_v53  ;;  %v1918_v27 = vadd.f32 1.0, %v491_v4  ;;  %v915_v52 = vadd.f32 0.0036580483, %v914_v11  ;;  %v924_v60 = vadd.f32 0.001143296, %v923_v24  ;;  %v577_v63 = vadd.f32 %v1514_v30, %v576_v57  ;;  %v1171_v4 = vpop.permute.xlu1 %1170 }
  0x89   : > { %1259 = vst [vmem:[%s1904_s21 + $0x28] sm:$0xff] %v1906_v25  ;;  %v1134_v12 = vmul.f32 %v1118_v56, %v1788_v26  ;;  %v592_v18 = vmul.f32 2.1237322e-06, %v1897_v49  ;;  %v404_v0 = vmul.f32 %v1674_v1, %v385_v43  ;;  %v440_v2 = vmul.f32 0.5, %v1695_v14 }
  0x8a   : > { %1515 = vrcp.f32 %v1918_v27  ;;  %v581_v16 = vsel %vm1914_vm10, %v1514_v30, %v577_v63  ;;  %v916_v6 = vmul.f32 %v915_v52, %v1874_v62  ;;  %v925_v26 = vmul.f32 %v924_v60, %v1874_v62  ;;  %v391_v60 = vld [vmem:[%s1666_s16 + $0x38] sm:$0xff] }
  0x8b   : > { %v1927_v15 = vmul.f32 %v1201_v54, %v1134_v12  ;;  %v586_v3 = vsel %vm1878_vm8, %v585_v61, %v581_v16  ;;  %v1937_v13 = vmul.f32 %v481_v31, %v1729_v28  ;;  %v504_v14 = vand.u32 2147483648, %v1918_v27 }
  0x8c   : > { %v593_v8 = vadd.f32 0.00028619796, %v592_v18  ;;  %v587_v10 = vmul.f32 %v586_v3, %v562_v50  ;;  %v917_v20 = vadd.f32 0.05243302, %v916_v6  ;;  %v926_v21 = vadd.f32 0.014752088, %v925_v26 }
  0x8d   : > { %1262 = vst [vmem:[%s1904_s21 + $0x40] sm:$0xff] %v1927_v15  ;;  %v1943_v59 = vadd.f32 %v1682_v9, %v404_v0  ;;  %vm498_vm11 = vweird.f32 %v1918_v27  ;;  %v603_v22 = vmul.f32 3.8918573e-05, %v1897_v49  ;;  %v417_v28 = vmul.f32 %v1674_v1, %v398_v7 }
  0x8e   : > { %v594_v5 = vmul.f32 %v593_v8, %v1897_v49  ;;  %v1472_v17 = vclamps-f32 %v587_v10, 1.0  ;;  %v918_v23 = vmul.f32 %v917_v20, %v1874_v62  ;;  %v927_v61 = vmul.f32 %v926_v21, %v1874_v62 }
  0x8f   : > { %v1952_v29 = vmul.f32 0.70710677, %v1943_v59  ;;  %v502_v32 = vand.u32 2147483647, %v1918_v27  ;;  %v604_v34 = vadd.f32 0.001143296, %v603_v22  ;;  %v1956_v36 = vadd.f32 %v1682_v9, %v417_v28 }
  0x90   : > { %v1516_v30 = vpop.eup %1515  ;;  %v595_v33 = vadd.f32 0.0036580483, %v594_v5  ;;  %v1112_v38 = vadd.f32 1.0, %v1472_v17  ;;  %v505_v39 = vor.u32 1.1754944e-38, %v504_v14  ;;  %v919_v41 = vadd.f32 0.18741608, %v918_v23 }
  0x91   : > { %v494_v40 = vmul.f32 %v1516_v30, %v1918_v27  ;;  %v928_v42 = vadd.f32 0.112945676, %v927_v61  ;;  %v605_v46 = vmul.f32 %v604_v34, %v1897_v49  ;;  %v510_v37 = vmul.f32 %v1952_v29, %v1952_v29 }
  0x92   : > { %v596_v45 = vmul.f32 %v595_v33, %v1897_v49  ;;  %v1128_v47 = vmul.f32 %v1112_v38, %v440_v2  ;;  %vm499_vm12 = vweird.f32 %v1516_v30  ;;  %v1964_v24 = vmul.f32 0.70710677, %v1956_v36 }
  0x93   : > { %v495_v48 = vsub.f32 1.0, %v494_v40  ;;  %v929_v11 = vmul.f32 %v928_v42, %v1874_v62  ;;  %v606_v56 = vadd.f32 0.014752088, %v605_v46  ;;  %v1967_v57 = vmin.f32 %v510_v37, 16.0  ;;  %vm1977_vm13 = vmor %vm498_vm11, %vm499_vm12 }
  0x94   : > { %v597_v43 = vadd.f32 0.05243302, %v596_v45  ;;  %v1969_v31 = vmul.f32 %v1171_v4, %v1128_v47  ;;  %v920_v58 = vmul.f32 %v919_v41, %v1874_v62  ;;  %v1030_v52 = vmul.f32 %v1964_v24, %v1964_v24  ;;  %v1161_v47 = vpop.permute.xlu0 %1160 }
  0x95   : > { %v496_v50 = vmul.f32 %v1516_v30, %v495_v48  ;;  %v930_v63 = vadd.f32 0.4994258, %v929_v11  ;;  %v607_v0 = vmul.f32 %v606_v56, %v1897_v49  ;;  %v512_v54 = vmul.f32 2.1237322e-06, %v1967_v57 }
  0x96   : > { %v598_v18 = vmul.f32 %v597_v43, %v1897_v49  ;;  %1256 = vst [vmem:[%s1904_s21 + $0x10] sm:$0xff] %v1969_v31  ;;  %vm503_vm14 = vcmp.eq.f32.partialorder %v502_v32, 8.507059e+37  ;;  %v523_v16 = vmul.f32 3.8918573e-05, %v1967_v57  ;;  %v1987_v6 = vmin.f32 %v1030_v52, 16.0 }
  0x97   : > { %v497_v2 = vadd.f32 %v1516_v30, %v496_v50  ;;  %v931_v27 = vmul.f32 %v930_v63, %v1874_v62  ;;  %v608_v26 = vadd.f32 0.112945676, %v607_v0  ;;  %v513_v7 = vadd.f32 0.00028619796, %v512_v54 }
  0x98   : > { %v410_v3 = vmul.f32 %v1674_v1, %v391_v60  ;;  %v921_v8 = vadd.f32 1.1283791, %v920_v58  ;;  %v524_v10 = vadd.f32 0.001143296, %v523_v16  ;;  %v1032_v20 = vmul.f32 2.1237322e-06, %v1987_v6 }
  0x99   : > { %v501_v14 = vsel %vm1977_vm13, %v1516_v30, %v497_v2  ;;  %v932_v5 = vadd.f32 1.0, %v931_v27  ;;  %v599_v22 = vadd.f32 0.18741608, %v598_v18  ;;  %v609_v28 = vmul.f32 %v608_v26, %v1897_v49 }
  0x9a   : > { %v506_v21 = vsel %vm503_vm14, %v505_v39, %v501_v14  ;;  %v514_v62 = vmul.f32 %v513_v7, %v1967_v57  ;;  %v525_v23 = vmul.f32 %v524_v10, %v1967_v57  ;;  %v1033_v61 = vadd.f32 0.00028619796, %v1032_v20 }
  0x9b   : > { %v507_v17 = vmul.f32 %v506_v21, %v1937_v13  ;;  %1517 = vrcp.f32 %v932_v5  ;;  %v1043_v32 = vmul.f32 3.8918573e-05, %v1987_v6  ;;  %v2000_v30 = vadd.f32 %v1682_v9, %v410_v3  ;;  %v390_v3 = vld [vmem:[%s1666_s16 + $0x30] sm:$0xff] }
  0x9c   : > { %v438_v33 = vmul.f32 0.5, %v1710_v19  ;;  %v610_v38 = vadd.f32 0.4994258, %v609_v28  ;;  %v1034_v40 = vmul.f32 %v1033_v61, %v1987_v6  ;;  %v2005_v39 = vmul.f32 0.5, %v1819_v35 }
  0x9d   : > { %v1470_v34 = vclamps-f32 %v507_v17, 1.0  ;;  %v2008_v13 = vmul.f32 %v921_v8, %v1827_v44  ;;  %v2011_v41 = vmul.f32 0.5, %v1776_v51  ;;  %v515_v42 = vadd.f32 0.0036580483, %v514_v62  ;;  %v2022_v51 = vld [vmem:[%s2436_s5] ss:$0 sm:$0xff] }
  0x9e   : > { %v600_v46 = vmul.f32 %v599_v22, %v1897_v49  ;;  %v611_v37 = vmul.f32 %v610_v38, %v1897_v49  ;;  %v526_v19 = vadd.f32 0.014752088, %v525_v23  ;;  %v1035_v4 = vadd.f32 0.0036580483, %v1034_v40 }
  0x9f   : > { %v1110_v45 = vadd.f32 1.0, %v1470_v34  ;;  %v516_v48 = vmul.f32 %v515_v42, %v1967_v57  ;;  %v1044_v11 = vadd.f32 0.001143296, %v1043_v32  ;;  %v2017_v35 = vmul.f32 0.70710677, %v2000_v30 }
  0xa0   : > { %v942_v43 = vand.u32 2147483647, %v932_v5  ;;  %v2024_v56 = vadd.f32 1.0, %v611_v37  ;;  %v527_v49 = vmul.f32 %v526_v19, %v1967_v57  ;;  %v944_v58 = vand.u32 2147483648, %v932_v5 }
  0xa1   : > { %v1126_v44 = vmul.f32 %v1110_v45, %v438_v33  ;;  %v1518_v50 = vpop.eup %1517  ;;  %v517_v52 = vadd.f32 0.05243302, %v516_v48  ;;  %v1036_v60 = vmul.f32 %v1035_v4, %v1987_v6  ;;  %v1045_v12 = vmul.f32 %v1044_v11, %v1987_v6 }
  0xa2   : > { %v934_v18 = vmul.f32 %v1518_v50, %v932_v5  ;;  %vm938_vm15 = vweird.f32 %v932_v5  ;;  %1519 = vrcp.f32 %v2024_v56  ;;  %vm939_vm0 = vweird.f32 %v1518_v50 }
  0xa3   : > { %v1238_v63 = vmul.f32 %v1161_v47, %v1126_v44  ;;  %v601_v0 = vadd.f32 1.1283791, %v600_v46  ;;  %v518_v54 = vmul.f32 %v517_v52, %v1967_v57  ;;  %v750_v2 = vmul.f32 %v2017_v35, %v2017_v35  ;;  %vm2047_vm2 = vmor %vm938_vm15, %vm939_vm0 }
  0xa4   : > { %v935_v27 = vsub.f32 1.0, %v934_v18  ;;  %v528_v26 = vadd.f32 0.112945676, %v527_v49  ;;  %v1037_v7 = vadd.f32 0.05243302, %v1036_v60  ;;  %vm2036_vm1 = vcmp.eq.f32.partialorder %v942_v43, 8.507059e+37 }
  0xa5   : > { %1254 = vst [vmem:[%s1904_s21] sm:$0xff] %v1238_v63  ;;  %v1274_v16 = vmul.f32 %v2022_v51, %v1238_v63  ;;  %v945_v8 = vor.u32 1.1754944e-38, %v944_v58  ;;  %v519_v10 = vadd.f32 0.18741608, %v518_v54  ;;  %v1046_v20 = vadd.f32 0.014752088, %v1045_v12  ;;  %v394_v58 = vld [vmem:[%s1666_s16 + $0x50] sm:$0xff] }
  0xa6   : > { %v936_v21 = vmul.f32 %v1518_v50, %v935_v27  ;;  %v2041_v22 = vmul.f32 0.5, %v1943_v59  ;;  %v529_v28 = vmul.f32 %v528_v26, %v1967_v57  ;;  %v1038_v17 = vmul.f32 %v1037_v7, %v1987_v6 }
  0xa7   : > { %1290 = vadd.xlane.f32.xlu1 %v1274_v16  ;;  %vm618_vm3 = vweird.f32 %v2024_v56  ;;  %v622_v23 = vand.u32 2147483647, %v2024_v56  ;;  %v2053_v61 = vmin.f32 %v750_v2, 16.0  ;;  %v409_v32 = vmul.f32 %v1674_v1, %v390_v3 }
  0xa8   : > { %v1520_v59 = vpop.eup %1519  ;;  %v937_v33 = vadd.f32 %v1518_v50, %v936_v21  ;;  %v520_v34 = vmul.f32 %v519_v10, %v1967_v57  ;;  %v530_v38 = vadd.f32 0.4994258, %v529_v28  ;;  %v1047_v40 = vmul.f32 %v1046_v20, %v1987_v6 }
  0xa9   : > { %v614_v5 = vmul.f32 %v1520_v59, %v2024_v56  ;;  %v1276_v42 = vmul.f32 %v2022_v51, %v1969_v31  ;;  %v1039_v45 = vadd.f32 0.18741608, %v1038_v17  ;;  %v752_v46 = vmul.f32 2.1237322e-06, %v2053_v61 }
  0xaa   : > { %v941_v37 = vsel %vm2047_vm2, %v1518_v50, %v937_v33  ;;  %v624_v19 = vand.u32 2147483648, %v2024_v56  ;;  %v531_v47 = vmul.f32 %v530_v38, %v1967_v57  ;;  %v1278_v48 = vmul.f32 %v2022_v51, %v1893_v53 }
  0xab   : > { %v946_v4 = vsel %vm2036_vm1, %v945_v8, %v941_v37  ;;  %v615_v11 = vsub.f32 1.0, %v614_v5  ;;  %vm619_vm4 = vweird.f32 %v1520_v59  ;;  %1294 = vadd.xlane.f32.xlu0 %v1276_v42  ;;  %v2071_v31 = vadd.f32 %v1682_v9, %v409_v32  ;;  %v393_v42 = vld [vmem:[%s1666_s16 + $0x48] sm:$0xff] }
  0xac   : > { %v947_v44 = vmul.f32 %v946_v4, %v2008_v13  ;;  %v521_v43 = vadd.f32 1.1283791, %v520_v34  ;;  %v2074_v49 = vadd.f32 1.0, %v531_v47  ;;  %v1048_v50 = vadd.f32 0.112945676, %v1047_v40  ;;  %vm2082_vm5 = vmor %vm618_vm3, %vm619_vm4 }
  0xad   : > { %v616_v57 = vmul.f32 %v1520_v59, %v615_v11  ;;  %v1040_v52 = vmul.f32 %v1039_v45, %v1987_v6  ;;  %v753_v53 = vadd.f32 0.00028619796, %v752_v46  ;;  %v763_v60 = vmul.f32 3.8918573e-05, %v2053_v61 }
  0xae   : > { %v1481_v12 = vclamps-f32 %v947_v44, 1.0  ;;  %v602_v63 = vmul.f32 %v601_v0, %v1846_v55  ;;  %v625_v13 = vor.u32 1.1754944e-38, %v624_v19  ;;  %1521 = vrcp.f32 %v2074_v49 }
  0xaf   : > { %1298 = vadd.xlane.f32.xlu1 %v1278_v48  ;;  %v617_v54 = vadd.f32 %v1520_v59, %v616_v57  ;;  %vm623_vm6 = vcmp.eq.f32.partialorder %v622_v23, 8.507059e+37  ;;  %v1049_v2 = vmul.f32 %v1048_v50, %v1987_v6  ;;  %v413_v16 = vmul.f32 %v1674_v1, %v394_v58  ;;  %v1176_v48 = vpop.permute.xlu1 %1175 }
  0xb0   : > { %v1121_v27 = vadd.f32 1.0, %v1481_v12  ;;  %v2090_v26 = vmul.f32 %v521_v43, %v1952_v29  ;;  %v754_v55 = vmul.f32 %v753_v53, %v2053_v61  ;;  %v764_v56 = vadd.f32 0.001143296, %v763_v60  ;;  %v1216_v29 = vpop.permute.xlu2 %1215 }
  0xb1   : > { %v621_v0 = vsel %vm2082_vm5, %v1520_v59, %v617_v54  ;;  %v1041_v7 = vadd.f32 1.1283791, %v1040_v52  ;;  %v1050_v3 = vadd.f32 0.4994258, %v1049_v2  ;;  %v2096_v14 = vmul.f32 0.70710677, %v2071_v31 }
  0xb2   : > { %v1137_v8 = vmul.f32 %v1121_v27, %v2005_v39  ;;  %v626_v10 = vsel %vm623_vm6, %v625_v13, %v621_v0  ;;  %v755_v20 = vadd.f32 0.0036580483, %v754_v55  ;;  %v765_v21 = vmul.f32 %v764_v56, %v2053_v61 }
  0xb3   : > { %v627_v28 = vmul.f32 %v626_v10, %v602_v63  ;;  %vm538_vm7 = vweird.f32 %v2074_v49  ;;  %v1051_v17 = vmul.f32 %v1050_v3, %v1987_v6  ;;  %v710_v62 = vmul.f32 %v2096_v14, %v2096_v14 }
  0xb4   : > { %v1522_v23 = vpop.eup %1521  ;;  %v2104_v32 = vmul.f32 %v1216_v29, %v1137_v8  ;;  %v756_v39 = vmul.f32 %v755_v20, %v2053_v61  ;;  %v766_v59 = vadd.f32 0.014752088, %v765_v21  ;;  %v2108_v33 = vadd.f32 %v1682_v9, %v413_v16 }
  0xb5   : > { %v1473_v34 = vclamps-f32 %v627_v28, 1.0  ;;  %v534_v38 = vmul.f32 %v1522_v23, %v2074_v49  ;;  %v542_v40 = vand.u32 2147483647, %v2074_v49  ;;  %v1052_v5 = vadd.f32 1.0, %v1051_v17 }
  0xb6   : > { %1265 = vst [vmem:[%s1904_s21 + $0x58] sm:$0xff] %v2104_v32  ;;  %vm539_vm8 = vweird.f32 %v1522_v23  ;;  %v544_v6 = vand.u32 2147483648, %v2074_v49  ;;  %v757_v45 = vadd.f32 0.05243302, %v756_v39  ;;  %v767_v46 = vmul.f32 %v766_v59, %v2053_v61 }
  0xb7   : > { %v1113_v37 = vadd.f32 1.0, %v1473_v34  ;;  %v535_v19 = vsub.f32 1.0, %v534_v38  ;;  %1523 = vrcp.f32 %v1052_v5  ;;  %v2117_v47 = vmin.f32 %v710_v62, 16.0  ;;  %vm2132_vm9 = vmor %vm538_vm7, %vm539_vm8 }
  0xb8   : > { %v758_v4 = vmul.f32 %v757_v45, %v2053_v61  ;;  %v768_v11 = vadd.f32 0.112945676, %v767_v46  ;;  %v2121_v44 = vmul.f32 0.70710677, %v2108_v33  ;;  %v412_v43 = vmul.f32 %v1674_v1, %v393_v42  ;;  %v397_v45 = vld [vmem:[%s1666_s16 + $0x68] sm:$0xff] }
  0xb9   : > { %v1129_v50 = vmul.f32 %v1113_v37, %v2011_v41  ;;  %v536_v58 = vmul.f32 %v1522_v23, %v535_v19  ;;  %v2126_v57 = vmul.f32 %v1041_v7, %v1964_v24  ;;  %v712_v52 = vmul.f32 2.1237322e-06, %v2117_v47 }
  0xba   : > { %vm2136_vm10 = vcmp.eq.f32.partialorder %v542_v40, 8.507059e+37  ;;  %v545_v12 = vor.u32 1.1754944e-38, %v544_v6  ;;  %v759_v41 = vadd.f32 0.18741608, %v758_v4  ;;  %v769_v63 = vmul.f32 %v768_v11, %v2053_v61  ;;  %v1166_v4 = vpop.permute.xlu0 %1165 }
  0xbb   : > { %v2141_v24 = vmul.f32 %v1176_v48, %v1129_v50  ;;  %v537_v18 = vadd.f32 %v1522_v23, %v536_v58  ;;  %v713_v13 = vadd.f32 0.00028619796, %v712_v52  ;;  %v723_v54 = vmul.f32 3.8918573e-05, %v2117_v47 }
  0xbc   : > { %vm1058_vm11 = vweird.f32 %v1052_v5  ;;  %v770_v49 = vadd.f32 0.4994258, %v769_v63  ;;  %v870_v2 = vmul.f32 %v2121_v44, %v2121_v44  ;;  %v2147_v16 = vadd.f32 %v1682_v9, %v412_v43 }
  0xbd   : > { %v1524_v27 = vpop.eup %1523  ;;  %1257 = vst [vmem:[%s1904_s21 + $0x18] sm:$0xff] %v2141_v24  ;;  %v541_v55 = vsel %vm2132_vm9, %v1522_v23, %v537_v18  ;;  %v1062_v56 = vand.u32 2147483647, %v1052_v5  ;;  %v714_v0 = vmul.f32 %v713_v13, %v2117_v47  ;;  %v724_v7 = vadd.f32 0.001143296, %v723_v54 }
  0xbe   : > { %v546_v3 = vsel %vm2136_vm10, %v545_v12, %v541_v55  ;;  %v1054_v8 = vmul.f32 %v1524_v27, %v1052_v5  ;;  %v1064_v10 = vand.u32 2147483648, %v1052_v5  ;;  %v760_v20 = vmul.f32 %v759_v41, %v2053_v61 }
  0xbf   : > { %v547_v21 = vmul.f32 %v546_v3, %v2090_v26  ;;  %v771_v29 = vmul.f32 %v770_v49, %v2053_v61  ;;  %v715_v28 = vadd.f32 0.0036580483, %v714_v0  ;;  %v725_v17 = vmul.f32 %v724_v7, %v2117_v47 }
  0xc0   : > { %v1055_v62 = vsub.f32 1.0, %v1054_v8  ;;  %vm1059_vm12 = vweird.f32 %v1524_v27  ;;  %v2160_v23 = vmin.f32 %v870_v2, 16.0  ;;  %v2163_v39 = vmul.f32 0.70710677, %v2147_v16 }
  0xc1   : > { %v1471_v59 = vclamps-f32 %v547_v21, 1.0  ;;  %v772_v34 = vadd.f32 1.0, %v771_v29  ;;  %v716_v38 = vmul.f32 %v715_v28, %v2117_v47  ;;  %v726_v40 = vadd.f32 0.014752088, %v725_v17  ;;  %vm2173_vm14 = vmor %vm1058_vm11, %vm1059_vm12 }
  0xc2   : > { %v1056_v42 = vmul.f32 %v1524_v27, %v1055_v62  ;;  %vm2166_vm13 = vcmp.eq.f32.partialorder %v1062_v56, 8.507059e+37  ;;  %v761_v61 = vadd.f32 1.1283791, %v760_v20  ;;  %v872_v6 = vmul.f32 2.1237322e-06, %v2160_v23 }
  0xc3   : > { %v1111_v46 = vadd.f32 1.0, %v1471_v59  ;;  %v1065_v19 = vor.u32 1.1754944e-38, %v1064_v10  ;;  %1525 = vrcp.f32 %v772_v34  ;;  %v883_v48 = vmul.f32 3.8918573e-05, %v2160_v23 }
  0xc4   : > { %v1057_v11 = vadd.f32 %v1524_v27, %v1056_v42  ;;  %v717_v43 = vadd.f32 0.05243302, %v716_v38  ;;  %v727_v50 = vmul.f32 %v726_v40, %v2117_v47  ;;  %v830_v58 = vmul.f32 %v2163_v39, %v2163_v39  ;;  %v1231_v38 = vpop.permute.xlu2 %1230 }
  0xc5   : > { %v1127_v52 = vmul.f32 %v1111_v46, %v2041_v22  ;;  %v452_v5 = vmul.f32 0.5, %v1956_v36  ;;  %v873_v53 = vadd.f32 0.00028619796, %v872_v6  ;;  %v416_v60 = vmul.f32 %v1674_v1, %v397_v45 }
  0xc6   : > { %v1061_v12 = vsel %vm2173_vm14, %v1524_v27, %v1057_v11  ;;  %v2187_v41 = vmul.f32 %v761_v61, %v2017_v35  ;;  %v718_v63 = vmul.f32 %v717_v43, %v2117_v47  ;;  %v728_v18 = vadd.f32 0.112945676, %v727_v50 }
  0xc7   : > { %v1239_v13 = vmul.f32 %v1166_v4, %v1127_v52  ;;  %v1066_v54 = vsel %vm2166_vm13, %v1065_v19, %v1061_v12  ;;  %v874_v22 = vmul.f32 %v873_v53, %v2160_v23  ;;  %v884_v36 = vadd.f32 0.001143296, %v883_v48 }
  0xc8   : > { %v1067_v49 = vmul.f32 %v1066_v54, %v2126_v57  ;;  %vm778_vm15 = vweird.f32 %v772_v34  ;;  %v729_v2 = vmul.f32 %v728_v18, %v2117_v47  ;;  %v2195_v55 = vmin.f32 %v830_v58, 16.0 }
  0xc9   : > { %v1526_v27 = vpop.eup %1525  ;;  %1255 = vst [vmem:[%s1904_s21 + $0x8] sm:$0xff] %v1239_v13  ;;  %v1275_v35 = vmul.f32 %v2022_v51, %v1239_v13  ;;  %v782_v56 = vand.u32 2147483647, %v772_v34  ;;  %v875_v0 = vadd.f32 0.0036580483, %v874_v22  ;;  %v885_v7 = vmul.f32 %v884_v36, %v2160_v23 }
  0xca   : > { %v1484_v3 = vclamps-f32 %v1067_v49, 1.0  ;;  %v774_v8 = vmul.f32 %v1526_v27, %v772_v34  ;;  %v784_v10 = vand.u32 2147483648, %v772_v34  ;;  %v719_v20 = vadd.f32 0.18741608, %v718_v63 }
  0xcb   : > { %1292 = vadd.xlane.f32.xlu2 %v1275_v35  ;;  %v730_v21 = vadd.f32 0.4994258, %v729_v2  ;;  %v876_v57 = vmul.f32 %v875_v0, %v2160_v23  ;;  %v886_v29 = vadd.f32 0.014752088, %v885_v7  ;;  %v832_v28 = vmul.f32 2.1237322e-06, %v2195_v55 }
  0xcc   : > { %v1124_v17 = vadd.f32 1.0, %v1484_v3  ;;  %v775_v62 = vsub.f32 1.0, %v774_v8  ;;  %vm779_vm0 = vweird.f32 %v1526_v27  ;;  %v843_v59 = vmul.f32 3.8918573e-05, %v2195_v55 }
  0xcd   : > { %v731_v40 = vmul.f32 %v730_v21, %v2117_v47  ;;  %v877_v42 = vadd.f32 0.05243302, %v876_v57  ;;  %v887_v26 = vmul.f32 %v886_v29, %v2160_v23  ;;  %v833_v61 = vadd.f32 0.00028619796, %v832_v28  ;;  %vm2210_vm2 = vmor %vm778_vm15, %vm779_vm0 }
  0xce   : > { %v1140_v6 = vmul.f32 %v1124_v17, %v452_v5  ;;  %v776_v45 = vmul.f32 %v1526_v27, %v775_v62  ;;  %vm2205_vm1 = vcmp.eq.f32.partialorder %v782_v56, 8.507059e+37  ;;  %v785_v37 = vor.u32 1.1754944e-38, %v784_v10  ;;  %v399_v62 = vld [vmem:[%s1666_s16 + $0x78] sm:$0xff] }
  0xcf   : > { %v720_v48 = vmul.f32 %v719_v20, %v2117_v47  ;;  %v2215_v4 = vadd.f32 1.0, %v731_v40  ;;  %v888_v11 = vadd.f32 0.112945676, %v887_v26  ;;  %v834_v43 = vmul.f32 %v833_v61, %v2195_v55 }
  0xd0   : > { %v2218_v50 = vmul.f32 %v1231_v38, %v1140_v6  ;;  %v777_v58 = vadd.f32 %v1526_v27, %v776_v45  ;;  %v878_v52 = vmul.f32 %v877_v42, %v2160_v23  ;;  %v844_v5 = vadd.f32 0.001143296, %v843_v59  ;;  %v1196_v59 = vpop.permute.xlu1 %1195 }
  0xd1   : > { %v445_v34 = vmul.f32 0.5, %v2000_v30  ;;  %1527 = vrcp.f32 %v2215_v4  ;;  %v1277_v53 = vmul.f32 %v2022_v51, %v2141_v24  ;;  %v2226_v47 = vadd.f32 %v1682_v9, %v416_v60  ;;  %v396_v30 = vld [vmem:[%s1666_s16 + $0x60] sm:$0xff] }
  0xd2   : > { %1268 = vst [vmem:[%s1904_s21 + $0x70] sm:$0xff] %v2218_v50  ;;  %v781_v12 = vsel %vm2210_vm2, %v1526_v27, %v777_v58  ;;  %v2233_v63 = vmul.f32 0.5, %v2071_v31  ;;  %v889_v18 = vmul.f32 %v888_v11, %v2160_v23  ;;  %v835_v13 = vadd.f32 0.0036580483, %v834_v43 }
  0xd3   : > { %v786_v54 = vsel %vm2205_vm1, %v785_v37, %v781_v12  ;;  %v721_v22 = vadd.f32 1.1283791, %v720_v48  ;;  %v742_v24 = vand.u32 2147483647, %v2215_v4  ;;  %1296 = vadd.xlane.f32.xlu2 %v1277_v53  ;;  %v845_v60 = vmul.f32 %v844_v5, %v2195_v55 }
  0xd4   : > { %v787_v36 = vmul.f32 %v786_v54, %v2187_v41  ;;  %v879_v49 = vadd.f32 0.18741608, %v878_v52  ;;  %v890_v2 = vadd.f32 0.4994258, %v889_v18  ;;  %v836_v31 = vmul.f32 %v835_v13, %v2195_v55 }
  0xd5   : > { %v2244_v27 = vmul.f32 0.5, %v2108_v33  ;;  %v846_v35 = vadd.f32 0.014752088, %v845_v60  ;;  %v2247_v56 = vmul.f32 0.70710677, %v2226_v47  ;;  %v415_v0 = vmul.f32 %v1674_v1, %v396_v30 }
  0xd6   : > { %v1477_v7 = vclamps-f32 %v787_v36, 1.0  ;;  %vm738_vm3 = vweird.f32 %v2215_v4  ;;  %v891_v3 = vmul.f32 %v890_v2, %v2160_v23  ;;  %v837_v41 = vadd.f32 0.05243302, %v836_v31 }
  0xd7   : > { %v1528_v8 = vpop.eup %1527  ;;  %v744_v10 = vand.u32 2147483648, %v2215_v4  ;;  %v847_v20 = vmul.f32 %v846_v35, %v2195_v55  ;;  %v990_v33 = vmul.f32 %v2247_v56, %v2247_v56  ;;  %v2257_v21 = vadd.f32 %v1682_v9, %v415_v0 }
  0xd8   : > { %v1117_v57 = vadd.f32 1.0, %v1477_v7  ;;  %v734_v29 = vmul.f32 %v1528_v8, %v2215_v4  ;;  %vm2260_vm4 = vcmp.eq.f32.partialorder %v742_v24, 8.507059e+37  ;;  %v880_v17 = vmul.f32 %v879_v49, %v2160_v23 }
  0xd9   : > { %v892_v38 = vadd.f32 1.0, %v891_v3  ;;  %v838_v40 = vmul.f32 %v837_v41, %v2195_v55  ;;  %v848_v42 = vadd.f32 0.112945676, %v847_v20  ;;  %v1279_v26 = vmul.f32 %v2022_v51, %v1906_v25 }
  0xda   : > { %v1133_v61 = vmul.f32 %v1117_v57, %v445_v34  ;;  %v735_v6 = vsub.f32 1.0, %v734_v29  ;;  %vm739_vm5 = vweird.f32 %v1528_v8  ;;  %v2269_v45 = vmin.f32 %v990_v33, 16.0 }
  0xdb   : > { %v745_v46 = vor.u32 1.1754944e-38, %v744_v10  ;;  %1529 = vrcp.f32 %v892_v38  ;;  %1300 = vadd.xlane.f32.xlu2 %v1279_v26  ;;  %v2272_v23 = vmul.f32 0.70710677, %v2257_v21  ;;  %v418_v37 = vmul.f32 %v1674_v1, %v399_v62  ;;  %vm2279_vm6 = vmor %vm738_vm3, %vm739_vm5 }
  0xdc   : > { %v1245_v19 = vmul.f32 %v1196_v59, %v1133_v61  ;;  %v736_v48 = vmul.f32 %v1528_v8, %v735_v6  ;;  %v839_v11 = vadd.f32 0.18741608, %v838_v40  ;;  %v849_v43 = vmul.f32 %v848_v42, %v2195_v55  ;;  %v1191_v42 = vpop.permute.xlu0 %1190 }
  0xdd   : > { %v722_v25 = vmul.f32 %v721_v22, %v2096_v14  ;;  %v881_v52 = vadd.f32 1.1283791, %v880_v17  ;;  %v992_v5 = vmul.f32 2.1237322e-06, %v2269_v45  ;;  %v1003_v34 = vmul.f32 3.8918573e-05, %v2269_v45 }
  0xde   : > { %1261 = vst [vmem:[%s1904_s21 + $0x38] sm:$0xff] %v1245_v19  ;;  %v737_v1 = vadd.f32 %v1528_v8, %v736_v48  ;;  %v1281_v53 = vmul.f32 %v2022_v51, %v1245_v19  ;;  %v840_v12 = vmul.f32 %v839_v11, %v2195_v55  ;;  %v850_v18 = vadd.f32 0.4994258, %v849_v43 }
  0xdf   : > { %v993_v13 = vadd.f32 0.00028619796, %v992_v5  ;;  %v1004_v14 = vadd.f32 0.001143296, %v1003_v34  ;;  %v950_v4 = vmul.f32 %v2272_v23, %v2272_v23  ;;  %v2291_v30 = vadd.f32 %v1682_v9, %v418_v37 }
  0xe0   : > { %v741_v54 = vsel %vm2279_vm6, %v1528_v8, %v737_v1  ;;  %1304 = vadd.xlane.f32.xlu1 %v1281_v53  ;;  %v902_v22 = vand.u32 2147483647, %v892_v38  ;;  %v904_v24 = vand.u32 2147483648, %v892_v38  ;;  %v851_v60 = vmul.f32 %v850_v18, %v2195_v55 }
  0xe1   : > { %v1530_v36 = vpop.eup %1529  ;;  %v746_v49 = vsel %vm2260_vm4, %v745_v46, %v741_v54  ;;  %v994_v2 = vmul.f32 %v993_v13, %v2269_v45  ;;  %v1005_v31 = vmul.f32 %v1004_v14, %v2269_v45  ;;  %v2300_v35 = vmin.f32 %v950_v4, 16.0 }
  0xe2   : > { %v747_v9 = vmul.f32 %v746_v49, %v722_v25  ;;  %v894_v0 = vmul.f32 %v1530_v36, %v892_v38  ;;  %vm898_vm7 = vweird.f32 %v892_v38  ;;  %v841_v7 = vadd.f32 1.1283791, %v840_v12 }
  0xe3   : > { %vm899_vm8 = vweird.f32 %v1530_v36  ;;  %v852_v3 = vadd.f32 1.0, %v851_v60  ;;  %v995_v41 = vadd.f32 0.0036580483, %v994_v2  ;;  %v1006_v8 = vadd.f32 0.014752088, %v1005_v31 }
  0xe4   : > { %v1476_v10 = vclamps-f32 %v747_v9, 1.0  ;;  %v895_v55 = vsub.f32 1.0, %v894_v0  ;;  %v952_v20 = vmul.f32 2.1237322e-06, %v2300_v35  ;;  %v963_v33 = vmul.f32 3.8918573e-05, %v2300_v35  ;;  %vm2313_vm10 = vmor %vm898_vm7, %vm899_vm8 }
  0xe5   : > { %v882_v57 = vmul.f32 %v881_v52, %v2121_v44  ;;  %vm2305_vm9 = vcmp.eq.f32.partialorder %v902_v22, 8.507059e+37  ;;  %v905_v28 = vor.u32 1.1754944e-38, %v904_v24  ;;  %1531 = vrcp.f32 %v852_v3 }
  0xe6   : > { %v1116_v17 = vadd.f32 1.0, %v1476_v10  ;;  %v896_v62 = vmul.f32 %v1530_v36, %v895_v55  ;;  %v996_v59 = vmul.f32 %v995_v41, %v2269_v45  ;;  %v1007_v40 = vmul.f32 %v1006_v8, %v2269_v45  ;;  %v1211_v55 = vpop.permute.xlu1 %1210 }
  0xe7   : > { %v2318_v44 = vmul.f32 %v841_v7, %v2163_v39  ;;  %v953_v61 = vadd.f32 0.00028619796, %v952_v20  ;;  %v964_v6 = vadd.f32 0.001143296, %v963_v33  ;;  %v2321_v46 = vmul.f32 0.70710677, %v2291_v30 }
  0xe8   : > { %v1132_v37 = vmul.f32 %v1116_v17, %v2233_v63  ;;  %v897_v19 = vadd.f32 %v1530_v36, %v896_v62  ;;  %v862_v48 = vand.u32 2147483647, %v852_v3  ;;  %v1008_v11 = vadd.f32 0.112945676, %v1007_v40 }
  0xe9   : > { %v997_v43 = vadd.f32 0.05243302, %v996_v59  ;;  %v954_v38 = vmul.f32 %v953_v61, %v2300_v35  ;;  %v965_v25 = vmul.f32 %v964_v6, %v2300_v35  ;;  %v1282_v39 = vmul.f32 %v2022_v51, %v1927_v15 }
  0xea   : > { %v1244_v58 = vmul.f32 %v1191_v42, %v1132_v37  ;;  %v901_v52 = vsel %vm2313_vm10, %v1530_v36, %v897_v19  ;;  %v864_v5 = vand.u32 2147483648, %v852_v3  ;;  %v1009_v34 = vmul.f32 %v1008_v11, %v2269_v45 }
  0xeb   : > { %v1532_v63 = vpop.eup %1531  ;;  %v906_v1 = vsel %vm2305_vm9, %v905_v28, %v901_v52  ;;  %v955_v53 = vadd.f32 0.0036580483, %v954_v38  ;;  %v966_v12 = vadd.f32 0.014752088, %v965_v25  ;;  %1306 = vadd.xlane.f32.xlu2 %v1282_v39  ;;  %v1070_v18 = vmul.f32 %v2321_v46, %v2321_v46 }
  0xec   : > { %1260 = vst [vmem:[%s1904_s21 + $0x30] sm:$0xff] %v1244_v58  ;;  %v1280_v15 = vmul.f32 %v2022_v51, %v1244_v58  ;;  %v907_v13 = vmul.f32 %v906_v1, %v882_v57  ;;  %v854_v14 = vmul.f32 %v1532_v63, %v852_v3  ;;  %vm858_vm11 = vweird.f32 %v852_v3  ;;  %v1206_v1 = vpop.permute.xlu0 %1205 }
  0xed   : > { %vm859_vm12 = vweird.f32 %v1532_v63  ;;  %v998_v4 = vmul.f32 %v997_v43, %v2269_v45  ;;  %v1010_v54 = vadd.f32 0.4994258, %v1009_v34  ;;  %v967_v22 = vmul.f32 %v966_v12, %v2300_v35 }
  0xee   : > { %1302 = vadd.xlane.f32.xlu0 %v1280_v15  ;;  %v1480_v24 = vclamps-f32 %v907_v13, 1.0  ;;  %v855_v60 = vsub.f32 1.0, %v854_v14  ;;  %v956_v36 = vmul.f32 %v955_v53, %v2300_v35  ;;  %v2340_v49 = vmin.f32 %v1070_v18, 16.0  ;;  %vm860_vm14 = vmor %vm858_vm11, %vm859_vm12 }
  0xef   : > { %vm2342_vm13 = vcmp.eq.f32.partialorder %v862_v48, 8.507059e+37  ;;  %v865_v31 = vor.u32 1.1754944e-38, %v864_v5  ;;  %v1011_v9 = vmul.f32 %v1010_v54, %v2269_v45  ;;  %v968_v0 = vadd.f32 0.112945676, %v967_v22 }
  0xf0   : > { %v1120_v7 = vadd.f32 1.0, %v1480_v24  ;;  %v856_v41 = vmul.f32 %v1532_v63, %v855_v60  ;;  %v1072_v8 = vmul.f32 2.1237322e-06, %v2340_v49  ;;  %v1083_v10 = vmul.f32 3.8918573e-05, %v2340_v49 }
  0xf1   : > { %v999_v20 = vadd.f32 0.18741608, %v998_v4  ;;  %v1012_v33 = vadd.f32 1.0, %v1011_v9  ;;  %v969_v57 = vmul.f32 %v968_v0, %v2300_v35  ;;  %v1285_v29 = vmul.f32 %v2022_v51, %v2104_v32 }
  0xf2   : > { %v1136_v28 = vmul.f32 %v1120_v7, %v2244_v27  ;;  %v857_v17 = vadd.f32 %v1532_v63, %v856_v41  ;;  %v957_v62 = vadd.f32 0.05243302, %v956_v36  ;;  %v1073_v59 = vadd.f32 0.00028619796, %v1072_v8 }
  0xf3   : > { %1533 = vrcp.f32 %v1012_v33  ;;  %v1084_v40 = vadd.f32 0.001143296, %v1083_v10  ;;  %1312 = vadd.xlane.f32.xlu2 %v1285_v29  ;;  %v970_v61 = vadd.f32 0.4994258, %v969_v57  ;;  %v1000_v27 = vmul.f32 %v999_v20, %v2269_v45 }
  0xf4   : > { %v1248_v42 = vmul.f32 %v1211_v55, %v1136_v28  ;;  %v861_v26 = vsel %vm860_vm14, %v1532_v63, %v857_v17  ;;  %v1074_v6 = vmul.f32 %v1073_v59, %v2340_v49  ;;  %v958_v19 = vmul.f32 %v957_v62, %v2300_v35 }
  0xf5   : > { %v866_v3 = vsel %vm2342_vm13, %v865_v31, %v861_v26  ;;  %v971_v48 = vmul.f32 %v970_v61, %v2300_v35  ;;  %v1085_v11 = vmul.f32 %v1084_v40, %v2340_v49  ;;  %v447_v43 = vmul.f32 0.5, %v2147_v16 }
  0xf6   : > { %1264 = vst [vmem:[%s1904_s21 + $0x50] sm:$0xff] %v1248_v42  ;;  %v867_v37 = vmul.f32 %v866_v3, %v2318_v44  ;;  %v1284_v32 = vmul.f32 %v2022_v51, %v1248_v42  ;;  %v1075_v58 = vadd.f32 0.0036580483, %v1074_v6  ;;  %v1288_v44 = vmul.f32 %v2022_v51, %v2218_v50  ;;  %v1226_v3 = vpop.permute.xlu1 %1225 }
  0xf7   : > { %v972_v39 = vadd.f32 1.0, %v971_v48  ;;  %v1086_v52 = vadd.f32 0.014752088, %v1085_v11  ;;  %v1001_v34 = vadd.f32 1.1283791, %v1000_v27  ;;  %vm1018_vm15 = vweird.f32 %v1012_v33 }
  0xf8   : > { %v1479_v38 = vclamps-f32 %v867_v37, 1.0  ;;  %1310 = vadd.xlane.f32.xlu1 %v1284_v32  ;;  %v959_v63 = vadd.f32 0.18741608, %v958_v19  ;;  %v1022_v53 = vand.u32 2147483647, %v1012_v33  ;;  %v1024_v12 = vand.u32 2147483648, %v1012_v33  ;;  %v1221_v19 = vpop.permute.xlu0 %1220 }
  0xf9   : > { %v1534_v25 = vpop.eup %1533  ;;  %1535 = vrcp.f32 %v972_v39  ;;  %v1087_v15 = vmul.f32 %v1086_v52, %v2340_v49  ;;  %v1076_v13 = vmul.f32 %v1075_v58, %v2340_v49  ;;  %v1002_v22 = vmul.f32 %v1001_v34, %v2247_v56 }
  0xfa   : > { %v1119_v5 = vadd.f32 1.0, %v1479_v38  ;;  %v1014_v45 = vmul.f32 %v1534_v25, %v1012_v33  ;;  %vm1019_vm0 = vweird.f32 %v1534_v25  ;;  %v960_v4 = vmul.f32 %v959_v63, %v2300_v35 }
  0xfb   : > { %1318 = vadd.xlane.f32.xlu2 %v1288_v44  ;;  %v1088_v54 = vadd.f32 0.112945676, %v1087_v15  ;;  %vm1020_vm1 = vmor %vm1018_vm15, %vm1019_vm0  ;;  %v1025_v24 = vor.u32 1.1754944e-38, %v1024_v12  ;;  %vm1023_vm2 = vcmp.eq.f32.partialorder %v1022_v53, 8.507059e+37  ;;  %v1077_v9 = vadd.f32 0.05243302, %v1076_v13 }
  0xfc   : > { %v1135_v16 = vmul.f32 %v1119_v5, %v447_v43  ;;  %v1015_v18 = vsub.f32 1.0, %v1014_v45  ;;  %v961_v7 = vadd.f32 1.1283791, %v960_v4  ;;  %vm978_vm3 = vweird.f32 %v972_v39 }
  0xfd   : > { %v1089_v2 = vmul.f32 %v1088_v54, %v2340_v49  ;;  %v984_v8 = vand.u32 2147483648, %v972_v39  ;;  %v982_v20 = vand.u32 2147483647, %v972_v39  ;;  %v1078_v33 = vmul.f32 %v1077_v9, %v2340_v49 }
  0xfe   : > { %v1247_v14 = vmul.f32 %v1206_v1, %v1135_v16  ;;  %v1016_v50 = vmul.f32 %v1534_v25, %v1015_v18  ;;  %v451_v29 = vmul.f32 0.5, %v2226_v47  ;;  %v962_v42 = vmul.f32 %v961_v7, %v2272_v23 }
  0xff   : > { %v1536_v31 = vpop.eup %1535  ;;  %v1090_v56 = vadd.f32 0.4994258, %v1089_v2  ;;  %v985_v62 = vor.u32 1.1754944e-38, %v984_v8  ;;  %vm983_vm6 = vcmp.eq.f32.partialorder %v982_v20, 8.507059e+37  ;;  %v1079_v61 = vadd.f32 0.18741608, %v1078_v33 }
 0x100   : > { %1263 = vst [vmem:[%s1904_s21 + $0x48] sm:$0xff] %v1247_v14  ;;  %v1283_v60 = vmul.f32 %v2022_v51, %v1247_v14  ;;  %v1017_v36 = vadd.f32 %v1534_v25, %v1016_v50  ;;  %v974_v41 = vmul.f32 %v1536_v31, %v972_v39  ;;  %vm979_vm4 = vweird.f32 %v1536_v31  ;;  %v1236_v1 = vpop.permute.xlu0 %1235 }
 0x101   : > { %v1091_v57 = vmul.f32 %v1090_v56, %v2340_v49  ;;  %vm980_vm5 = vmor %vm978_vm3, %vm979_vm4  ;;  %v1080_v48 = vmul.f32 %v1079_v61, %v2340_v49  ;;  %v450_v11 = vmul.f32 0.5, %v2257_v21  ;;  %v453_v14 = vmul.f32 0.5, %v2291_v30 }
 0x102   : > { %1308 = vadd.xlane.f32.xlu0 %v1283_v60  ;;  %v1021_v0 = vsel %vm1020_vm1, %v1534_v25, %v1017_v36  ;;  %v975_v55 = vsub.f32 1.0, %v974_v41  ;;  %vm1338_vm11 = vcmask 7168  }
 0x103   : > { %v1026_v35 = vsel %vm1023_vm2, %v1025_v24, %v1021_v0  ;;  %v1092_v59 = vadd.f32 1.0, %v1091_v57  ;;  %v1081_v58 = vadd.f32 1.1283791, %v1080_v48 }
 0x104   : > { %v1027_v10 = vmul.f32 %v1026_v35, %v1002_v22  ;;  %v976_v17 = vmul.f32 %v1536_v31, %v975_v55 }
 0x105   : > { %1537 = vrcp.f32 %v1092_v59  ;;  %vm1098_vm7 = vweird.f32 %v1092_v59  ;;  %v1104_v52 = vand.u32 2147483648, %v1092_v59  ;;  %v1102_v34 = vand.u32 2147483647, %v1092_v59 }
 0x106   : > { %v1483_v28 = vclamps-f32 %v1027_v10, 1.0  ;;  %v977_v26 = vadd.f32 %v1536_v31, %v976_v17  ;;  %v1082_v53 = vmul.f32 %v1081_v58, %v2321_v46 }
 0x107   : > { %v1105_v21 = vor.u32 1.1754944e-38, %v1104_v52  ;;  %vm1103_vm10 = vcmp.eq.f32.partialorder %v1102_v34, 8.507059e+37 }
 0x108   : > { %v1123_v40 = vadd.f32 1.0, %v1483_v28  ;;  %v981_v37 = vsel %vm980_vm5, %v1536_v31, %v977_v26 }
 0x109   : > { %v986_v32 = vsel %vm983_vm6, %v985_v62, %v981_v37 }
 0x10a   : > { %v1139_v6 = vmul.f32 %v1123_v40, %v451_v29  ;;  %v987_v47 = vmul.f32 %v986_v32, %v962_v42 }
 0x10b   : > { %v1538_v23 = vpop.eup %1537 }
 0x10c   : > { %v1251_v27 = vmul.f32 %v1226_v3, %v1139_v6  ;;  %v1482_v43 = vclamps-f32 %v987_v47, 1.0  ;;  %v1094_v39 = vmul.f32 %v1538_v23, %v1092_v59  ;;  %vm1099_vm8 = vweird.f32 %v1538_v23 }
 0x10d   : > { %vm1100_vm9 = vmor %vm1098_vm7, %vm1099_vm8 }
 0x10e   : > { %1267 = vst [vmem:[%s1904_s21 + $0x68] sm:$0xff] %v1251_v27  ;;  %v1287_v38 = vmul.f32 %v2022_v51, %v1251_v27  ;;  %v1122_v25 = vadd.f32 1.0, %v1482_v43  ;;  %v1095_v5 = vsub.f32 1.0, %v1094_v39 }
 0x110   : > { %1316 = vadd.xlane.f32.xlu1 %v1287_v38  ;;  %v1138_v44 = vmul.f32 %v1122_v25, %v450_v11  ;;  %v1096_v49 = vmul.f32 %v1538_v23, %v1095_v5 }
 0x112   : > { %v1250_v45 = vmul.f32 %v1221_v19, %v1138_v44  ;;  %v1097_v12 = vadd.f32 %v1538_v23, %v1096_v49 }
 0x114   : > { %1266 = vst [vmem:[%s1904_s21 + $0x60] sm:$0xff] %v1250_v45  ;;  %v1286_v63 = vmul.f32 %v2022_v51, %v1250_v45  ;;  %v1101_v16 = vsel %vm1100_vm9, %v1538_v23, %v1097_v12 }
 0x115   : > { %v1106_v18 = vsel %vm1103_vm10, %v1105_v21, %v1101_v16 }
 0x116   : > { %1314 = vadd.xlane.f32.xlu0 %v1286_v63  ;;  %v1107_v13 = vmul.f32 %v1106_v18, %v1082_v53 }
 0x118   : > { %v1485_v50 = vclamps-f32 %v1107_v13, 1.0 }
 0x11a   : > { %v1291_v15 = vpop.xlane.xlu1 %1290  ;;  %v1125_v46 = vadd.f32 1.0, %v1485_v50 }
 0x11b   : > { %1539 = vtanh.f32 %v1291_v15 }
 0x11c   : > { %v1141_v22 = vmul.f32 %v1125_v46, %v453_v14 }
 0x11e   : > { %v1295_v4 = vpop.xlane.xlu0 %1294  ;;  %v1253_v24 = vmul.f32 %v1236_v1, %v1141_v22 }
 0x11f   : > { %1541 = vtanh.f32 %v1295_v4 }
 0x120   : > { %1269 = vst [vmem:[%s1904_s21 + $0x78] sm:$0xff] %v1253_v24  ;;  %v1289_v30 = vmul.f32 %v2022_v51, %v1253_v24 }
 0x121   : > { %v1540_v54 = vpop.eup %1539 }
 0x122   : > { %1339 = vst.msk [vmem:[%s2392_s27] sm:$0xff] %vm1338_vm11, %v1540_v54  ;;  %1320 = vadd.xlane.f32.xlu0 %v1289_v30  ;;  %v1299_v36 = vpop.xlane.xlu1 %1298 }
 0x123   : > { %1543 = vtanh.f32 %v1299_v36 }
 0x125   : > { %v1542_v60 = vpop.eup %1541 }
 0x126   : > { %1341 = vst.msk [vmem:[%s2392_s27 + $0x10] sm:$0xff] %vm1338_vm11, %v1542_v60 }
 0x129   : > { %v1544_v2 = vpop.eup %1543 }
 0x12a   : > { %1343 = vst.msk [vmem:[%s2392_s27 + $0x20] sm:$0xff] %vm1338_vm11, %v1544_v2 }
 0x13e   : > { %v1293_v31 = vpop.xlane.xlu2 %1292 }
 0x13f   : > { %1545 = vtanh.f32 %v1293_v31 }
 0x145   : > { %v1546_v9 = vpop.eup %1545 }
 0x146   : > { %1340 = vst.msk [vmem:[%s2392_s27 + $0x8] sm:$0xff] %vm1338_vm11, %v1546_v9  ;;  %v1297_v0 = vpop.xlane.xlu2 %1296 }
 0x147   : > { %1547 = vtanh.f32 %v1297_v0 }
 0x14d   : > { %v1548_v51 = vpop.eup %1547 }
 0x14e   : > { %1342 = vst.msk [vmem:[%s2392_s27 + $0x18] sm:$0xff] %vm1338_vm11, %v1548_v51  ;;  %v1301_v35 = vpop.xlane.xlu2 %1300 }
 0x153   : > { %v1305_v7 = vpop.xlane.xlu1 %1304 }
 0x154   : > { %1549 = vtanh.f32 %v1305_v7 }
 0x155   : > { %1551 = vtanh.f32 %v1301_v35 }
 0x15a   : > { %v1550_v41 = vpop.eup %1549 }
 0x15b   : > { %1346 = vst.msk [vmem:[%s2392_s27 + $0x38] sm:$0xff] %vm1338_vm11, %v1550_v41  ;;  %v1552_v56 = vpop.eup %1551 }
 0x15c   : > { %1344 = vst.msk [vmem:[%s2392_s27 + $0x28] sm:$0xff] %vm1338_vm11, %v1552_v56 }
 0x15e   : > { %v1307_v20 = vpop.xlane.xlu2 %1306 }
 0x161   : > { %v1303_v8 = vpop.xlane.xlu0 %1302 }
 0x162   : > { %1553 = vtanh.f32 %v1303_v8 }
 0x166   : > { %v1313_v28 = vpop.xlane.xlu2 %1312 }
 0x168   : > { %v1554_v10 = vpop.eup %1553 }
 0x169   : > { %1345 = vst.msk [vmem:[%s2392_s27 + $0x30] sm:$0xff] %vm1338_vm11, %v1554_v10 }
 0x16b   : > { %v1311_v55 = vpop.xlane.xlu1 %1310 }
 0x16c   : > { %1555 = vtanh.f32 %v1311_v55 }
 0x16d   : > { %1557 = vtanh.f32 %v1307_v20 }
 0x16e   : > { %v1319_v59 = vpop.xlane.xlu2 %1318 }
 0x172   : > { %v1556_v33 = vpop.eup %1555 }
 0x173   : > { %1349 = vst.msk [vmem:[%s2392_s27 + $0x50] sm:$0xff] %vm1338_vm11, %v1556_v33  ;;  %v1558_v29 = vpop.eup %1557 }
 0x174   : > { %1347 = vst.msk [vmem:[%s2392_s27 + $0x40] sm:$0xff] %vm1338_vm11, %v1558_v29 }
 0x175   : > { %v1309_v57 = vpop.xlane.xlu0 %1308 }
 0x176   : > { %1559 = vtanh.f32 %v1309_v57 }
 0x177   : > { %1561 = vtanh.f32 %v1313_v28 }
 0x178   : > { %1563 = vtanh.f32 %v1319_v59 }
 0x17c   : > { %v1560_v17 = vpop.eup %1559 }
 0x17d   : > { %1348 = vst.msk [vmem:[%s2392_s27 + $0x48] sm:$0xff] %vm1338_vm11, %v1560_v17  ;;  %v1562_v62 = vpop.eup %1561 }
 0x17e   : > { %1350 = vst.msk [vmem:[%s2392_s27 + $0x58] sm:$0xff] %vm1338_vm11, %v1562_v62  ;;  %v1564_v42 = vpop.eup %1563 }
 0x17f   : > { %1353 = vst.msk [vmem:[%s2392_s27 + $0x70] sm:$0xff] %vm1338_vm11, %v1564_v42 }
 0x183   : > { %v1317_v40 = vpop.xlane.xlu1 %1316 }
 0x184   : > { %1565 = vtanh.f32 %v1317_v40 }
 0x189   : > { %v1315_v3 = vpop.xlane.xlu0 %1314 }
 0x18a   : > { %v1566_v26 = vpop.eup %1565  ;;  %1567 = vtanh.f32 %v1315_v3 }
 0x18b   : > { %1352 = vst.msk [vmem:[%s2392_s27 + $0x68] sm:$0xff] %vm1338_vm11, %v1566_v26 }
 0x190   : > { %v1568_v61 = vpop.eup %1567 }
 0x191   : > { %1351 = vst.msk [vmem:[%s2392_s27 + $0x60] sm:$0xff] %vm1338_vm11, %v1568_v61 }
 0x195   : > { %v1321_v6 = vpop.xlane.xlu0 %1320 }
 0x196   : > { %1569 = vtanh.f32 %v1321_v6 }
 0x19c   : > { %v1570_v37 = vpop.eup %1569 }
 0x19d   : > { %1354 = vst.msk [vmem:[%s2392_s27 + $0x78] sm:$0xff] %vm1338_vm11, %v1570_v37 }
 0x19e PF: > { %s18_s24 = sadd.s32 1, %s1577_s24  }
 0x19f   : > { %p15_p4 = scmp.ge.s32.totalorder %s18_s24, 4  }
 0x1a1   :  { %17 = sbr.rel (!%p15_p4) target bundleno = 1 (0x1), region = 90 }

// kernel: forward.12
= control target key start
LH: loop header
LB: loop body
LE: loop exit
PB: predicated region body
PF: predicated region fallthrough
CT: control target
= control target key end

     0   :  { %s2445_s30 = smov 0   ;;  %s3255_s0 = inlined_call_operand.vmem [shape: bf16[256,256], index: 0, kind: input, shape index: {}]   ;;  %s3256_s1 = inlined_call_operand.vmem [shape: bf16[256,128], index: 1, kind: input, shape index: {}, may-alias: {1,2}]   ;;  %s3257_s2 = inlined_call_operand.vmem [shape: bf16[256,128], index: 2, kind: input, shape index: {}, may-alias: {1,2}]   ;;  %s3258_s3 = inlined_call_operand.vmem [shape: f32[256,1], index: 3, kind: input, shape index: {}]   ;;  %s3259_s4 = inlined_call_operand.vmem [shape: bf16[128,128], index: 4, kind: input, shape index: {}]   ;;  %s3260_s5 = inlined_call_operand.vmem [shape: f32[1,128], index: 5, kind: input, shape index: {}]   ;;  %s3261_s6 = inlined_call_operand.vmem [shape: bf16[128,128], index: 6, kind: input, shape index: {}]   ;;  %s3262_s7 = inlined_call_operand.vmem [shape: f32[1,128], index: 7, kind: input, shape index: {}]   ;;  %s3263_s8 = inlined_call_operand.vmem [shape: f32[256,128], index: 8, kind: output, shape index: {0}]   ;;  %s3264_s9 = inlined_call_operand.vmem [shape: f32[2,8,128], index: 9, kind: output, shape index: {1}]  }
   0x1 LB: > { %s2451_s10 = sadd.s32 4294967295, %s2392_s30   ;;  %p2031_p0 = scmp.ge.s32.totalorder %s2392_s30, 1  ;;  %s2392_s30 = sphi %s2445_s30, %s20_s30  }
   0x2   : > { %p314_p1 = scmp.lt.s32.totalorder %s2392_s30, 3 }
   0x4   : > { %p315_p2 = pnand %p2031_p0, %p314_p1 }
   0x5   : > { %s2032_s23 = sshll.u32 (!%p315_p2), %s2451_s10, 4  ;;  %p390_p4 = scmp.lt.s32.totalorder (!%p315_p2), %s2451_s10, 1 }
   0x6   : > { %318 = sbr.rel (%p315_p2) target bundleno = 688 (0x2b0), region = 52  ;;  %p366_p3 = scmp.lt.s32.totalorder (!%p315_p2), %s2032_s23, 31 }
   0xb   : > { %v2276_v0 = vld [vmem:[%s3256_s1 + $0x38] sm:$0xff]  ;;  %v2275_v2 = vld [vmem:[%s3256_s1 + $0x30] sm:$0xff]  ;;  %v2274_v4 = vld [vmem:[%s3256_s1 + $0x28] sm:$0xff]  ;;  %s3274_s23 = smov (!%p366_p3, %s2032_s23), 31  ;;  %s3276_s10 = smov (!%p390_p4, %s2451_s10), 1 }
   0xc   : > { %v2284_v1 = vld [vmem:[%s3256_s1 + $0x78] sm:$0xff]  ;;  %650 = vmatpush.bf16.msra.mxu0 %v2276_v0  ;;  %v2283_v3 = vld [vmem:[%s3256_s1 + $0x70] sm:$0xff]  ;;  %v2282_v5 = vld [vmem:[%s3256_s1 + $0x68] sm:$0xff]  ;;  %s2495_s17 = sshll.u32 %s3274_s23, 3  ;;  %s2036_s11 = sshll.u32 %s3274_s23, 2 }
   0xd   : > { %699 = vmatpush.bf16.msra.mxu1 %v2284_v1  ;;  %v2273_v6 = vld [vmem:[%s3256_s1 + $0x20] sm:$0xff]  ;;  %v2272_v8 = vld [vmem:[%s3256_s1 + $0x18] sm:$0xff]  ;;  %v2271_v10 = vld [vmem:[%s3256_s1 + $0x10] sm:$0xff]  ;;  %s2507_s25 = scalar_lea.vmem %s3255_s0, %s2495_s17  ;;  %s2575_s14 = scalar_lea.vmem %s3257_s2, %s2036_s11 }
   0xe   : > { %v2281_v7 = vld [vmem:[%s3256_s1 + $0x60] sm:$0xff]  ;;  %v2280_v9 = vld [vmem:[%s3256_s1 + $0x58] sm:$0xff]  ;;  %v2279_v11 = vld [vmem:[%s3256_s1 + $0x50] sm:$0xff]  ;;  %s2772_s15 = scalar_lea.vmem %s3258_s3, %s2495_s17  ;;  %s3208_s21 = scalar_lea.vmem %s3263_s8, %s2495_s17 }
   0xf   : > { %v2270_v12 = vld [vmem:[%s3256_s1 + $0x8] sm:$0xff]  ;;  %v2269_v14 = vld [vmem:[%s3256_s1] sm:$0xff]  ;;  %v2052_v22 = vld [vmem:[%s2507_s25 + $0x10] sm:$0xf]  ;;  %s2041_s17 = sshll.u32 %s3276_s10, 3 }
  0x10   : > { %651 = vmatpush.bf16.msra.mxu0 %v2275_v2  ;;  %v2278_v13 = vld [vmem:[%s3256_s1 + $0x48] sm:$0xff]  ;;  %v2277_v15 = vld [vmem:[%s3256_s1 + $0x40] sm:$0xff]  ;;  %v2256_v23 = vld [vmem:[%s2507_s25 + $0x14] sm:$0xf0]  ;;  %s393_s26 = scalar_lea.vmem %s3264_s9, %s2041_s17 }
  0x11   : > { %700 = vmatpush.bf16.msra.mxu1 %v2283_v3  ;;  %v2044_v16 = vld [vmem:[%s2507_s25] sm:$0xf]  ;;  %v2254_v17 = vld [vmem:[%s2507_s25 + $0x4] sm:$0xf0]  ;;  %v2253_v18 = vld [vmem:[%s2507_s25 + $0x4] sm:$0xf]  ;;  %v2053_v26 = vor.u32 %v2256_v23, %v2052_v22 }
  0x12   : > { %v2046_v19 = vld [vmem:[%s2507_s25 + $0x8] sm:$0xf0]  ;;  %v2045_v20 = vor.u32 %v2254_v17, %v2044_v16  ;;  %v2255_v24 = vld [vmem:[%s2507_s25 + $0x14] sm:$0xf]  ;;  %v2054_v25 = vld [vmem:[%s2507_s25 + $0x18] sm:$0xf0] }
  0x13   : > { %v2049_v21 = vor.u32 %v2253_v18, %v2046_v19  ;;  %v2057_v27 = vor.u32 %v2255_v24, %v2054_v25  ;;  %v2060_v28 = vld [vmem:[%s2507_s25 + $0x20] sm:$0xf]  ;;  %v2258_v29 = vld [vmem:[%s2507_s25 + $0x24] sm:$0xf0]  ;;  %v2257_v30 = vld [vmem:[%s2507_s25 + $0x24] sm:$0xf] }
  0x14   : > { %652 = vmatpush.bf16.msra.mxu0 %v2274_v4  ;;  %v2062_v31 = vld [vmem:[%s2507_s25 + $0x28] sm:$0xf0]  ;;  %v2061_v32 = vor.u32 %v2258_v29, %v2060_v28  ;;  %v2068_v34 = vld [vmem:[%s2507_s25 + $0x30] sm:$0xf]  ;;  %v2260_v35 = vld [vmem:[%s2507_s25 + $0x34] sm:$0xf0] }
  0x15   : > { %701 = vmatpush.bf16.msra.mxu1 %v2282_v5  ;;  %v2065_v33 = vor.u32 %v2257_v30, %v2062_v31  ;;  %v2259_v36 = vld [vmem:[%s2507_s25 + $0x34] sm:$0xf]  ;;  %v2070_v37 = vld [vmem:[%s2507_s25 + $0x38] sm:$0xf0]  ;;  %v2069_v38 = vor.u32 %v2260_v35, %v2068_v34  ;;  %v2076_v40 = vld [vmem:[%s2507_s25 + $0x40] sm:$0xf] }
  0x16   : > { %v2073_v39 = vor.u32 %v2259_v36, %v2070_v37  ;;  %v2262_v41 = vld [vmem:[%s2507_s25 + $0x44] sm:$0xf0]  ;;  %v2261_v42 = vld [vmem:[%s2507_s25 + $0x44] sm:$0xf]  ;;  %v2078_v43 = vld [vmem:[%s2507_s25 + $0x48] sm:$0xf0] }
  0x17   : > { %v2077_v44 = vor.u32 %v2262_v41, %v2076_v40  ;;  %v2081_v45 = vor.u32 %v2261_v42, %v2078_v43  ;;  %v2292_v46 = vld [vmem:[%s3259_s4 + $0x38] sm:$0xff]  ;;  %v2084_v47 = vld [vmem:[%s2507_s25 + $0x50] sm:$0xf]  ;;  %v2263_v49 = vld [vmem:[%s2507_s25 + $0x54] sm:$0xf] }
  0x18   : > { %653 = vmatpush.bf16.msra.mxu0 %v2273_v6  ;;  %824 = vmatpush.bf16.msra.mxu2 %v2292_v46  ;;  %v2264_v48 = vld [vmem:[%s2507_s25 + $0x54] sm:$0xf0]  ;;  %v2086_v50 = vld [vmem:[%s2507_s25 + $0x58] sm:$0xf0]  ;;  %v2291_v53 = vld [vmem:[%s3259_s4 + $0x30] sm:$0xff] }
  0x19   : > { %702 = vmatpush.bf16.msra.mxu1 %v2281_v7  ;;  %v2085_v51 = vor.u32 %v2264_v48, %v2084_v47  ;;  %v2089_v52 = vor.u32 %v2263_v49, %v2086_v50  ;;  %v2290_v54 = vld [vmem:[%s3259_s4 + $0x28] sm:$0xff]  ;;  %v2289_v55 = vld [vmem:[%s3259_s4 + $0x20] sm:$0xff]  ;;  %v2288_v60 = vld [vmem:[%s3259_s4 + $0x18] sm:$0xff] }
  0x1a   : > { %v2092_v56 = vld [vmem:[%s2507_s25 + $0x60] sm:$0xf]  ;;  %v2266_v57 = vld [vmem:[%s2507_s25 + $0x64] sm:$0xf0]  ;;  %v2265_v58 = vld [vmem:[%s2507_s25 + $0x64] sm:$0xf] }
  0x1b   : > { %v2094_v59 = vld [vmem:[%s2507_s25 + $0x68] sm:$0xf0]  ;;  %v2093_v61 = vor.u32 %v2266_v57, %v2092_v56  ;;  %v2287_v63 = vld [vmem:[%s3259_s4 + $0x10] sm:$0xff]  ;;  %v2285_v1 = vld [vmem:[%s3259_s4] sm:$0xff] }
  0x1c   : > { %654 = vmatpush.bf16.msra.mxu0 %v2272_v8  ;;  %825 = vmatpush.bf16.msra.mxu2 %v2291_v53  ;;  %v2097_v62 = vor.u32 %v2265_v58, %v2094_v59  ;;  %v2286_v0 = vld [vmem:[%s3259_s4 + $0x8] sm:$0xff]  ;;  %v2100_v2 = vld [vmem:[%s2507_s25 + $0x70] sm:$0xf]  ;;  %v2268_v3 = vld [vmem:[%s2507_s25 + $0x74] sm:$0xf0] }
  0x1d   : > { %703 = vmatpush.bf16.msra.mxu1 %v2280_v9  ;;  %v2267_v4 = vld [vmem:[%s2507_s25 + $0x74] sm:$0xf]  ;;  %v2102_v5 = vld [vmem:[%s2507_s25 + $0x78] sm:$0xf0]  ;;  %v2101_v6 = vor.u32 %v2268_v3, %v2100_v2  ;;  %v2302_v8 = vld [vmem:[%s2575_s14] sm:$0xff]  }
  0x1e   : > { %v2105_v7 = vor.u32 %v2267_v4, %v2102_v5  ;;  %v2336_v56 = vld [vmem:[%s2575_s14 + $0x20] sm:$0xff]   ;;  %v2337_v4 = vld [vmem:[%s2575_s14 + $0x28] sm:$0xff]  }
  0x1f   : > { %v2319_v59 = vunpack.c.l.bf16 %v2336_v56 }
  0x20   : > { %655 = vmatpush.bf16.msra.mxu0 %v2271_v10  ;;  %826 = vmatpush.bf16.msra.mxu2 %v2290_v54 }
  0x21   : > { %704 = vmatpush.bf16.msra.mxu1 %v2279_v11  ;;  %v2303_v11 = vunpack.c.l.bf16 %v2302_v8 }
  0x24   : > { %656 = vmatpush.bf16.msra.mxu0 %v2270_v12  ;;  %827 = vmatpush.bf16.msra.mxu2 %v2289_v55  ;;  %v2304_v12 = vunpack.c.h.bf16 %v2302_v8  ;;  %v2324_v8 = vunpack.c.h.bf16 %v2337_v4 }
  0x25   : > { %705 = vmatpush.bf16.msra.mxu1 %v2278_v13 }
  0x28   : > { %657 = vmatpush.bf16.msra.mxu0 %v2269_v14  ;;  %828 = vmatpush.bf16.msra.mxu2 %v2288_v60  ;;  %v2320_v60 = vunpack.c.h.bf16 %v2336_v56 }
  0x29   : > { %706 = vmatpush.bf16.msra.mxu1 %v2277_v15 }
  0x2b   : > { %658 = vmatmul.bf16.vlgmr.msra.gmra.mxu0 %v2045_v20  ;;  %v2333_v20 = vld [vmem:[%s2575_s14 + $0x8] sm:$0xff]  }
  0x2c   : > { %707 = vmatmul.bf16.vlgmr.msra.gmra.mxu1 %v2049_v21  ;;  %829 = vmatpush.bf16.msra.mxu2 %v2287_v63  ;;  %v2307_v23 = vunpack.c.l.bf16 %v2333_v20  ;;  %v2308_v24 = vunpack.c.h.bf16 %v2333_v20 }
  0x30   : > { %830 = vmatpush.bf16.msra.mxu2 %v2286_v0 }
  0x34   : > { %831 = vmatpush.bf16.msra.mxu2 %v2285_v1 }
  0x3b   : > { %663 = vmatmul.bf16.gmra.mxu0 %v2053_v26 }
  0x3c   : > { %712 = vmatmul.bf16.gmra.mxu1 %v2057_v27 }
  0x4b   : > { %668 = vmatmul.bf16.gmra.mxu0 %v2061_v32  ;;  %v2334_v32 = vld [vmem:[%s2575_s14 + $0x10] sm:$0xff]  }
  0x4c   : > { %717 = vmatmul.bf16.gmra.mxu1 %v2065_v33  ;;  %v2311_v35 = vunpack.c.l.bf16 %v2334_v32  ;;  %v2312_v36 = vunpack.c.h.bf16 %v2334_v32 }
  0x5b   : > { %673 = vmatmul.bf16.gmra.mxu0 %v2069_v38 }
  0x5c   : > { %722 = vmatmul.bf16.gmra.mxu1 %v2073_v39 }
  0x6b   : > { %678 = vmatmul.bf16.gmra.mxu0 %v2077_v44  ;;  %v2335_v44 = vld [vmem:[%s2575_s14 + $0x18] sm:$0xff]  }
  0x6c   : > { %727 = vmatmul.bf16.gmra.mxu1 %v2081_v45  ;;  %v2315_v47 = vunpack.c.l.bf16 %v2335_v44  ;;  %v2316_v48 = vunpack.c.h.bf16 %v2335_v44 }
  0x7b   : > { %683 = vmatmul.bf16.gmra.mxu0 %v2085_v51 }
  0x7c   : > { %732 = vmatmul.bf16.gmra.mxu1 %v2089_v52 }
  0x8b   : > { %688 = vmatmul.bf16.gmra.mxu0 %v2093_v61 }
  0x8c   : > { %737 = vmatmul.bf16.gmra.mxu1 %v2097_v62 }
  0x9b   : > { %693 = vmatmul.bf16.gmra.mxu0 %v2101_v6 }
  0x9c   : > { %742 = vmatmul.bf16.gmra.mxu1 %v2105_v7  ;;  %v2323_v7 = vunpack.c.l.bf16 %v2337_v4 }
  0xa8   : > { %v659_v9 = vpop.f32.mrf.mxu0 }
  0xa9   : > { %v708_v10 = vpop.f32.mrf.mxu1  ;;  %v660_v13 = vadd.f32 %v2303_v11, %v659_v9 }
  0xab   : > { %v709_v17 = vadd.f32 %v708_v10, %v660_v13 }
  0xb0   : > { %v661_v14 = vpop.f32.mrf.mxu0 }
  0xb1   : > { %v710_v15 = vpop.f32.mrf.mxu1  ;;  %v662_v16 = vadd.f32 %v2304_v12, %v661_v14 }
  0xb3   : > { %v711_v18 = vadd.f32 %v710_v15, %v662_v16  ;;  %v2338_v16 = vld [vmem:[%s2575_s14 + $0x30] sm:$0xff]  }
  0xb4   : > { %v2328_v20 = vunpack.c.h.bf16 %v2338_v16 }
  0xb5   : > { %v748_v19 = vpack.c.bf16 %v711_v18, %v709_v17 }
  0xb7   : > { %832 = vmatmul.bf16.vlgmr.msra.gmra.mxu2 %v748_v19  ;;  %v2327_v19 = vunpack.c.l.bf16 %v2338_v16 }
  0xb8   : > { %v664_v21 = vpop.f32.mrf.mxu0 }
  0xb9   : > { %v713_v22 = vpop.f32.mrf.mxu1  ;;  %v665_v25 = vadd.f32 %v2307_v23, %v664_v21 }
  0xbb   : > { %v714_v29 = vadd.f32 %v713_v22, %v665_v25 }
  0xc0   : > { %v666_v26 = vpop.f32.mrf.mxu0 }
  0xc1   : > { %v715_v27 = vpop.f32.mrf.mxu1  ;;  %v667_v28 = vadd.f32 %v2308_v24, %v666_v26 }
  0xc3   : > { %v716_v30 = vadd.f32 %v715_v27, %v667_v28  ;;  %v2339_v28 = vld [vmem:[%s2575_s14 + $0x38] sm:$0xff]  }
  0xc4   : > { %v2332_v32 = vunpack.c.h.bf16 %v2339_v28 }
  0xc5   : > { %v749_v31 = vpack.c.bf16 %v716_v30, %v714_v29 }
  0xc7   : > { %837 = vmatmul.bf16.gmra.mxu2 %v749_v31  ;;  %v2331_v31 = vunpack.c.l.bf16 %v2339_v28 }
  0xc8   : > { %v669_v33 = vpop.f32.mrf.mxu0 }
  0xc9   : > { %v718_v34 = vpop.f32.mrf.mxu1  ;;  %v670_v37 = vadd.f32 %v2311_v35, %v669_v33 }
  0xcb   : > { %v719_v41 = vadd.f32 %v718_v34, %v670_v37 }
  0xd0   : > { %v671_v38 = vpop.f32.mrf.mxu0 }
  0xd1   : > { %v720_v39 = vpop.f32.mrf.mxu1  ;;  %v672_v40 = vadd.f32 %v2312_v36, %v671_v38 }
  0xd3   : > { %v721_v42 = vadd.f32 %v720_v39, %v672_v40  ;;  %v2588_v40 = vld [vmem:[%s3260_s5] ss:$0 sm:$0xff] }
  0xd5   : > { %v750_v43 = vpack.c.bf16 %v721_v42, %v719_v41  ;;  %v2300_v42 = vld [vmem:[%s3261_s6 + $0x38] sm:$0xff] }
  0xd6   : > { %1653 = vmatpush.bf16.msra.mxu3 %v2300_v42 }
  0xd7   : > { %842 = vmatmul.bf16.gmra.mxu2 %v750_v43 }
  0xd8   : > { %v674_v45 = vpop.f32.mrf.mxu0 }
  0xd9   : > { %v723_v46 = vpop.f32.mrf.mxu1  ;;  %v675_v49 = vadd.f32 %v2315_v47, %v674_v45  ;;  %v2299_v45 = vld [vmem:[%s3261_s6 + $0x30] sm:$0xff] }
  0xda   : > { %1654 = vmatpush.bf16.msra.mxu3 %v2299_v45 }
  0xdb   : > { %v724_v53 = vadd.f32 %v723_v46, %v675_v49  ;;  %v2298_v49 = vld [vmem:[%s3261_s6 + $0x28] sm:$0xff] }
  0xde   : > { %1655 = vmatpush.bf16.msra.mxu3 %v2298_v49 }
  0xe0   : > { %v676_v50 = vpop.f32.mrf.mxu0 }
  0xe1   : > { %v725_v51 = vpop.f32.mrf.mxu1  ;;  %v677_v52 = vadd.f32 %v2316_v48, %v676_v50 }
  0xe3   : > { %v726_v54 = vadd.f32 %v725_v51, %v677_v52 }
  0xe5   : > { %v751_v55 = vpack.c.bf16 %v726_v54, %v724_v53 }
  0xe7   : > { %847 = vmatmul.bf16.gmra.mxu2 %v751_v55  ;;  %v2297_v55 = vld [vmem:[%s3261_s6 + $0x20] sm:$0xff] }
  0xe8   : > { %v679_v57 = vpop.f32.mrf.mxu0  ;;  %1656 = vmatpush.bf16.msra.mxu3 %v2297_v55 }
  0xe9   : > { %v728_v58 = vpop.f32.mrf.mxu1  ;;  %v680_v61 = vadd.f32 %v2319_v59, %v679_v57 }
  0xeb   : > { %v729_v1 = vadd.f32 %v728_v58, %v680_v61 }
  0xf0   : > { %v681_v62 = vpop.f32.mrf.mxu0 }
  0xf1   : > { %v730_v63 = vpop.f32.mrf.mxu1  ;;  %v682_v0 = vadd.f32 %v2320_v60, %v681_v62  ;;  %v2296_v62 = vld [vmem:[%s3261_s6 + $0x18] sm:$0xff] }
  0xf2   : > { %1657 = vmatpush.bf16.msra.mxu3 %v2296_v62 }
  0xf3   : > { %v731_v2 = vadd.f32 %v730_v63, %v682_v0 }
  0xf5   : > { %v752_v3 = vpack.c.bf16 %v731_v2, %v729_v1 }
  0xf7   : > { %852 = vmatmul.bf16.gmra.mxu2 %v752_v3 }
  0xf8   : > { %v684_v5 = vpop.f32.mrf.mxu0 }
  0xf9   : > { %v733_v6 = vpop.f32.mrf.mxu1  ;;  %v685_v9 = vadd.f32 %v2323_v7, %v684_v5  ;;  %v2295_v7 = vld [vmem:[%s3261_s6 + $0x10] sm:$0xff] }
  0xfa   : > { %1658 = vmatpush.bf16.msra.mxu3 %v2295_v7 }
  0xfb   : > { %v734_v13 = vadd.f32 %v733_v6, %v685_v9 }
 0x100   : > { %v686_v10 = vpop.f32.mrf.mxu0 }
 0x101   : > { %v735_v11 = vpop.f32.mrf.mxu1  ;;  %v687_v12 = vadd.f32 %v2324_v8, %v686_v10 }
 0x103   : > { %v736_v14 = vadd.f32 %v735_v11, %v687_v12 }
 0x105   : > { %v753_v15 = vpack.c.bf16 %v736_v14, %v734_v13 }
 0x107   : > { %857 = vmatmul.bf16.gmra.mxu2 %v753_v15 }
 0x108   : > { %v689_v17 = vpop.f32.mrf.mxu0 }
 0x109   : > { %v738_v18 = vpop.f32.mrf.mxu1  ;;  %v690_v21 = vadd.f32 %v2327_v19, %v689_v17  ;;  %v2294_v17 = vld [vmem:[%s3261_s6 + $0x8] sm:$0xff] }
 0x10a   : > { %1659 = vmatpush.bf16.msra.mxu3 %v2294_v17 }
 0x10b   : > { %v739_v25 = vadd.f32 %v738_v18, %v690_v21 }
 0x110   : > { %v691_v22 = vpop.f32.mrf.mxu0 }
 0x111   : > { %v740_v23 = vpop.f32.mrf.mxu1  ;;  %v692_v24 = vadd.f32 %v2328_v20, %v691_v22 }
 0x113   : > { %v741_v26 = vadd.f32 %v740_v23, %v692_v24 }
 0x115   : > { %v754_v27 = vpack.c.bf16 %v741_v26, %v739_v25 }
 0x117   : > { %862 = vmatmul.bf16.gmra.mxu2 %v754_v27  ;;  %v2293_v27 = vld [vmem:[%s3261_s6] sm:$0xff] }
 0x118   : > { %v694_v29 = vpop.f32.mrf.mxu0  ;;  %1660 = vmatpush.bf16.msra.mxu3 %v2293_v27 }
 0x119   : > { %v743_v30 = vpop.f32.mrf.mxu1  ;;  %v695_v33 = vadd.f32 %v2331_v31, %v694_v29 }
 0x11b   : > { %v744_v37 = vadd.f32 %v743_v30, %v695_v33 }
 0x120   : > { %v696_v34 = vpop.f32.mrf.mxu0 }
 0x121   : > { %v697_v35 = vadd.f32 %v2332_v32, %v696_v34  ;;  %v745_v36 = vpop.f32.mrf.mxu1 }
 0x123   : > { %v746_v38 = vadd.f32 %v745_v36, %v697_v35 }
 0x125   : > { %v755_v39 = vpack.c.bf16 %v746_v38, %v744_v37 }
 0x127   : > { %867 = vmatmul.bf16.gmra.mxu2 %v755_v39 }
 0x13a   : > { %v833_v41 = vpop.f32.mrf.mxu2 }
 0x13b   : > { %v2594_v43 = vadd.f32 %v2588_v40, %v833_v41 }
 0x13d   : > { %v2597_v44 = vmul.f32 0.70710677, %v2594_v43 }
 0x13f   : > { %v905_v46 = vmul.f32 %v2597_v44, %v2597_v44 }
 0x141   : > { %v2604_v47 = vmin.f32 %v905_v46, 16.0 }
 0x142   : > { %v835_v48 = vpop.f32.mrf.mxu2 }
 0x143   : > { %v907_v50 = vmul.f32 2.1237322e-06, %v2604_v47  ;;  %v2611_v51 = vadd.f32 %v2588_v40, %v835_v48  ;;  %v918_v52 = vmul.f32 3.8918573e-05, %v2604_v47 }
 0x145   : > { %v908_v53 = vadd.f32 0.00028619796, %v907_v50  ;;  %v2615_v54 = vmul.f32 0.70710677, %v2611_v51  ;;  %v919_v56 = vadd.f32 0.001143296, %v918_v52 }
 0x147   : > { %v945_v57 = vmul.f32 %v2615_v54, %v2615_v54  ;;  %v920_v58 = vmul.f32 %v919_v56, %v2604_v47  ;;  %v909_v59 = vmul.f32 %v908_v53, %v2604_v47 }
 0x149   : > { %v2624_v60 = vmin.f32 %v945_v57, 16.0  ;;  %v921_v63 = vadd.f32 0.014752088, %v920_v58  ;;  %v910_v4 = vadd.f32 0.0036580483, %v909_v59 }
 0x14a   : > { %v838_v61 = vpop.f32.mrf.mxu2 }
 0x14b   : > { %v947_v0 = vmul.f32 2.1237322e-06, %v2624_v60  ;;  %v2631_v1 = vadd.f32 %v2588_v40, %v838_v61  ;;  %v958_v2 = vmul.f32 3.8918573e-05, %v2624_v60  ;;  %v922_v3 = vmul.f32 %v921_v63, %v2604_v47 }
 0x14c   : > { %v911_v14 = vmul.f32 %v910_v4, %v2604_v47 }
 0x14d   : > { %v948_v5 = vadd.f32 0.00028619796, %v947_v0  ;;  %v2636_v6 = vmul.f32 0.70710677, %v2631_v1  ;;  %v923_v8 = vadd.f32 0.112945676, %v922_v3 }
 0x14e   : > { %v959_v10 = vadd.f32 0.001143296, %v958_v2  ;;  %v912_v25 = vadd.f32 0.05243302, %v911_v14 }
 0x14f   : > { %v949_v9 = vmul.f32 %v948_v5, %v2624_v60  ;;  %v985_v11 = vmul.f32 %v2636_v6, %v2636_v6  ;;  %v924_v12 = vmul.f32 %v923_v8, %v2604_v47 }
 0x150   : > { %v960_v13 = vmul.f32 %v959_v10, %v2624_v60  ;;  %v913_v35 = vmul.f32 %v912_v25, %v2604_v47 }
 0x151   : > { %v2647_v15 = vmin.f32 %v985_v11, 16.0  ;;  %v925_v18 = vadd.f32 0.4994258, %v924_v12  ;;  %v950_v19 = vadd.f32 0.0036580483, %v949_v9 }
 0x152   : > { %v840_v16 = vpop.f32.mrf.mxu2  ;;  %v961_v21 = vadd.f32 0.014752088, %v960_v13  ;;  %v914_v52 = vadd.f32 0.18741608, %v913_v35 }
 0x153   : > { %v2653_v20 = vadd.f32 %v2588_v40, %v840_v16  ;;  %v926_v22 = vmul.f32 %v925_v18, %v2604_v47  ;;  %v998_v23 = vmul.f32 3.8918573e-05, %v2647_v15  ;;  %v951_v29 = vmul.f32 %v950_v19, %v2624_v60 }
 0x154   : > { %v962_v24 = vmul.f32 %v961_v21, %v2624_v60  ;;  %v987_v32 = vmul.f32 2.1237322e-06, %v2647_v15  ;;  %v915_v2 = vmul.f32 %v914_v52, %v2604_v47 }
 0x155   : > { %v2659_v26 = vmul.f32 0.70710677, %v2653_v20  ;;  %v2664_v28 = vadd.f32 1.0, %v926_v22  ;;  %v999_v31 = vadd.f32 0.001143296, %v998_v23 }
 0x156   : > { %v963_v30 = vadd.f32 0.112945676, %v962_v24  ;;  %v952_v39 = vadd.f32 0.05243302, %v951_v29  ;;  %v988_v42 = vadd.f32 0.00028619796, %v987_v32 }
 0x157   : > { %v1025_v33 = vmul.f32 %v2659_v26, %v2659_v26  ;;  %2354 = vrcp.f32 %v2664_v28  ;;  %v1000_v38 = vmul.f32 %v999_v31, %v2647_v15  ;;  %v939_v14 = vand.u32 2147483648, %v2664_v28 }
 0x158   : > { %v964_v34 = vmul.f32 %v963_v30, %v2624_v60  ;;  %v953_v56 = vmul.f32 %v952_v39, %v2624_v60  ;;  %v989_v59 = vmul.f32 %v988_v42, %v2647_v15  ;;  %v916_v16 = vadd.f32 1.1283791, %v915_v2 }
 0x159   : > { %v2673_v36 = vmin.f32 %v1025_v33, 16.0  ;;  %v1001_v46 = vadd.f32 0.014752088, %v1000_v38  ;;  %vm933_vm1 = vweird.f32 %v2664_v28  ;;  %v937_v17 = vand.u32 2147483647, %v2664_v28 }
 0x15a   : > { %v843_v37 = vpop.f32.mrf.mxu2  ;;  %v965_v45 = vadd.f32 0.4994258, %v964_v34  ;;  %v954_v4 = vadd.f32 0.18741608, %v953_v56  ;;  %v990_v9 = vadd.f32 0.0036580483, %v989_v59  ;;  %v917_v32 = vmul.f32 %v916_v16, %v2597_v44 }
 0x15b   : > { %v2677_v41 = vadd.f32 %v2588_v40, %v843_v37  ;;  %v1027_v48 = vmul.f32 2.1237322e-06, %v2673_v36  ;;  %v1002_v55 = vmul.f32 %v1001_v46, %v2647_v15  ;;  %v1038_v11 = vmul.f32 3.8918573e-05, %v2673_v36 }
 0x15c   : > { %v966_v53 = vmul.f32 %v965_v45, %v2624_v60  ;;  %v955_v24 = vmul.f32 %v954_v4, %v2624_v60  ;;  %v991_v25 = vmul.f32 %v990_v9, %v2647_v15  ;;  %v940_v30 = vor.u32 1.1754944e-38, %v939_v14 }
 0x15d   : > { %v2681_v49 = vmul.f32 0.70710677, %v2677_v41  ;;  %v2355_v50 = vpop.eup %2354  ;;  %v1003_v62 = vadd.f32 0.112945676, %v1002_v55  ;;  %v1028_v63 = vadd.f32 0.00028619796, %v1027_v48 }
 0x15e   : > { %v929_v58 = vmul.f32 %v2355_v50, %v2664_v28  ;;  %v2690_v61 = vadd.f32 1.0, %v966_v53  ;;  %vm934_vm0 = vweird.f32 %v2355_v50  ;;  %v1039_v29 = vadd.f32 0.001143296, %v1038_v11 }
 0x15f   : > { %v1065_v57 = vmul.f32 %v2681_v49, %v2681_v49  ;;  %v1004_v10 = vmul.f32 %v1003_v62, %v2647_v15  ;;  %v1029_v12 = vmul.f32 %v1028_v63, %v2673_v36  ;;  %vm2711_vm2 = vmor %vm933_vm1, %vm934_vm0  ;;  %vm938_vm3 = vcmp.eq.f32.partialorder %v937_v17, 8.507059e+37 }
 0x160   : > { %v930_v0 = vsub.f32 1.0, %v929_v58  ;;  %2356 = vrcp.f32 %v2690_v61  ;;  %v1040_v35 = vmul.f32 %v1039_v29, %v2673_v36  ;;  %v956_v42 = vadd.f32 1.1283791, %v955_v24 }
 0x161   : > { %v2694_v5 = vmin.f32 %v1065_v57, 16.0  ;;  %v1005_v22 = vadd.f32 0.4994258, %v1004_v10  ;;  %v1030_v28 = vadd.f32 0.0036580483, %v1029_v12  ;;  %v979_v52 = vand.u32 2147483648, %v2690_v61 }
 0x162   : > { %v845_v3 = vpop.f32.mrf.mxu2  ;;  %v931_v8 = vmul.f32 %v2355_v50, %v930_v0  ;;  %v992_v45 = vadd.f32 0.05243302, %v991_v25  ;;  %v1041_v53 = vadd.f32 0.014752088, %v1040_v35  ;;  %vm973_vm5 = vweird.f32 %v2690_v61 }
 0x163   : > { %v2697_v7 = vadd.f32 %v2588_v40, %v845_v3  ;;  %v1067_v18 = vmul.f32 2.1237322e-06, %v2694_v5  ;;  %v1006_v34 = vmul.f32 %v1005_v22, %v2647_v15  ;;  %v1031_v44 = vmul.f32 %v1030_v28, %v2673_v36 }
 0x164   : > { %v932_v13 = vadd.f32 %v2355_v50, %v931_v8  ;;  %v993_v63 = vmul.f32 %v992_v45, %v2647_v15  ;;  %v980_v2 = vor.u32 1.1754944e-38, %v979_v52  ;;  %v1042_v3 = vmul.f32 %v1041_v53, %v2673_v36 }
 0x165   : > { %v2703_v47 = vmul.f32 0.70710677, %v2697_v7  ;;  %v1068_v37 = vadd.f32 0.00028619796, %v1067_v18  ;;  %v2728_v48 = vadd.f32 1.0, %v1006_v34  ;;  %v957_v4 = vmul.f32 %v956_v42, %v2615_v54 }
 0x166   : > { %v2357_v23 = vpop.eup %2356  ;;  %v936_v27 = vsel %vm2711_vm2, %v2355_v50, %v932_v13  ;;  %v977_v50 = vand.u32 2147483647, %v2690_v61  ;;  %v1032_v0 = vadd.f32 0.05243302, %v1031_v44  ;;  %v1043_v18 = vadd.f32 0.112945676, %v1042_v3 }
 0x167   : > { %v1105_v19 = vmul.f32 %v2703_v47, %v2703_v47  ;;  %v969_v31 = vmul.f32 %v2357_v23, %v2690_v61  ;;  %v941_v39 = vsel %vm938_vm3, %v940_v30, %v936_v27  ;;  %vm974_vm4 = vweird.f32 %v2357_v23 }
 0x168   : > { %v942_v55 = vmul.f32 %v941_v39, %v917_v32  ;;  %2358 = vrcp.f32 %v2728_v48  ;;  %v1069_v57 = vmul.f32 %v1068_v37, %v2694_v5  ;;  %vm975_vm6 = vmor %vm973_vm5, %vm974_vm4  ;;  %vm978_vm7 = vcmp.eq.f32.partialorder %v977_v50, 8.507059e+37 }
 0x169   : > { %v2723_v60 = vmin.f32 %v1105_v19, 16.0  ;;  %v970_v46 = vsub.f32 1.0, %v969_v31  ;;  %v1078_v19 = vmul.f32 3.8918573e-05, %v2694_v5  ;;  %v994_v54 = vadd.f32 0.18741608, %v993_v63 }
 0x16a   : > { %v848_v33 = vpop.f32.mrf.mxu2  ;;  %v2202_v9 = vclamps-f32 %v942_v55, 1.0  ;;  %v1070_v11 = vadd.f32 0.0036580483, %v1069_v57  ;;  %v1033_v21 = vmul.f32 %v1032_v0, %v2673_v36  ;;  %v874_v24 = vmul.f32 0.5, %v2611_v51  ;;  %v1718_v0 = vld [vmem:[%s2772_s15] sm:$0xff] }
 0x16b   : > { %v2726_v38 = vadd.f32 %v2588_v40, %v848_v33  ;;  %v971_v56 = vmul.f32 %v2357_v23, %v970_v46  ;;  %v1107_v58 = vmul.f32 2.1237322e-06, %v2723_v60  ;;  %v1044_v31 = vmul.f32 %v1043_v18, %v2673_v36 }
 0x16c   : > { %v1545_v27 = vadd.f32 1.0, %v2202_v9  ;;  %v1071_v29 = vmul.f32 %v1070_v11, %v2694_v5  ;;  %v1079_v35 = vadd.f32 0.001143296, %v1078_v19  ;;  %v1034_v51 = vadd.f32 0.18741608, %v1033_v21 }
 0x16d   : > { %v2737_v59 = vmul.f32 0.70710677, %v2726_v38  ;;  %v972_v62 = vadd.f32 %v2357_v23, %v971_v56  ;;  %v1108_v12 = vadd.f32 0.00028619796, %v1107_v58  ;;  %v1045_v37 = vadd.f32 0.4994258, %v1044_v31 }
 0x16e   : > { %v2745_v61 = vpop.eup %2358  ;;  %v1080_v46 = vmul.f32 %v1079_v35, %v2694_v5  ;;  %v1072_v44 = vadd.f32 0.05243302, %v1071_v29  ;;  %v1035_v58 = vmul.f32 %v1034_v51, %v2673_v36  ;;  %v1118_v3 = vmul.f32 3.8918573e-05, %v2723_v60 }
 0x16f   : > { %v976_v10 = vsel %vm975_vm6, %v2357_v23, %v972_v62  ;;  %v1145_v13 = vmul.f32 %v2737_v59, %v2737_v59  ;;  %v1009_v22 = vmul.f32 %v2745_v61, %v2728_v48  ;;  %v873_v23 = vmul.f32 0.5, %v2594_v43 }
 0x170   : > { %v981_v14 = vsel %vm978_vm7, %v980_v2, %v976_v10  ;;  %v1109_v28 = vmul.f32 %v1108_v12, %v2723_v60  ;;  %v995_v43 = vmul.f32 %v994_v54, %v2647_v15  ;;  %v1046_v53 = vmul.f32 %v1045_v37, %v2673_v36  ;;  %v1719_v37 = vld [vmem:[%s2772_s15 + $0x8] sm:$0xff] }
 0x171   : > { %v982_v17 = vmul.f32 %v981_v14, %v957_v4  ;;  %v2758_v30 = vmin.f32 %v1145_v13, 16.0  ;;  %v1010_v34 = vsub.f32 1.0, %v1009_v22  ;;  %v1561_v42 = vmul.f32 %v1545_v27, %v873_v23 }
 0x172   : > { %v850_v8 = vpop.f32.mrf.mxu2  ;;  %v1110_v50 = vadd.f32 0.0036580483, %v1109_v28  ;;  %v996_v57 = vadd.f32 1.1283791, %v995_v43  ;;  %v2781_v63 = vadd.f32 1.0, %v1046_v53  ;;  %v1073_v4 = vmul.f32 %v1072_v44, %v2694_v5 }
 0x173   : > { %v2748_v16 = vadd.f32 %v2588_v40, %v850_v8  ;;  %v2203_v25 = vclamps-f32 %v982_v17, 1.0  ;;  %v1147_v52 = vmul.f32 2.1237322e-06, %v2758_v30  ;;  %v1011_v56 = vmul.f32 %v2745_v61, %v1010_v34 }
 0x174   : > { %v1081_v2 = vadd.f32 0.014752088, %v1080_v46  ;;  %v1111_v8 = vmul.f32 %v1110_v50, %v2723_v60  ;;  %vm1014_vm8 = vweird.f32 %v2745_v61  ;;  %2360 = vrcp.f32 %v2781_v63 }
 0x175   : > { %v2762_v32 = vmul.f32 0.70710677, %v2748_v16  ;;  %v1546_v33 = vadd.f32 1.0, %v2203_v25  ;;  %v1148_v9 = vadd.f32 0.00028619796, %v1147_v52  ;;  %v1012_v11 = vadd.f32 %v2745_v61, %v1011_v56 }
 0x176   : > { %v2394_v36 = vmov 0   ;;  %v2793_v12 = vmul.f32 0.5, %v2631_v1  ;;  %v1036_v13 = vadd.f32 1.1283791, %v1035_v58  ;;  %v1019_v17 = vand.u32 2147483648, %v2728_v48 }
 0x177   : > { %v1562_v45 = vmul.f32 %v1546_v33, %v874_v24  ;;  %v1185_v15 = vmul.f32 %v2762_v32, %v2762_v32  ;;  %2349 = vset.pattern.permute.xlu0 %v2394_v36  ;;  %2350 = vset.pattern.permute.xlu1 %v2394_v36  ;;  %vm1013_vm9 = vweird.f32 %v2728_v48  ;;  %v1017_v19 = vand.u32 2147483647, %v2728_v48 }
 0x178   : > { %1736 = vperm.xlu0 %2349, %v1718_v0   ;;  %2351 = vset.pattern.permute.xlu2 %v2394_v36  ;;  %v1082_v54 = vmul.f32 %v1081_v2, %v2694_v5  ;;  %v1119_v21 = vadd.f32 0.001143296, %v1118_v3  ;;  %v2803_v22 = vmul.f32 0.5, %v2653_v20  ;;  %v1074_v1 = vadd.f32 0.18741608, %v1073_v4  ;;  %vm2811_vm10 = vmor %vm1013_vm9, %vm1014_vm8 }
 0x179   : > { %v1577_v55 = vpack.c.bf16 %v1562_v45, %v1561_v42  ;;  %v2787_v10 = vmin.f32 %v1185_v15, 16.0  ;;  %v1149_v23 = vmul.f32 %v1148_v9, %v2758_v30  ;;  %v1112_v48 = vadd.f32 0.05243302, %v1111_v8 }
 0x17a   : > { %v853_v39 = vpop.f32.mrf.mxu2  ;;  %v1016_v20 = vsel %vm2811_vm10, %v2745_v61, %v1012_v11  ;;  %v1083_v29 = vadd.f32 0.112945676, %v1082_v54  ;;  %v1020_v33 = vor.u32 1.1754944e-38, %v1019_v17  ;;  %v1120_v34 = vmul.f32 %v1119_v21, %v2723_v60  ;;  %v2361_v35 = vpop.eup %2360 }
 0x17b   : > { %v2779_v62 = vadd.f32 %v2588_v40, %v853_v39  ;;  %1661 = vmatmul.bf16.vlgmr.msra.gmra.mxu3 %v1577_v55  ;;  %v1187_v27 = vmul.f32 2.1237322e-06, %v2787_v10  ;;  %v997_v43 = vmul.f32 %v996_v57, %v2636_v6  ;;  %v1037_v51 = vmul.f32 %v1036_v13, %v2659_v26 }
 0x17c   : > { %vm1018_vm11 = vcmp.eq.f32.partialorder %v1017_v19, 8.507059e+37  ;;  %v1084_v39 = vmul.f32 %v1083_v29, %v2694_v5  ;;  %v1075_v61 = vmul.f32 %v1074_v1, %v2694_v5  ;;  %v1150_v42 = vadd.f32 0.0036580483, %v1149_v23 }
 0x17d   : > { %v2796_v14 = vmul.f32 0.70710677, %v2779_v62  ;;  %v1021_v45 = vsel %vm1018_vm11, %v1020_v33, %v1016_v20  ;;  %v1049_v46 = vmul.f32 %v2361_v35, %v2781_v63  ;;  %v1113_v44 = vmul.f32 %v1112_v48, %v2723_v60 }
 0x17e   : > { %v1188_v50 = vadd.f32 0.00028619796, %v1187_v27  ;;  %v1085_v52 = vadd.f32 0.4994258, %v1084_v39  ;;  %v1121_v53 = vadd.f32 0.014752088, %v1120_v34  ;;  %v1022_v57 = vmul.f32 %v1021_v45, %v997_v43 }
 0x17f   : > { %v1225_v28 = vmul.f32 %v2796_v14, %v2796_v14  ;;  %v1050_v26 = vsub.f32 1.0, %v1049_v46  ;;  %v1059_v55 = vand.u32 2147483648, %v2781_v63  ;;  %v1158_v2 = vmul.f32 3.8918573e-05, %v2758_v30 }
 0x180   : > { %1741 = vperm.xlu0 %2349, %v1719_v37   ;;  %v1086_v58 = vmul.f32 %v1085_v52, %v2694_v5  ;;  %v1122_v0 = vmul.f32 %v1121_v53, %v2723_v60  ;;  %vm1054_vm12 = vweird.f32 %v2361_v35  ;;  %v1057_v8 = vand.u32 2147483647, %v2781_v63 }
 0x181   : > { %v2832_v15 = vmin.f32 %v1225_v28, 16.0  ;;  %v1051_v4 = vmul.f32 %v2361_v35, %v1050_v26  ;;  %v1151_v9 = vmul.f32 %v1150_v42, %v2758_v30  ;;  %v1189_v11 = vmul.f32 %v1188_v50, %v2787_v10 }
 0x182   : > { %v855_v18 = vpop.f32.mrf.mxu2  ;;  %vm1053_vm13 = vweird.f32 %v2781_v63  ;;  %v2847_v36 = vadd.f32 1.0, %v1086_v58  ;;  %v1123_v54 = vadd.f32 0.112945676, %v1122_v0  ;;  %v1159_v21 = vadd.f32 0.001143296, %v1158_v2 }
 0x183   : > { %v2807_v24 = vadd.f32 %v2588_v40, %v855_v18  ;;  %v1227_v5 = vmul.f32 2.1237322e-06, %v2832_v15  ;;  %v1052_v17 = vadd.f32 %v2361_v35, %v1051_v4  ;;  %v1060_v18 = vor.u32 1.1754944e-38, %v1059_v55  ;;  %vm1055_vm14 = vmor %vm1053_vm13, %vm1054_vm12 }
 0x184   : > { %2362 = vrcp.f32 %v2847_v36  ;;  %v1114_v1 = vadd.f32 0.18741608, %v1113_v44  ;;  %v2204_v23 = vclamps-f32 %v1022_v57, 1.0  ;;  %vm1058_vm15 = vcmp.eq.f32.partialorder %v1057_v8, 8.507059e+37  ;;  %v1720_v8 = vld [vmem:[%s2772_s15 + $0x10] sm:$0xff] }
 0x185   : > { %v2822_v31 = vmul.f32 0.70710677, %v2807_v24  ;;  %v1056_v25 = vsel %vm1055_vm14, %v2361_v35, %v1052_v17  ;;  %v2857_v63 = vmul.f32 0.5, %v2677_v41  ;;  %v2860_v48 = vmul.f32 0.5, %v2697_v7  ;;  %1746 = vperm.xlu1 %2350, %v1720_v8  }
 0x186   : > { %v1061_v20 = vsel %vm1058_vm15, %v1060_v18, %v1056_v25  ;;  %v1076_v29 = vadd.f32 1.1283791, %v1075_v61  ;;  %v1152_v28 = vadd.f32 0.05243302, %v1151_v9  ;;  %v1190_v33 = vadd.f32 0.0036580483, %v1189_v11 }
 0x187   : > { %v1265_v6 = vmul.f32 %v2822_v31, %v2822_v31  ;;  %v1062_v34 = vmul.f32 %v1061_v20, %v1037_v51  ;;  %v1228_v43 = vadd.f32 0.00028619796, %v1227_v5  ;;  %v1124_v35 = vmul.f32 %v1123_v54, %v2723_v60 }
 0x188   : > { %v1160_v41 = vmul.f32 %v1159_v21, %v2758_v30  ;;  %v1115_v42 = vmul.f32 %v1114_v1, %v2723_v60  ;;  %v1547_v45 = vadd.f32 1.0, %v2204_v23  ;;  %v2874_v61 = vmul.f32 0.5, %v2726_v38 }
 0x189   : > { %v2850_v13 = vmin.f32 %v1265_v6, 16.0  ;;  %v2205_v7 = vclamps-f32 %v1062_v34, 1.0  ;;  %v1125_v50 = vadd.f32 0.4994258, %v1124_v35  ;;  %v1153_v53 = vmul.f32 %v1152_v28, %v2758_v30 }
 0x18a   : > { %v858_v56 = vpop.f32.mrf.mxu2  ;;  %v2871_v44 = vpop.eup %2362  ;;  %v1161_v52 = vadd.f32 0.014752088, %v1160_v41  ;;  %v2880_v6 = vmul.f32 0.5, %v2748_v16  ;;  %v1191_v26 = vmul.f32 %v1190_v33, %v2787_v10  ;;  %v1116_v0 = vadd.f32 1.1283791, %v1115_v42 }
 0x18b   : > { %v2841_v3 = vadd.f32 %v2588_v40, %v858_v56  ;;  %v1267_v37 = vmul.f32 2.1237322e-06, %v2850_v13  ;;  %v1548_v55 = vadd.f32 1.0, %v2205_v7  ;;  %v1229_v56 = vmul.f32 %v1228_v43, %v2832_v15 }
 0x18c   : > { %v1089_v38 = vmul.f32 %v2871_v44, %v2847_v36  ;;  %v1563_v2 = vmul.f32 %v1547_v45, %v2793_v12  ;;  %v1126_v16 = vmul.f32 %v1125_v50, %v2723_v60  ;;  %v1162_v17 = vmul.f32 %v1161_v52, %v2758_v30 }
 0x18d   : > { %v2853_v19 = vmul.f32 0.70710677, %v2841_v3  ;;  %v1268_v57 = vadd.f32 0.00028619796, %v1267_v37  ;;  %v1564_v4 = vmul.f32 %v1548_v55, %v2803_v22  ;;  %v1154_v18 = vadd.f32 0.18741608, %v1153_v53 }
 0x18e   : > { %v1090_v5 = vsub.f32 1.0, %v1089_v38  ;;  %v1192_v54 = vadd.f32 0.05243302, %v1191_v26  ;;  %v2897_v1 = vadd.f32 1.0, %v1126_v16  ;;  %v1230_v12 = vadd.f32 0.0036580483, %v1229_v56 }
 0x18f   : > { %v1305_v27 = vmul.f32 %v2853_v19, %v2853_v19  ;;  %v1578_v21 = vpack.c.bf16 %v1564_v4, %v1563_v2  ;;  %v1269_v22 = vmul.f32 %v1268_v57, %v2850_v13  ;;  %vm1094_vm0 = vweird.f32 %v2871_v44 }
 0x190   : > { %v1091_v25 = vmul.f32 %v2871_v44, %v1090_v5  ;;  %v1099_v20 = vand.u32 2147483648, %v2847_v36  ;;  %2364 = vrcp.f32 %v2897_v1  ;;  %v1163_v43 = vadd.f32 0.112945676, %v1162_v17 }
 0x191   : > { %v2876_v51 = vmin.f32 %v1305_v27, 16.0  ;;  %1666 = vmatmul.bf16.gmra.mxu3 %v1578_v21  ;;  %vm1093_vm1 = vweird.f32 %v2847_v36  ;;  %v1198_v35 = vmul.f32 3.8918573e-05, %v2787_v10  ;;  %v1077_v41 = vmul.f32 %v1076_v29, %v2681_v49 }
 0x192   : > { %v860_v39 = vpop.f32.mrf.mxu2  ;;  %v1092_v34 = vadd.f32 %v2871_v44, %v1091_v25  ;;  %v2919_v42 = vmul.f32 0.5, %v2779_v62  ;;  %v1231_v7 = vmul.f32 %v1230_v12, %v2832_v15  ;;  %vm2924_vm2 = vmor %vm1093_vm1, %vm1094_vm0  ;;  %v1117_v52 = vmul.f32 %v1116_v0, %v2703_v47  ;;  %v1721_v62 = vld [vmem:[%s2772_s15 + $0x18] sm:$0xff] }
 0x193   : > { %v2869_v46 = vadd.f32 %v2588_v40, %v860_v39  ;;  %v1307_v9 = vmul.f32 2.1237322e-06, %v2876_v51  ;;  %v1097_v39 = vand.u32 2147483647, %v2847_v36  ;;  %v1270_v53 = vadd.f32 0.0036580483, %v1269_v22  ;;  %1751 = vperm.xlu1 %2350, %v1721_v62  }
 0x194   : > { %v1096_v49 = vsel %vm2924_vm2, %v2871_v44, %v1092_v34  ;;  %v1155_v29 = vmul.f32 %v1154_v18, %v2758_v30  ;;  %v1100_v55 = vor.u32 1.1754944e-38, %v1099_v20  ;;  %v1164_v56 = vmul.f32 %v1163_v43, %v2758_v30 }
 0x195   : > { %v2885_v58 = vmul.f32 0.70710677, %v2869_v46  ;;  %v1308_v28 = vadd.f32 0.00028619796, %v1307_v9  ;;  %v1193_v47 = vmul.f32 %v1192_v54, %v2787_v10  ;;  %vm1098_vm3 = vcmp.eq.f32.partialorder %v1097_v39, 8.507059e+37 }
 0x196   : > { %v2365_v57 = vpop.eup %2364  ;;  %v1199_v0 = vadd.f32 0.001143296, %v1198_v35  ;;  %v1232_v2 = vadd.f32 0.05243302, %v1231_v7  ;;  %v1101_v44 = vsel %vm1098_vm3, %v1100_v55, %v1096_v49  ;;  %v1271_v9 = vmul.f32 %v1270_v53, %v2850_v13 }
 0x197   : > { %v1345_v11 = vmul.f32 %v2885_v58, %v2885_v58  ;;  %v1309_v26 = vmul.f32 %v1308_v28, %v2876_v51  ;;  %v1129_v16 = vmul.f32 %v2365_v57, %v2897_v1  ;;  %v1165_v17 = vadd.f32 0.4994258, %v1164_v56 }
 0x198   : > { %v1137_v21 = vand.u32 2147483647, %v2897_v1  ;;  %v1139_v12 = vand.u32 2147483648, %v2897_v1  ;;  %v1102_v22 = vmul.f32 %v1101_v44, %v1077_v41  ;;  %v1200_v25 = vmul.f32 %v1199_v0, %v2787_v10 }
 0x199   : > { %v2900_v23 = vmin.f32 %v1345_v11, 16.0  ;;  %v1310_v18 = vadd.f32 0.0036580483, %v1309_v26  ;;  %v1130_v54 = vsub.f32 1.0, %v1129_v16  ;;  %v1238_v20 = vmul.f32 3.8918573e-05, %v2832_v15 }
 0x19a   : > { %v863_v60 = vpop.f32.mrf.mxu2  ;;  %vm1134_vm4 = vweird.f32 %v2365_v57  ;;  %v1233_v43 = vmul.f32 %v1232_v2, %v2832_v15  ;;  %v1272_v39 = vadd.f32 0.05243302, %v1271_v9  ;;  %vm1133_vm5 = vweird.f32 %v2897_v1 }
 0x19b   : > { %v2904_v27 = vadd.f32 %v2588_v40, %v863_v60  ;;  %v1347_v33 = vmul.f32 2.1237322e-06, %v2900_v23  ;;  %v1166_v60 = vmul.f32 %v1165_v17, %v2758_v30  ;;  %v1311_v41 = vmul.f32 %v1310_v18, %v2876_v51  ;;  %vm1135_vm7 = vmor %vm1133_vm5, %vm1134_vm4 }
 0x19c   : > { %vm1138_vm6 = vcmp.eq.f32.partialorder %v1137_v21, 8.507059e+37  ;;  %v2206_v30 = vclamps-f32 %v1102_v22, 1.0  ;;  %v1140_v50 = vor.u32 1.1754944e-38, %v1139_v12  ;;  %v1201_v53 = vadd.f32 0.014752088, %v1200_v25 }
 0x19d   : > { %v2912_v37 = vmul.f32 0.70710677, %v2904_v27  ;;  %v1348_v45 = vadd.f32 0.00028619796, %v1347_v33  ;;  %v1131_v33 = vmul.f32 %v2365_v57, %v1130_v54  ;;  %v2957_v7 = vadd.f32 1.0, %v1166_v60 }
 0x19e   : > { %v1239_v26 = vadd.f32 0.001143296, %v1238_v20  ;;  %v2966_v55 = vmul.f32 0.5, %v2807_v24  ;;  %v1278_v0 = vmul.f32 3.8918573e-05, %v2850_v13 }
 0x19f   : > { %v1385_v36 = vmul.f32 %v2912_v37, %v2912_v37  ;;  %v1349_v4 = vmul.f32 %v1348_v45, %v2900_v23  ;;  %v1132_v45 = vadd.f32 %v2365_v57, %v1131_v33  ;;  %2366 = vrcp.f32 %v2957_v7 }
 0x1a0   : > { %v1156_v2 = vadd.f32 1.1283791, %v1155_v29  ;;  %v1234_v44 = vadd.f32 0.18741608, %v1233_v43  ;;  %v1312_v9 = vadd.f32 0.05243302, %v1311_v41  ;;  %v1240_v24 = vmul.f32 %v1239_v26, %v2832_v15 }
 0x1a1   : > { %v2939_v38 = vmin.f32 %v1385_v36, 16.0  ;;  %v1350_v28 = vadd.f32 0.0036580483, %v1349_v4  ;;  %v1136_v49 = vsel %vm1135_vm7, %v2365_v57, %v1132_v45  ;;  %v1194_v4 = vadd.f32 0.18741608, %v1193_v47 }
 0x1a2   : > { %v865_v8 = vpop.f32.mrf.mxu2  ;;  %v1141_v1 = vsel %vm1138_vm6, %v1140_v50, %v1136_v49  ;;  %v1549_v57 = vadd.f32 1.0, %v2206_v30  ;;  %v1279_v60 = vadd.f32 0.001143296, %v1278_v0  ;;  %v1313_v33 = vmul.f32 %v1312_v9, %v2876_v51 }
 0x1a3   : > { %v1387_v11 = vmul.f32 2.1237322e-06, %v2939_v38  ;;  %v2946_v5 = vadd.f32 %v2588_v40, %v865_v8  ;;  %v1351_v36 = vmul.f32 %v1350_v28, %v2900_v23  ;;  %v1142_v16 = vmul.f32 %v1141_v1, %v1117_v52 }
 0x1a4   : > { %v1273_v8 = vmul.f32 %v1272_v39, %v2850_v13  ;;  %v1195_v29 = vmul.f32 %v1194_v4, %v2787_v10  ;;  %v1235_v52 = vmul.f32 %v1234_v44, %v2832_v15  ;;  %v1565_v43 = vmul.f32 %v1549_v57, %v2857_v63 }
 0x1a5   : > { %v2954_v34 = vmul.f32 0.70710677, %v2946_v5  ;;  %v1388_v35 = vadd.f32 0.00028619796, %v1387_v11  ;;  %v1202_v11 = vmul.f32 %v1201_v53, %v2787_v10  ;;  %v1352_v17 = vadd.f32 0.05243302, %v1351_v36  ;;  %v2367_v21 = vpop.eup %2366 }
 0x1a6   : > { %v2207_v18 = vclamps-f32 %v1142_v16, 1.0  ;;  %v1169_v20 = vmul.f32 %v2367_v21, %v2957_v7  ;;  %v1274_v28 = vadd.f32 0.18741608, %v1273_v8  ;;  %v1241_v30 = vadd.f32 0.014752088, %v1240_v24 }
 0x1a7   : > { %v1425_v62 = vmul.f32 %v2954_v34, %v2954_v34  ;;  %v1389_v56 = vmul.f32 %v1388_v35, %v2939_v38  ;;  %v1203_v22 = vadd.f32 0.112945676, %v1202_v11  ;;  %v1353_v50 = vmul.f32 %v1352_v17, %v2900_v23 }
 0x1a8   : > { %v1550_v47 = vadd.f32 1.0, %v2207_v18  ;;  %v1170_v45 = vsub.f32 1.0, %v1169_v20  ;;  %v1280_v49 = vmul.f32 %v1279_v60, %v2850_v13  ;;  %v1314_v1 = vadd.f32 0.18741608, %v1313_v33 }
 0x1a9   : > { %v2972_v54 = vmin.f32 %v1425_v62, 16.0  ;;  %v1390_v12 = vadd.f32 0.0036580483, %v1389_v56  ;;  %v1204_v39 = vmul.f32 %v1203_v22, %v2787_v10  ;;  %v1242_v56 = vmul.f32 %v1241_v30, %v2832_v15 }
 0x1aa   : > { %v868_v25 = vpop.f32.mrf.mxu2  ;;  %v1566_v35 = vmul.f32 %v1550_v47, %v2860_v48  ;;  %v1171_v63 = vmul.f32 %v2367_v21, %v1170_v45  ;;  %v1275_v48 = vmul.f32 %v1274_v28, %v2850_v13  ;;  %vm1173_vm8 = vweird.f32 %v2957_v7  ;;  %v1725_v47 = vld [vmem:[%s2772_s15 + $0x38] sm:$0xff] }
 0x1ab   : > { %v1427_v41 = vmul.f32 2.1237322e-06, %v2972_v54  ;;  %v1391_v53 = vmul.f32 %v1390_v12, %v2939_v38  ;;  %v1205_v36 = vadd.f32 0.4994258, %v1204_v39  ;;  %v2987_v26 = vadd.f32 %v2588_v40, %v868_v25  ;;  %1771 = vperm.xlu1 %2350, %v1725_v47  }
 0x1ac   : > { %v1579_v62 = vpack.c.bf16 %v1566_v35, %v1565_v43  ;;  %v1172_v44 = vadd.f32 %v2367_v21, %v1171_v63  ;;  %vm1174_vm9 = vweird.f32 %v2367_v21  ;;  %v1243_v16 = vadd.f32 0.112945676, %v1242_v56 }
 0x1ad   : > { %v1206_v0 = vmul.f32 %v1205_v36, %v2787_v10  ;;  %v1428_v4 = vadd.f32 0.00028619796, %v1427_v41  ;;  %v1392_v8 = vadd.f32 0.05243302, %v1391_v53  ;;  %v1179_v9 = vand.u32 2147483648, %v2957_v7  ;;  %vm3007_vm10 = vmor %vm1173_vm8, %vm1174_vm9 }
 0x1ae   : > { %1671 = vmatmul.bf16.gmra.mxu3 %v1579_v62  ;;  %v1281_v11 = vadd.f32 0.014752088, %v1280_v49  ;;  %v1354_v17 = vadd.f32 0.18741608, %v1353_v50  ;;  %v2997_v18 = vmul.f32 0.70710677, %v2987_v26  ;;  %v1244_v12 = vmul.f32 %v1243_v16, %v2832_v15 }
 0x1af   : > { %v2994_v57 = vadd.f32 1.0, %v1206_v0  ;;  %v1177_v24 = vand.u32 2147483647, %v2957_v7  ;;  %v1157_v10 = vmul.f32 %v1156_v2, %v2737_v59  ;;  %v1196_v22 = vadd.f32 1.1283791, %v1195_v29 }
 0x1b0   : > { %v3003_v60 = vmul.f32 0.5, %v2841_v3  ;;  %v1236_v25 = vadd.f32 1.1283791, %v1235_v52  ;;  %v1276_v20 = vadd.f32 1.1283791, %v1275_v48  ;;  %v1429_v28 = vmul.f32 %v1428_v4, %v2972_v54 }
 0x1b1   : > { %2368 = vrcp.f32 %v2994_v57  ;;  %v1176_v33 = vsel %vm3007_vm10, %v2367_v21, %v1172_v44  ;;  %v1393_v2 = vmul.f32 %v1392_v8, %v2939_v38  ;;  %v1180_v3 = vor.u32 1.1754944e-38, %v1179_v9 }
 0x1b2   : > { %v870_v59 = vpop.f32.mrf.mxu2  ;;  %v1245_v29 = vadd.f32 0.4994258, %v1244_v12  ;;  %v1282_v7 = vmul.f32 %v1281_v11, %v2850_v13  ;;  %v1315_v43 = vmul.f32 %v1314_v1, %v2876_v51  ;;  %v1355_v39 = vmul.f32 %v1354_v17, %v2900_v23 }
 0x1b3   : > { %v1465_v52 = vmul.f32 %v2997_v18, %v2997_v18  ;;  %vm1178_vm11 = vcmp.eq.f32.partialorder %v1177_v24, 8.507059e+37  ;;  %v3022_v41 = vadd.f32 %v2588_v40, %v870_v59  ;;  %v1197_v30 = vmul.f32 %v1196_v22, %v2762_v32  ;;  %v1724_v22 = vld [vmem:[%s2772_s15 + $0x30] sm:$0xff] }
 0x1b4   : > { %v1181_v35 = vsel %vm1178_vm11, %v1180_v3, %v1176_v33  ;;  %v1246_v21 = vmul.f32 %v1245_v29, %v2832_v15  ;;  %v1283_v45 = vadd.f32 0.112945676, %v1282_v7  ;;  %v3027_v50 = vmul.f32 %v1236_v25, %v2796_v14  ;;  %v1722_v25 = vld [vmem:[%s2772_s15 + $0x20] sm:$0xff]  ;;  %1766 = vperm.xlu0 %2349, %v1724_v22  }
 0x1b5   : > { %v3030_v53 = vmul.f32 0.5, %v2869_v46  ;;  %v1430_v36 = vadd.f32 0.0036580483, %v1429_v28  ;;  %v1394_v62 = vadd.f32 0.18741608, %v1393_v2  ;;  %v3037_v15 = vmul.f32 %v1276_v20, %v2822_v31  ;;  %1756 = vperm.xlu2 %2351, %v1722_v25  }
 0x1b6   : > { %v3032_v63 = vadd.f32 1.0, %v1246_v21  ;;  %v1284_v56 = vmul.f32 %v1283_v45, %v2850_v13  ;;  %v1318_v40 = vmul.f32 3.8918573e-05, %v2876_v51  ;;  %v3039_v48 = vadd.f32 1.1283791, %v1315_v43 }
 0x1b7   : > { %v2369_v49 = vpop.eup %2368  ;;  %v1182_v32 = vmul.f32 %v1181_v35, %v1157_v10  ;;  %v3042_v1 = vadd.f32 1.1283791, %v1355_v39  ;;  %v3044_v46 = vmin.f32 %v1465_v52, 16.0  ;;  %v3047_v0 = vmul.f32 0.70710677, %v3022_v41 }
 0x1b8   : > { %v1209_v14 = vmul.f32 %v2369_v49, %v2994_v57  ;;  %2370 = vrcp.f32 %v3032_v63  ;;  %v1431_v31 = vmul.f32 %v1430_v36, %v2972_v54  ;;  %v1217_v44 = vand.u32 2147483647, %v2994_v57 }
 0x1b9   : > { %v1285_v16 = vadd.f32 0.4994258, %v1284_v56  ;;  %v3053_v8 = vmul.f32 %v1394_v62, %v2939_v38  ;;  %v1219_v9 = vand.u32 2147483648, %v2994_v57  ;;  %v1319_v11 = vadd.f32 0.001143296, %v1318_v40 }
 0x1ba   : > { %v1210_v4 = vsub.f32 1.0, %v1209_v14  ;;  %v1358_v17 = vmul.f32 3.8918573e-05, %v2900_v23  ;;  %v2208_v24 = vclamps-f32 %v1182_v32, 1.0  ;;  %vm1214_vm12 = vweird.f32 %v2369_v49 }
 0x1bb   : > { %v1286_v10 = vmul.f32 %v1285_v16, %v2850_v13  ;;  %v1467_v20 = vmul.f32 2.1237322e-06, %v3044_v46  ;;  %v1505_v28 = vmul.f32 %v3047_v0, %v3047_v0  ;;  %v1320_v33 = vmul.f32 %v1319_v11, %v2876_v51 }
 0x1bc   : > { %v1211_v12 = vmul.f32 %v2369_v49, %v1210_v4  ;;  %v1359_v59 = vadd.f32 0.001143296, %v1358_v17  ;;  %v3065_v2 = vadd.f32 0.05243302, %v1431_v31  ;;  %vm1213_vm13 = vweird.f32 %v2994_v57  ;;  %v1727_v31 = vld [vmem:[%s2772_s15 + $0x48] sm:$0xff] }
 0x1bd   : > { %v3068_v29 = vadd.f32 1.0, %v1286_v10  ;;  %vm1215_vm14 = vmor %vm1213_vm13, %vm1214_vm12  ;;  %v1220_v7 = vor.u32 1.1754944e-38, %v1219_v9  ;;  %v1321_v43 = vadd.f32 0.014752088, %v1320_v33  ;;  %v1398_v52 = vmul.f32 3.8918573e-05, %v2939_v38  ;;  %1781 = vperm.xlu0 %2349, %v1727_v31  }
 0x1be   : > { %v1212_v3 = vadd.f32 %v2369_v49, %v1211_v12  ;;  %v2371_v13 = vpop.eup %2370  ;;  %v1360_v39 = vmul.f32 %v1359_v59, %v2900_v23  ;;  %vm1218_vm15 = vcmp.eq.f32.partialorder %v1217_v44, 8.507059e+37  ;;  %v1551_v21 = vadd.f32 1.0, %v2208_v24 }
 0x1bf   : > { %v1249_v45 = vmul.f32 %v2371_v13, %v3032_v63  ;;  %v1468_v36 = vadd.f32 0.00028619796, %v1467_v20  ;;  %v3074_v62 = vmin.f32 %v1505_v28, 16.0  ;;  %2372 = vrcp.f32 %v3068_v29 }
 0x1c0   : > { %v1216_v35 = vsel %vm1215_vm14, %v2369_v49, %v1212_v3  ;;  %v1257_v32 = vand.u32 2147483647, %v3032_v63  ;;  %v1259_v14 = vand.u32 2147483648, %v3032_v63  ;;  %v1322_v4 = vmul.f32 %v1321_v43, %v2876_v51 }
 0x1c1   : > { %v1221_v57 = vsel %vm1218_vm15, %v1220_v7, %v1216_v35  ;;  %v1250_v40 = vsub.f32 1.0, %v1249_v45  ;;  %v1361_v49 = vadd.f32 0.014752088, %v1360_v39  ;;  %v1399_v44 = vadd.f32 0.001143296, %v1398_v52 }
 0x1c2   : > { %v1222_v56 = vmul.f32 %v1221_v57, %v1197_v30  ;;  %v1438_v16 = vmul.f32 3.8918573e-05, %v2972_v54  ;;  %v1567_v11 = vmul.f32 %v1551_v21, %v2874_v61  ;;  %vm1254_vm0 = vweird.f32 %v2371_v13 }
 0x1c3   : > { %v1251_v17 = vmul.f32 %v2371_v13, %v1250_v40  ;;  %vm1253_vm1 = vweird.f32 %v3032_v63  ;;  %v1323_v30 = vadd.f32 0.112945676, %v1322_v4  ;;  %v1362_v24 = vmul.f32 %v1361_v49, %v2900_v23 }
 0x1c4   : > { %v2209_v9 = vclamps-f32 %v1222_v56, 1.0  ;;  %v1400_v12 = vmul.f32 %v1399_v44, %v2939_v38  ;;  %vm1258_vm2 = vcmp.eq.f32.partialorder %v1257_v32, 8.507059e+37  ;;  %v1260_v47 = vor.u32 1.1754944e-38, %v1259_v14  ;;  %vm1255_vm3 = vmor %vm1253_vm1, %vm1254_vm0 }
 0x1c5   : > { %v1252_v22 = vadd.f32 %v2371_v13, %v1251_v17  ;;  %v2373_v25 = vpop.eup %2372  ;;  %v1324_v20 = vmul.f32 %v1323_v30, %v2876_v51  ;;  %v1363_v28 = vadd.f32 0.112945676, %v1362_v24  ;;  %v1439_v33 = vadd.f32 0.001143296, %v1438_v16 }
 0x1c6   : > { %v1552_v10 = vadd.f32 1.0, %v2209_v9  ;;  %v1401_v61 = vadd.f32 0.014752088, %v1400_v12  ;;  %v1289_v3 = vmul.f32 %v2373_v25, %v3068_v29  ;;  %v1478_v7 = vmul.f32 3.8918573e-05, %v3044_v46  ;;  %v1728_v9 = vld [vmem:[%s2772_s15 + $0x50] sm:$0xff] }
 0x1c7   : > { %v1256_v63 = vsel %vm1255_vm3, %v2371_v13, %v1252_v22  ;;  %v1297_v39 = vand.u32 2147483647, %v3068_v29  ;;  %v1325_v52 = vadd.f32 0.4994258, %v1324_v20  ;;  %v1364_v35 = vmul.f32 %v1363_v28, %v2900_v23  ;;  %1786 = vperm.xlu1 %2350, %v1728_v9  }
 0x1c8   : > { %v1568_v59 = vmul.f32 %v1552_v10, %v2880_v6  ;;  %v1261_v43 = vsel %vm1258_vm2, %v1260_v47, %v1256_v63  ;;  %v1290_v45 = vsub.f32 1.0, %v1289_v3  ;;  %v1299_v57 = vand.u32 2147483648, %v3068_v29  ;;  %v1731_v63 = vld [vmem:[%s2772_s15 + $0x68] sm:$0xff] }
 0x1c9   : > { %v1402_v6 = vmul.f32 %v1401_v61, %v2939_v38  ;;  %v1262_v13 = vmul.f32 %v1261_v43, %v3027_v50  ;;  %v1326_v56 = vmul.f32 %v1325_v52, %v2876_v51  ;;  %v1365_v40 = vadd.f32 0.4994258, %v1364_v35  ;;  %v1730_v50 = vld [vmem:[%s2772_s15 + $0x60] sm:$0xff]  ;;  %v1733_v52 = vld [vmem:[%s2772_s15 + $0x78] sm:$0xff] }
 0x1ca   : > { %v1580_v21 = vpack.c.bf16 %v1568_v59, %v1567_v11  ;;  %v1440_v32 = vmul.f32 %v1439_v33, %v2972_v54  ;;  %v1291_v14 = vmul.f32 %v2373_v25, %v1290_v45  ;;  %vm1294_vm4 = vweird.f32 %v2373_v25  ;;  %v1723_v11 = vld [vmem:[%s2772_s15 + $0x28] sm:$0xff]  ;;  %1796 = vperm.xlu0 %2349, %v1730_v50  }
 0x1cb   : > { %v1403_v31 = vadd.f32 0.112945676, %v1402_v6  ;;  %v1479_v4 = vadd.f32 0.001143296, %v1478_v7  ;;  %v1433_v49 = vmul.f32 %v3065_v2, %v2972_v54  ;;  %v3099_v44 = vadd.f32 1.0, %v1326_v56  ;;  %1761 = vperm.xlu2 %2351, %v1723_v11  }
 0x1cc   : > { %1676 = vmatmul.bf16.gmra.mxu3 %v1580_v21  ;;  %v1366_v16 = vmul.f32 %v1365_v40, %v2900_v23  ;;  %v1441_v17 = vadd.f32 0.014752088, %v1440_v32  ;;  %v1469_v51 = vmul.f32 %v1468_v36, %v3044_v46  ;;  %v1292_v30 = vadd.f32 %v2373_v25, %v1291_v14 }
 0x1cd   : > { %vm1293_vm5 = vweird.f32 %v3068_v29  ;;  %v1404_v24 = vmul.f32 %v1403_v31, %v2939_v38  ;;  %v2210_v12 = vclamps-f32 %v1262_v13, 1.0  ;;  %v1300_v2 = vor.u32 1.1754944e-38, %v1299_v57 }
 0x1ce   : > { %vm1295_vm6 = vmor %vm1293_vm5, %vm1294_vm4  ;;  %2374 = vrcp.f32 %v3099_v44  ;;  %v1480_v23 = vmul.f32 %v1479_v4, %v3044_v46  ;;  %vm1298_vm7 = vcmp.eq.f32.partialorder %v1297_v39, 8.507059e+37  ;;  %v3111_v36 = vadd.f32 1.0, %v1366_v16 }
 0x1cf   : > { %v1296_v10 = vsel %vm1295_vm6, %v2373_v25, %v1292_v30  ;;  %v1405_v22 = vadd.f32 0.4994258, %v1404_v24  ;;  %v3115_v29 = vmul.f32 %v3039_v48, %v2853_v19  ;;  %v1507_v47 = vmul.f32 2.1237322e-06, %v3074_v62  ;;  %1801 = vperm.xlu1 %2350, %v1731_v63  }
 0x1d0   : > { %v1301_v20 = vsel %vm1298_vm7, %v1300_v2, %v1296_v10  ;;  %v1442_v28 = vmul.f32 %v1441_v17, %v2972_v54  ;;  %v1434_v61 = vadd.f32 0.18741608, %v1433_v49  ;;  %v1470_v33 = vadd.f32 0.0036580483, %v1469_v51 }
 0x1d1   : > { %v1302_v59 = vmul.f32 %v1301_v20, %v3037_v15  ;;  %2376 = vrcp.f32 %v3111_v36  ;;  %v1553_v25 = vadd.f32 1.0, %v2210_v12  ;;  %v1406_v3 = vmul.f32 %v1405_v22, %v2939_v38  ;;  %v1726_v20 = vld [vmem:[%s2772_s15 + $0x40] sm:$0xff] }
 0x1d2   : > { %v1443_v7 = vadd.f32 0.112945676, %v1442_v28  ;;  %v1481_v43 = vadd.f32 0.014752088, %v1480_v23  ;;  %v3125_v19 = vmul.f32 %v3042_v1, %v2885_v58  ;;  %v3128_v48 = vadd.f32 1.1283791, %v3053_v8  ;;  %1811 = vperm.xlu0 %2349, %v1733_v52  }
 0x1d3   : > { %v2211_v39 = vclamps-f32 %v1302_v59, 1.0  ;;  %v1518_v35 = vmul.f32 3.8918573e-05, %v3074_v62  ;;  %v1508_v21 = vadd.f32 0.00028619796, %v1507_v47  ;;  %v3132_v45 = vadd.f32 1.0, %v1406_v3  ;;  %1776 = vperm.xlu2 %2351, %v1726_v20  }
 0x1d4   : > { %v2375_v15 = vpop.eup %2374  ;;  %v1444_v57 = vmul.f32 %v1443_v7, %v2972_v54  ;;  %v1482_v38 = vmul.f32 %v1481_v43, %v3044_v46  ;;  %v3137_v6 = vmul.f32 %v1434_v61, %v2972_v54  ;;  %v1471_v58 = vmul.f32 %v1470_v33, %v3044_v46 }
 0x1d5   : > { %v1554_v1 = vadd.f32 1.0, %v2211_v39  ;;  %v1329_v8 = vmul.f32 %v2375_v15, %v3099_v44  ;;  %v1569_v13 = vmul.f32 %v1553_v25, %v2919_v42  ;;  %v1339_v56 = vand.u32 2147483648, %v3099_v44 }
 0x1d6   : > { %2378 = vrcp.f32 %v3132_v45  ;;  %v1519_v40 = vadd.f32 0.001143296, %v1518_v35  ;;  %v1445_v4 = vadd.f32 0.4994258, %v1444_v57  ;;  %v1483_v49 = vadd.f32 0.112945676, %v1482_v38 }
 0x1d7   : > { %v2377_v32 = vpop.eup %2376  ;;  %v1570_v14 = vmul.f32 %v1554_v1, %v2966_v55  ;;  %v1330_v31 = vsub.f32 1.0, %v1329_v8  ;;  %v1509_v16 = vmul.f32 %v1508_v21, %v3074_v62  ;;  %vm1334_vm8 = vweird.f32 %v2375_v15  ;;  %v1729_v1 = vld [vmem:[%s2772_s15 + $0x58] sm:$0xff] }
 0x1d8   : > { %v1337_v9 = vand.u32 2147483647, %v3099_v44  ;;  %v1369_v11 = vmul.f32 %v2377_v32, %v3111_v36  ;;  %v1446_v17 = vmul.f32 %v1445_v4, %v2972_v54  ;;  %v1484_v51 = vmul.f32 %v1483_v49, %v3044_v46 }
 0x1d9   : > { %v1581_v42 = vpack.c.bf16 %v1570_v14, %v1569_v13  ;;  %v1331_v50 = vmul.f32 %v2375_v15, %v1330_v31  ;;  %vm1333_vm9 = vweird.f32 %v3099_v44  ;;  %v1340_v55 = vor.u32 1.1754944e-38, %v1339_v56 }
 0x1da   : > { %v1370_v30 = vsub.f32 1.0, %v1369_v11  ;;  %v1520_v24 = vmul.f32 %v1519_v40, %v3074_v62  ;;  %v1379_v2 = vand.u32 2147483648, %v3111_v36  ;;  %v3153_v23 = vadd.f32 1.0, %v1446_v17  ;;  %vm1335_vm10 = vmor %vm1333_vm9, %vm1334_vm8 }
 0x1db   : > { %v1332_v12 = vadd.f32 %v2375_v15, %v1331_v50  ;;  %v1485_v10 = vadd.f32 0.4994258, %v1484_v51  ;;  %vm1374_vm11 = vweird.f32 %v2377_v32  ;;  %v1377_v47 = vand.u32 2147483647, %v3111_v36  ;;  %1791 = vperm.xlu2 %2351, %v1729_v1  }
 0x1dc   : > { %1681 = vmatmul.bf16.gmra.mxu3 %v1581_v42  ;;  %v2379_v22 = vpop.eup %2378  ;;  %v1371_v54 = vmul.f32 %v2377_v32, %v1370_v30  ;;  %v1521_v44 = vadd.f32 0.014752088, %v1520_v24  ;;  %vm1338_vm12 = vcmp.eq.f32.partialorder %v1337_v9, 8.507059e+37  ;;  %2380 = vrcp.f32 %v3153_v23 }
 0x1dd   : > { %v1336_v28 = vsel %vm1335_vm10, %v2375_v15, %v1332_v12  ;;  %v1409_v61 = vmul.f32 %v2379_v22, %v3132_v45  ;;  %v1510_v33 = vadd.f32 0.0036580483, %v1509_v16  ;;  %vm1373_vm13 = vweird.f32 %v3111_v36 }
 0x1de   : > { %v1341_v59 = vsel %vm1338_vm12, %v1340_v55, %v1336_v28  ;;  %v1372_v25 = vadd.f32 %v2377_v32, %v1371_v54  ;;  %vm1375_vm14 = vmor %vm1373_vm13, %vm1374_vm11  ;;  %v1380_v3 = vor.u32 1.1754944e-38, %v1379_v2  ;;  %v1486_v43 = vmul.f32 %v1485_v10, %v3044_v46 }
 0x1df   : > { %v1342_v63 = vmul.f32 %v1341_v59, %v3115_v29  ;;  %v1410_v7 = vsub.f32 1.0, %v1409_v61  ;;  %vm1378_vm15 = vcmp.eq.f32.partialorder %v1377_v47, 8.507059e+37  ;;  %v1419_v52 = vand.u32 2147483648, %v3132_v45 }
 0x1e0   : > { %v1376_v39 = vsel %vm1375_vm14, %v2377_v32, %v1372_v25  ;;  %v1522_v35 = vmul.f32 %v1521_v44, %v3074_v62  ;;  %vm1414_vm0 = vweird.f32 %v2379_v22  ;;  %v1472_v38 = vadd.f32 0.05243302, %v1471_v58  ;;  %v1732_v44 = vld [vmem:[%s2772_s15 + $0x70] sm:$0xff] }
 0x1e1   : > { %v2212_v15 = vclamps-f32 %v1342_v63, 1.0  ;;  %v1381_v21 = vsel %vm1378_vm15, %v1380_v3, %v1376_v39  ;;  %v1411_v57 = vmul.f32 %v2379_v22, %v1410_v7  ;;  %v1417_v29 = vand.u32 2147483647, %v3132_v45 }
 0x1e2   : > { %v1382_v36 = vmul.f32 %v1381_v21, %v3125_v19  ;;  %v3168_v8 = vadd.f32 1.0, %v1486_v43  ;;  %v2381_v13 = vpop.eup %2380  ;;  %v1397_v56 = vmul.f32 %v3128_v48, %v2912_v37  ;;  %vm1413_vm1 = vweird.f32 %v3132_v45 }
 0x1e3   : > { %v1412_v40 = vadd.f32 %v2379_v22, %v1411_v57  ;;  %v1523_v32 = vadd.f32 0.112945676, %v1522_v35  ;;  %v1555_v31 = vadd.f32 1.0, %v2212_v15  ;;  %vm1415_vm2 = vmor %vm1413_vm1, %vm1414_vm0  ;;  %v1449_v58 = vmul.f32 %v2381_v13, %v3153_v23  ;;  %1806 = vperm.xlu2 %2351, %v1732_v44  }
 0x1e4   : > { %v2213_v14 = vclamps-f32 %v1382_v36, 1.0  ;;  %2382 = vrcp.f32 %v3168_v8  ;;  %v1436_v19 = vadd.f32 1.1283791, %v3137_v6  ;;  %v1511_v4 = vmul.f32 %v1510_v33, %v3074_v62 }
 0x1e5   : > { %v1416_v49 = vsel %vm1415_vm2, %v2379_v22, %v1412_v40  ;;  %v1420_v16 = vor.u32 1.1754944e-38, %v1419_v52  ;;  %v1473_v37 = vmul.f32 %v1472_v38, %v3044_v46  ;;  %vm1418_vm3 = vcmp.eq.f32.partialorder %v1417_v29, 8.507059e+37 }
 0x1e6   : > { %v1556_v48 = vadd.f32 1.0, %v2213_v14  ;;  %v1450_v45 = vsub.f32 1.0, %v1449_v58  ;;  %v1457_v11 = vand.u32 2147483647, %v3153_v23  ;;  %v1459_v42 = vand.u32 2147483648, %v3153_v23 }
 0x1e7   : > { %v1421_v9 = vsel %vm1418_vm3, %v1420_v16, %v1416_v49  ;;  %v1524_v50 = vmul.f32 %v1523_v32, %v3074_v62  ;;  %v1571_v17 = vmul.f32 %v1555_v31, %v3003_v60  ;;  %vm1454_vm4 = vweird.f32 %v2381_v13 }
 0x1e8   : > { %v1572_v6 = vmul.f32 %v1556_v48, %v3030_v53  ;;  %v1451_v51 = vmul.f32 %v2381_v13, %v1450_v45  ;;  %v1512_v55 = vadd.f32 0.05243302, %v1511_v4  ;;  %v1422_v2 = vmul.f32 %v1421_v9, %v1397_v56 }
 0x1e9   : > { %v1525_v30 = vadd.f32 0.4994258, %v1524_v50  ;;  %vm1453_vm5 = vweird.f32 %v3153_v23  ;;  %v1460_v22 = vor.u32 1.1754944e-38, %v1459_v42  ;;  %v1437_v60 = vmul.f32 %v1436_v19, %v2954_v34 }
 0x1ea   : > { %v2383_v24 = vpop.eup %2382  ;;  %v1582_v12 = vpack.c.bf16 %v1572_v6, %v1571_v17  ;;  %v1452_v10 = vadd.f32 %v2381_v13, %v1451_v51  ;;  %vm1455_vm6 = vmor %vm1453_vm5, %vm1454_vm4  ;;  %v1474_v53 = vadd.f32 0.18741608, %v1473_v37  ;;  %vm1458_vm7 = vcmp.eq.f32.partialorder %v1457_v11, 8.507059e+37 }
 0x1eb   : > { %v1489_v54 = vmul.f32 %v2383_v24, %v3168_v8  ;;  %v1526_v47 = vmul.f32 %v1525_v30, %v3074_v62  ;;  %v1513_v28 = vmul.f32 %v1512_v55, %v3074_v62  ;;  %v2214_v23 = vclamps-f32 %v1422_v2, 1.0 }
 0x1ec   : > { %1686 = vmatmul.bf16.gmra.mxu3 %v1582_v12  ;;  %v1456_v20 = vsel %vm1455_vm6, %v2381_v13, %v1452_v10  ;;  %v1475_v3 = vmul.f32 %v1474_v53, %v3044_v46  ;;  %vm1494_vm8 = vweird.f32 %v2383_v24  ;;  %v886_v34 = vmul.f32 0.5, %v2946_v5  ;;  %v3199_v13 = vld [vmem:[%s3262_s7] ss:$0 sm:$0xff] }
 0x1ed   : > { %v1461_v61 = vsel %vm1458_vm7, %v1460_v22, %v1456_v20  ;;  %v1490_v33 = vsub.f32 1.0, %v1489_v54  ;;  %v1527_v59 = vadd.f32 1.0, %v1526_v47  ;;  %v1514_v43 = vadd.f32 0.18741608, %v1513_v28 }
 0x1ee   : > { %v1462_v25 = vmul.f32 %v1461_v61, %v1437_v60  ;;  %v1499_v52 = vand.u32 2147483648, %v3168_v8  ;;  %v1557_v35 = vadd.f32 1.0, %v2214_v23  ;;  %vm1493_vm9 = vweird.f32 %v3168_v8 }
 0x1ef   : > { %v1491_v63 = vmul.f32 %v2383_v24, %v1490_v33  ;;  %2384 = vrcp.f32 %v1527_v59  ;;  %v1497_v21 = vand.u32 2147483647, %v3168_v8  ;;  %vm1495_vm10 = vmor %vm1493_vm9, %vm1494_vm8  ;;  %v885_v57 = vmul.f32 0.5, %v2904_v27  ;;  %v3201_v8 = vpop.permute.xlu0 %1736 }
 0x1f0   : > { %v2215_v7 = vclamps-f32 %v1462_v25, 1.0  ;;  %v1476_v38 = vadd.f32 1.1283791, %v1475_v3  ;;  %v1515_v5 = vmul.f32 %v1514_v43, %v3074_v62  ;;  %v1500_v1 = vor.u32 1.1754944e-38, %v1499_v52 }
 0x1f1   : > { %v1492_v39 = vadd.f32 %v2383_v24, %v1491_v63  ;;  %v1573_v56 = vmul.f32 %v1557_v35, %v885_v57  ;;  %vm1498_vm11 = vcmp.eq.f32.partialorder %v1497_v21, 8.507059e+37  ;;  %v1539_v19 = vand.u32 2147483648, %v1527_v59 }
 0x1f2   : > { %v1558_v15 = vadd.f32 1.0, %v2215_v7  ;;  %v1477_v27 = vmul.f32 %v1476_v38, %v2997_v18  ;;  %v1516_v58 = vadd.f32 1.1283791, %v1515_v5  ;;  %v1537_v37 = vand.u32 2147483647, %v1527_v59 }
 0x1f3   : > { %v1496_v36 = vsel %vm1495_vm10, %v2383_v24, %v1492_v39  ;;  %vm1533_vm13 = vweird.f32 %v1527_v59  ;;  %v1540_v48 = vor.u32 1.1754944e-38, %v1539_v19  ;;  %v887_v2 = vmul.f32 0.5, %v2987_v26 }
 0x1f4   : > { %v1574_v46 = vmul.f32 %v1558_v15, %v886_v34  ;;  %v1501_v32 = vsel %vm1498_vm11, %v1500_v1, %v1496_v36  ;;  %v1517_v45 = vmul.f32 %v1516_v58, %v3047_v0  ;;  %vm1538_vm15 = vcmp.eq.f32.partialorder %v1537_v37, 8.507059e+37 }
 0x1f5   : > { %v2385_v29 = vpop.eup %2384  ;;  %v1502_v49 = vmul.f32 %v1501_v32, %v1477_v27  ;;  %v888_v0 = vmul.f32 0.5, %v3022_v41  ;;  %vm1909_vm0 = vcmask 1040384   ;;  %vm1911_vm1 = vcmask 1041408  }
 0x1f6   : > { %v1529_v40 = vmul.f32 %v2385_v29, %v1527_v59  ;;  %v1583_v14 = vpack.c.bf16 %v1574_v46, %v1573_v56  ;;  %vm1534_vm12 = vweird.f32 %v2385_v29  ;;  %vm1913_vm2 = vcmask 1042432  }
 0x1f7   : > { %vm1535_vm14 = vmor %vm1533_vm13, %vm1534_vm12  ;;  %v2216_v9 = vclamps-f32 %v1502_v49, 1.0  ;;  %v1742_v6 = vpop.permute.xlu0 %1741  ;;  %v1747_v28 = vpop.permute.xlu1 %1746 }
 0x1f8   : > { %v1530_v31 = vsub.f32 1.0, %v1529_v40  ;;  %v1888_v58 = vadd.f32 %v1742_v6, %v3201_v8 }
 0x1f9   : > { %v1559_v24 = vadd.f32 1.0, %v2216_v9 }
 0x1fa   : > { %v1531_v16 = vmul.f32 %v2385_v29, %v1530_v31 }
 0x1fb   : > { %v1575_v60 = vmul.f32 %v1559_v24, %v887_v2 }
 0x1fc   : > { %1691 = vmatmul.bf16.gmra.mxu3 %v1583_v14  ;;  %v1532_v18 = vadd.f32 %v2385_v29, %v1531_v16 }
 0x1fe   : > { %v1662_v62 = vpop.f32.mrf.mxu3  ;;  %v1536_v11 = vsel %vm1535_vm14, %v2385_v29, %v1532_v18 }
 0x1ff   : > { %v1663_v4 = vadd.f32 %v3199_v13, %v1662_v62  ;;  %v1541_v42 = vsel %vm1538_vm15, %v1540_v48, %v1536_v11 }
 0x200   : > { %v1542_v50 = vmul.f32 %v1541_v42, %v1517_v45 }
 0x201   : > { %1702 = vst [vmem:[%s3208_s21] sm:$0xff] %v1663_v4  ;;  %v1814_v51 = vmul.f32 %v3201_v8, %v1663_v4 }
 0x202   : > { %v2217_v30 = vclamps-f32 %v1542_v50, 1.0 }
 0x203   : > { %v1851_v22 = vmul.f32 %v1814_v51, %v1663_v4  ;;  %v1889_v4 = vadd.f32 %v1888_v58, %v1747_v28 }
 0x204   : > { %v1560_v10 = vadd.f32 1.0, %v2217_v30 }
 0x205   : > { %v1752_v63 = vpop.permute.xlu1 %1751 }
 0x206   : > { %v1664_v17 = vpop.f32.mrf.mxu3  ;;  %v1576_v53 = vmul.f32 %v1560_v10, %v888_v0  ;;  %v1890_v16 = vadd.f32 %v1889_v4, %v1752_v63 }
 0x207   : > { %v1665_v55 = vadd.f32 %v3199_v13, %v1664_v17 }
 0x208   : > { %v1584_v44 = vpack.c.bf16 %v1576_v53, %v1575_v60 }
 0x209   : > { %1703 = vst [vmem:[%s3208_s21 + $0x8] sm:$0xff] %v1665_v55  ;;  %v1815_v12 = vmul.f32 %v1742_v6, %v1665_v55 }
 0x20b   : > { %v1830_v54 = vadd.f32 %v1815_v12, %v1814_v51  ;;  %v1852_v47 = vmul.f32 %v1815_v12, %v1665_v55 }
 0x20c   : > { %1696 = vmatmul.bf16.gmra.mxu3 %v1584_v44 }
 0x20d   : > { %v1867_v20 = vadd.f32 %v1852_v47, %v1851_v22 }
 0x20f   : > { %v1757_v52 = vpop.permute.xlu2 %1756 }
 0x210   : > { %v1891_v18 = vadd.f32 %v1890_v16, %v1757_v52 }
 0x214   : > { %v1667_v61 = vpop.f32.mrf.mxu3 }
 0x215   : > { %v1668_v33 = vadd.f32 %v3199_v13, %v1667_v61 }
 0x217   : > { %1704 = vst [vmem:[%s3208_s21 + $0x10] sm:$0xff] %v1668_v33  ;;  %v1816_v59 = vmul.f32 %v1747_v28, %v1668_v33 }
 0x219   : > { %v1831_v26 = vadd.f32 %v1830_v54, %v1816_v59  ;;  %v1853_v23 = vmul.f32 %v1816_v59, %v1668_v33 }
 0x21b   : > { %v1868_v41 = vadd.f32 %v1867_v20, %v1853_v23 }
 0x21c   : > { %v1669_v25 = vpop.f32.mrf.mxu3 }
 0x21d   : > { %v1670_v3 = vadd.f32 %v3199_v13, %v1669_v25  ;;  %v1772_v8 = vpop.permute.xlu1 %1771 }
 0x21f   : > { %1705 = vst [vmem:[%s3208_s21 + $0x18] sm:$0xff] %v1670_v3  ;;  %v1817_v7 = vmul.f32 %v1752_v63, %v1670_v3 }
 0x221   : > { %v1832_v34 = vadd.f32 %v1831_v26, %v1817_v7  ;;  %v1854_v43 = vmul.f32 %v1817_v7, %v1670_v3 }
 0x223   : > { %v1869_v39 = vadd.f32 %v1868_v41, %v1854_v43 }
 0x225   : > { %v1762_v29 = vpop.permute.xlu2 %1761 }
 0x226   : > { %v1892_v45 = vadd.f32 %v1891_v18, %v1762_v29  ;;  %v1767_v9 = vpop.permute.xlu0 %1766 }
 0x228   : > { %v1893_v11 = vadd.f32 %v1892_v45, %v1767_v9 }
 0x22a   : > { %v1894_v17 = vadd.f32 %v1893_v11, %v1772_v8 }
 0x22d   : > { %v1777_v6 = vpop.permute.xlu2 %1776 }
 0x22e   : > { %v1895_v51 = vadd.f32 %v1894_v17, %v1777_v6 }
 0x22f   : > { %v1782_v24 = vpop.permute.xlu0 %1781 }
 0x230   : > { %v1896_v12 = vadd.f32 %v1895_v51, %v1782_v24 }
 0x231   : > { %v1672_v35 = vpop.f32.mrf.mxu3 }
 0x232   : > { %v1673_v15 = vadd.f32 %v3199_v13, %v1672_v35 }
 0x234   : > { %1706 = vst [vmem:[%s3208_s21 + $0x20] sm:$0xff] %v1673_v15  ;;  %v1818_v21 = vmul.f32 %v1757_v52, %v1673_v15 }
 0x235   : > { %v1792_v54 = vpop.permute.xlu2 %1791 }
 0x236   : > { %v1833_v57 = vadd.f32 %v1832_v34, %v1818_v21  ;;  %v1855_v38 = vmul.f32 %v1818_v21, %v1673_v15 }
 0x238   : > { %v1870_v46 = vadd.f32 %v1869_v39, %v1855_v38 }
 0x239   : > { %v1674_v36 = vpop.f32.mrf.mxu3  ;;  %v1787_v2 = vpop.permute.xlu1 %1786 }
 0x23a   : > { %v1675_v5 = vadd.f32 %v3199_v13, %v1674_v36  ;;  %v1897_v0 = vadd.f32 %v1896_v12, %v1787_v2 }
 0x23c   : > { %1707 = vst [vmem:[%s3208_s21 + $0x28] sm:$0xff] %v1675_v5  ;;  %v1819_v1 = vmul.f32 %v1762_v29, %v1675_v5  ;;  %v1898_v60 = vadd.f32 %v1897_v0, %v1792_v54  ;;  %v1797_v20 = vpop.permute.xlu0 %1796 }
 0x23d   : > { %v1807_v43 = vpop.permute.xlu2 %1806 }
 0x23e   : > { %v1834_v56 = vadd.f32 %v1833_v57, %v1819_v1  ;;  %v1856_v40 = vmul.f32 %v1819_v1, %v1675_v5  ;;  %v1899_v61 = vadd.f32 %v1898_v60, %v1797_v20 }
 0x240   : > { %v1871_v32 = vadd.f32 %v1870_v46, %v1856_v40 }
 0x241   : > { %v1802_v59 = vpop.permute.xlu1 %1801 }
 0x242   : > { %v1900_v7 = vadd.f32 %v1899_v61, %v1802_v59 }
 0x244   : > { %v1901_v38 = vadd.f32 %v1900_v7, %v1807_v43  ;;  %v1812_v29 = vpop.permute.xlu0 %1811 }
 0x24f   : > { %v1677_v27 = vpop.f32.mrf.mxu3 }
 0x250   : > { %v1678_v14 = vadd.f32 %v3199_v13, %v1677_v27 }
 0x252   : > { %1708 = vst [vmem:[%s3208_s21 + $0x30] sm:$0xff] %v1678_v14  ;;  %v1820_v47 = vmul.f32 %v1767_v9, %v1678_v14 }
 0x254   : > { %v1857_v44 = vmul.f32 %v1820_v47, %v1678_v14  ;;  %v1835_v41 = vadd.f32 %v1834_v56, %v1820_v47 }
 0x256   : > { %v1872_v63 = vadd.f32 %v1871_v32, %v1857_v44 }
 0x257   : > { %v1679_v31 = vpop.f32.mrf.mxu3 }
 0x258   : > { %v1680_v62 = vadd.f32 %v3199_v13, %v1679_v31  ;;  %v1902_v31 = vadd.f32 %v1901_v38, %v1812_v29 }
 0x25a   : > { %1709 = vst [vmem:[%s3208_s21 + $0x38] sm:$0xff] %v1680_v62  ;;  %v1821_v53 = vmul.f32 %v1772_v8, %v1680_v62  ;;  %v1903_v18 = vrot.slane %v1902_v31, 4 }
 0x25c   : > { %v1858_v23 = vmul.f32 %v1821_v53, %v1680_v62  ;;  %v1836_v34 = vadd.f32 %v1835_v41, %v1821_v53 }
 0x25e   : > { %v1873_v52 = vadd.f32 %v1872_v63, %v1858_v23 }
 0x25f   : > { %v1682_v19 = vpop.f32.mrf.mxu3 }
 0x260   : > { %v1683_v49 = vadd.f32 %v3199_v13, %v1682_v19 }
 0x262   : > { %1710 = vst [vmem:[%s3208_s21 + $0x40] sm:$0xff] %v1683_v49  ;;  %v1822_v28 = vmul.f32 %v1777_v6, %v1683_v49  ;;  %v1904_v6 = vadd.f32 %v1903_v18, %v1902_v31 }
 0x264   : > { %v1859_v3 = vmul.f32 %v1822_v28, %v1683_v49  ;;  %v1837_v35 = vadd.f32 %v1836_v34, %v1822_v28 }
 0x266   : > { %v1874_v57 = vadd.f32 %v1873_v52, %v1859_v3 }
 0x267   : > { %v1684_v37 = vpop.f32.mrf.mxu3 }
 0x268   : > { %v1685_v48 = vadd.f32 %v3199_v13, %v1684_v37 }
 0x26a   : > { %1711 = vst [vmem:[%s3208_s21 + $0x48] sm:$0xff] %v1685_v48  ;;  %v1823_v25 = vmul.f32 %v1782_v24, %v1685_v48 }
 0x26c   : > { %v1860_v15 = vmul.f32 %v1823_v25, %v1685_v48  ;;  %v1838_v36 = vadd.f32 %v1837_v35, %v1823_v25 }
 0x26e   : > { %v1875_v40 = vadd.f32 %v1874_v57, %v1860_v15 }
 0x26f   : > { %v1687_v42 = vpop.f32.mrf.mxu3 }
 0x270   : > { %v1688_v50 = vadd.f32 %v3199_v13, %v1687_v42 }
 0x272   : > { %1712 = vst [vmem:[%s3208_s21 + $0x50] sm:$0xff] %v1688_v50  ;;  %v1824_v39 = vmul.f32 %v1787_v2, %v1688_v50  ;;  %v1905_v2 = vrot.slane %v1904_v6, 2 }
 0x274   : > { %v1861_v5 = vmul.f32 %v1824_v39, %v1688_v50  ;;  %v1839_v32 = vadd.f32 %v1838_v36, %v1824_v39  ;;  %v1906_v47 = vadd.f32 %v1905_v2, %v1904_v6 }
 0x276   : > { %v1876_v62 = vadd.f32 %v1875_v40, %v1861_v5  ;;  %v1907_v44 = vrot.slane %v1906_v47, 1 }
 0x277   : > { %v1689_v55 = vpop.f32.mrf.mxu3 }
 0x278   : > { %v1690_v30 = vadd.f32 %v3199_v13, %v1689_v55 }
 0x27a   : > { %1713 = vst [vmem:[%s3208_s21 + $0x58] sm:$0xff] %v1690_v30  ;;  %v1825_v21 = vmul.f32 %v1792_v54, %v1690_v30 }
 0x27c   : > { %v1862_v27 = vmul.f32 %v1825_v21, %v1690_v30  ;;  %v1840_v58 = vadd.f32 %v1839_v32, %v1825_v21 }
 0x27e   : > { %v1877_v49 = vadd.f32 %v1876_v62, %v1862_v27 }
 0x27f   : > { %v1692_v10 = vpop.f32.mrf.mxu3 }
 0x280   : > { %v1693_v22 = vadd.f32 %v3199_v13, %v1692_v10 }
 0x282   : > { %1714 = vst [vmem:[%s3208_s21 + $0x60] sm:$0xff] %v1693_v22  ;;  %v1826_v1 = vmul.f32 %v1797_v20, %v1693_v22 }
 0x284   : > { %v1863_v19 = vmul.f32 %v1826_v1, %v1693_v22  ;;  %v1841_v16 = vadd.f32 %v1840_v58, %v1826_v1 }
 0x286   : > { %v1878_v45 = vadd.f32 %v1877_v49, %v1863_v19 }
 0x287   : > { %v1694_v33 = vpop.f32.mrf.mxu3 }
 0x288   : > { %v1695_v26 = vadd.f32 %v3199_v13, %v1694_v33 }
 0x28a   : > { %1715 = vst [vmem:[%s3208_s21 + $0x68] sm:$0xff] %v1695_v26  ;;  %v1827_v14 = vmul.f32 %v1802_v59, %v1695_v26  ;;  %v1908_v59 = vadd.f32 %v1907_v44, %v1906_v47 }
 0x28c   : > { %v1864_v37 = vmul.f32 %v1827_v14, %v1695_v26  ;;  %v1842_v9 = vadd.f32 %v1841_v16, %v1827_v14 }
 0x28e   : > { %v1879_v50 = vadd.f32 %v1878_v45, %v1864_v37 }
 0x28f   : > { %v1697_v46 = vpop.f32.mrf.mxu3 }
 0x290   : > { %v1698_v56 = vadd.f32 %v3199_v13, %v1697_v46 }
 0x292   : > { %1716 = vst [vmem:[%s3208_s21 + $0x70] sm:$0xff] %v1698_v56  ;;  %v1828_v4 = vmul.f32 %v1807_v43, %v1698_v56 }
 0x294   : > { %v1865_v11 = vmul.f32 %v1828_v4, %v1698_v56  ;;  %v1843_v8 = vadd.f32 %v1842_v9, %v1828_v4 }
 0x296   : > { %v1880_v51 = vadd.f32 %v1879_v50, %v1865_v11 }
 0x297   : > { %v1699_v48 = vpop.f32.mrf.mxu3 }
 0x298   : > { %v1700_v42 = vadd.f32 %v3199_v13, %v1699_v48 }
 0x29a   : > { %1717 = vst [vmem:[%s3208_s21 + $0x78] sm:$0xff] %v1700_v42  ;;  %v1829_v17 = vmul.f32 %v1812_v29, %v1700_v42 }
 0x29c   : > { %v1844_v55 = vadd.f32 %v1843_v8, %v1829_v17  ;;  %v1866_v30 = vmul.f32 %v1829_v17, %v1700_v42 }
 0x29e   : > { %v1845_v24 = vrot.slane %v1844_v55, 4  ;;  %v1881_v12 = vadd.f32 %v1880_v51, %v1866_v30 }
 0x2a0   : > { %v1846_v0 = vadd.f32 %v1845_v24, %v1844_v55  ;;  %v1882_v10 = vrot.slane %v1881_v12, 4 }
 0x2a2   : > { %v1847_v22 = vrot.slane %v1846_v0, 2  ;;  %v1883_v54 = vadd.f32 %v1882_v10, %v1881_v12 }
 0x2a4   : > { %v1848_v60 = vadd.f32 %v1847_v22, %v1846_v0  ;;  %v1884_v13 = vrot.slane %v1883_v54, 2 }
 0x2a6   : > { %v1849_v53 = vrot.slane %v1848_v60, 1  ;;  %v1885_v20 = vadd.f32 %v1884_v13, %v1883_v54 }
 0x2a8   : > { %v1886_v28 = vrot.slane %v1885_v20, 1  ;;  %v1850_v61 = vadd.f32 %v1849_v53, %v1848_v60 }
 0x2aa   : > { %v1887_v33 = vadd.f32 %v1886_v28, %v1885_v20 }
 0x2ac   : > { %v1910_v26 = vsel %vm1909_vm0, %v1850_v61, %v1887_v33 }
 0x2ad   : > { %v1912_v23 = vsel %vm1911_vm1, %v1910_v26, %v1908_v59 }
 0x2ae   : > { %v1914_v41 = vsel %vm1913_vm2, %v1912_v23, 0.0 }
 0x2af   : > { %1915 = vst [vmem:[%s393_s26] sm:$0xff] %v1914_v41 }
 0x2b0 PF: > { %s20_s30 = sadd.s32 1, %s2392_s30  }
 0x2b1   : > { %p17_p5 = scmp.ge.s32.totalorder %s20_s30, 4  }
 0x2b3   :  { %19 = sbr.rel (!%p17_p5) target bundleno = 1 (0x1), region = 100 }

// kernel: forward.14
= control target key start
LH: loop header
LB: loop body
LE: loop exit
PB: predicated region body
PF: predicated region fallthrough
CT: control target
= control target key end

     0   :  { %v2307_v0 = vmov 0   ;;  %vm654_vm7 = vcmask 1041408   ;;  %s2299_s1 = inlined_call_operand.vmem [shape: f32[256,1], index: 1, kind: input, shape index: {}]   ;;  %s2300_s2 = inlined_call_operand.vmem [shape: f32[256,1], index: 2, kind: input, shape index: {}]   ;;  %s2301_s3 = inlined_call_operand.vmem [shape: f32[2,256], index: 3, kind: input, shape index: {}]   ;;  %s2302_s4 = inlined_call_operand.vmem [shape: f32[256,2], index: 4, kind: input, shape index: {}]   ;;  %s2303_s0 = inlined_call_operand.vmem [shape: f32[256,128], index: 0, kind: input, shape index: {}]   ;;  %s2304_s6 = inlined_call_operand.vmem [shape: bf16[256,128], index: 6, kind: output, shape index: {0}]   ;;  %s2305_s5 = inlined_call_operand.vmem [shape: f32[2,256], index: 5, kind: input, shape index: {}]   ;;  %s2306_s7 = inlined_call_operand.vmem [shape: f32[2,256], index: 7, kind: output, shape index: {1}]  }
   0x1   :  { %1250 = vset.pattern.permute.xlu2 %v2307_v0  ;;  %1249 = vset.pattern.permute.xlu1 %v2307_v0  ;;  %v61_v1 = vld [vmem:[%s2299_s1 + $0x20] sm:$0xff]  ;;  %v59_v2 = vld [vmem:[%s2299_s1 + $0x10] sm:$0xff]  ;;  %v62_v4 = vld [vmem:[%s2299_s1 + $0x28] sm:$0xff] }
   0x2   :  { %v57_v3 = vld [vmem:[%s2299_s1] sm:$0xff]  ;;  %1248 = vset.pattern.permute.xlu0 %v2307_v0  ;;  %111 = vperm.xlu2 %1250, %v61_v1   ;;  %v60_v5 = vld [vmem:[%s2299_s1 + $0x18] sm:$0xff]  ;;  %v58_v6 = vld [vmem:[%s2299_s1 + $0x8] sm:$0xff] }
   0x3   :  { %101 = vperm.xlu1 %1249, %v59_v2   ;;  %91 = vperm.xlu0 %1248, %v57_v3   ;;  %v65_v7 = vld [vmem:[%s2299_s1 + $0x40] sm:$0xff]  ;;  %v64_v8 = vld [vmem:[%s2299_s1 + $0x38] sm:$0xff]  ;;  %v63_v9 = vld [vmem:[%s2299_s1 + $0x30] sm:$0xff] }
   0x4   :  { %v68_v10 = vld [vmem:[%s2299_s1 + $0x58] sm:$0xff]  ;;  %v67_v11 = vld [vmem:[%s2299_s1 + $0x50] sm:$0xff]  ;;  %v66_v12 = vld [vmem:[%s2299_s1 + $0x48] sm:$0xff] }
   0x5   :  { %v71_v13 = vld [vmem:[%s2299_s1 + $0x70] sm:$0xff]  ;;  %v70_v14 = vld [vmem:[%s2299_s1 + $0x68] sm:$0xff]  ;;  %v69_v15 = vld [vmem:[%s2299_s1 + $0x60] sm:$0xff] }
   0x6   :  { %v74_v16 = vld [vmem:[%s2299_s1 + $0x88] sm:$0xff]  ;;  %v73_v17 = vld [vmem:[%s2299_s1 + $0x80] sm:$0xff]  ;;  %v72_v18 = vld [vmem:[%s2299_s1 + $0x78] sm:$0xff] }
   0x7   :  { %v77_v19 = vld [vmem:[%s2299_s1 + $0xa0] sm:$0xff]  ;;  %v76_v20 = vld [vmem:[%s2299_s1 + $0x98] sm:$0xff]  ;;  %v75_v21 = vld [vmem:[%s2299_s1 + $0x90] sm:$0xff] }
   0x8   :  { %v80_v22 = vld [vmem:[%s2299_s1 + $0xb8] sm:$0xff]  ;;  %v79_v23 = vld [vmem:[%s2299_s1 + $0xb0] sm:$0xff]  ;;  %v78_v24 = vld [vmem:[%s2299_s1 + $0xa8] sm:$0xff] }
   0x9   :  { %v83_v25 = vld [vmem:[%s2299_s1 + $0xd0] sm:$0xff]  ;;  %v82_v26 = vld [vmem:[%s2299_s1 + $0xc8] sm:$0xff]  ;;  %v81_v27 = vld [vmem:[%s2299_s1 + $0xc0] sm:$0xff] }
   0xa   :  { %116 = vperm.xlu2 %1250, %v62_v4   ;;  %v86_v28 = vld [vmem:[%s2299_s1 + $0xe8] sm:$0xff]  ;;  %v85_v29 = vld [vmem:[%s2299_s1 + $0xe0] sm:$0xff]  ;;  %v84_v30 = vld [vmem:[%s2299_s1 + $0xd8] sm:$0xff] }
   0xb   :  { %106 = vperm.xlu1 %1249, %v60_v5   ;;  %96 = vperm.xlu0 %1248, %v58_v6   ;;  %v281_v31 = vld [vmem:[%s2300_s2] sm:$0xff]  ;;  %v88_v32 = vld [vmem:[%s2299_s1 + $0xf8] sm:$0xff]  ;;  %v87_v33 = vld [vmem:[%s2299_s1 + $0xf0] sm:$0xff] }
   0xc   :  { %v284_v34 = vld [vmem:[%s2300_s2 + $0x18] sm:$0xff]  ;;  %v283_v35 = vld [vmem:[%s2300_s2 + $0x10] sm:$0xff]  ;;  %v282_v36 = vld [vmem:[%s2300_s2 + $0x8] sm:$0xff] }
   0xd   :  { %v287_v38 = vld [vmem:[%s2300_s2 + $0x30] sm:$0xff]  ;;  %v286_v39 = vld [vmem:[%s2300_s2 + $0x28] sm:$0xff]  ;;  %v285_v40 = vld [vmem:[%s2300_s2 + $0x20] sm:$0xff] }
   0xe   :  { %v290_v42 = vld [vmem:[%s2300_s2 + $0x48] sm:$0xff]  ;;  %v289_v43 = vld [vmem:[%s2300_s2 + $0x40] sm:$0xff]  ;;  %v288_v44 = vld [vmem:[%s2300_s2 + $0x38] sm:$0xff] }
   0xf   :  { %v293_v46 = vld [vmem:[%s2300_s2 + $0x60] sm:$0xff]  ;;  %v292_v47 = vld [vmem:[%s2300_s2 + $0x58] sm:$0xff]  ;;  %v291_v48 = vld [vmem:[%s2300_s2 + $0x50] sm:$0xff] }
  0x10   :  { %v296_v52 = vld [vmem:[%s2300_s2 + $0x78] sm:$0xff]  ;;  %v295_v53 = vld [vmem:[%s2300_s2 + $0x70] sm:$0xff]  ;;  %v294_v54 = vld [vmem:[%s2300_s2 + $0x68] sm:$0xff] }
  0x11   :  { %v299_v58 = vld [vmem:[%s2300_s2 + $0x90] sm:$0xff]  ;;  %v298_v59 = vld [vmem:[%s2300_s2 + $0x88] sm:$0xff]  ;;  %v297_v60 = vld [vmem:[%s2300_s2 + $0x80] sm:$0xff] }
  0x12   :  { %131 = vperm.xlu2 %1250, %v65_v7   ;;  %v302_v1 = vld [vmem:[%s2300_s2 + $0xa8] sm:$0xff]  ;;  %v301_v2 = vld [vmem:[%s2300_s2 + $0xa0] sm:$0xff]  ;;  %v300_v3 = vld [vmem:[%s2300_s2 + $0x98] sm:$0xff] }
  0x13   :  { %126 = vperm.xlu1 %1249, %v64_v8   ;;  %121 = vperm.xlu0 %1248, %v63_v9   ;;  %v305_v7 = vld [vmem:[%s2300_s2 + $0xc0] sm:$0xff]  ;;  %v304_v8 = vld [vmem:[%s2300_s2 + $0xb8] sm:$0xff]  ;;  %v303_v9 = vld [vmem:[%s2300_s2 + $0xb0] sm:$0xff] }
  0x1a   :  { %146 = vperm.xlu2 %1250, %v68_v10  }
  0x1b   :  { %141 = vperm.xlu1 %1249, %v67_v11   ;;  %136 = vperm.xlu0 %1248, %v66_v12  }
  0x22   :  { %161 = vperm.xlu2 %1250, %v71_v13   ;;  %v308_v13 = vld [vmem:[%s2300_s2 + $0xd8] sm:$0xff] }
  0x23   :  { %156 = vperm.xlu1 %1249, %v70_v14   ;;  %151 = vperm.xlu0 %1248, %v69_v15   ;;  %v307_v14 = vld [vmem:[%s2300_s2 + $0xd0] sm:$0xff]  ;;  %v306_v15 = vld [vmem:[%s2300_s2 + $0xc8] sm:$0xff] }
  0x2a   :  { %176 = vperm.xlu2 %1250, %v74_v16   ;;  %v570_v16 = vld [vmem:[%s2301_s3] sm:$0xf] }
  0x2b   :  { %171 = vperm.xlu1 %1249, %v73_v17   ;;  %166 = vperm.xlu0 %1248, %v72_v18   ;;  %604 = vst [vmem:[#allocation1] ss:$4 sm:$0xff] %v570_v16 }
  0x32   :  { %191 = vperm.xlu2 %1250, %v77_v19  }
  0x33   :  { %186 = vperm.xlu1 %1249, %v76_v20   ;;  %181 = vperm.xlu0 %1248, %v75_v21   ;;  %v311_v20 = vld [vmem:[%s2300_s2 + $0xf0] sm:$0xff]  ;;  %v310_v21 = vld [vmem:[%s2300_s2 + $0xe8] sm:$0xff] }
  0x3a   :  { %206 = vperm.xlu2 %1250, %v80_v22   ;;  %v309_v22 = vld [vmem:[%s2300_s2 + $0xe0] sm:$0xff] }
  0x3b   :  { %201 = vperm.xlu1 %1249, %v79_v23   ;;  %196 = vperm.xlu0 %1248, %v78_v24   ;;  %v571_v23 = vld [vmem:[%s2302_s4] sm:$0xff] }
  0x3c   :  { %v1538_v24 = vld.sshfl [vmem:[#allocation1] sm:$0xff pattern:$0x73625140]  ;;  %vm676_vm0 = vcmp.gt.f32.partialorder %v571_v23, 0.0  ;;  %v28_v23 = vld [vmem:[%s2303_s0 + $0x18] sm:$0xff] }
  0x42   :  { %221 = vperm.xlu2 %1250, %v83_v25   ;;  %v1540_v25 = vld.sshfl [vmem:[#allocation1 + $0x8] sm:$0xff pattern:$0x73625140] }
  0x43   :  { %216 = vperm.xlu1 %1249, %v82_v26   ;;  %211 = vperm.xlu0 %1248, %v81_v27   ;;  %2332 = vst [vmem:[#allocation2_spill] sm:$0xff] %v1540_v25 }
  0x44   :  { %649 = vst [vmem:[#allocation1] ss:$4 sm:$0xff] %v570_v16 }
  0x4a   :  { %236 = vperm.xlu2 %1250, %v86_v28  }
  0x4b   :  { %231 = vperm.xlu1 %1249, %v85_v29   ;;  %226 = vperm.xlu0 %1248, %v84_v30   ;;  %v1549_v29 = vsel %vm676_vm0, 1, %v2307_v0  ;;  %v312_v30 = vld [vmem:[%s2300_s2 + $0xf8] sm:$0xff] }
  0x52   :  { %315 = vperm.xlu2 %1250, %v281_v31   ;;  %v573_v31 = vld [vmem:[%s2302_s4 + $0x10] sm:$0xff] }
  0x53   :  { %246 = vperm.xlu1 %1249, %v88_v32   ;;  %241 = vperm.xlu0 %1248, %v87_v33   ;;  %v572_v32 = vld [vmem:[%s2302_s4 + $0x8] sm:$0xff]  ;;  %vm678_vm1 = vcmp.gt.f32.partialorder %v573_v31, 0.0 }
  0x54   :  { %vm677_vm2 = vcmp.gt.f32.partialorder %v572_v32, 0.0  ;;  %v581_v32 = vld [vmem:[%s2302_s4 + $0x50] sm:$0xff] }
  0x55   :  { %vm686_vm10 = vcmp.gt.f32.partialorder %v581_v32, 0.0 }
  0x5a   :  { %330 = vperm.xlu2 %1250, %v284_v34  }
  0x5b   :  { %325 = vperm.xlu1 %1249, %v283_v35   ;;  %320 = vperm.xlu0 %1248, %v282_v36   ;;  %v1568_v36 = vsel %vm678_vm1, 1, %v2307_v0 }
  0x5c   :  { %v1409_v37 = vpop.permute.xlu2 %111 }
  0x62   :  { %345 = vperm.xlu2 %1250, %v287_v38   ;;  %v1571_v38 = vsel %vm677_vm2, 1, %v2307_v0 }
  0x63   :  { %340 = vperm.xlu1 %1249, %v286_v39   ;;  %335 = vperm.xlu0 %1248, %v285_v40   ;;  %v575_v39 = vld [vmem:[%s2302_s4 + $0x20] sm:$0xff]  ;;  %v574_v40 = vld [vmem:[%s2302_s4 + $0x18] sm:$0xff] }
  0x64   :  { %v1420_v41 = vpop.permute.xlu2 %116  ;;  %vm680_vm3 = vcmp.gt.f32.partialorder %v575_v39, 0.0  ;;  %vm679_vm4 = vcmp.gt.f32.partialorder %v574_v40, 0.0  ;;  %v580_v39 = vld [vmem:[%s2302_s4 + $0x48] sm:$0xff] }
  0x65   :  { %vm685_vm11 = vcmp.gt.f32.partialorder %v580_v39, 0.0 }
  0x6a   :  { %360 = vperm.xlu2 %1250, %v290_v42  }
  0x6b   :  { %355 = vperm.xlu1 %1249, %v289_v43   ;;  %350 = vperm.xlu0 %1248, %v288_v44  }
  0x6c   :  { %v1431_v45 = vpop.permute.xlu2 %131 }
  0x72   :  { %375 = vperm.xlu2 %1250, %v293_v46   ;;  %v1586_v46 = vsel %vm680_vm3, 1, %v2307_v0 }
  0x73   :  { %370 = vperm.xlu1 %1249, %v292_v47   ;;  %365 = vperm.xlu0 %1248, %v291_v48   ;;  %v1589_v47 = vsel %vm679_vm4, 1, %v2307_v0  ;;  %v577_v48 = vld [vmem:[%s2302_s4 + $0x30] sm:$0xff] }
  0x74   :  { %v1442_v49 = vpop.permute.xlu2 %146  ;;  %vm682_vm5 = vcmp.gt.f32.partialorder %v577_v48, 0.0 }
  0x75   :  { %v1444_v50 = vpop.permute.xlu1 %101  ;;  %v1446_v51 = vpop.permute.xlu0 %91 }
  0x7a   :  { %390 = vperm.xlu2 %1250, %v296_v52   ;;  %v576_v52 = vld [vmem:[%s2302_s4 + $0x28] sm:$0xff] }
  0x7b   :  { %385 = vperm.xlu1 %1249, %v295_v53   ;;  %380 = vperm.xlu0 %1248, %v294_v54   ;;  %vm681_vm6 = vcmp.gt.f32.partialorder %v576_v52, 0.0 }
  0x7c   :  { %v1457_v55 = vpop.permute.xlu2 %161 }
  0x7d   :  { %v1459_v56 = vpop.permute.xlu1 %106  ;;  %v1461_v57 = vpop.permute.xlu0 %96 }
  0x7e   :  { %v252_v52 = vmul.f32 %v1459_v56, %v28_v23  ;;  %v40_v56 = vld [vmem:[%s2303_s0 + $0x78] sm:$0xff]  ;;  %v30_v23 = vld [vmem:[%s2303_s0 + $0x28] sm:$0xff] }
  0x82   :  { %405 = vperm.xlu2 %1250, %v299_v58  }
  0x83   :  { %400 = vperm.xlu1 %1249, %v298_v59   ;;  %395 = vperm.xlu0 %1248, %v297_v60   ;;  %v1606_v59 = vsel %vm682_vm5, 1, %v2307_v0  ;;  %v1609_v60 = vsel %vm681_vm6, 1, %v2307_v0 }
  0x84   :  { %v1472_v61 = vpop.permute.xlu2 %176 }
  0x85   :  { %v1474_v62 = vpop.permute.xlu1 %126  ;;  %v1476_v63 = vpop.permute.xlu0 %121 }
  0x8a   :  { %420 = vperm.xlu2 %1250, %v302_v1   ;;  %v579_v1 = vld [vmem:[%s2302_s4 + $0x40] sm:$0xff] }
  0x8b   :  { %415 = vperm.xlu1 %1249, %v301_v2   ;;  %410 = vperm.xlu0 %1248, %v300_v3   ;;  %v578_v2 = vld [vmem:[%s2302_s4 + $0x38] sm:$0xff]  ;;  %v650_v3 = vld.sshfl [vmem:[#allocation1] sm:$0xff pattern:$0x73625140]  ;;  %vm684_vm8 = vcmp.gt.f32.partialorder %v579_v1, 0.0 }
  0x8c   :  { %v1487_v4 = vpop.permute.xlu2 %191  ;;  %vm683_vm9 = vcmp.gt.f32.partialorder %v578_v2, 0.0  ;;  %v1628_v16 = vsel %vm684_vm8, 1, %v2307_v0 }
  0x8d   :  { %v1489_v5 = vpop.permute.xlu1 %141  ;;  %v1491_v6 = vpop.permute.xlu0 %136 }
  0x92   :  { %435 = vperm.xlu2 %1250, %v305_v7   ;;  %v651_v7 = vld.sshfl [vmem:[#allocation1 + $0x8] sm:$0xff pattern:$0x73625140] }
  0x93   :  { %430 = vperm.xlu1 %1249, %v304_v8   ;;  %425 = vperm.xlu0 %1248, %v303_v9  }
  0x94   :  { %v1502_v10 = vpop.permute.xlu2 %206 }
  0x95   :  { %v1504_v11 = vpop.permute.xlu1 %156  ;;  %v1506_v12 = vpop.permute.xlu0 %151 }
  0x9a   :  { %450 = vperm.xlu2 %1250, %v308_v13  }
  0x9b   :  { %445 = vperm.xlu1 %1249, %v307_v14   ;;  %440 = vperm.xlu0 %1248, %v306_v15   ;;  %v655_v14 = vsel %vm654_vm7, %v650_v3, 0.0  ;;  %v656_v15 = vsel %vm654_vm7, %v651_v7, 0.0 }
  0x9c   :  { %v1520_v17 = vpop.permute.xlu2 %221  ;;  %v657_v31 = vadd.f32 %v656_v15, %v655_v14 }
  0x9d   :  { %v1522_v18 = vpop.permute.xlu1 %171  ;;  %v1524_v19 = vpop.permute.xlu0 %166 }
  0x9e   :  { %v264_v32 = vmul.f32 %v1524_v19, %v40_v56 }
  0xa2   :  { %465 = vperm.xlu2 %1250, %v311_v20   ;;  %v27_v20 = vld [vmem:[%s2303_s0 + $0x10] sm:$0xff] }
  0xa3   :  { %460 = vperm.xlu1 %1249, %v310_v21   ;;  %455 = vperm.xlu0 %1248, %v309_v22   ;;  %v25_v21 = vld [vmem:[%s2303_s0] sm:$0xff]  ;;  %v1637_v22 = vsel %vm683_vm9, 1, %v2307_v0  ;;  %v251_v40 = vmul.f32 %v1444_v50, %v27_v20 }
  0xa4   :  { %v1542_v26 = vpop.permute.xlu2 %236  ;;  %v249_v48 = vmul.f32 %v1446_v51, %v25_v21  ;;  %v1669_v51 = vsel %vm686_vm10, 1, %v2307_v0  ;;  %v29_v21 = vld [vmem:[%s2303_s0 + $0x20] sm:$0xff] }
  0xa5   :  { %v1544_v27 = vpop.permute.xlu1 %186  ;;  %v1546_v28 = vpop.permute.xlu0 %181  ;;  %v253_v39 = vmul.f32 %v1409_v37, %v29_v21  ;;  %v33_v37 = vld [vmem:[%s2303_s0 + $0x40] sm:$0xff]  ;;  %v31_v21 = vld [vmem:[%s2303_s0 + $0x30] sm:$0xff] }
  0xaa   :  { %741 = vperm.xlu2 %1250, %v1549_v29  }
  0xab   :  { %470 = vperm.xlu0 %1248, %v312_v30   ;;  %v26_v30 = vld [vmem:[%s2303_s0 + $0x8] sm:$0xff] }
  0xac   :  { %v1561_v33 = vpop.permute.xlu2 %315  ;;  %v250_v1 = vmul.f32 %v1461_v57, %v26_v30  ;;  %v584_v30 = vld [vmem:[%s2302_s4 + $0x68] sm:$0xff] }
  0xad   :  { %v1563_v34 = vpop.permute.xlu1 %201  ;;  %v1565_v35 = vpop.permute.xlu0 %196  ;;  %v1660_v14 = vmul.f32 %v1561_v33, %v249_v48  ;;  %vm689_vm12 = vcmp.gt.f32.partialorder %v584_v30, 0.0  ;;  %v586_v30 = vld [vmem:[%s2302_s4 + $0x78] sm:$0xff] }
  0xae   :  { %v1712_v56 = vsel %vm689_vm12, 1, %v2307_v0  ;;  %vm691_vm14 = vcmp.gt.f32.partialorder %v586_v30, 0.0 }
  0xaf   :  { %2334 = vst [vmem:[#allocation4_spill] sm:$0xff] %v1712_v56 }
  0xb2   :  { %747 = vperm.xlu2 %1250, %v1568_v36  }
  0xb3   :  { %744 = vperm.xlu0 %1248, %v1571_v38  }
  0xb4   :  { %v331_v42 = vpop.permute.xlu2 %330 }
  0xb5   :  { %v1581_v43 = vpop.permute.xlu1 %216  ;;  %v1583_v44 = vpop.permute.xlu0 %211  ;;  %v1662_v15 = vmul.f32 %v331_v42, %v252_v52  ;;  %v1679_v42 = vsel %vm685_vm11, 1, %v2307_v0 }
  0xba   :  { %753 = vperm.xlu2 %1250, %v1586_v46  }
  0xbb   :  { %750 = vperm.xlu0 %1248, %v1589_v47  }
  0xbc   :  { %v1599_v53 = vpop.permute.xlu2 %345 }
  0xbd   :  { %v1601_v54 = vpop.permute.xlu1 %231  ;;  %v1603_v58 = vpop.permute.xlu0 %226 }
  0xc2   :  { %759 = vperm.xlu2 %1250, %v1606_v59  }
  0xc3   :  { %756 = vperm.xlu0 %1248, %v1609_v60  }
  0xc4   :  { %v1619_v8 = vpop.permute.xlu2 %360 }
  0xc5   :  { %v1621_v9 = vpop.permute.xlu1 %246  ;;  %v1623_v13 = vpop.permute.xlu0 %241 }
  0xca   :  { %765 = vperm.xlu2 %1250, %v1628_v16  }
  0xcb   :  { %762 = vperm.xlu0 %1248, %v1637_v22  }
  0xcc   :  { %v1657_v2 = vpop.permute.xlu2 %375 }
  0xcd   :  { %658 = vadd.xlane.f32.xlu1 %v657_v31  ;;  %v326_v3 = vpop.permute.xlu1 %325  ;;  %v321_v7 = vpop.permute.xlu0 %320  ;;  %v583_v31 = vld [vmem:[%s2302_s4 + $0x60] sm:$0xff] }
  0xce   :  { %v1664_v50 = vmul.f32 %v326_v3, %v251_v40  ;;  %v1666_v20 = vmul.f32 %v321_v7, %v250_v1  ;;  %v254_v40 = vmul.f32 %v1420_v41, %v30_v23  ;;  %vm688_vm13 = vcmp.gt.f32.partialorder %v583_v31, 0.0  ;;  %v32_v41 = vld [vmem:[%s2303_s0 + $0x38] sm:$0xff]  ;;  %v34_v23 = vld [vmem:[%s2303_s0 + $0x48] sm:$0xff]  ;;  %v585_v31 = vld [vmem:[%s2302_s4 + $0x70] sm:$0xff] }
  0xcf   :  { %vm690_vm15 = vcmp.gt.f32.partialorder %v585_v31, 0.0  ;;  %v588_v31 = vld [vmem:[%s2302_s4 + $0x88] sm:$0xff] }
  0xd0   :  { %v1159_v57 = vpack.c.bf16 %v1662_v15, %v1664_v50  ;;  %v1154_v33 = vpack.c.bf16 %v1666_v20, %v1660_v14  ;;  %vm693_vm1 = vcmp.gt.f32.partialorder %v588_v31, 0.0  ;;  %v38_v31 = vld [vmem:[%s2303_s0 + $0x68] sm:$0xff] }
  0xd2   :  { %1231 = vst [vmem:[%s2304_s6 + $0x8] sm:$0xff] %v1159_v57   ;;  %771 = vperm.xlu2 %1250, %v1669_v51  }
  0xd3   :  { %1155 = vst [vmem:[%s2304_s6] sm:$0xff] %v1154_v33   ;;  %768 = vperm.xlu0 %1248, %v1679_v42   ;;  %v1723_v33 = vsel %vm688_vm13, 1, %v2307_v0  ;;  %v582_v0 = vld [vmem:[%s2302_s4 + $0x58] sm:$0xff] }
  0xd4   :  { %v391_v48 = vpop.permute.xlu2 %390  ;;  %2335 = vst [vmem:[#allocation5_spill] sm:$0xff] %v1723_v33  ;;  %vm687_vm0 = vcmp.gt.f32.partialorder %v582_v0, 0.0  ;;  %v587_v0 = vld [vmem:[%s2302_s4 + $0x80] sm:$0xff] }
  0xd5   :  { %v1704_v52 = vmul.f32 %v391_v48, %v264_v32  ;;  %v341_v1 = vpop.permute.xlu1 %340  ;;  %v336_v3 = vpop.permute.xlu0 %335  ;;  %v257_v32 = vmul.f32 %v1431_v45, %v33_v37  ;;  %v258_v48 = vmul.f32 %v1491_v6, %v34_v23  ;;  %v2336_v6 = vmov 0  }
  0xd6   :  { %v1706_v7 = vmul.f32 %v341_v1, %v254_v40  ;;  %v1708_v19 = vmul.f32 %v336_v3, %v253_v39  ;;  %v256_v39 = vmul.f32 %v1474_v62, %v32_v41  ;;  %v255_v40 = vmul.f32 %v1476_v63, %v31_v21 }
  0xd7   :  { %2333 = vst [vmem:[#allocation3_spill] sm:$0xff] %v1704_v52  ;;  %609 = vmatpush.msra.mxu0 %v1704_v52  ;;  %v1755_v37 = vmul.f32 %v1619_v8, %v258_v48  ;;  %v1762_v41 = vsel %vm691_vm14, 1, %v2336_v6  ;;  %v1769_v30 = vsel %vm690_vm15, 1, %v2336_v6  ;;  %v35_v8 = vld [vmem:[%s2303_s0 + $0x50] sm:$0xff]  ;;  %vm692_vm2 = vcmp.gt.f32.partialorder %v587_v0, 0.0  ;;  %v37_v0 = vld [vmem:[%s2303_s0 + $0x60] sm:$0xff] }
  0xd8   :  { %v1164_v57 = vpack.c.bf16 %v1706_v7, %v1708_v19  ;;  %v1752_v45 = vmul.f32 %v1599_v53, %v255_v40  ;;  %2337 = vst [vmem:[#allocation6_spill] sm:$0xff] %v1762_v41  ;;  %v36_v53 = vld [vmem:[%s2303_s0 + $0x58] sm:$0xff]  ;;  %v259_v40 = vmul.f32 %v1489_v5, %v35_v8  ;;  %v39_v5 = vld [vmem:[%s2303_s0 + $0x70] sm:$0xff]  ;;  %v1815_v8 = vsel %vm692_vm2, 1, %v2336_v6 }
  0xd9   :  { %2338 = vst [vmem:[#allocation7_spill] sm:$0xff] %v1769_v30 }
  0xda   :  { %1232 = vst [vmem:[%s2304_s6 + $0x10] sm:$0xff] %v1164_v57   ;;  %780 = vperm.xlu2 %1250, %v1712_v56  }
  0xdb   :  { %777 = vperm.xlu0 %1248, %v1723_v33   ;;  %2341 = vst [vmem:[#allocation10_spill] sm:$0xff] %v1815_v8  ;;  %v592_v33 = vld [vmem:[%s2302_s4 + $0xa8] sm:$0xff] }
  0xdc   :  { %v1746_v1 = vpop.permute.xlu2 %405  ;;  %vm697_vm6 = vcmp.gt.f32.partialorder %v592_v33, 0.0  ;;  %v593_v33 = vld [vmem:[%s2302_s4 + $0xb0] sm:$0xff] }
  0xdd   :  { %v356_v3 = vpop.permute.xlu1 %355  ;;  %v351_v57 = vpop.permute.xlu0 %350  ;;  %vm698_vm9 = vcmp.gt.f32.partialorder %v593_v33, 0.0  ;;  %v44_v33 = vld [vmem:[%s2303_s0 + $0x98] sm:$0xff] }
  0xde   :  { %v1757_v62 = vmul.f32 %v356_v3, %v257_v32  ;;  %v1759_v63 = vmul.f32 %v351_v57, %v256_v39  ;;  %v1792_v32 = vsel %vm687_vm0, 1, %v2336_v6  ;;  %v260_v39 = vmul.f32 %v1442_v49, %v36_v53 }
  0xdf   :  { %v1807_v49 = vsel %vm693_vm1, 1, %v2336_v6 }
  0xe0   :  { %v1174_v21 = vpack.c.bf16 %v1755_v37, %v1757_v62  ;;  %v1169_v23 = vpack.c.bf16 %v1759_v63, %v1752_v45  ;;  %2340 = vst [vmem:[#allocation9_spill] sm:$0xff] %v1807_v49 }
  0xe2   :  { %1234 = vst [vmem:[%s2304_s6 + $0x20] sm:$0xff] %v1174_v21   ;;  %786 = vperm.xlu2 %1250, %v1762_v41   ;;  %v589_v21 = vld [vmem:[%s2302_s4 + $0x90] sm:$0xff]  ;;  %v261_v41 = vmul.f32 %v1506_v12, %v37_v0  ;;  %v1886_v0 = vsel %vm697_vm6, 1, %v2336_v6 }
  0xe3   :  { %1233 = vst [vmem:[%s2304_s6 + $0x18] sm:$0xff] %v1169_v23   ;;  %783 = vperm.xlu0 %1248, %v1769_v30   ;;  %vm694_vm3 = vcmp.gt.f32.partialorder %v589_v21, 0.0  ;;  %v262_v21 = vmul.f32 %v1504_v11, %v38_v31  ;;  %v594_v31 = vld [vmem:[%s2302_s4 + $0xb8] sm:$0xff] }
  0xe4   :  { %v1796_v48 = vpop.permute.xlu2 %420  ;;  %2344 = vst [vmem:[#allocation13_spill] sm:$0xff] %v1886_v0  ;;  %vm699_vm8 = vcmp.gt.f32.partialorder %v594_v31, 0.0  ;;  %v1915_v31 = vsel %vm698_vm9, 1, %v2336_v6 }
  0xe5   :  { %v371_v3 = vpop.permute.xlu1 %370  ;;  %v366_v57 = vpop.permute.xlu0 %365  ;;  %2346 = vst [vmem:[#allocation15_spill] sm:$0xff] %v1915_v31 }
  0xe6   :  { %v1801_v23 = vmul.f32 %v371_v3, %v260_v39  ;;  %v1803_v25 = vmul.f32 %v366_v57, %v259_v40  ;;  %774 = vperm.xlu1 %1249, %v1792_v32   ;;  %v591_v39 = vld [vmem:[%s2302_s4 + $0xa0] sm:$0xff]  ;;  %v590_v40 = vld [vmem:[%s2302_s4 + $0x98] sm:$0xff]  ;;  %v1835_v3 = vsel %vm694_vm3, 1, %v2336_v6  ;;  %v263_v57 = vmul.f32 %v1457_v55, %v39_v5 }
  0xe7   :  { %vm696_vm4 = vcmp.gt.f32.partialorder %v591_v39, 0.0  ;;  %vm695_vm5 = vcmp.gt.f32.partialorder %v590_v40, 0.0 }
  0xe8   :  { %2339 = vst [vmem:[#allocation8_spill] sm:$0xff] %v1801_v23  ;;  %v1179_v53 = vpack.c.bf16 %v1801_v23, %v1803_v25  ;;  %v1854_v11 = vsel %vm696_vm4, 1, %v2336_v6 }
  0xea   :  { %1235 = vst [vmem:[%s2304_s6 + $0x28] sm:$0xff] %v1179_v53   ;;  %792 = vperm.xlu2 %1250, %v1807_v49  }
  0xeb   :  { %789 = vperm.xlu0 %1248, %v1815_v8   ;;  %v1846_v8 = vmul.f32 %v1657_v2, %v261_v41  ;;  %v1862_v2 = vsel %vm695_vm5, 1, %v2336_v6  ;;  %v42_v41 = vld [vmem:[%s2303_s0 + $0x88] sm:$0xff] }
  0xec   :  { %v1840_v30 = vpop.permute.xlu2 %435  ;;  %v266_v39 = vmul.f32 %v1472_v61, %v42_v41  ;;  %v1903_v61 = vsel %vm699_vm8, 1, %v2336_v6  ;;  %v43_v41 = vld [vmem:[%s2303_s0 + $0x90] sm:$0xff] }
  0xed   :  { %v386_v53 = vpop.permute.xlu1 %385  ;;  %v381_v49 = vpop.permute.xlu0 %380  ;;  %2342 = vst [vmem:[#allocation11_spill] sm:$0xff] %v1846_v8 }
  0xee   :  { %v1848_v56 = vmul.f32 %v386_v53, %v263_v57  ;;  %v1850_v55 = vmul.f32 %v381_v49, %v262_v21  ;;  %795 = vperm.xlu1 %1249, %v1835_v3   ;;  %v41_v49 = vld [vmem:[%s2303_s0 + $0x80] sm:$0xff]  ;;  %2345 = vst [vmem:[#allocation14_spill] sm:$0xff] %v1903_v61 }
  0xef   :  { %v265_v40 = vmul.f32 %v1522_v18, %v41_v49  ;;  %v45_v18 = vld [vmem:[%s2303_s0 + $0xa0] sm:$0xff] }
  0xf0   :  { %2343 = vst [vmem:[#allocation12_spill] sm:$0xff] %v1848_v56  ;;  %v1189_v12 = vpack.c.bf16 %v1704_v52, %v1848_v56  ;;  %v1184_v5 = vpack.c.bf16 %v1850_v55, %v1846_v8  ;;  %610 = vmatpush.msra.mxu0 %v1848_v56  ;;  %v268_v56 = vmul.f32 %v1544_v27, %v44_v33 }
  0xf2   :  { %1237 = vst [vmem:[%s2304_s6 + $0x38] sm:$0xff] %v1189_v12   ;;  %611 = vmatpush.msra.mxu0 %v1850_v55  ;;  %801 = vperm.xlu2 %1250, %v1854_v11   ;;  %v595_v12 = vld [vmem:[%s2302_s4 + $0xc0] sm:$0xff] }
  0xf3   :  { %1236 = vst [vmem:[%s2304_s6 + $0x30] sm:$0xff] %v1184_v5   ;;  %798 = vperm.xlu0 %1248, %v1862_v2   ;;  %vm700_vm10 = vcmp.gt.f32.partialorder %v595_v12, 0.0 }
  0xf4   :  { %612 = vmatpush.msra.mxu0 %v1846_v8  ;;  %v1891_v57 = vpop.permute.xlu2 %450  ;;  %v1937_v12 = vsel %vm700_vm10, 1, %v2336_v6  ;;  %v598_v8 = vld [vmem:[%s2302_s4 + $0xd8] sm:$0xff] }
  0xf5   :  { %v401_v21 = vpop.permute.xlu1 %400  ;;  %v396_v53 = vpop.permute.xlu0 %395  ;;  %2347 = vst [vmem:[#allocation16_spill] sm:$0xff] %v1937_v12  ;;  %vm703_vm13 = vcmp.gt.f32.partialorder %v598_v8, 0.0  ;;  %v599_v8 = vld [vmem:[%s2302_s4 + $0xe0] sm:$0xff] }
  0xf6   :  { %v1896_v5 = vmul.f32 %v401_v21, %v266_v39  ;;  %v1898_v52 = vmul.f32 %v396_v53, %v265_v40  ;;  %804 = vperm.xlu1 %1249, %v1886_v0   ;;  %613 = vmatpush.msra.mxu0 %v1801_v23  ;;  %v46_v39 = vld [vmem:[%s2303_s0 + $0xa8] sm:$0xff]  ;;  %v597_v40 = vld [vmem:[%s2302_s4 + $0xd0] sm:$0xff]  ;;  %v267_v53 = vmul.f32 %v1546_v28, %v43_v41  ;;  %vm704_vm15 = vcmp.gt.f32.partialorder %v599_v8, 0.0  ;;  %v49_v8 = vld [vmem:[%s2303_s0 + $0xc0] sm:$0xff] }
  0xf7   :  { %v596_v21 = vld [vmem:[%s2302_s4 + $0xc8] sm:$0xff]  ;;  %v269_v23 = vmul.f32 %v1487_v4, %v45_v18  ;;  %vm702_vm11 = vcmp.gt.f32.partialorder %v597_v40, 0.0  ;;  %v1993_v40 = vsel %vm703_vm13, 1, %v2336_v6 }
  0xf8   :  { %v1194_v49 = vpack.c.bf16 %v1896_v5, %v1898_v52  ;;  %614 = vmatpush.msra.mxu0 %v1803_v25  ;;  %v1946_v0 = vmul.f32 %v1746_v1, %v267_v53  ;;  %vm701_vm12 = vcmp.gt.f32.partialorder %v596_v21, 0.0  ;;  %v1961_v1 = vsel %vm702_vm11, 1, %v2336_v6  ;;  %2350 = vst [vmem:[#allocation19_spill] sm:$0xff] %v1993_v40 }
  0xf9   :  { %2348 = vst [vmem:[#allocation17_spill] sm:$0xff] %v1961_v1 }
  0xfa   :  { %1238 = vst [vmem:[%s2304_s6 + $0x40] sm:$0xff] %v1194_v49   ;;  %615 = vmatpush.msra.mxu0 %v1755_v37  ;;  %810 = vperm.xlu2 %1250, %v1903_v61   ;;  %v270_v49 = vmul.f32 %v1565_v35, %v46_v39  ;;  %v600_v39 = vld [vmem:[%s2302_s4 + $0xe8] sm:$0xff] }
  0xfb   :  { %807 = vperm.xlu0 %1248, %v1915_v31   ;;  %vm705_vm14 = vcmp.gt.f32.partialorder %v600_v39, 0.0  ;;  %v50_v39 = vld [vmem:[%s2303_s0 + $0xc8] sm:$0xff] }
  0xfc   :  { %616 = vmatpush.msra.mxu0 %v1757_v62  ;;  %v1943_v61 = vpop.permute.xlu2 %465  ;;  %v1952_v4 = vmul.f32 %v1796_v48, %v270_v49  ;;  %v1969_v48 = vsel %vm701_vm12, 1, %v2336_v6 }
  0xfd   :  { %v416_v28 = vpop.permute.xlu1 %415  ;;  %v411_v41 = vpop.permute.xlu0 %410  ;;  %2349 = vst [vmem:[#allocation18_spill] sm:$0xff] %v1969_v48 }
  0xfe   :  { %v1954_v27 = vmul.f32 %v416_v28, %v269_v23  ;;  %v1956_v35 = vmul.f32 %v411_v41, %v268_v56  ;;  %813 = vperm.xlu1 %1249, %v1937_v12   ;;  %617 = vmatpush.msra.mxu0 %v1759_v63  ;;  %v48_v56 = vld [vmem:[%s2303_s0 + $0xb8] sm:$0xff]  ;;  %v47_v23 = vld [vmem:[%s2303_s0 + $0xb0] sm:$0xff] }
  0xff   :  { %v272_v21 = vmul.f32 %v1502_v10, %v48_v56  ;;  %v271_v53 = vmul.f32 %v1563_v34, %v47_v23  ;;  %v2008_v10 = vsel %vm705_vm14, 1, %v2336_v6  ;;  %v51_v34 = vld [vmem:[%s2303_s0 + $0xd0] sm:$0xff]  ;;  %v2017_v23 = vsel %vm704_vm15, 1, %v2336_v6 }
 0x100   :  { %v1204_v18 = vpack.c.bf16 %v1952_v4, %v1954_v27  ;;  %v1199_v33 = vpack.c.bf16 %v1956_v35, %v1946_v0  ;;  %618 = vmatpush.msra.mxu0 %v1752_v45  ;;  %2351 = vst [vmem:[#allocation20_spill] sm:$0xff] %v2008_v10 }
 0x101   :  { %2352 = vst [vmem:[#allocation21_spill] sm:$0xff] %v2017_v23 }
 0x102   :  { %1240 = vst [vmem:[%s2304_s6 + $0x50] sm:$0xff] %v1204_v18   ;;  %619 = vmatpush.msra.mxu0 %v1706_v7  ;;  %819 = vperm.xlu2 %1250, %v1961_v1   ;;  %v601_v18 = vld [vmem:[%s2302_s4 + $0xf0] sm:$0xff] }
 0x103   :  { %1239 = vst [vmem:[%s2304_s6 + $0x48] sm:$0xff] %v1199_v33   ;;  %816 = vperm.xlu0 %1248, %v1969_v48   ;;  %vm706_vm0 = vcmp.gt.f32.partialorder %v601_v18, 0.0  ;;  %v274_v18 = vmul.f32 %v1581_v43, %v50_v39 }
 0x104   :  { %620 = vmatpush.msra.mxu0 %v1708_v19  ;;  %v742_v49 = vpop.permute.xlu2 %741 }
 0x105   :  { %v431_v28 = vpop.permute.xlu1 %430  ;;  %v426_v41 = vpop.permute.xlu0 %425  ;;  %vm836_vm2 = vcmp.eq.s32.totalorder %v742_v49, 1 }
 0x106   :  { %v2001_v33 = vmul.f32 %v431_v28, %v272_v21  ;;  %v2003_v1 = vmul.f32 %v426_v41, %v271_v53  ;;  %822 = vperm.xlu1 %1249, %v1993_v40   ;;  %621 = vmatpush.msra.mxu0 %v1662_v15  ;;  %v52_v21 = vld [vmem:[%s2303_s0 + $0xd8] sm:$0xff]  ;;  %v2038_v28 = vsel %vm706_vm0, 1, %v2336_v6  ;;  %v275_v41 = vmul.f32 %v1520_v17, %v51_v34 }
 0x107   :  { %v602_v53 = vld [vmem:[%s2302_s4 + $0xf8] sm:$0xff]  ;;  %v273_v40 = vmul.f32 %v1583_v44, %v49_v8  ;;  %v868_v8 = vsel %vm836_vm2, %v1660_v14, -1e+30 }
 0x108   :  { %v1209_v56 = vpack.c.bf16 %v2001_v33, %v2003_v1  ;;  %622 = vmatpush.msra.mxu0 %v1664_v50  ;;  %vm707_vm1 = vcmp.gt.f32.partialorder %v602_v53, 0.0 }
 0x10a   :  { %1241 = vst [vmem:[%s2304_s6 + $0x58] sm:$0xff] %v1209_v56   ;;  %623 = vmatpush.msra.mxu0 %v1666_v20  ;;  %828 = vperm.xlu2 %1250, %v2008_v10   ;;  %v276_v56 = vmul.f32 %v1603_v58, %v52_v21 }
 0x10b   :  { %825 = vperm.xlu0 %1248, %v2017_v23   ;;  %v2047_v23 = vmul.f32 %v1840_v30, %v273_v40  ;;  %v54_v30 = vld [vmem:[%s2303_s0 + $0xe8] sm:$0xff] }
 0x10c   :  { %624 = vmatpush.msra.mxu0 %v1660_v14  ;;  %v748_v10 = vpop.permute.xlu2 %747  ;;  %v2050_v31 = vmul.f32 %v1891_v57, %v276_v56  ;;  %v53_v57 = vld [vmem:[%s2303_s0 + $0xe0] sm:$0xff] }
 0x10d   :  { %v446_v12 = vpop.permute.xlu1 %445  ;;  %v441_v48 = vpop.permute.xlu0 %440  ;;  %625 = vmatmul.f32.vlgmr.msra.gmra.mxu0 %v1538_v24  ;;  %v2062_v24 = vsel %vm707_vm1, 1, %v2336_v6  ;;  %v278_v6 = vmul.f32 %v1542_v26, %v54_v30  ;;  %vm838_vm4 = vcmp.eq.s32.totalorder %v748_v10, 1 }
 0x10e   :  { %v2052_v17 = vmul.f32 %v446_v12, %v275_v41  ;;  %v2054_v43 = vmul.f32 %v441_v48, %v274_v18  ;;  %831 = vperm.xlu1 %1249, %v2038_v28   ;;  %v1257_v12 = vmov 1   ;;  %v277_v48 = vmul.f32 %v1601_v54, %v53_v57  ;;  %v55_v54 = vld [vmem:[%s2303_s0 + $0xf0] sm:$0xff] }
 0x10f   :  { %v279_v18 = vmul.f32 %v1623_v13, %v55_v54  ;;  %v870_v30 = vsel %vm838_vm4, %v1664_v50, -1e+30  ;;  %v2358_v54 = vld [vmem:[#allocation2_spill] sm:$0xff] }
 0x110   :  { %v1219_v44 = vpack.c.bf16 %v2050_v31, %v2052_v17  ;;  %v1214_v58 = vpack.c.bf16 %v2054_v43, %v2047_v23 }
 0x112   :  { %1243 = vst [vmem:[%s2304_s6 + $0x68] sm:$0xff] %v1219_v44   ;;  %1251 = vset.pattern.permute.xlu2 %v1257_v12 }
 0x113   :  { %1242 = vst [vmem:[%s2304_s6 + $0x60] sm:$0xff] %v1214_v58   ;;  %834 = vperm.xlu0 %1248, %v2062_v24   ;;  %938 = vperm.xlu2 %1251, %v1549_v29   ;;  %v56_v29 = vld [vmem:[%s2303_s0 + $0xf8] sm:$0xff]  ;;  %v2103_v58 = vmul.f32 %v1943_v61, %v279_v18  ;;  %v2359_v18 = vld [vmem:[#allocation9_spill] sm:$0xff] }
 0x114   :  { %v754_v40 = vpop.permute.xlu2 %753 }
 0x115   :  { %vm840_vm3 = vcmp.eq.s32.totalorder %v754_v40, 1  ;;  %v461_v34 = vpop.permute.xlu1 %460  ;;  %v456_v39 = vpop.permute.xlu0 %455  ;;  %v2354_v40 = vld [vmem:[#allocation5_spill] sm:$0xff] }
 0x116   :  { %v872_v49 = vsel %vm840_vm3, %v1708_v19, -1e+30  ;;  %v2082_v21 = vmul.f32 %v461_v34, %v278_v6  ;;  %v2084_v53 = vmul.f32 %v456_v39, %v277_v48  ;;  %1252 = vset.pattern.permute.xlu1 %v1257_v12  ;;  %v2356_v39 = vld [vmem:[#allocation10_spill] sm:$0xff] }
 0x117   :  { %v900_v41 = vmax.f32 %v868_v8, %v872_v49  ;;  %941 = vperm.xlu1 %1252, %v1571_v38   ;;  %v280_v38 = vmul.f32 %v1621_v9, %v56_v29  ;;  %v2357_v29 = vld [vmem:[#allocation6_spill] sm:$0xff] }
 0x118   :  { %v1224_v26 = vpack.c.bf16 %v2082_v21, %v2084_v53 }
 0x11a   :  { %1244 = vst [vmem:[%s2304_s6 + $0x70] sm:$0xff] %v1224_v26  }
 0x11b   :  { %1253 = vset.pattern.permute.xlu0 %v1257_v12  ;;  %947 = vperm.xlu2 %1251, %v1589_v47  }
 0x11c   :  { %944 = vperm.xlu0 %1253, %v1568_v36   ;;  %v760_v56 = vpop.permute.xlu2 %759 }
 0x11d   :  { %vm842_vm5 = vcmp.eq.s32.totalorder %v760_v56, 1  ;;  %v471_v44 = vpop.permute.xlu0 %470 }
 0x11e   :  { %v874_v57 = vsel %vm842_vm5, %v1752_v45, -1e+30  ;;  %v2107_v10 = vmul.f32 %v471_v44, %v280_v38 }
 0x11f   :  { %v902_v12 = vmax.f32 %v870_v30, %v874_v57  ;;  %950 = vperm.xlu1 %1252, %v1586_v46  }
 0x120   :  { %v1229_v47 = vpack.c.bf16 %v2107_v10, %v2103_v58  ;;  %629 = vmatpush.msra.mxu1 %v2107_v10 }
 0x122   :  { %1245 = vst [vmem:[%s2304_s6 + $0x78] sm:$0xff] %v1229_v47   ;;  %630 = vmatpush.msra.mxu1 %v2103_v58 }
 0x123   :  { %953 = vperm.xlu2 %1251, %v1609_v60  }
 0x124   :  { %959 = vperm.xlu0 %1253, %v1637_v22   ;;  %631 = vmatpush.msra.mxu1 %v2082_v21  ;;  %v766_v36 = vpop.permute.xlu2 %765 }
 0x125   :  { %vm844_vm6 = vcmp.eq.s32.totalorder %v766_v36, 1  ;;  %v745_v46 = vpop.permute.xlu0 %744 }
 0x126   :  { %v876_v9 = vsel %vm844_vm6, %v1757_v62, -1e+30  ;;  %632 = vmatpush.msra.mxu1 %v2084_v53  ;;  %vm837_vm9 = vcmp.eq.s32.totalorder %v745_v46, 1  ;;  %v2360_v46 = vld [vmem:[#allocation15_spill] sm:$0xff] }
 0x127   :  { %v2122_v13 = vmax.f32 %v900_v41, %v876_v9  ;;  %956 = vperm.xlu1 %1252, %v1606_v59   ;;  %v2353_v59 = vld [vmem:[#allocation4_spill] sm:$0xff]  ;;  %v869_v48 = vsel %vm837_vm9, %v1666_v20, -1e+30 }
 0x128   :  { %633 = vmatpush.msra.mxu1 %v2050_v31 }
 0x12a   :  { %634 = vmatpush.msra.mxu1 %v2052_v17 }
 0x12b   :  { %962 = vperm.xlu2 %1251, %v1628_v16  }
 0x12c   :  { %968 = vperm.xlu0 %1253, %v1669_v51   ;;  %635 = vmatpush.msra.mxu1 %v2054_v43  ;;  %v772_v60 = vpop.permute.xlu2 %771 }
 0x12d   :  { %vm846_vm8 = vcmp.eq.s32.totalorder %v772_v60, 1  ;;  %v751_v22 = vpop.permute.xlu0 %750 }
 0x12e   :  { %v878_v61 = vsel %vm846_vm8, %v1803_v25, -1e+30  ;;  %636 = vmatpush.msra.mxu1 %v2047_v23  ;;  %vm839_vm11 = vcmp.eq.s32.totalorder %v751_v22, 1  ;;  %v2361_v22 = vld [vmem:[#allocation11_spill] sm:$0xff] }
 0x12f   :  { %v2132_v6 = vmax.f32 %v902_v12, %v878_v61  ;;  %965 = vperm.xlu1 %1252, %v1679_v42   ;;  %v871_v41 = vsel %vm839_vm11, %v1662_v15, -1e+30 }
 0x130   :  { %637 = vmatpush.msra.mxu1 %v2001_v33 }
 0x132   :  { %638 = vmatpush.msra.mxu1 %v2003_v1 }
 0x133   :  { %971 = vperm.xlu2 %1251, %v1792_v32   ;;  %v2355_v32 = vld [vmem:[#allocation7_spill] sm:$0xff] }
 0x134   :  { %977 = vperm.xlu0 %1253, %v2353_v59   ;;  %639 = vmatpush.msra.mxu1 %v1952_v4  ;;  %v781_v16 = vpop.permute.xlu2 %780  ;;  %v2362_v59 = vld [vmem:[#allocation13_spill] sm:$0xff] }
 0x135   :  { %v757_v51 = vpop.permute.xlu0 %756  ;;  %vm849_vm13 = vcmp.eq.s32.totalorder %v781_v16, 1 }
 0x136   :  { %vm841_vm10 = vcmp.eq.s32.totalorder %v757_v51, 1  ;;  %640 = vmatpush.msra.mxu1 %v1954_v27  ;;  %v881_v12 = vsel %vm849_vm13, %v1850_v55, -1e+30  ;;  %v2363_v51 = vld [vmem:[#allocation14_spill] sm:$0xff] }
 0x137   :  { %v873_v42 = vsel %vm841_vm10, %v1706_v7, -1e+30  ;;  %974 = vperm.xlu1 %1252, %v2354_v40   ;;  %v2365_v40 = vld [vmem:[#allocation12_spill] sm:$0xff] }
 0x138   :  { %v901_v34 = vmax.f32 %v869_v48, %v873_v42  ;;  %641 = vmatpush.msra.mxu1 %v1956_v35  ;;  %v2364_v48 = vld [vmem:[#allocation18_spill] sm:$0xff] }
 0x13a   :  { %642 = vmatpush.msra.mxu1 %v1946_v0 }
 0x13b   :  { %980 = vperm.xlu2 %1251, %v2355_v32   ;;  %v2366_v32 = vld [vmem:[#allocation16_spill] sm:$0xff] }
 0x13c   :  { %986 = vperm.xlu0 %1253, %v2356_v39   ;;  %643 = vmatpush.msra.mxu1 %v1896_v5  ;;  %v787_v8 = vpop.permute.xlu2 %786 }
 0x13d   :  { %v763_v49 = vpop.permute.xlu0 %762  ;;  %vm851_vm2 = vcmp.eq.s32.totalorder %v787_v8, 1 }
 0x13e   :  { %vm843_vm12 = vcmp.eq.s32.totalorder %v763_v49, 1  ;;  %644 = vmatpush.msra.mxu1 %v1898_v52 }
 0x13f   :  { %v875_v26 = vsel %vm843_vm12, %v1759_v63, -1e+30  ;;  %983 = vperm.xlu1 %1252, %v2357_v29   ;;  %645 = vmatmul.f32.vlgmr.msra.gmra.mxu1 %v2358_v54  ;;  %v2369_v54 = vld [vmem:[#allocation3_spill] sm:$0xff] }
 0x140   :  { %v903_v38 = vmax.f32 %v871_v41, %v875_v26  ;;  %v2367_v41 = vld [vmem:[#allocation8_spill] sm:$0xff] }
 0x143   :  { %989 = vperm.xlu2 %1251, %v2359_v18   ;;  %v883_v18 = vsel %vm851_vm2, %v2369_v54, -1e+30 }
 0x144   :  { %995 = vperm.xlu0 %1253, %v1862_v2   ;;  %v793_v56 = vpop.permute.xlu2 %792 }
 0x145   :  { %v769_v44 = vpop.permute.xlu0 %768  ;;  %vm853_vm15 = vcmp.eq.s32.totalorder %v793_v56, 1  ;;  %v2370_v56 = vld [vmem:[#allocation21_spill] sm:$0xff] }
 0x146   :  { %vm845_vm14 = vcmp.eq.s32.totalorder %v769_v44, 1  ;;  %v885_v36 = vsel %vm853_vm15, %v1896_v5, -1e+30 }
 0x147   :  { %v877_v30 = vsel %vm845_vm14, %v1755_v37, -1e+30  ;;  %992 = vperm.xlu1 %1252, %v1835_v3   ;;  %v2166_v3 = vpop.xlane.xlu1 %658 }
 0x148   :  { %v905_v57 = vmax.f32 %v901_v34, %v877_v30 }
 0x14a   :  { %v909_v47 = vmax.f32 %v905_v57, %v881_v12 }
 0x14b   :  { %998 = vperm.xlu2 %1251, %v1854_v11  }
 0x14c   :  { %1004 = vperm.xlu0 %1253, %v2360_v46   ;;  %v802_v2 = vpop.permute.xlu2 %801  ;;  %v2162_v9 = vmax.f32 %v909_v47, %v885_v36 }
 0x14d   :  { %v778_v60 = vpop.permute.xlu0 %777  ;;  %vm856_vm4 = vcmp.eq.s32.totalorder %v802_v2, 1 }
 0x14e   :  { %vm848_vm0 = vcmp.eq.s32.totalorder %v778_v60, 1  ;;  %v888_v36 = vsel %vm856_vm4, %v1954_v27, -1e+30 }
 0x14f   :  { %v880_v61 = vsel %vm848_vm0, %v2361_v22, -1e+30  ;;  %1001 = vperm.xlu1 %1252, %v2362_v59  }
 0x150   :  { %v908_v16 = vmax.f32 %v2122_v13, %v880_v61  ;;  %v2368_v13 = vld [vmem:[#allocation17_spill] sm:$0xff]  ;;  %v2372_v61 = vld [vmem:[#allocation20_spill] sm:$0xff] }
 0x153   :  { %1007 = vperm.xlu2 %1251, %v2363_v51  }
 0x154   :  { %1013 = vperm.xlu0 %1253, %v2364_v48   ;;  %v811_v11 = vpop.permute.xlu2 %810 }
 0x155   :  { %v784_v42 = vpop.permute.xlu0 %783  ;;  %vm859_vm8 = vcmp.eq.s32.totalorder %v811_v11, 1 }
 0x156   :  { %vm850_vm1 = vcmp.eq.s32.totalorder %v784_v42, 1  ;;  %v891_v42 = vsel %vm859_vm8, %v2001_v33, -1e+30 }
 0x157   :  { %v882_v34 = vsel %vm850_vm1, %v2365_v40, -1e+30  ;;  %1010 = vperm.xlu1 %1252, %v2366_v32  }
 0x158   :  { %v910_v39 = vmax.f32 %v2132_v6, %v882_v34  ;;  %v775_v49 = vpop.permute.xlu1 %774  ;;  %v2371_v6 = vld [vmem:[#allocation19_spill] sm:$0xff] }
 0x159   :  { %vm847_vm3 = vcmp.eq.s32.totalorder %v775_v49, 1 }
 0x15a   :  { %v879_v26 = vsel %vm847_vm3, %v2367_v41, -1e+30 }
 0x15b   :  { %v907_v29 = vmax.f32 %v903_v38, %v879_v26  ;;  %1016 = vperm.xlu2 %1251, %v2368_v13  }
 0x15c   :  { %1022 = vperm.xlu0 %1253, %v2370_v56   ;;  %v820_v44 = vpop.permute.xlu2 %819 }
 0x15d   :  { %v790_v30 = vpop.permute.xlu0 %789  ;;  %v911_v57 = vmax.f32 %v907_v29, %v883_v18  ;;  %vm862_vm11 = vcmp.eq.s32.totalorder %v820_v44, 1 }
 0x15e   :  { %vm852_vm5 = vcmp.eq.s32.totalorder %v790_v30, 1 }
 0x15f   :  { %v884_v12 = vsel %vm852_vm5, %v1898_v52, -1e+30  ;;  %1019 = vperm.xlu1 %1252, %v2371_v6  }
 0x160   :  { %v912_v8 = vmax.f32 %v908_v16, %v884_v12  ;;  %v796_v47 = vpop.permute.xlu1 %795 }
 0x161   :  { %vm854_vm6 = vcmp.eq.s32.totalorder %v796_v47, 1 }
 0x162   :  { %v886_v38 = vsel %vm854_vm6, %v1946_v0, -1e+30  ;;  %v916_v46 = vmax.f32 %v912_v8, %v888_v36 }
 0x163   :  { %v914_v60 = vmax.f32 %v910_v39, %v886_v38  ;;  %1025 = vperm.xlu2 %1251, %v2372_v61  }
 0x164   :  { %1031 = vperm.xlu0 %1253, %v2062_v24   ;;  %v829_v59 = vpop.permute.xlu2 %828 }
 0x165   :  { %v799_v2 = vpop.permute.xlu0 %798  ;;  %vm865_vm14 = vcmp.eq.s32.totalorder %v829_v59, 1 }
 0x166   :  { %vm855_vm9 = vcmp.eq.s32.totalorder %v799_v2, 1  ;;  %v897_v6 = vsel %vm865_vm14, %v2082_v21, -1e+30 }
 0x167   :  { %v887_v51 = vsel %vm855_vm9, %v1956_v35, -1e+30  ;;  %1028 = vperm.xlu1 %1252, %v2038_v28   ;;  %v894_v28 = vsel %vm862_vm11, %v2052_v17, -1e+30 }
 0x168   :  { %v915_v16 = vmax.f32 %v911_v57, %v887_v51  ;;  %v805_v48 = vpop.permute.xlu1 %804 }
 0x169   :  { %vm857_vm10 = vcmp.eq.s32.totalorder %v805_v48, 1 }
 0x16a   :  { %v889_v34 = vsel %vm857_vm10, %v1952_v4, -1e+30  ;;  %v919_v32 = vmax.f32 %v915_v16, %v891_v42 }
 0x16b   :  { %v917_v39 = vmax.f32 %v2162_v9, %v889_v34 }
 0x16d   :  { %v808_v49 = vpop.permute.xlu0 %807  ;;  %v2189_v24 = vpop.permute.xlu2 %938 }
 0x16e   :  { %vm858_vm12 = vcmp.eq.s32.totalorder %v808_v49, 1  ;;  %vm1033_vm6 = vcmp.eq.s32.totalorder %v2189_v24, 1 }
 0x16f   :  { %v890_v11 = vsel %vm858_vm12, %v2003_v1, -1e+30 }
 0x170   :  { %v918_v26 = vmax.f32 %v914_v60, %v890_v11  ;;  %v814_v29 = vpop.permute.xlu1 %813 }
 0x171   :  { %vm860_vm13 = vcmp.eq.s32.totalorder %v814_v29, 1 }
 0x172   :  { %v892_v13 = vsel %vm860_vm13, %v2047_v23, -1e+30  ;;  %v922_v18 = vmax.f32 %v918_v26, %v894_v28 }
 0x173   :  { %v920_v56 = vmax.f32 %v916_v46, %v892_v13 }
 0x175   :  { %v817_v30 = vpop.permute.xlu0 %816  ;;  %v2194_v57 = vpop.permute.xlu2 %947 }
 0x176   :  { %vm861_vm15 = vcmp.eq.s32.totalorder %v817_v30, 1  ;;  %vm1036_vm13 = vcmp.eq.s32.totalorder %v2194_v57, 1 }
 0x177   :  { %v893_v9 = vsel %vm861_vm15, %v2054_v43, -1e+30 }
 0x178   :  { %v921_v44 = vmax.f32 %v917_v39, %v893_v9  ;;  %v823_v12 = vpop.permute.xlu1 %822 }
 0x179   :  { %vm863_vm0 = vcmp.eq.s32.totalorder %v823_v12, 1 }
 0x17a   :  { %v925_v8 = vmax.f32 %v921_v44, %v897_v6  ;;  %v895_v47 = vsel %vm863_vm0, %v2050_v31, -1e+30 }
 0x17b   :  { %v923_v36 = vmax.f32 %v919_v32, %v895_v47 }
 0x17d   :  { %v826_v38 = vpop.permute.xlu0 %825  ;;  %v954_v60 = vpop.permute.xlu2 %953 }
 0x17e   :  { %vm864_vm1 = vcmp.eq.s32.totalorder %v826_v38, 1  ;;  %vm1038_vm8 = vcmp.eq.s32.totalorder %v954_v60, 1 }
 0x17f   :  { %v896_v46 = vsel %vm864_vm1, %v2084_v53, -1e+30 }
 0x180   :  { %v924_v61 = vmax.f32 %v920_v56, %v896_v46  ;;  %v832_v2 = vpop.permute.xlu1 %831 }
 0x181   :  { %vm866_vm2 = vcmp.eq.s32.totalorder %v832_v2, 1 }
 0x182   :  { %v928_v59 = vmax.f32 %v924_v61, %v925_v8  ;;  %v898_v51 = vsel %vm866_vm2, %v2103_v58, -1e+30 }
 0x183   :  { %v926_v16 = vmax.f32 %v922_v18, %v898_v51 }
 0x185   :  { %v835_v48 = vpop.permute.xlu0 %834  ;;  %v963_v42 = vpop.permute.xlu2 %962 }
 0x186   :  { %vm867_vm3 = vcmp.eq.s32.totalorder %v835_v48, 1  ;;  %v1070_v48 = vsel %vm1038_vm8, %v1706_v7, -1e+30  ;;  %vm1041_vm11 = vcmp.eq.s32.totalorder %v963_v42, 1 }
 0x187   :  { %v899_v34 = vsel %vm867_vm3, %v2107_v10, -1e+30 }
 0x188   :  { %v927_v39 = vmax.f32 %v923_v36, %v899_v34 }
 0x189   :  { %v942_v49 = vpop.permute.xlu1 %941 }
 0x18a   :  { %v929_v32 = vmax.f32 %v926_v16, %v927_v39  ;;  %vm1034_vm4 = vcmp.eq.s32.totalorder %v942_v49, 1  ;;  %v1065_v16 = vsel %vm1033_vm6, %v1660_v14, -1e+30  ;;  %v1073_v14 = vsel %vm1041_vm11, %v1757_v62, -1e+30 }
 0x18b   :  { %v1066_v2 = vsel %vm1034_vm4, %v1666_v20, -1e+30 }
 0x18c   :  { %v2202_v11 = vmax.f32 %v928_v59, %v929_v32  ;;  %v1098_v49 = vmax.f32 %v1066_v2, %v1070_v48  ;;  %v2235_v32 = vmax.f32 %v2166_v3, 1.0 }
 0x18d   :  { %v2204_v26 = vpop.permute.xlu2 %971 }
 0x18e   :  { %v2206_v29 = vpop.permute.xlu0 %944  ;;  %1254 = vrcp.f32 %v2235_v32  ;;  %vm1044_vm8 = vcmp.eq.s32.totalorder %v2204_v26, 1 }
 0x18f   :  { %vm1035_vm3 = vcmp.eq.s32.totalorder %v2206_v29, 1 }
 0x191   :  { %v951_v28 = vpop.permute.xlu1 %950 }
 0x192   :  { %vm1037_vm5 = vcmp.eq.s32.totalorder %v951_v28, 1  ;;  %v1068_v28 = vsel %vm1036_vm13, %v1662_v15, -1e+30 }
 0x193   :  { %v1069_v59 = vsel %vm1037_vm5, %v1708_v19, -1e+30 }
 0x194   :  { %v1097_v24 = vmax.f32 %v1065_v16, %v1069_v59 }
 0x195   :  { %v2208_v56 = vpop.permute.xlu2 %980 }
 0x196   :  { %v960_v13 = vpop.permute.xlu0 %959  ;;  %v1101_v42 = vmax.f32 %v1097_v24, %v1073_v14 }
 0x197   :  { %vm1040_vm15 = vcmp.eq.s32.totalorder %v960_v13, 1 }
 0x198   :  { %v1072_v3 = vsel %vm1040_vm15, %v1759_v63, -1e+30  ;;  %v1067_v63 = vsel %vm1035_vm3, %v1664_v50, -1e+30 }
 0x199   :  { %v957_v30 = vpop.permute.xlu1 %956 }
 0x19a   :  { %vm1039_vm2 = vcmp.eq.s32.totalorder %v957_v30, 1 }
 0x19b   :  { %v1071_v15 = vsel %vm1039_vm2, %v1752_v45, -1e+30 }
 0x19c   :  { %v1099_v45 = vmax.f32 %v1067_v63, %v1071_v15 }
 0x19d   :  { %v990_v44 = vpop.permute.xlu2 %989 }
 0x19e   :  { %v2210_v18 = vpop.permute.xlu0 %968  ;;  %vm1050_vm0 = vcmp.eq.s32.totalorder %v990_v44, 1 }
 0x19f   :  { %v1082_v62 = vsel %vm1050_vm0, %v1896_v5, -1e+30  ;;  %vm1043_vm5 = vcmp.eq.s32.totalorder %v2210_v18, 1  ;;  %v1100_v5 = vmax.f32 %v1068_v28, %v1072_v3 }
 0x1a1   :  { %v966_v9 = vpop.permute.xlu1 %965 }
 0x1a2   :  { %vm1042_vm9 = vcmp.eq.s32.totalorder %v966_v9, 1 }
 0x1a3   :  { %v1074_v34 = vsel %vm1042_vm9, %v1755_v37, -1e+30 }
 0x1a4   :  { %v1102_v19 = vmax.f32 %v1098_v49, %v1074_v34 }
 0x1a5   :  { %v2212_v8 = vpop.permute.xlu2 %998 }
 0x1a6   :  { %v978_v12 = vpop.permute.xlu0 %977  ;;  %vm1053_vm6 = vcmp.eq.s32.totalorder %v2212_v8, 1 }
 0x1a7   :  { %vm1046_vm10 = vcmp.eq.s32.totalorder %v978_v12, 1  ;;  %v1085_v12 = vsel %vm1053_vm6, %v1954_v27, -1e+30 }
 0x1a8   :  { %v1078_v20 = vsel %vm1046_vm10, %v1850_v55, -1e+30  ;;  %vm1047_vm10 = vcmp.eq.s32.totalorder %v2208_v56, 1 }
 0x1a9   :  { %v975_v6 = vpop.permute.xlu1 %974  ;;  %v1106_v37 = vmax.f32 %v1102_v19, %v1078_v20  ;;  %v1079_v27 = vsel %vm1047_vm10, %v2365_v40, -1e+30 }
 0x1aa   :  { %vm1045_vm12 = vcmp.eq.s32.totalorder %v975_v6, 1 }
 0x1ab   :  { %v1077_v7 = vsel %vm1045_vm12, %v2361_v22, -1e+30  ;;  %v1110_v13 = vmax.f32 %v1106_v37, %v1082_v62 }
 0x1ac   :  { %v1105_v9 = vmax.f32 %v1101_v42, %v1077_v7 }
 0x1ad   :  { %v2216_v38 = vpop.permute.xlu2 %1007 }
 0x1ae   :  { %v987_v47 = vpop.permute.xlu0 %986 }
 0x1af   :  { %vm1049_vm14 = vcmp.eq.s32.totalorder %v987_v47, 1  ;;  %v2257_v47 = vpop.eup %1254 }
 0x1b0   :  { %v1081_v55 = vsel %vm1049_vm14, %v1898_v52, -1e+30  ;;  %vm667_vm6 = vweird.f32 %v2257_v47 }
 0x1b1   :  { %v2214_v36 = vpop.permute.xlu1 %983  ;;  %v1109_v52 = vmax.f32 %v1105_v9, %v1081_v55 }
 0x1b2   :  { %vm1048_vm11 = vcmp.eq.s32.totalorder %v2214_v36, 1 }
 0x1b3   :  { %v1113_v50 = vmax.f32 %v1109_v52, %v1085_v12 }
 0x1b5   :  { %v2230_v39 = vpop.permute.xlu2 %1016 }
 0x1b6   :  { %v2218_v46 = vpop.permute.xlu0 %995  ;;  %vm1059_vm3 = vcmp.eq.s32.totalorder %v2230_v39, 1 }
 0x1b7   :  { %vm1052_vm13 = vcmp.eq.s32.totalorder %v2218_v46, 1 }
 0x1b8   :  { %v1084_v26 = vsel %vm1052_vm13, %v1956_v35, -1e+30 }
 0x1b9   :  { %v2220_v61 = vpop.permute.xlu1 %992 }
 0x1ba   :  { %vm1051_vm14 = vcmp.eq.s32.totalorder %v2220_v61, 1 }
 0x1bb   :  { %v1083_v46 = vsel %vm1051_vm14, %v1946_v0, -1e+30 }
 0x1bd   :  { %v1026_v29 = vpop.permute.xlu2 %1025 }
 0x1be   :  { %v2225_v51 = vpop.permute.xlu0 %1004  ;;  %vm1062_vm12 = vcmp.eq.s32.totalorder %v1026_v29, 1 }
 0x1bf   :  { %v1094_v16 = vsel %vm1062_vm12, %v2082_v21, -1e+30  ;;  %vm1055_vm0 = vcmp.eq.s32.totalorder %v2225_v51, 1 }
 0x1c1   :  { %v1002_v60 = vpop.permute.xlu1 %1001 }
 0x1c2   :  { %vm1054_vm1 = vcmp.eq.s32.totalorder %v1002_v60, 1 }
 0x1c3   :  { %v1086_v22 = vsel %vm1054_vm1, %v1952_v4, -1e+30  ;;  %v1075_v4 = vsel %vm1043_vm5, %v1803_v25, -1e+30  ;;  %vm1056_vm1 = vcmp.eq.s32.totalorder %v2216_v38, 1 }
 0x1c4   :  { %v1114_v18 = vmax.f32 %v1110_v13, %v1086_v22  ;;  %v1103_v2 = vmax.f32 %v1099_v45, %v1075_v4  ;;  %v1088_v51 = vsel %vm1056_vm1, %v2001_v33, -1e+30  ;;  %v1091_v38 = vsel %vm1059_vm3, %v2052_v17, -1e+30  ;;  %v626_v17 = vpop.f32.mrf.mxu0 }
 0x1c5   :  { %v672_v22 = vand.u32 2147483648, %v2235_v32 }
 0x1c6   :  { %v1014_v57 = vpop.permute.xlu0 %1013  ;;  %v1107_v40 = vmax.f32 %v1103_v2, %v1079_v27 }
 0x1c7   :  { %vm1058_vm4 = vcmp.eq.s32.totalorder %v1014_v57, 1  ;;  %v673_v63 = vor.u32 1.1754944e-38, %v672_v22 }
 0x1c8   :  { %v1090_v44 = vsel %vm1058_vm4, %v2054_v43, -1e+30  ;;  %v1076_v43 = vsel %vm1044_vm8, %v2367_v41, -1e+30  ;;  %v1111_v21 = vmax.f32 %v1107_v40, %v1083_v46  ;;  %vm666_vm8 = vweird.f32 %v2235_v32 }
 0x1c9   :  { %v1011_v30 = vpop.permute.xlu1 %1010  ;;  %v1118_v8 = vmax.f32 %v1114_v18, %v1090_v44  ;;  %v1104_v59 = vmax.f32 %v1100_v5, %v1076_v43 }
 0x1ca   :  { %vm1057_vm9 = vcmp.eq.s32.totalorder %v1011_v30, 1 }
 0x1cb   :  { %v1089_v6 = vsel %vm1057_vm9, %v2047_v23, -1e+30  ;;  %v1080_v23 = vsel %vm1048_vm11, %v2369_v54, -1e+30  ;;  %v1122_v61 = vmax.f32 %v1118_v8, %v1094_v16  ;;  %v1087_v54 = vsel %vm1055_vm0, %v2003_v1, -1e+30  ;;  %vm668_vm9 = vmor %vm666_vm8, %vm667_vm6 }
 0x1cc   :  { %v1117_v36 = vmax.f32 %v1113_v50, %v1089_v6  ;;  %v1108_v56 = vmax.f32 %v1104_v59, %v1080_v23  ;;  %v1115_v35 = vmax.f32 %v1111_v21, %v1087_v54  ;;  %v931_v1 = vrot.slane %v2202_v11, 4 }
 0x1cd   :  { %vm1134_vm11 = vcmask 1040384  }
 0x1ce   :  { %v1023_v25 = vpop.permute.xlu0 %1022  ;;  %v1112_v24 = vmax.f32 %v1108_v56, %v1084_v26  ;;  %v1119_v42 = vmax.f32 %v1115_v35, %v1091_v38  ;;  %v932_v28 = vmax.f32 %v2202_v11, %v931_v1 }
 0x1cf   :  { %vm1061_vm15 = vcmp.eq.s32.totalorder %v1023_v25, 1 }
 0x1d0   :  { %v1093_v41 = vsel %vm1061_vm15, %v2084_v53, -1e+30  ;;  %v662_v53 = vmul.f32 %v2257_v47, %v2235_v32  ;;  %v1116_v20 = vmax.f32 %v1112_v24, %v1088_v51  ;;  %v933_v3 = vrot.slane %v932_v28, 2 }
 0x1d1   :  { %v1121_v48 = vmax.f32 %v1117_v36, %v1093_v41  ;;  %v1020_v34 = vpop.permute.xlu1 %1019 }
 0x1d2   :  { %vm1060_vm2 = vcmp.eq.s32.totalorder %v1020_v34, 1  ;;  %v663_v19 = vsub.f32 1.0, %v662_v53  ;;  %v934_v11 = vmax.f32 %v932_v28, %v933_v3 }
 0x1d3   :  { %v1125_v49 = vmax.f32 %v1121_v48, %v1122_v61  ;;  %v1092_v60 = vsel %vm1060_vm2, %v2050_v31, -1e+30 }
 0x1d4   :  { %v1120_v37 = vmax.f32 %v1116_v20, %v1092_v60  ;;  %v664_v31 = vmul.f32 %v2257_v47, %v663_v19  ;;  %v935_v44 = vrot.slane %v934_v11, 1 }
 0x1d6   :  { %v1032_v0 = vpop.permute.xlu0 %1031  ;;  %v665_v62 = vadd.f32 %v2257_v47, %v664_v31  ;;  %v936_v12 = vmax.f32 %v934_v11, %v935_v44 }
 0x1d7   :  { %vm1064_vm4 = vcmp.eq.s32.totalorder %v1032_v0, 1 }
 0x1d8   :  { %v1096_v14 = vsel %vm1064_vm4, %v2107_v10, -1e+30  ;;  %v646_v10 = vpop.f32.mrf.mxu1  ;;  %v669_v30 = vsel %vm668_vm9, %v2257_v47, %v665_v62 }
 0x1d9   :  { %v1029_v7 = vpop.permute.xlu1 %1028  ;;  %v1124_v33 = vmax.f32 %v1120_v37, %v1096_v14  ;;  %v647_v13 = vadd.f32 %v646_v10, %v626_v17 }
 0x1da   :  { %vm1063_vm5 = vcmp.eq.s32.totalorder %v1029_v7, 1 }
 0x1db   :  { %v1095_v39 = vsel %vm1063_vm5, %v2103_v58, -1e+30  ;;  %v670_v58 = vand.u32 2147483647, %v2235_v32  ;;  %v569_v32 = vld [vmem:[%s2305_s5] sm:$0xf] }
 0x1dc   :  { %v1123_v55 = vmax.f32 %v1119_v42, %v1095_v39 }
 0x1dd   :  { %vm671_vm10 = vcmp.eq.f32.partialorder %v670_v58, 8.507059e+37 }
 0x1de   :  { %v1126_v57 = vmax.f32 %v1123_v55, %v1124_v33  ;;  %v674_v5 = vsel %vm671_vm10, %v673_v63, %v669_v30 }
 0x1df   :  { %v675_v18 = vmul.f32 %v674_v5, %v647_v13 }
 0x1e0   :  { %v1127_v9 = vmax.f32 %v1125_v49, %v1126_v57 }
 0x1e1   :  { %v1138_v8 = vrot.slane %v675_v18, 6 }
 0x1e2   :  { %v1128_v15 = vrot.slane %v1127_v9, 4 }
 0x1e4   :  { %v1129_v52 = vmax.f32 %v1127_v9, %v1128_v15 }
 0x1e6   :  { %v1130_v29 = vrot.slane %v1129_v52, 2 }
 0x1e8   :  { %v1131_v4 = vmax.f32 %v1129_v52, %v1130_v29 }
 0x1ea   :  { %v1132_v45 = vrot.slane %v1131_v4, 1 }
 0x1ec   :  { %v1133_v6 = vmax.f32 %v1131_v4, %v1132_v45 }
 0x1ee   :  { %v1135_v50 = vsel %vm1134_vm11, %v936_v12, %v1133_v6 }
 0x1ef   :  { %v1139_v43 = vsel %vm654_vm7, %v1135_v50, %v1138_v8 }
 0x1f0   :  { %v1141_v47 = vadd.f32 %v1139_v43, %v569_v32 }
 0x1f2   :  { %1142 = vst [vmem:[%s2306_s7] sm:$0xf] %v1141_v47 }

// kernel: forward.23
= control target key start
LH: loop header
LB: loop body
LE: loop exit
PB: predicated region body
PF: predicated region fallthrough
CT: control target
= control target key end

     0   :  { %v2404_v3 = vmov 0   ;;  %s2392_s0 = inlined_call_operand.vmem [shape: f32[256,128], index: 0, kind: input, shape index: {}]   ;;  %s2393_s1 = inlined_call_operand.vmem [shape: f32[256,1], index: 1, kind: input, shape index: {}]   ;;  %s2394_s2 = inlined_call_operand.vmem [shape: f32[256,1], index: 2, kind: input, shape index: {}]   ;;  %s2395_s3 = inlined_call_operand.vmem [shape: f32[2,256], index: 3, kind: input, shape index: {}]   ;;  %s2396_s4 = inlined_call_operand.vmem [shape: f32[256,2], index: 4, kind: input, shape index: {}]   ;;  %s2397_s5 = inlined_call_operand.vmem [shape: f32[2,256], index: 5, kind: input, shape index: {}]   ;;  %s2398_s6 = inlined_call_operand.vmem [shape: f32[256,128], index: 6, kind: input, shape index: {}]   ;;  %s2399_s7 = inlined_call_operand.vmem [shape: f32[1,128], index: 7, kind: input, shape index: {}]   ;;  %s2400_s8 = inlined_call_operand.hbm [shape: f32[2,128], index: 8, kind: output, shape index: {}]  }
   0x1   :  { %v66_v0 = vld [vmem:[%s2393_s1 + $0x20] sm:$0xff]  ;;  %v64_v1 = vld [vmem:[%s2393_s1 + $0x10] sm:$0xff]  ;;  %1187 = vset.pattern.permute.xlu2 %v2404_v3  ;;  %1186 = vset.pattern.permute.xlu1 %v2404_v3 }
   0x2   :  { %v62_v2 = vld [vmem:[%s2393_s1] sm:$0xff]  ;;  %1185 = vset.pattern.permute.xlu0 %v2404_v3  ;;  %116 = vperm.xlu2 %1187, %v66_v0  }
   0x3   :  { %106 = vperm.xlu1 %1186, %v64_v1   ;;  %96 = vperm.xlu0 %1185, %v62_v2  }
   0x4   :  { %13 = vsyncpa [#allocation3], 0  ;;  %v67_v4 = vld [vmem:[%s2393_s1 + $0x28] sm:$0xff]  ;;  %v65_v5 = vld [vmem:[%s2393_s1 + $0x18] sm:$0xff]  ;;  %vm595_vm7 = vcmask 1041408   ;;  %s1226_s11 = smov [#allocation2]  }
   0x5   :  { %v63_v6 = vld [vmem:[%s2393_s1 + $0x8] sm:$0xff]  ;;  %v70_v7 = vld [vmem:[%s2393_s1 + $0x40] sm:$0xff]  ;;  %v69_v8 = vld [vmem:[%s2393_s1 + $0x38] sm:$0xff]  ;;  %s1171_s12 = sshll.u32 %s1226_s11, 4  ;;  %s1172_s12 = int_to_ptr.vmem [resolvable:$true] %s1171_s12 }
   0x6   :  { %v68_v9 = vld [vmem:[%s2393_s1 + $0x30] sm:$0xff]  ;;  %v73_v10 = vld [vmem:[%s2393_s1 + $0x58] sm:$0xff]  ;;  %v71_v12 = vld [vmem:[%s2393_s1 + $0x48] sm:$0xff] }
   0x7   :  { %v72_v11 = vld [vmem:[%s2393_s1 + $0x50] sm:$0xff]  ;;  %v75_v14 = vld [vmem:[%s2393_s1 + $0x68] sm:$0xff]  ;;  %v74_v15 = vld [vmem:[%s2393_s1 + $0x60] sm:$0xff] }
   0x8   :  { %v76_v13 = vld [vmem:[%s2393_s1 + $0x70] sm:$0xff]  ;;  %v79_v16 = vld [vmem:[%s2393_s1 + $0x88] sm:$0xff]  ;;  %v78_v17 = vld [vmem:[%s2393_s1 + $0x80] sm:$0xff] }
   0x9   :  { %v77_v18 = vld [vmem:[%s2393_s1 + $0x78] sm:$0xff]  ;;  %v82_v19 = vld [vmem:[%s2393_s1 + $0xa0] sm:$0xff]  ;;  %v80_v21 = vld [vmem:[%s2393_s1 + $0x90] sm:$0xff] }
   0xa   :  { %121 = vperm.xlu2 %1187, %v67_v4   ;;  %v81_v20 = vld [vmem:[%s2393_s1 + $0x98] sm:$0xff]  ;;  %v84_v23 = vld [vmem:[%s2393_s1 + $0xb0] sm:$0xff]  ;;  %v83_v24 = vld [vmem:[%s2393_s1 + $0xa8] sm:$0xff] }
   0xb   :  { %111 = vperm.xlu1 %1186, %v65_v5   ;;  %101 = vperm.xlu0 %1185, %v63_v6   ;;  %v85_v22 = vld [vmem:[%s2393_s1 + $0xb8] sm:$0xff]  ;;  %v88_v25 = vld [vmem:[%s2393_s1 + $0xd0] sm:$0xff]  ;;  %v87_v26 = vld [vmem:[%s2393_s1 + $0xc8] sm:$0xff] }
   0xc   :  { %v86_v27 = vld [vmem:[%s2393_s1 + $0xc0] sm:$0xff]  ;;  %v91_v28 = vld [vmem:[%s2393_s1 + $0xe8] sm:$0xff]  ;;  %v89_v30 = vld [vmem:[%s2393_s1 + $0xd8] sm:$0xff] }
   0xd   :  { %v90_v29 = vld [vmem:[%s2393_s1 + $0xe0] sm:$0xff]  ;;  %v93_v32 = vld [vmem:[%s2393_s1 + $0xf8] sm:$0xff]  ;;  %v92_v33 = vld [vmem:[%s2393_s1 + $0xf0] sm:$0xff] }
   0xe   :  { %v286_v31 = vld [vmem:[%s2394_s2] sm:$0xff]  ;;  %v289_v34 = vld [vmem:[%s2394_s2 + $0x18] sm:$0xff]  ;;  %v288_v35 = vld [vmem:[%s2394_s2 + $0x10] sm:$0xff] }
   0xf   :  { %v287_v36 = vld [vmem:[%s2394_s2 + $0x8] sm:$0xff]  ;;  %v292_v38 = vld [vmem:[%s2394_s2 + $0x30] sm:$0xff]  ;;  %v290_v40 = vld [vmem:[%s2394_s2 + $0x20] sm:$0xff] }
  0x10   :  { %v291_v39 = vld [vmem:[%s2394_s2 + $0x28] sm:$0xff]  ;;  %v294_v43 = vld [vmem:[%s2394_s2 + $0x40] sm:$0xff]  ;;  %v293_v44 = vld [vmem:[%s2394_s2 + $0x38] sm:$0xff] }
  0x11   :  { %v295_v42 = vld [vmem:[%s2394_s2 + $0x48] sm:$0xff]  ;;  %v298_v46 = vld [vmem:[%s2394_s2 + $0x60] sm:$0xff]  ;;  %v297_v47 = vld [vmem:[%s2394_s2 + $0x58] sm:$0xff] }
  0x12   :  { %136 = vperm.xlu2 %1187, %v70_v7   ;;  %v296_v48 = vld [vmem:[%s2394_s2 + $0x50] sm:$0xff]  ;;  %v301_v52 = vld [vmem:[%s2394_s2 + $0x78] sm:$0xff]  ;;  %v299_v54 = vld [vmem:[%s2394_s2 + $0x68] sm:$0xff] }
  0x13   :  { %131 = vperm.xlu1 %1186, %v69_v8   ;;  %126 = vperm.xlu0 %1185, %v68_v9   ;;  %v300_v53 = vld [vmem:[%s2394_s2 + $0x70] sm:$0xff]  ;;  %v303_v59 = vld [vmem:[%s2394_s2 + $0x88] sm:$0xff]  ;;  %v302_v60 = vld [vmem:[%s2394_s2 + $0x80] sm:$0xff] }
  0x14   :  { %v304_v58 = vld [vmem:[%s2394_s2 + $0x90] sm:$0xff]  ;;  %v307_v0 = vld [vmem:[%s2394_s2 + $0xa8] sm:$0xff]  ;;  %v306_v1 = vld [vmem:[%s2394_s2 + $0xa0] sm:$0xff] }
  0x15   :  { %v305_v2 = vld [vmem:[%s2394_s2 + $0x98] sm:$0xff]  ;;  %v310_v7 = vld [vmem:[%s2394_s2 + $0xc0] sm:$0xff]  ;;  %v308_v9 = vld [vmem:[%s2394_s2 + $0xb0] sm:$0xff] }
  0x16   :  { %v309_v8 = vld [vmem:[%s2394_s2 + $0xb8] sm:$0xff] }
  0x1a   :  { %151 = vperm.xlu2 %1187, %v73_v10  }
  0x1b   :  { %146 = vperm.xlu1 %1186, %v72_v11   ;;  %141 = vperm.xlu0 %1185, %v71_v12  }
  0x22   :  { %166 = vperm.xlu2 %1187, %v76_v13   ;;  %v313_v13 = vld [vmem:[%s2394_s2 + $0xd8] sm:$0xff] }
  0x23   :  { %161 = vperm.xlu1 %1186, %v75_v14   ;;  %156 = vperm.xlu0 %1185, %v74_v15   ;;  %v312_v14 = vld [vmem:[%s2394_s2 + $0xd0] sm:$0xff]  ;;  %v311_v15 = vld [vmem:[%s2394_s2 + $0xc8] sm:$0xff] }
  0x2a   :  { %181 = vperm.xlu2 %1187, %v79_v16   ;;  %v511_v16 = vld [vmem:[%s2395_s3] sm:$0xf] }
  0x2b   :  { %176 = vperm.xlu1 %1186, %v78_v17   ;;  %171 = vperm.xlu0 %1185, %v77_v18   ;;  %545 = vst [vmem:[#allocation1] ss:$4 sm:$0xff] %v511_v16 }
  0x32   :  { %196 = vperm.xlu2 %1187, %v82_v19  }
  0x33   :  { %191 = vperm.xlu1 %1186, %v81_v20   ;;  %186 = vperm.xlu0 %1185, %v80_v21   ;;  %v316_v20 = vld [vmem:[%s2394_s2 + $0xf0] sm:$0xff]  ;;  %v315_v21 = vld [vmem:[%s2394_s2 + $0xe8] sm:$0xff] }
  0x3a   :  { %211 = vperm.xlu2 %1187, %v85_v22   ;;  %v314_v22 = vld [vmem:[%s2394_s2 + $0xe0] sm:$0xff] }
  0x3b   :  { %206 = vperm.xlu1 %1186, %v84_v23   ;;  %201 = vperm.xlu0 %1185, %v83_v24   ;;  %v512_v23 = vld [vmem:[%s2396_s4] sm:$0xff] }
  0x3c   :  { %v1512_v24 = vld.sshfl [vmem:[#allocation1] sm:$0xff pattern:$0x73625140]  ;;  %vm617_vm0 = vcmp.gt.f32.partialorder %v512_v23, 0.0 }
  0x42   :  { %226 = vperm.xlu2 %1187, %v88_v25   ;;  %v1514_v25 = vld.sshfl [vmem:[#allocation1 + $0x8] sm:$0xff pattern:$0x73625140] }
  0x43   :  { %221 = vperm.xlu1 %1186, %v87_v26   ;;  %216 = vperm.xlu0 %1185, %v86_v27   ;;  %2425 = vst [vmem:[#allocation7_spill] sm:$0xff] %v1514_v25 }
  0x44   :  { %590 = vst [vmem:[#allocation1] ss:$4 sm:$0xff] %v511_v16 }
  0x4a   :  { %241 = vperm.xlu2 %1187, %v91_v28  }
  0x4b   :  { %236 = vperm.xlu1 %1186, %v90_v29   ;;  %231 = vperm.xlu0 %1185, %v89_v30   ;;  %v1523_v29 = vsel %vm617_vm0, 1, %v2404_v3  ;;  %v30_v30 = vld [vmem:[%s2392_s0] sm:$0xff]  ;;  %v592_v16 = vld.sshfl [vmem:[#allocation1 + $0x8] sm:$0xff pattern:$0x73625140] }
  0x52   :  { %320 = vperm.xlu2 %1187, %v286_v31   ;;  %v317_v31 = vld [vmem:[%s2394_s2 + $0xf8] sm:$0xff] }
  0x53   :  { %251 = vperm.xlu1 %1186, %v93_v32   ;;  %246 = vperm.xlu0 %1185, %v92_v33   ;;  %v514_v32 = vld [vmem:[%s2396_s4 + $0x10] sm:$0xff]  ;;  %v513_v33 = vld [vmem:[%s2396_s4 + $0x8] sm:$0xff] }
  0x54   :  { %vm619_vm1 = vcmp.gt.f32.partialorder %v514_v32, 0.0  ;;  %vm618_vm2 = vcmp.gt.f32.partialorder %v513_v33, 0.0 }
  0x5a   :  { %335 = vperm.xlu2 %1187, %v289_v34  }
  0x5b   :  { %330 = vperm.xlu1 %1186, %v288_v35   ;;  %325 = vperm.xlu0 %1185, %v287_v36  }
  0x5c   :  { %v1383_v37 = vpop.permute.xlu2 %116 }
  0x62   :  { %350 = vperm.xlu2 %1187, %v292_v38  }
  0x63   :  { %345 = vperm.xlu1 %1186, %v291_v39   ;;  %340 = vperm.xlu0 %1185, %v290_v40   ;;  %v1546_v40 = vsel %vm619_vm1, 1, %v2404_v3 }
  0x64   :  { %v1394_v41 = vpop.permute.xlu2 %121 }
  0x6a   :  { %365 = vperm.xlu2 %1187, %v295_v42   ;;  %v33_v42 = vld [vmem:[%s2392_s0 + $0x18] sm:$0xff] }
  0x6b   :  { %360 = vperm.xlu1 %1186, %v294_v43   ;;  %355 = vperm.xlu0 %1185, %v293_v44   ;;  %v1552_v43 = vsel %vm618_vm2, 1, %v2404_v3  ;;  %v516_v44 = vld [vmem:[%s2396_s4 + $0x20] sm:$0xff] }
  0x6c   :  { %v1405_v45 = vpop.permute.xlu2 %136  ;;  %vm621_vm3 = vcmp.gt.f32.partialorder %v516_v44, 0.0 }
  0x72   :  { %380 = vperm.xlu2 %1187, %v298_v46   ;;  %v515_v46 = vld [vmem:[%s2396_s4 + $0x18] sm:$0xff] }
  0x73   :  { %375 = vperm.xlu1 %1186, %v297_v47   ;;  %370 = vperm.xlu0 %1185, %v296_v48   ;;  %vm620_vm4 = vcmp.gt.f32.partialorder %v515_v46, 0.0 }
  0x74   :  { %v1416_v49 = vpop.permute.xlu2 %151 }
  0x75   :  { %v1418_v50 = vpop.permute.xlu1 %106  ;;  %v1420_v51 = vpop.permute.xlu0 %96 }
  0x76   :  { %v254_v34 = vmul.f32 %v1420_v51, %v30_v30  ;;  %v597_v30 = vsel %vm595_vm7, %v592_v16, 0.0 }
  0x7a   :  { %395 = vperm.xlu2 %1187, %v301_v52  }
  0x7b   :  { %390 = vperm.xlu1 %1186, %v300_v53   ;;  %385 = vperm.xlu0 %1185, %v299_v54   ;;  %v1570_v54 = vsel %vm621_vm3, 1, %v2404_v3 }
  0x7c   :  { %v1431_v55 = vpop.permute.xlu2 %166 }
  0x7d   :  { %v1433_v56 = vpop.permute.xlu1 %111  ;;  %v1435_v57 = vpop.permute.xlu0 %101 }
  0x7e   :  { %v257_v47 = vmul.f32 %v1433_v56, %v33_v42  ;;  %v1576_v56 = vsel %vm620_vm4, 1, %v2404_v3 }
  0x82   :  { %410 = vperm.xlu2 %1187, %v304_v58   ;;  %v36_v58 = vld [vmem:[%s2392_s0 + $0x30] sm:$0xff] }
  0x83   :  { %405 = vperm.xlu1 %1186, %v303_v59   ;;  %400 = vperm.xlu0 %1185, %v302_v60   ;;  %v518_v59 = vld [vmem:[%s2396_s4 + $0x30] sm:$0xff]  ;;  %v517_v60 = vld [vmem:[%s2396_s4 + $0x28] sm:$0xff] }
  0x84   :  { %v1446_v61 = vpop.permute.xlu2 %181  ;;  %vm623_vm5 = vcmp.gt.f32.partialorder %v518_v59, 0.0  ;;  %vm622_vm6 = vcmp.gt.f32.partialorder %v517_v60, 0.0  ;;  %v525_v59 = vld [vmem:[%s2396_s4 + $0x68] sm:$0xff]  ;;  %v524_v60 = vld [vmem:[%s2396_s4 + $0x60] sm:$0xff] }
  0x85   :  { %2423 = vst [vmem:[#allocation5_spill] sm:$0xff] %v1446_v61  ;;  %v1448_v62 = vpop.permute.xlu1 %131  ;;  %v1450_v63 = vpop.permute.xlu0 %126  ;;  %vm630_vm12 = vcmp.gt.f32.partialorder %v525_v59, 0.0  ;;  %vm629_vm13 = vcmp.gt.f32.partialorder %v524_v60, 0.0  ;;  %v531_v61 = vld [vmem:[%s2396_s4 + $0x98] sm:$0xff] }
  0x86   :  { %v1661_v16 = vsel %vm630_vm12, 1, %v2404_v3 }
  0x87   :  { %2430 = vst [vmem:[#allocation12_spill] sm:$0xff] %v1661_v16 }
  0x8a   :  { %425 = vperm.xlu2 %1187, %v307_v0   ;;  %v260_v0 = vmul.f32 %v1450_v63, %v36_v58  ;;  %v520_v63 = vld [vmem:[%s2396_s4 + $0x40] sm:$0xff] }
  0x8b   :  { %420 = vperm.xlu1 %1186, %v306_v1   ;;  %415 = vperm.xlu0 %1185, %v305_v2   ;;  %vm625_vm8 = vcmp.gt.f32.partialorder %v520_v63, 0.0 }
  0x8c   :  { %v1461_v4 = vpop.permute.xlu2 %196 }
  0x8d   :  { %2424 = vst [vmem:[#allocation6_spill] sm:$0xff] %v1461_v4  ;;  %v1463_v5 = vpop.permute.xlu1 %146  ;;  %v1465_v6 = vpop.permute.xlu0 %141 }
  0x92   :  { %440 = vperm.xlu2 %1187, %v310_v7  }
  0x93   :  { %435 = vperm.xlu1 %1186, %v309_v8   ;;  %430 = vperm.xlu0 %1185, %v308_v9   ;;  %v1594_v9 = vsel %vm623_vm5, 1, %v2404_v3  ;;  %vm636_vm5 = vcmp.gt.f32.partialorder %v531_v61, 0.0 }
  0x94   :  { %v1476_v10 = vpop.permute.xlu2 %211 }
  0x95   :  { %v1478_v11 = vpop.permute.xlu1 %161  ;;  %v1480_v12 = vpop.permute.xlu0 %156 }
  0x9a   :  { %455 = vperm.xlu2 %1187, %v313_v13   ;;  %v1597_v13 = vsel %vm622_vm6, 1, %v2404_v3 }
  0x9b   :  { %450 = vperm.xlu1 %1186, %v312_v14   ;;  %445 = vperm.xlu0 %1185, %v311_v15   ;;  %v519_v14 = vld [vmem:[%s2396_s4 + $0x38] sm:$0xff]  ;;  %v591_v15 = vld.sshfl [vmem:[#allocation1] sm:$0xff pattern:$0x73625140] }
  0x9c   :  { %v1494_v17 = vpop.permute.xlu2 %226  ;;  %vm624_vm9 = vcmp.gt.f32.partialorder %v519_v14, 0.0  ;;  %v596_v23 = vsel %vm595_vm7, %v591_v15, 0.0 }
  0x9d   :  { %v1496_v18 = vpop.permute.xlu1 %176  ;;  %v1498_v19 = vpop.permute.xlu0 %171  ;;  %v1619_v32 = vsel %vm624_vm9, 1, %v2404_v3  ;;  %v598_v33 = vadd.f32 %v597_v30, %v596_v23  ;;  %v1667_v23 = vsel %vm629_vm13, 1, %v2404_v3  ;;  %v527_v30 = vld [vmem:[%s2396_s4 + $0x78] sm:$0xff] }
  0x9e   :  { %vm632_vm14 = vcmp.gt.f32.partialorder %v527_v30, 0.0  ;;  %v528_v30 = vld [vmem:[%s2396_s4 + $0x80] sm:$0xff] }
  0x9f   :  { %vm633_vm2 = vcmp.gt.f32.partialorder %v528_v30, 0.0  ;;  %v532_v30 = vld [vmem:[%s2396_s4 + $0xa0] sm:$0xff] }
  0xa0   :  { %vm637_vm4 = vcmp.gt.f32.partialorder %v532_v30, 0.0 }
  0xa2   :  { %470 = vperm.xlu2 %1187, %v316_v20  }
  0xa3   :  { %465 = vperm.xlu1 %1186, %v315_v21   ;;  %460 = vperm.xlu0 %1185, %v314_v22  }
  0xa4   :  { %v1516_v26 = vpop.permute.xlu2 %241 }
  0xa5   :  { %v1518_v27 = vpop.permute.xlu1 %191  ;;  %v1520_v28 = vpop.permute.xlu0 %186 }
  0xa6   :  { %2426 = vst [vmem:[#allocation8_spill] sm:$0xff] %v1518_v27 }
  0xaa   :  { %682 = vperm.xlu2 %1187, %v1523_v29  }
  0xab   :  { %475 = vperm.xlu0 %1185, %v317_v31   ;;  %v1616_v31 = vsel %vm625_vm8, 1, %v2404_v3 }
  0xac   :  { %v321_v35 = vpop.permute.xlu2 %320 }
  0xad   :  { %v1539_v36 = vmul.f32 %v321_v35, %v254_v34  ;;  %v1541_v38 = vpop.permute.xlu1 %206  ;;  %v1543_v39 = vpop.permute.xlu0 %201  ;;  %v522_v34 = vld [vmem:[%s2396_s4 + $0x50] sm:$0xff]  ;;  %v521_v35 = vld [vmem:[%s2396_s4 + $0x48] sm:$0xff] }
  0xae   :  { %2427 = vst [vmem:[#allocation9_spill] sm:$0xff] %v1541_v38  ;;  %vm627_vm10 = vcmp.gt.f32.partialorder %v522_v34, 0.0  ;;  %vm626_vm11 = vcmp.gt.f32.partialorder %v521_v35, 0.0 }
  0xaf   :  { %2428 = vst [vmem:[#allocation10_spill] sm:$0xff] %v1543_v39  ;;  %v1642_v58 = vsel %vm626_vm11, 1, %v2404_v3  ;;  %v533_v39 = vld [vmem:[%s2396_s4 + $0xa8] sm:$0xff] }
  0xb0   :  { %vm638_vm6 = vcmp.gt.f32.partialorder %v533_v39, 0.0  ;;  %v39_v39 = vld [vmem:[%s2392_s0 + $0x48] sm:$0xff] }
  0xb2   :  { %688 = vperm.xlu2 %1187, %v1546_v40  }
  0xb3   :  { %685 = vperm.xlu0 %1185, %v1552_v43  }
  0xb4   :  { %v336_v48 = vpop.permute.xlu2 %335 }
  0xb5   :  { %v1563_v51 = vmul.f32 %v336_v48, %v257_v47  ;;  %v1565_v52 = vpop.permute.xlu1 %221  ;;  %v1567_v53 = vpop.permute.xlu0 %216  ;;  %v1636_v47 = vsel %vm627_vm10, 1, %v2404_v3  ;;  %v45_v48 = vld [vmem:[%s2392_s0 + $0x78] sm:$0xff] }
  0xba   :  { %694 = vperm.xlu2 %1187, %v1570_v54  }
  0xbb   :  { %691 = vperm.xlu0 %1185, %v1576_v56  }
  0xbc   :  { %v351_v1 = vpop.permute.xlu2 %350 }
  0xbd   :  { %v1587_v2 = vmul.f32 %v351_v1, %v260_v0  ;;  %v1589_v7 = vpop.permute.xlu1 %236  ;;  %v1591_v8 = vpop.permute.xlu0 %231  ;;  %v269_v0 = vmul.f32 %v1498_v19, %v45_v48  ;;  %v48_v19 = vld [vmem:[%s2392_s0 + $0x90] sm:$0xff] }
  0xbe   :  { %v272_v34 = vmul.f32 %v1520_v28, %v48_v19  ;;  %v529_v19 = vld [vmem:[%s2396_s4 + $0x88] sm:$0xff] }
  0xbf   :  { %vm634_vm1 = vcmp.gt.f32.partialorder %v529_v19, 0.0  ;;  %v44_v19 = vld [vmem:[%s2392_s0 + $0x70] sm:$0xff] }
  0xc0   :  { %v1711_v25 = vsel %vm634_vm1, 1, %v2404_v3  ;;  %v268_v27 = vmul.f32 %v1431_v55, %v44_v19  ;;  %v41_v55 = vld [vmem:[%s2392_s0 + $0x58] sm:$0xff] }
  0xc1   :  { %2435 = vst [vmem:[#allocation17_spill] sm:$0xff] %v1711_v25 }
  0xc2   :  { %700 = vperm.xlu2 %1187, %v1594_v9  }
  0xc3   :  { %697 = vperm.xlu0 %1185, %v1597_v13  }
  0xc4   :  { %v1607_v20 = vpop.permute.xlu2 %365 }
  0xc5   :  { %v1609_v21 = vpop.permute.xlu1 %251  ;;  %v1611_v22 = vpop.permute.xlu0 %246 }
  0xca   :  { %706 = vperm.xlu2 %1187, %v1616_v31  }
  0xcb   :  { %703 = vperm.xlu0 %1185, %v1619_v32  }
  0xcc   :  { %v1629_v42 = vpop.permute.xlu2 %380 }
  0xcd   :  { %599 = vadd.xlane.f32.xlu1 %v598_v33  ;;  %v1631_v44 = vpop.permute.xlu1 %330  ;;  %v1633_v46 = vpop.permute.xlu0 %325  ;;  %v526_v33 = vld [vmem:[%s2396_s4 + $0x70] sm:$0xff] }
  0xce   :  { %vm631_vm15 = vcmp.gt.f32.partialorder %v526_v33, 0.0 }
  0xcf   :  { %v1691_v28 = vsel %vm631_vm15, 1, %v2404_v3 }
  0xd0   :  { %2433 = vst [vmem:[#allocation15_spill] sm:$0xff] %v1691_v28 }
  0xd2   :  { %712 = vperm.xlu2 %1187, %v1636_v47  }
  0xd3   :  { %709 = vperm.xlu0 %1185, %v1642_v58  }
  0xd4   :  { %v396_v1 = vpop.permute.xlu2 %395 }
  0xd5   :  { %v1653_v63 = vmul.f32 %v396_v1, %v269_v0  ;;  %v1655_v14 = vpop.permute.xlu1 %345  ;;  %v1657_v15 = vpop.permute.xlu0 %340  ;;  %v523_v0 = vld [vmem:[%s2396_s4 + $0x58] sm:$0xff]  ;;  %v1688_v1 = vsel %vm632_vm14, 1, %v2404_v3 }
  0xd6   :  { %2432 = vst [vmem:[#allocation14_spill] sm:$0xff] %v1688_v1  ;;  %vm628_vm0 = vcmp.gt.f32.partialorder %v523_v0, 0.0 }
  0xd7   :  { %2429 = vst [vmem:[#allocation11_spill] sm:$0xff] %v1653_v63  ;;  %550 = vmatpush.msra.mxu0 %v1653_v63  ;;  %v1702_v33 = vsel %vm628_vm0, 1, %v2404_v3  ;;  %v530_v63 = vld [vmem:[%s2396_s4 + $0x90] sm:$0xff] }
  0xd8   :  { %vm635_vm3 = vcmp.gt.f32.partialorder %v530_v63, 0.0  ;;  %v2437_v63 = vmov 0  }
  0xd9   :  { %v1750_v19 = vsel %vm637_vm4, 1, %v2437_v63  ;;  %v1757_v38 = vsel %vm636_vm5, 1, %v2437_v63 }
  0xda   :  { %721 = vperm.xlu2 %1187, %v1661_v16  }
  0xdb   :  { %718 = vperm.xlu0 %1185, %v1667_v23  }
  0xdc   :  { %v411_v35 = vpop.permute.xlu2 %410 }
  0xdd   :  { %v1678_v48 = vmul.f32 %v411_v35, %v272_v34  ;;  %v1680_v59 = vpop.permute.xlu1 %360  ;;  %v1682_v60 = vpop.permute.xlu0 %355 }
  0xdf   :  { %2431 = vst [vmem:[#allocation13_spill] sm:$0xff] %v1678_v48  ;;  %v1714_v48 = vsel %vm633_vm2, 1, %v2404_v3  ;;  %v43_v3 = vld [vmem:[%s2392_s0 + $0x68] sm:$0xff] }
  0xe0   :  { %2436 = vst [vmem:[#allocation18_spill] sm:$0xff] %v1714_v48 }
  0xe2   :  { %727 = vperm.xlu2 %1187, %v1688_v1  }
  0xe3   :  { %724 = vperm.xlu0 %1185, %v1691_v28   ;;  %v1731_v28 = vsel %vm635_vm3, 1, %v2437_v63 }
  0xe4   :  { %v1704_v34 = vpop.permute.xlu2 %425 }
  0xe5   :  { %2434 = vst [vmem:[#allocation16_spill] sm:$0xff] %v1704_v34  ;;  %v376_v35 = vpop.permute.xlu1 %375  ;;  %v371_v0 = vpop.permute.xlu0 %370 }
  0xe6   :  { %715 = vperm.xlu1 %1186, %v1702_v33  }
  0xea   :  { %733 = vperm.xlu2 %1187, %v1711_v25   ;;  %v42_v25 = vld [vmem:[%s2392_s0 + $0x60] sm:$0xff] }
  0xeb   :  { %730 = vperm.xlu0 %1185, %v1714_v48   ;;  %v267_v48 = vmul.f32 %v1478_v11, %v43_v3  ;;  %v266_v30 = vmul.f32 %v1480_v12, %v42_v25  ;;  %v40_v3 = vld [vmem:[%s2392_s0 + $0x50] sm:$0xff]  ;;  %v46_v11 = vld [vmem:[%s2392_s0 + $0x80] sm:$0xff]  ;;  %v535_v12 = vld [vmem:[%s2396_s4 + $0xb8] sm:$0xff] }
  0xec   :  { %v1734_v1 = vpop.permute.xlu2 %440  ;;  %vm640_vm8 = vcmp.gt.f32.partialorder %v535_v12, 0.0 }
  0xed   :  { %v391_v34 = vpop.permute.xlu1 %390  ;;  %v386_v4 = vpop.permute.xlu0 %385  ;;  %v1770_v25 = vmul.f32 %v1629_v42, %v266_v30  ;;  %v270_v42 = vmul.f32 %v1496_v18, %v46_v11  ;;  %v38_v30 = vld [vmem:[%s2392_s0 + $0x40] sm:$0xff]  ;;  %v1810_v12 = vsel %vm640_vm8, 1, %v2437_v63 }
  0xee   :  { %v1743_v16 = vmul.f32 %v391_v34, %v268_v27  ;;  %736 = vperm.xlu1 %1186, %v1731_v28   ;;  %v1753_v61 = vmul.f32 %v386_v4, %v267_v48  ;;  %v265_v4 = vmul.f32 %v1416_v49, %v41_v55  ;;  %v534_v27 = vld [vmem:[%s2396_s4 + $0xb0] sm:$0xff]  ;;  %v1782_v48 = vsel %vm638_vm6, 1, %v2437_v63 }
  0xef   :  { %v264_v49 = vmul.f32 %v1463_v5, %v40_v3  ;;  %vm639_vm9 = vcmp.gt.f32.partialorder %v534_v27, 0.0  ;;  %v263_v5 = vmul.f32 %v1465_v6, %v39_v39  ;;  %v37_v3 = vld [vmem:[%s2392_s0 + $0x38] sm:$0xff] }
  0xf0   :  { %2438 = vst [vmem:[#allocation19_spill] sm:$0xff] %v1743_v16  ;;  %551 = vmatpush.msra.mxu0 %v1743_v16  ;;  %v1786_v34 = vmul.f32 %v376_v35, %v265_v4  ;;  %v262_v4 = vmul.f32 %v1405_v45, %v38_v30  ;;  %v261_v27 = vmul.f32 %v1448_v62, %v37_v3  ;;  %v537_v45 = vld [vmem:[%s2396_s4 + $0xc8] sm:$0xff]  ;;  %v539_v30 = vld [vmem:[%s2396_s4 + $0xd8] sm:$0xff] }
  0xf1   :  { %2439 = vst [vmem:[#allocation20_spill] sm:$0xff] %v1753_v61  ;;  %v1798_v18 = vmul.f32 %v371_v0, %v264_v49  ;;  %v1814_v6 = vmul.f32 %v1607_v20, %v263_v5  ;;  %v538_v0 = vld [vmem:[%s2396_s4 + $0xd0] sm:$0xff]  ;;  %v35_v20 = vld [vmem:[%s2392_s0 + $0x28] sm:$0xff]  ;;  %v34_v49 = vld [vmem:[%s2392_s0 + $0x20] sm:$0xff]  ;;  %vm642_vm12 = vcmp.gt.f32.partialorder %v537_v45, 0.0  ;;  %vm644_vm13 = vcmp.gt.f32.partialorder %v539_v30, 0.0 }
  0xf2   :  { %552 = vmatpush.msra.mxu0 %v1753_v61  ;;  %742 = vperm.xlu2 %1187, %v1750_v19   ;;  %2440 = vst [vmem:[#allocation21_spill] sm:$0xff] %v1786_v34  ;;  %v536_v61 = vld [vmem:[%s2396_s4 + $0xc0] sm:$0xff]  ;;  %v1825_v39 = vmul.f32 %v1680_v59, %v262_v4  ;;  %v1840_v62 = vmul.f32 %v1682_v60, %v261_v27  ;;  %vm643_vm11 = vcmp.gt.f32.partialorder %v538_v0, 0.0  ;;  %v1865_v0 = vsel %vm642_vm12, 1, %v2437_v63 }
  0xf3   :  { %739 = vperm.xlu0 %1185, %v1757_v38   ;;  %vm641_vm10 = vcmp.gt.f32.partialorder %v536_v61, 0.0  ;;  %v259_v5 = vmul.f32 %v1394_v41, %v35_v20  ;;  %v1857_v60 = vsel %vm643_vm11, 1, %v2437_v63  ;;  %v258_v3 = vmul.f32 %v1383_v37, %v34_v49  ;;  %v32_v41 = vld [vmem:[%s2392_s0 + $0x10] sm:$0xff]  ;;  %v541_v37 = vld [vmem:[%s2396_s4 + $0xe8] sm:$0xff] }
  0xf4   :  { %553 = vmatpush.msra.mxu0 %v1770_v25  ;;  %v1789_v55 = vpop.permute.xlu2 %455  ;;  %v1837_v61 = vsel %vm641_vm10, 1, %v2437_v63  ;;  %v1885_v20 = vsel %vm644_vm13, 1, %v2437_v63  ;;  %vm646_vm14 = vcmp.gt.f32.partialorder %v541_v37, 0.0 }
  0xf5   :  { %v401_v16 = vpop.permute.xlu0 %400  ;;  %v1807_v11 = vpop.permute.xlu1 %405  ;;  %v1861_v4 = vmul.f32 %v1655_v14, %v259_v5  ;;  %v1873_v45 = vmul.f32 %v1657_v15, %v258_v3  ;;  %v31_v14 = vld [vmem:[%s2392_s0 + $0x8] sm:$0xff]  ;;  %v256_v15 = vmul.f32 %v1418_v50, %v32_v41  ;;  %v1902_v50 = vsel %vm646_vm14, 1, %v2437_v63 }
  0xf6   :  { %v1800_v35 = vmul.f32 %v401_v16, %v270_v42  ;;  %745 = vperm.xlu1 %1186, %v1782_v48   ;;  %554 = vmatpush.msra.mxu0 %v1786_v34  ;;  %v1818_v16 = vsel %vm639_vm9, 1, %v2437_v63  ;;  %v255_v5 = vmul.f32 %v1435_v57, %v31_v14  ;;  %v2417_v41 = vmov 1  }
  0xf7   :  { %v1893_v3 = vmul.f32 %v1631_v44, %v256_v15 }
  0xf8   :  { %555 = vmatpush.msra.mxu0 %v1798_v18  ;;  %v1898_v34 = vmul.f32 %v1633_v46, %v255_v5 }
  0xfa   :  { %556 = vmatpush.msra.mxu0 %v1814_v6  ;;  %751 = vperm.xlu2 %1187, %v1810_v12  }
  0xfb   :  { %748 = vperm.xlu0 %1185, %v1818_v16  }
  0xfc   :  { %557 = vmatpush.msra.mxu0 %v1825_v39  ;;  %v1843_v59 = vpop.permute.xlu2 %470 }
  0xfd   :  { %v1848_v42 = vpop.permute.xlu0 %415  ;;  %v1870_v27 = vpop.permute.xlu1 %420 }
  0xfe   :  { %754 = vperm.xlu1 %1186, %v1837_v61   ;;  %558 = vmatpush.msra.mxu0 %v1840_v62 }
 0x100   :  { %559 = vmatpush.msra.mxu0 %v1587_v2 }
 0x102   :  { %560 = vmatpush.msra.mxu0 %v1861_v4  ;;  %760 = vperm.xlu2 %1187, %v1857_v60  }
 0x103   :  { %757 = vperm.xlu0 %1185, %v1865_v0  }
 0x104   :  { %561 = vmatpush.msra.mxu0 %v1873_v45  ;;  %v683_v49 = vpop.permute.xlu2 %682 }
 0x105   :  { %v1889_v30 = vpop.permute.xlu0 %430  ;;  %v1906_v57 = vpop.permute.xlu1 %435  ;;  %vm777_vm15 = vcmp.eq.s32.totalorder %v683_v49, 1 }
 0x106   :  { %763 = vperm.xlu1 %1186, %v1885_v20   ;;  %562 = vmatpush.msra.mxu0 %v1563_v51  ;;  %v809_v15 = vsel %vm777_vm15, %v1539_v36, -1e+30 }
 0x108   :  { %563 = vmatpush.msra.mxu0 %v1893_v3 }
 0x10a   :  { %564 = vmatpush.msra.mxu0 %v1898_v34  ;;  %1188 = vset.pattern.permute.xlu2 %v2417_v41 }
 0x10b   :  { %769 = vperm.xlu0 %1185, %v1902_v50   ;;  %882 = vperm.xlu2 %1188, %v1552_v43  }
 0x10c   :  { %565 = vmatpush.msra.mxu0 %v1539_v36  ;;  %v689_v44 = vpop.permute.xlu2 %688 }
 0x10d   :  { %v1911_v46 = vpop.permute.xlu0 %445  ;;  %566 = vmatmul.f32.vlgmr.msra.gmra.mxu0 %v1512_v24  ;;  %v451_v43 = vpop.permute.xlu1 %450  ;;  %vm779_vm1 = vcmp.eq.s32.totalorder %v689_v44, 1 }
 0x10e   :  { %1189 = vset.pattern.permute.xlu1 %v2417_v41 }
 0x10f   :  { %885 = vperm.xlu1 %1189, %v1546_v40   ;;  %v61_v40 = vld [vmem:[%s2392_s0 + $0xf8] sm:$0xff] }
 0x113   :  { %1191 = vset.pattern.permute.xlu0 %v2417_v41  ;;  %888 = vperm.xlu2 %1188, %v1576_v56   ;;  %v60_v56 = vld [vmem:[%s2392_s0 + $0xf0] sm:$0xff] }
 0x114   :  { %879 = vperm.xlu0 %1191, %v1523_v29   ;;  %v695_v37 = vpop.permute.xlu2 %694  ;;  %v285_v29 = vmul.f32 %v1609_v21, %v61_v40 }
 0x115   :  { %vm781_vm0 = vcmp.eq.s32.totalorder %v695_v37, 1  ;;  %v461_v14 = vpop.permute.xlu0 %460 }
 0x116   :  { %v813_v5 = vsel %vm781_vm0, %v1873_v45, -1e+30 }
 0x117   :  { %v841_v24 = vmax.f32 %v809_v15, %v813_v5  ;;  %891 = vperm.xlu1 %1189, %v1570_v54   ;;  %v59_v54 = vld [vmem:[%s2392_s0 + $0xe8] sm:$0xff]  ;;  %v284_v15 = vmul.f32 %v1611_v22, %v60_v56  ;;  %v811_v5 = vsel %vm779_vm1, %v1893_v3, -1e+30  ;;  %v57_v22 = vld [vmem:[%s2392_s0 + $0xd8] sm:$0xff] }
 0x118   :  { %v283_v40 = vmul.f32 %v1516_v26, %v59_v54  ;;  %v281_v26 = vmul.f32 %v1591_v8, %v57_v22  ;;  %v2445_v22 = vld [vmem:[#allocation12_spill] sm:$0xff] }
 0x11b   :  { %897 = vperm.xlu2 %1188, %v1594_v9   ;;  %v58_v9 = vld [vmem:[%s2392_s0 + $0xe0] sm:$0xff] }
 0x11c   :  { %894 = vperm.xlu0 %1191, %v1597_v13   ;;  %v701_v49 = vpop.permute.xlu2 %700  ;;  %v466_v13 = vpop.permute.xlu1 %465  ;;  %v282_v56 = vmul.f32 %v1589_v7, %v58_v9  ;;  %v55_v7 = vld [vmem:[%s2392_s0 + $0xc8] sm:$0xff] }
 0x11d   :  { %vm783_vm2 = vcmp.eq.s32.totalorder %v701_v49, 1  ;;  %v476_v37 = vpop.permute.xlu0 %475  ;;  %v1945_v49 = vmul.f32 %v1843_v59, %v284_v15  ;;  %v1969_v15 = vmul.f32 %v1789_v55, %v281_v26 }
 0x11e   :  { %v815_v41 = vsel %vm783_vm2, %v1587_v2, -1e+30  ;;  %v1937_v44 = vmul.f32 %v476_v37, %v285_v29  ;;  %v1952_v29 = vmul.f32 %v466_v13, %v283_v40  ;;  %v1960_v59 = vmul.f32 %v461_v14, %v282_v56  ;;  %v2444_v13 = vld [vmem:[#allocation9_spill] sm:$0xff]  ;;  %v2446_v56 = vld [vmem:[#allocation10_spill] sm:$0xff] }
 0x11f   :  { %v843_v21 = vmax.f32 %v811_v5, %v815_v41  ;;  %900 = vperm.xlu1 %1189, %v1619_v32   ;;  %v56_v32 = vld [vmem:[%s2392_s0 + $0xd0] sm:$0xff]  ;;  %v279_v14 = vmul.f32 %v1565_v52, %v55_v7 }
 0x120   :  { %570 = vmatpush.msra.mxu1 %v1937_v44  ;;  %2441 = vst [vmem:[#allocation22_spill] sm:$0xff] %v1952_v29  ;;  %v280_v37 = vmul.f32 %v1494_v17, %v56_v32  ;;  %v53_v17 = vld [vmem:[%s2392_s0 + $0xb8] sm:$0xff] }
 0x121   :  { %v1988_v9 = vmul.f32 %v1911_v46, %v279_v14  ;;  %v277_v52 = vmul.f32 %v1476_v10, %v53_v17  ;;  %v51_v46 = vld [vmem:[%s2392_s0 + $0xa8] sm:$0xff]  ;;  %v2452_v17 = vld [vmem:[#allocation15_spill] sm:$0xff] }
 0x122   :  { %571 = vmatpush.msra.mxu1 %v1945_v49  ;;  %v1980_v5 = vmul.f32 %v451_v43, %v280_v37  ;;  %v275_v32 = vmul.f32 %v2446_v56, %v51_v46  ;;  %v2448_v37 = vld [vmem:[#allocation16_spill] sm:$0xff]  ;;  %v2453_v46 = vld [vmem:[#allocation18_spill] sm:$0xff] }
 0x123   :  { %906 = vperm.xlu2 %1188, %v1642_v58   ;;  %2442 = vst [vmem:[#allocation23_spill] sm:$0xff] %v1988_v9 }
 0x124   :  { %903 = vperm.xlu0 %1191, %v1616_v31   ;;  %572 = vmatpush.msra.mxu1 %v1952_v29  ;;  %v707_v41 = vpop.permute.xlu2 %706  ;;  %v54_v31 = vld [vmem:[%s2392_s0 + $0xc0] sm:$0xff] }
 0x125   :  { %vm785_vm3 = vcmp.eq.s32.totalorder %v707_v41, 1  ;;  %v686_v54 = vpop.permute.xlu0 %685  ;;  %v278_v55 = vmul.f32 %v1567_v53, %v54_v31  ;;  %v2447_v41 = vld [vmem:[#allocation6_spill] sm:$0xff]  ;;  %v2451_v31 = vld [vmem:[#allocation8_spill] sm:$0xff] }
 0x126   :  { %v817_v8 = vsel %vm785_vm3, %v1825_v39, -1e+30  ;;  %573 = vmatpush.msra.mxu1 %v1960_v59  ;;  %vm778_vm5 = vcmp.eq.s32.totalorder %v686_v54, 1 }
 0x127   :  { %v1976_v58 = vmax.f32 %v841_v24, %v817_v8  ;;  %909 = vperm.xlu1 %1189, %v1636_v47   ;;  %v52_v47 = vld [vmem:[%s2392_s0 + $0xb0] sm:$0xff]  ;;  %v1997_v43 = vmul.f32 %v1734_v1, %v278_v55  ;;  %v50_v1 = vld [vmem:[%s2392_s0 + $0xa0] sm:$0xff]  ;;  %v2026_v8 = vmul.f32 %v2448_v37, %v275_v32 }
 0x128   :  { %574 = vmatpush.msra.mxu1 %v1969_v15  ;;  %v276_v40 = vmul.f32 %v2444_v13, %v52_v47  ;;  %v274_v7 = vmul.f32 %v2447_v41, %v50_v1  ;;  %v47_v47 = vld [vmem:[%s2392_s0 + $0x88] sm:$0xff] }
 0x129   :  { %2443 = vst [vmem:[#allocation24_spill] sm:$0xff] %v1997_v43  ;;  %v2454_v13 = vld [vmem:[#allocation5_spill] sm:$0xff] }
 0x12a   :  { %575 = vmatpush.msra.mxu1 %v1980_v5  ;;  %v2018_v26 = vmul.f32 %v1889_v30, %v276_v40  ;;  %2449 = vst [vmem:[#allocation9_spill] sm:$0xff] %v2026_v8  ;;  %v2032_v30 = vmul.f32 %v1870_v27, %v274_v7  ;;  %v810_v27 = vsel %vm778_vm5, %v1898_v34, -1e+30  ;;  %v271_v40 = vmul.f32 %v2454_v13, %v47_v47 }
 0x12b   :  { %915 = vperm.xlu2 %1188, %v1667_v23   ;;  %v2006_v23 = vmul.f32 %v1906_v57, %v277_v52  ;;  %v49_v57 = vld [vmem:[%s2392_s0 + $0x98] sm:$0xff] }
 0x12c   :  { %912 = vperm.xlu0 %1191, %v1702_v33   ;;  %576 = vmatpush.msra.mxu1 %v1988_v9  ;;  %v713_v53 = vpop.permute.xlu2 %712  ;;  %v273_v14 = vmul.f32 %v2451_v31, %v49_v57  ;;  %v2049_v1 = vmul.f32 %v1807_v11, %v271_v40  ;;  %v2457_v11 = vld [vmem:[#allocation7_spill] sm:$0xff]  ;;  %v2458_v31 = vld [vmem:[#allocation20_spill] sm:$0xff] }
 0x12d   :  { %vm787_vm4 = vcmp.eq.s32.totalorder %v713_v53, 1  ;;  %v692_v24 = vpop.permute.xlu0 %691 }
 0x12e   :  { %v819_v10 = vsel %vm787_vm4, %v1798_v18, -1e+30  ;;  %577 = vmatpush.msra.mxu1 %v1997_v43  ;;  %v2040_v53 = vmul.f32 %v1848_v42, %v273_v14  ;;  %vm780_vm8 = vcmp.eq.s32.totalorder %v692_v24, 1  ;;  %v2456_v42 = vld [vmem:[#allocation17_spill] sm:$0xff] }
 0x12f   :  { %v2013_v33 = vmax.f32 %v843_v21, %v819_v10  ;;  %918 = vperm.xlu1 %1189, %v2445_v22   ;;  %v2450_v21 = vld [vmem:[#allocation14_spill] sm:$0xff]  ;;  %v2455_v22 = vld [vmem:[#allocation13_spill] sm:$0xff]  ;;  %v812_v57 = vsel %vm780_vm8, %v1563_v51, -1e+30 }
 0x130   :  { %578 = vmatpush.msra.mxu1 %v2006_v23 }
 0x132   :  { %579 = vmatpush.msra.mxu1 %v2018_v26 }
 0x133   :  { %924 = vperm.xlu2 %1188, %v2450_v21  }
 0x134   :  { %921 = vperm.xlu0 %1191, %v2452_v17   ;;  %580 = vmatpush.msra.mxu1 %v2026_v8  ;;  %v722_v55 = vpop.permute.xlu2 %721 }
 0x135   :  { %v698_v52 = vpop.permute.xlu0 %697  ;;  %vm790_vm10 = vcmp.eq.s32.totalorder %v722_v55, 1 }
 0x136   :  { %vm782_vm6 = vcmp.eq.s32.totalorder %v698_v52, 1  ;;  %581 = vmatpush.msra.mxu1 %v2032_v30  ;;  %v822_v14 = vsel %vm790_vm10, %v2458_v31, -1e+30 }
 0x137   :  { %v814_v54 = vsel %vm782_vm6, %v1861_v4, -1e+30  ;;  %927 = vperm.xlu1 %1189, %v2453_v46   ;;  %v2459_v46 = vld [vmem:[#allocation19_spill] sm:$0xff] }
 0x138   :  { %v842_v10 = vmax.f32 %v810_v27, %v814_v54  ;;  %582 = vmatpush.msra.mxu1 %v2040_v53 }
 0x13a   :  { %583 = vmatpush.msra.mxu1 %v2455_v22 }
 0x13b   :  { %933 = vperm.xlu2 %1188, %v1731_v28  }
 0x13c   :  { %930 = vperm.xlu0 %1191, %v2456_v42   ;;  %584 = vmatpush.msra.mxu1 %v2049_v1  ;;  %v728_v56 = vpop.permute.xlu2 %727 }
 0x13d   :  { %v704_v32 = vpop.permute.xlu0 %703  ;;  %vm792_vm1 = vcmp.eq.s32.totalorder %v728_v56, 1 }
 0x13e   :  { %vm784_vm9 = vcmp.eq.s32.totalorder %v704_v32, 1  ;;  %585 = vmatpush.msra.mxu1 %v1800_v35 }
 0x13f   :  { %v816_v41 = vsel %vm784_vm9, %v1840_v62, -1e+30  ;;  %936 = vperm.xlu1 %1189, %v1757_v38   ;;  %586 = vmatmul.f32.vlgmr.msra.gmra.mxu1 %v2457_v11 }
 0x140   :  { %v844_v7 = vmax.f32 %v812_v57, %v816_v41  ;;  %v2075_v52 = vpop.xlane.xlu1 %599  ;;  %v2461_v57 = vld [vmem:[#allocation11_spill] sm:$0xff] }
 0x141   :  { %v824_v41 = vsel %vm792_vm1, %v2461_v57, -1e+30 }
 0x143   :  { %942 = vperm.xlu2 %1188, %v1782_v48  }
 0x144   :  { %939 = vperm.xlu0 %1191, %v1750_v19   ;;  %v734_v28 = vpop.permute.xlu2 %733 }
 0x145   :  { %v710_v24 = vpop.permute.xlu0 %709  ;;  %vm794_vm12 = vcmp.eq.s32.totalorder %v734_v28, 1 }
 0x146   :  { %vm786_vm11 = vcmp.eq.s32.totalorder %v710_v24, 1  ;;  %v826_v17 = vsel %vm794_vm12, %v2049_v1, -1e+30 }
 0x147   :  { %v818_v37 = vsel %vm786_vm11, %v1814_v6, -1e+30  ;;  %945 = vperm.xlu1 %1189, %v1818_v16   ;;  %v540_v16 = vld [vmem:[%s2396_s4 + $0xe0] sm:$0xff] }
 0x148   :  { %v846_v21 = vmax.f32 %v842_v10, %v818_v37  ;;  %vm645_vm14 = vcmp.gt.f32.partialorder %v540_v16, 0.0  ;;  %v2460_v10 = vld [vmem:[#allocation21_spill] sm:$0xff] }
 0x14a   :  { %v850_v38 = vmax.f32 %v846_v21, %v822_v14 }
 0x14b   :  { %951 = vperm.xlu2 %1188, %v1837_v61  }
 0x14c   :  { %948 = vperm.xlu0 %1191, %v1810_v12   ;;  %v743_v19 = vpop.permute.xlu2 %742  ;;  %v2068_v48 = vmax.f32 %v850_v38, %v826_v17  ;;  %v542_v12 = vld [vmem:[%s2396_s4 + $0xf0] sm:$0xff] }
 0x14d   :  { %v719_v55 = vpop.permute.xlu0 %718  ;;  %vm647_vm0 = vcmp.gt.f32.partialorder %v542_v12, 0.0  ;;  %vm797_vm4 = vcmp.eq.s32.totalorder %v743_v19, 1 }
 0x14e   :  { %vm789_vm13 = vcmp.eq.s32.totalorder %v719_v55, 1  ;;  %v2462_v55 = vmov 1  }
 0x14f   :  { %v821_v47 = vsel %vm789_vm13, %v1770_v25, -1e+30  ;;  %954 = vperm.xlu1 %1189, %v1865_v0   ;;  %v677_v0 = vsel %vm645_vm14, 1, %v2437_v63 }
 0x150   :  { %v849_v27 = vmax.f32 %v1976_v58, %v821_v47 }
 0x153   :  { %960 = vperm.xlu2 %1188, %v1885_v20   ;;  %v543_v20 = vld [vmem:[%s2396_s4 + $0xf8] sm:$0xff] }
 0x154   :  { %957 = vperm.xlu0 %1191, %v1857_v60   ;;  %v752_v61 = vpop.permute.xlu2 %751  ;;  %v679_v60 = vsel %vm647_vm0, 1, %v2437_v63  ;;  %vm648_vm3 = vcmp.gt.f32.partialorder %v543_v20, 0.0 }
 0x155   :  { %v725_v54 = vpop.permute.xlu0 %724  ;;  %vm800_vm8 = vcmp.eq.s32.totalorder %v752_v61, 1 }
 0x156   :  { %vm791_vm15 = vcmp.eq.s32.totalorder %v725_v54, 1  ;;  %v832_v12 = vsel %vm800_vm8, %v2006_v23, -1e+30 }
 0x157   :  { %v823_v13 = vsel %vm791_vm15, %v2459_v46, -1e+30  ;;  %1190 = vset.pattern.permute.xlu1 %v2437_v63 }
 0x158   :  { %v851_v58 = vmax.f32 %v2013_v33, %v823_v13  ;;  %766 = vperm.xlu1 %1190, %v677_v0   ;;  %v716_v40 = vpop.permute.xlu1 %715  ;;  %v680_v33 = vsel %vm648_vm3, 1, %v2437_v63 }
 0x159   :  { %vm788_vm2 = vcmp.eq.s32.totalorder %v716_v40, 1 }
 0x15a   :  { %v820_v42 = vsel %vm788_vm2, %v2460_v10, -1e+30 }
 0x15b   :  { %v848_v32 = vmax.f32 %v844_v7, %v820_v42  ;;  %1192 = vset.pattern.permute.xlu2 %v2437_v63  ;;  %v829_v7 = vsel %vm797_vm4, %v2032_v30, -1e+30 }
 0x15c   :  { %969 = vperm.xlu0 %1191, %v679_v60   ;;  %772 = vperm.xlu2 %1192, %v679_v60   ;;  %v761_v11 = vpop.permute.xlu2 %760 }
 0x15d   :  { %v731_v28 = vpop.permute.xlu0 %730  ;;  %v852_v24 = vmax.f32 %v848_v32, %v824_v41  ;;  %vm803_vm11 = vcmp.eq.s32.totalorder %v761_v11, 1 }
 0x15e   :  { %vm793_vm5 = vcmp.eq.s32.totalorder %v731_v28, 1  ;;  %v835_v42 = vsel %vm803_vm11, %v1980_v5, -1e+30 }
 0x15f   :  { %v825_v56 = vsel %vm793_vm5, %v1800_v35, -1e+30 }
 0x160   :  { %v853_v37 = vmax.f32 %v849_v27, %v825_v56  ;;  %775 = vperm.xlu1 %1190, %v680_v33   ;;  %v737_v21 = vpop.permute.xlu1 %736 }
 0x161   :  { %vm795_vm6 = vcmp.eq.s32.totalorder %v737_v21, 1 }
 0x162   :  { %v827_v14 = vsel %vm795_vm6, %v2455_v22, -1e+30  ;;  %v857_v38 = vmax.f32 %v853_v37, %v829_v7 }
 0x163   :  { %v855_v17 = vmax.f32 %v851_v58, %v827_v14 }
 0x164   :  { %1193 = vset.pattern.permute.xlu2 %v2462_v55 }
 0x165   :  { %v740_v47 = vpop.permute.xlu0 %739  ;;  %963 = vperm.xlu2 %1193, %v677_v0   ;;  %v2099_v63 = vpop.permute.xlu2 %882 }
 0x166   :  { %vm796_vm9 = vcmp.eq.s32.totalorder %v740_v47, 1  ;;  %vm975_vm8 = vcmp.eq.s32.totalorder %v2099_v63, 1 }
 0x167   :  { %v828_v19 = vsel %vm796_vm9, %v2040_v53, -1e+30 }
 0x168   :  { %v856_v16 = vmax.f32 %v852_v24, %v828_v19  ;;  %1194 = vset.pattern.permute.xlu1 %v2462_v55  ;;  %v746_v27 = vpop.permute.xlu1 %745  ;;  %v1114_v19 = vld [vmem:[%s2398_s6 + $0xf8] sm:$0xff] }
 0x169   :  { %vm798_vm10 = vcmp.eq.s32.totalorder %v746_v27, 1  ;;  %966 = vperm.xlu1 %1194, %v1902_v50   ;;  %1145 = vmatpush.msra.mxu3 %v1114_v19  ;;  %v1112_v19 = vld [vmem:[%s2398_s6 + $0xe8] sm:$0xff] }
 0x16a   :  { %v830_v54 = vsel %vm798_vm10, %v2026_v8, -1e+30  ;;  %v860_v13 = vmax.f32 %v856_v16, %v832_v12 }
 0x16b   :  { %v858_v0 = vmax.f32 %v2068_v48, %v830_v54 }
 0x16d   :  { %v749_v20 = vpop.permute.xlu0 %748  ;;  %972 = vperm.xlu2 %1193, %v680_v33   ;;  %v2107_v61 = vpop.permute.xlu2 %888 }
 0x16e   :  { %vm799_vm12 = vcmp.eq.s32.totalorder %v749_v20, 1  ;;  %vm977_vm4 = vcmp.eq.s32.totalorder %v2107_v61, 1  ;;  %v1113_v61 = vld [vmem:[%s2398_s6 + $0xf0] sm:$0xff] }
 0x16f   :  { %v831_v58 = vsel %vm799_vm12, %v2018_v26, -1e+30  ;;  %1146 = vmatpush.msra.mxu3 %v1113_v61 }
 0x170   :  { %v859_v40 = vmax.f32 %v855_v17, %v831_v58  ;;  %v755_v60 = vpop.permute.xlu1 %754 }
 0x171   :  { %vm801_vm13 = vcmp.eq.s32.totalorder %v755_v60, 1  ;;  %1147 = vmatpush.msra.mxu3 %v1112_v19 }
 0x172   :  { %v833_v50 = vsel %vm801_vm13, %v1997_v43, -1e+30  ;;  %v2112_v32 = vmax.f32 %v859_v40, %v835_v42 }
 0x173   :  { %v2114_v41 = vmax.f32 %v857_v38, %v833_v50  ;;  %v1098_v38 = vld [vmem:[%s2398_s6 + $0x78] sm:$0xff] }
 0x174   :  { %1125 = vmatpush.msra.mxu2 %v1098_v38  ;;  %v1096_v38 = vld [vmem:[%s2398_s6 + $0x68] sm:$0xff] }
 0x175   :  { %v758_v48 = vpop.permute.xlu0 %757  ;;  %v898_v28 = vpop.permute.xlu2 %897 }
 0x176   :  { %vm802_vm14 = vcmp.eq.s32.totalorder %v758_v48, 1  ;;  %vm980_vm1 = vcmp.eq.s32.totalorder %v898_v28, 1 }
 0x177   :  { %v834_v33 = vsel %vm802_vm14, %v1988_v9, -1e+30  ;;  %v2130_v55 = vsel %vm980_vm1, %v1587_v2, -1e+30  ;;  %v1009_v9 = vsel %vm977_vm4, %v1563_v51, -1e+30 }
 0x178   :  { %v2117_v11 = vmax.f32 %v858_v0, %v834_v33  ;;  %v764_v24 = vpop.permute.xlu1 %763 }
 0x179   :  { %vm804_vm15 = vcmp.eq.s32.totalorder %v764_v24, 1 }
 0x17a   :  { %v836_v56 = vsel %vm804_vm15, %v1969_v15, -1e+30 }
 0x17b   :  { %v2120_v37 = vmax.f32 %v860_v13, %v836_v56 }
 0x17d   :  { %v770_v21 = vpop.permute.xlu0 %769  ;;  %v2122_v7 = vpop.permute.xlu2 %906 }
 0x17e   :  { %vm806_vm0 = vcmp.eq.s32.totalorder %v770_v21, 1  ;;  %vm983_vm9 = vcmp.eq.s32.totalorder %v2122_v7, 1  ;;  %v1111_v7 = vld [vmem:[%s2398_s6 + $0xe0] sm:$0xff] }
 0x17f   :  { %v2125_v14 = vsel %vm806_vm0, %v1952_v29, -1e+30  ;;  %1148 = vmatpush.msra.mxu3 %v1111_v7  ;;  %v1106_v7 = vld [vmem:[%s2398_s6 + $0xb8] sm:$0xff] }
 0x181   :  { %v886_v17 = vpop.permute.xlu1 %885 }
 0x182   :  { %vm976_vm2 = vcmp.eq.s32.totalorder %v886_v17, 1 }
 0x183   :  { %v2133_v47 = vsel %vm976_vm2, %v1893_v3, -1e+30 }
 0x185   :  { %v2137_v16 = vpop.permute.xlu2 %915 }
 0x186   :  { %v2139_v27 = vpop.permute.xlu0 %879  ;;  %vm986_vm0 = vcmp.eq.s32.totalorder %v2137_v16, 1 }
 0x187   :  { %vm974_vm13 = vcmp.eq.s32.totalorder %v2139_v27, 1 }
 0x189   :  { %v2141_v12 = vpop.permute.xlu1 %891 }
 0x18a   :  { %vm978_vm14 = vcmp.eq.s32.totalorder %v2141_v12, 1 }
 0x18d   :  { %v925_v54 = vpop.permute.xlu2 %924 }
 0x18e   :  { %v2143_v13 = vpop.permute.xlu0 %894  ;;  %vm989_vm11 = vcmp.eq.s32.totalorder %v925_v54, 1 }
 0x18f   :  { %v1021_v61 = vsel %vm989_vm11, %v2461_v57, -1e+30  ;;  %vm979_vm1 = vcmp.eq.s32.totalorder %v2143_v13, 1  ;;  %v1093_v57 = vld [vmem:[%s2398_s6 + $0x50] sm:$0xff] }
 0x190   :  { %v1011_v27 = vsel %vm979_vm1, %v1861_v4, -1e+30  ;;  %v1091_v4 = vld [vmem:[%s2398_s6 + $0x40] sm:$0xff] }
 0x191   :  { %v901_v0 = vpop.permute.xlu1 %900 }
 0x192   :  { %vm981_vm3 = vcmp.eq.s32.totalorder %v901_v0, 1  ;;  %v1097_v0 = vld [vmem:[%s2398_s6 + $0x70] sm:$0xff] }
 0x193   :  { %v1013_v29 = vsel %vm981_vm3, %v1840_v62, -1e+30  ;;  %1126 = vmatpush.msra.mxu2 %v1097_v0 }
 0x194   :  { %v1041_v51 = vmax.f32 %v1009_v9, %v1013_v29  ;;  %v2206_v29 = vsel %vm983_vm9, %v1814_v6, -1e+30  ;;  %v1110_v6 = vld [vmem:[%s2398_s6 + $0xd8] sm:$0xff] }
 0x195   :  { %v2145_v20 = vpop.permute.xlu2 %933  ;;  %1127 = vmatpush.msra.mxu2 %v1096_v38  ;;  %1149 = vmatpush.msra.mxu3 %v1110_v6 }
 0x196   :  { %v2147_v2 = vpop.permute.xlu0 %903  ;;  %vm992_vm2 = vcmp.eq.s32.totalorder %v2145_v20, 1 }
 0x199   :  { %v910_v58 = vpop.permute.xlu1 %909 }
 0x19a   :  { %vm984_vm6 = vcmp.eq.s32.totalorder %v910_v58, 1 }
 0x19b   :  { %v1016_v63 = vsel %vm984_vm6, %v1798_v18, -1e+30  ;;  %v2209_v18 = vmax.f32 %v2075_v52, 1.0  ;;  %v2463_v52 = vmax.f32 %v2133_v47, %v2130_v55  ;;  %v1109_v55 = vld [vmem:[%s2398_s6 + $0xd0] sm:$0xff]  ;;  %v1006_v47 = vsel %vm974_vm13, %v1539_v36, -1e+30 }
 0x19c   :  { %1150 = vmatpush.msra.mxu3 %v1109_v55  ;;  %v1108_v36 = vld [vmem:[%s2398_s6 + $0xc8] sm:$0xff] }
 0x19d   :  { %v2149_v3 = vpop.permute.xlu2 %942  ;;  %1196 = vrcp.f32 %v2209_v18 }
 0x19e   :  { %v913_v40 = vpop.permute.xlu0 %912  ;;  %1151 = vmatpush.msra.mxu3 %v1108_v36  ;;  %v1101_v36 = vld [vmem:[%s2398_s6 + $0x90] sm:$0xff]  ;;  %vm995_vm1 = vcmp.eq.s32.totalorder %v2149_v3, 1 }
 0x19f   :  { %vm985_vm5 = vcmp.eq.s32.totalorder %v913_v40, 1  ;;  %v2203_v40 = vsel %vm975_vm8, %v1898_v34, -1e+30  ;;  %v1094_v34 = vld [vmem:[%s2398_s6 + $0x58] sm:$0xff] }
 0x1a0   :  { %v1017_v62 = vsel %vm985_vm5, %v2460_v10, -1e+30  ;;  %v1095_v10 = vld [vmem:[%s2398_s6 + $0x60] sm:$0xff]  ;;  %vm982_vm5 = vcmp.eq.s32.totalorder %v2147_v2, 1  ;;  %v1039_v6 = vmax.f32 %v2203_v40, %v1011_v27  ;;  %v2464_v40 = vmax.f32 %v2117_v11, %v2125_v14 }
 0x1a1   :  { %v2151_v60 = vpop.permute.xlu1 %918  ;;  %v1045_v9 = vmax.f32 %v1041_v51, %v1017_v62  ;;  %1128 = vmatpush.msra.mxu2 %v1095_v10  ;;  %v1044_v62 = vmax.f32 %v2463_v52, %v1016_v63  ;;  %v1092_v51 = vld [vmem:[%s2398_s6 + $0x48] sm:$0xff]  ;;  %v1090_v10 = vld [vmem:[%s2398_s6 + $0x38] sm:$0xff]  ;;  %v1018_v11 = vsel %vm986_vm0, %v1770_v25, -1e+30  ;;  %v1087_v25 = vld [vmem:[%s2398_s6 + $0x20] sm:$0xff] }
 0x1a3   :  { %1129 = vmatpush.msra.mxu2 %v1094_v34  ;;  %v1049_v38 = vmax.f32 %v1045_v9, %v1021_v61  ;;  %v1014_v9 = vsel %vm982_vm5, %v1825_v39, -1e+30  ;;  %v1089_v39 = vld [vmem:[%s2398_s6 + $0x30] sm:$0xff] }
 0x1a5   :  { %v2153_v42 = vpop.permute.xlu2 %951  ;;  %1130 = vmatpush.msra.mxu2 %v1093_v57  ;;  %v1104_v57 = vld [vmem:[%s2398_s6 + $0xa8] sm:$0xff] }
 0x1a6   :  { %v922_v50 = vpop.permute.xlu0 %921 }
 0x1a7   :  { %vm988_vm10 = vcmp.eq.s32.totalorder %v922_v50, 1  ;;  %1131 = vmatpush.msra.mxu2 %v1092_v51  ;;  %v1086_v51 = vld [vmem:[%s2398_s6 + $0x18] sm:$0xff] }
 0x1a8   :  { %v1020_v0 = vsel %vm988_vm10, %v2459_v46, -1e+30  ;;  %vm987_vm10 = vcmp.eq.s32.totalorder %v2151_v60, 1 }
 0x1a9   :  { %v2155_v48 = vpop.permute.xlu1 %927  ;;  %v1048_v54 = vmax.f32 %v1044_v62, %v1020_v0  ;;  %1132 = vmatpush.msra.mxu2 %v1091_v4  ;;  %v1019_v14 = vsel %vm987_vm10, %v2458_v31, -1e+30  ;;  %v1103_v31 = vld [vmem:[%s2398_s6 + $0xa0] sm:$0xff] }
 0x1aa   :  { %vm990_vm13 = vcmp.eq.s32.totalorder %v2155_v48, 1  ;;  %v2466_v4 = vld [vmem:[#allocation23_spill] sm:$0xff] }
 0x1ab   :  { %1133 = vmatpush.msra.mxu2 %v1090_v10  ;;  %v1022_v60 = vsel %vm990_vm13, %v1800_v35, -1e+30  ;;  %v1102_v35 = vld [vmem:[%s2398_s6 + $0x98] sm:$0xff] }
 0x1ad   :  { %v2157_v28 = vpop.permute.xlu2 %960  ;;  %1134 = vmatpush.msra.mxu2 %v1089_v39 }
 0x1ae   :  { %v2159_v33 = vpop.permute.xlu0 %930  ;;  %vm1001_vm6 = vcmp.eq.s32.totalorder %v2157_v28, 1 }
 0x1af   :  { %v1033_v0 = vsel %vm1001_vm6, %v1969_v15, -1e+30  ;;  %v1105_v15 = vld [vmem:[%s2398_s6 + $0xb0] sm:$0xff] }
 0x1b1   :  { %v937_v24 = vpop.permute.xlu1 %936 }
 0x1b2   :  { %vm993_vm12 = vcmp.eq.s32.totalorder %v937_v24, 1 }
 0x1b3   :  { %v1025_v46 = vsel %vm993_vm12, %v2040_v53, -1e+30  ;;  %v1010_v53 = vsel %vm978_vm14, %v1873_v45, -1e+30  ;;  %v1024_v45 = vsel %vm992_vm2, %v2455_v22, -1e+30 }
 0x1b4   :  { %v1053_v12 = vmax.f32 %v1049_v38, %v1025_v46  ;;  %v1107_v22 = vld [vmem:[%s2398_s6 + $0xc0] sm:$0xff]  ;;  %v1052_v13 = vmax.f32 %v1048_v54, %v1024_v45  ;;  %v1038_v63 = vmax.f32 %v1006_v47, %v1010_v53  ;;  %vm991_vm14 = vcmp.eq.s32.totalorder %v2159_v33, 1  ;;  %v2315_v54 = vpop.eup %1196 }
 0x1b5   :  { %1152 = vmatpush.msra.mxu3 %v1107_v22  ;;  %v1043_v38 = vmax.f32 %v1039_v6, %v2206_v29  ;;  %v1023_v29 = vsel %vm991_vm14, %v2049_v1, -1e+30  ;;  %v1085_v1 = vld [vmem:[%s2398_s6 + $0x10] sm:$0xff]  ;;  %vm608_vm6 = vweird.f32 %v2315_v54 }
 0x1b6   :  { %v2161_v56 = vpop.permute.xlu0 %939  ;;  %v2163_v21 = vpop.permute.xlu2 %772  ;;  %v1042_v62 = vmax.f32 %v1038_v63, %v1014_v9  ;;  %v2467_v63 = vld [vmem:[#allocation24_spill] sm:$0xff] }
 0x1b7   :  { %1153 = vmatpush.msra.mxu3 %v1106_v7  ;;  %vm807_vm11 = vcmp.eq.s32.totalorder %v2163_v21, 1 }
 0x1b8   :  { %v839_v53 = vsel %vm807_vm11, %v1945_v49, -1e+30  ;;  %v1046_v21 = vmax.f32 %v1042_v62, %v1018_v11  ;;  %vm1075_vm11 = vcmask 1040384  }
 0x1b9   :  { %v2165_v17 = vpop.permute.xlu1 %945  ;;  %1154 = vmatpush.msra.mxu3 %v1105_v15  ;;  %v867_v33 = vmax.f32 %v2112_v32, %v839_v53  ;;  %v1100_v32 = vld [vmem:[%s2398_s6 + $0x88] sm:$0xff] }
 0x1ba   :  { %vm996_vm3 = vcmp.eq.s32.totalorder %v2165_v17, 1  ;;  %v1050_v27 = vmax.f32 %v1046_v21, %v1022_v60 }
 0x1bb   :  { %1155 = vmatpush.msra.mxu3 %v1104_v57 }
 0x1bd   :  { %1156 = vmatpush.msra.mxu3 %v1103_v31 }
 0x1be   :  { %v949_v43 = vpop.permute.xlu0 %948 }
 0x1bf   :  { %v2182_v8 = vpop.permute.xlu2 %963  ;;  %vm997_vm15 = vcmp.eq.s32.totalorder %v949_v43, 1  ;;  %v1028_v43 = vsel %vm996_vm3, %v2018_v26, -1e+30  ;;  %1157 = vmatpush.msra.mxu3 %v1102_v35  ;;  %vm998_vm3 = vcmp.eq.s32.totalorder %v2153_v42, 1  ;;  %v1195_v35 = vld [vmem:[%s2399_s7] ss:$0 sm:$0xff] }
 0x1c0   :  { %v1029_v24 = vsel %vm997_vm15, %v2006_v23, -1e+30  ;;  %v1056_v34 = vmax.f32 %v1052_v13, %v1028_v43  ;;  %vm994_vm15 = vcmp.eq.s32.totalorder %v2161_v56, 1  ;;  %v2465_v43 = vld [vmem:[#allocation9_spill] sm:$0xff] }
 0x1c1   :  { %v2193_v58 = vpop.permute.xlu1 %954  ;;  %v1057_v20 = vmax.f32 %v1053_v12, %v1029_v24  ;;  %v1026_v48 = vsel %vm994_vm15, %v2032_v30, -1e+30  ;;  %v1084_v30 = vld [vmem:[%s2398_s6 + $0x8] sm:$0xff]  ;;  %1158 = vmatpush.msra.mxu3 %v1101_v36  ;;  %v1099_v12 = vld [vmem:[%s2398_s6 + $0x80] sm:$0xff] }
 0x1c2   :  { %vm999_vm2 = vcmp.eq.s32.totalorder %v2193_v58, 1  ;;  %v1054_v3 = vmax.f32 %v1050_v27, %v1026_v48  ;;  %v1083_v58 = vld [vmem:[%s2398_s6] sm:$0xff] }
 0x1c3   :  { %v1061_v28 = vmax.f32 %v1057_v20, %v1033_v0  ;;  %v1031_v22 = vsel %vm999_vm2, %v2466_v4, -1e+30  ;;  %1159 = vmatpush.msra.mxu3 %v1100_v32  ;;  %v2468_v0 = vld [vmem:[#allocation22_spill] sm:$0xff] }
 0x1c5   :  { %1160 = vmatpush.msra.mxu3 %v1099_v12 }
 0x1c6   :  { %v958_v50 = vpop.permute.xlu0 %957 }
 0x1c7   :  { %v973_v19 = vpop.permute.xlu2 %972  ;;  %vm1000_vm4 = vcmp.eq.s32.totalorder %v958_v50, 1  ;;  %v1088_v50 = vld [vmem:[%s2398_s6 + $0x28] sm:$0xff] }
 0x1c8   :  { %vm1005_vm8 = vcmp.eq.s32.totalorder %v973_v19, 1  ;;  %v1032_v26 = vsel %vm1000_vm4, %v1980_v5, -1e+30  ;;  %1135 = vmatpush.msra.mxu2 %v1088_v50  ;;  %vm1002_vm4 = vcmp.eq.s32.totalorder %v2182_v8, 1 }
 0x1c9   :  { %v1037_v61 = vsel %vm1005_vm8, %v1937_v44, -1e+30  ;;  %v1034_v8 = vsel %vm1002_vm4, %v1960_v59, -1e+30  ;;  %vm607_vm8 = vweird.f32 %v2209_v18 }
 0x1ca   :  { %v767_v23 = vpop.permute.xlu1 %766  ;;  %v1065_v55 = vmax.f32 %v1061_v28, %v1037_v61  ;;  %1136 = vmatpush.msra.mxu2 %v1087_v25 }
 0x1cb   :  { %vm805_vm9 = vcmp.eq.s32.totalorder %v767_v23, 1  ;;  %v1027_v23 = vsel %vm995_vm1, %v2465_v43, -1e+30 }
 0x1cc   :  { %v837_v17 = vsel %vm805_vm9, %v1960_v59, -1e+30  ;;  %1137 = vmatpush.msra.mxu2 %v1086_v51  ;;  %v567_v59 = vpop.f32.mrf.mxu0  ;;  %vm609_vm9 = vmor %vm607_vm8, %vm608_vm6 }
 0x1cd   :  { %v865_v5 = vmax.f32 %v2114_v41, %v837_v17  ;;  %v1060_v41 = vmax.f32 %v1056_v34, %v1032_v26  ;;  %v1030_v26 = vsel %vm998_vm3, %v2467_v63, -1e+30 }
 0x1ce   :  { %v970_v2 = vpop.permute.xlu0 %969  ;;  %1138 = vmatpush.msra.mxu2 %v1085_v1  ;;  %v1058_v7 = vmax.f32 %v1054_v3, %v1030_v26 }
 0x1cf   :  { %v869_v52 = vmax.f32 %v865_v5, %v2464_v40  ;;  %vm1004_vm12 = vcmp.eq.s32.totalorder %v970_v2, 1  ;;  %v587_v40 = vpop.f32.mrf.mxu1 }
 0x1d0   :  { %v1036_v46 = vsel %vm1004_vm12, %v1945_v49, -1e+30  ;;  %v1047_v49 = vmax.f32 %v1043_v38, %v1019_v14  ;;  %1139 = vmatpush.msra.mxu2 %v1084_v30  ;;  %v1062_v5 = vmax.f32 %v1058_v7, %v1034_v8  ;;  %v588_v11 = vadd.f32 %v587_v40, %v567_v59 }
 0x1d1   :  { %v1064_v47 = vmax.f32 %v1060_v41, %v1036_v46  ;;  %v611_v46 = vand.u32 2147483647, %v2209_v18 }
 0x1d2   :  { %v776_v16 = vpop.permute.xlu1 %775  ;;  %v1051_v45 = vmax.f32 %v1047_v49, %v1023_v29  ;;  %1140 = vmatpush.msra.mxu2 %v1083_v58 }
 0x1d3   :  { %v1067_v24 = vmax.f32 %v1064_v47, %v1065_v55  ;;  %vm808_vm0 = vcmp.eq.s32.totalorder %v776_v16, 1  ;;  %vm612_vm10 = vcmp.eq.f32.partialorder %v611_v46, 8.507059e+37 }
 0x1d4   :  { %v840_v19 = vsel %vm808_vm0, %v1937_v44, -1e+30  ;;  %v1055_v20 = vmax.f32 %v1051_v45, %v1027_v23 }
 0x1d5   :  { %v868_v44 = vmax.f32 %v2120_v37, %v840_v19  ;;  %v603_v37 = vmul.f32 %v2315_v54, %v2209_v18 }
 0x1d6   :  { %v1059_v9 = vmax.f32 %v1055_v20, %v1031_v22 }
 0x1d7   :  { %v870_v56 = vmax.f32 %v867_v33, %v868_v44  ;;  %v604_v42 = vsub.f32 1.0, %v603_v37 }
 0x1d9   :  { %v871_v13 = vmax.f32 %v869_v52, %v870_v56  ;;  %v605_v2 = vmul.f32 %v2315_v54, %v604_v42  ;;  %v613_v52 = vand.u32 2147483648, %v2209_v18  ;;  %v510_v18 = vld [vmem:[%s2397_s5] sm:$0xf]  ;;  %s1173_s5 = sshll.u32 %s2400_s8, 4  ;;  %s1174_s5 = int_to_ptr.hbm [resolvable:$true] %s1173_s5 }
 0x1db   :  { %v872_v17 = vrot.slane %v871_v13, 4  ;;  %v967_v10 = vpop.permute.xlu1 %966  ;;  %v606_v28 = vadd.f32 %v2315_v54, %v605_v2  ;;  %v614_v55 = vor.u32 1.1754944e-38, %v613_v52 }
 0x1dc   :  { %vm1003_vm5 = vcmp.eq.s32.totalorder %v967_v10, 1 }
 0x1dd   :  { %v1035_v34 = vsel %vm1003_vm5, %v2468_v0, -1e+30  ;;  %v873_v6 = vmax.f32 %v871_v13, %v872_v17  ;;  %v610_v14 = vsel %vm609_vm9, %v2315_v54, %v606_v28 }
 0x1de   :  { %v1063_v61 = vmax.f32 %v1059_v9, %v1035_v34  ;;  %v615_v38 = vsel %vm612_vm10, %v614_v55, %v610_v14 }
 0x1df   :  { %v874_v15 = vrot.slane %v873_v6, 2  ;;  %v616_v25 = vmul.f32 %v615_v38, %v588_v11 }
 0x1e0   :  { %v1066_v39 = vmax.f32 %v1062_v5, %v1063_v61 }
 0x1e1   :  { %v875_v50 = vmax.f32 %v873_v6, %v874_v15 }
 0x1e2   :  { %v1068_v41 = vmax.f32 %v1066_v39, %v1067_v24  ;;  %v1079_v24 = vrot.slane %v616_v25, 6 }
 0x1e3   :  { %v876_v53 = vrot.slane %v875_v50, 1 }
 0x1e4   :  { %v1069_v62 = vrot.slane %v1068_v41, 4 }
 0x1e5   :  { %v877_v60 = vmax.f32 %v875_v50, %v876_v53 }
 0x1e6   :  { %v1070_v57 = vmax.f32 %v1068_v41, %v1069_v62 }
 0x1e8   :  { %v1071_v47 = vrot.slane %v1070_v57, 2 }
 0x1ea   :  { %v1072_v16 = vmax.f32 %v1070_v57, %v1071_v47 }
 0x1ec   :  { %v1073_v31 = vrot.slane %v1072_v16, 1 }
 0x1ee   :  { %v1074_v29 = vmax.f32 %v1072_v16, %v1073_v31 }
 0x1f0   :  { %v1076_v49 = vsel %vm1075_vm11, %v877_v60, %v1074_v29 }
 0x1f1   :  { %v1080_v21 = vsel %vm595_vm7, %v1076_v49, %v1079_v24 }
 0x1f2   :  { %v1082_v54 = vadd.f32 %v1080_v21, %v510_v18 }
 0x1f4   :  { %1120 = vst [vmem:[#allocation1] ss:$4 sm:$0xff] %v1082_v54 }
 0x1fb   :  { %v1121_v19 = vld.sshfl [vmem:[#allocation1] sm:$0xff pattern:$0x73625140]  ;;  %v1122_v51 = vld.sshfl [vmem:[#allocation1 + $0x8] sm:$0xff pattern:$0x73625140] }
 0x1fc   :  { %1141 = vmatmul.f32.vlgmr.msra.gmra.mxu2 %v1121_v19  ;;  %1161 = vmatmul.f32.vlgmr.msra.gmra.mxu3 %v1122_v51 }
 0x27f   :  { %v1142_v1 = vpop.f32.mrf.mxu2  ;;  %v1162_v33 = vpop.f32.mrf.mxu3 }
 0x280   :  { %v1143_v48 = vadd.f32 %v1195_v35, %v1142_v1 }
 0x282   :  { %v1163_v44 = vadd.f32 %v1162_v33, %v1143_v48 }
 0x284   :  { %1165 = vst [vmem:[#allocation2] sm:$0x3] %v1163_v44 }
 0x285   :  { %1176 = dma.vmem_to_hbm [thread:$0]  %s1172_s12, 32, %s1174_s5, [#allocation3]  }
 0x286   :  { %1222 = dma.done.wait [#allocation3], 32  }
 0x287   :  { %1223 = vsyncadd [#allocation3], 4294967264 }
 0x288   :  { %1181 = vsyncpa [#allocation3], 1 }

</bundles_post_ra>
